<compile_context>
chip_gen: v6e
topology: v6e:2x2x1
jax: 0.10.0
libtpu: 0.0.40
codegen_flags: <defaults>
</compile_context>

<pallas_src>
import math

import jax
import jax.numpy as jnp
from jax.experimental import pallas as pl
from jax.experimental.pallas import tpu as pltpu

# ----------------------------- configuration --------------------------------
N = 8            # batch size (args.batch_size)
C = 4            # input channels
H = W = 16       # spatial size
HW = H * W
TWO_N = 2 * N
E = 32           # backbone embedding dim
H1 = 32          # projector hidden dim     (args.mlp = "32-32")
F_DIM = 32       # num_features = last entry of args.mlp
SIM_COEFF = 25.0
STD_COEFF = 25.0
COV_COEFF = 1.0
BN_EPS = 1e-5


# --------------------------- fused forward kernel ----------------------------
# TODO(synk): the original backbone is a full ResNet (resnet.__dict__[args.arch],
# not provided in the source); replaced by a deterministic conv3x3 + ReLU +
# global-average-pool stub producing the same (N, embedding) output.
def _vicreg_fused_kernel(patch_ref, cw_ref, cb_ref, w1_ref, b1_ref,
                         g_ref, beta_ref, w2_ref, loss_ref):
    # ---- backbone stub: conv3x3 as ONE im2col matmul over both views + ReLU
    p = patch_ref[...]                                            # (2N*HW, C*9)
    h = jnp.dot(p, cw_ref[...], preferred_element_type=jnp.float32) + cb_ref[...]
    h = jnp.maximum(h, 0.0)                                       # (2N*HW, E)

    # global average pool via a block-diagonal pooling matmul (stays 2-D, MXU)
    r = jax.lax.broadcasted_iota(jnp.int32, (TWO_N, TWO_N * HW), 0)
    c = jax.lax.broadcasted_iota(jnp.int32, (TWO_N, TWO_N * HW), 1)
    in_row = jnp.logical_and(c >= r * HW, c < (r + 1) * HW)
    pool = jnp.where(in_row, 1.0 / HW, 0.0)                       # (2N, 2N*HW)
    emb = jnp.dot(pool, h, preferred_element_type=jnp.float32)    # (2N, E)

    # ---- projector: Linear -> BatchNorm1d(training stats) -> ReLU -> Linear
    # linear1 / ReLU / linear2 are shared across both views (single matmuls);
    # only the BN statistics are computed per view.
    a = jnp.dot(emb, w1_ref[...], preferred_element_type=jnp.float32) + b1_ref[...]

    ax = a[:N]                                                    # (N, H1)
    ay = a[N:]                                                    # (N, H1)
    mu_x = jnp.mean(ax, axis=0, keepdims=True)
    mu_y = jnp.mean(ay, axis=0, keepdims=True)
    var_bx = jnp.mean((ax - mu_x) ** 2, axis=0, keepdims=True)    # biased (BN train)
    var_by = jnp.mean((ay - mu_y) ** 2, axis=0, keepdims=True)

    row = jax.lax.broadcasted_iota(jnp.int32, (TWO_N, H1), 0)
    is_x = row < N
    mu = jnp.where(is_x, mu_x, mu_y)                              # (2N, H1)
    var = jnp.where(is_x, var_bx, var_by)                         # (2N, H1)

    an = (a - mu) * jax.lax.rsqrt(var + BN_EPS) * g_ref[...] + beta_ref[...]
    an = jnp.maximum(an, 0.0)
    z = jnp.dot(an, w2_ref[...], preferred_element_type=jnp.float32)  # (2N, F)
    zx = z[:N]
    zy = z[N:]

    # ---- VICReg loss --------------------------------------------------------
    # invariance term: F.mse_loss (mean reduction)
    repr_loss = jnp.mean((zx - zy) ** 2)

    # variance term (unbiased variance, matching torch.var default)
    xc = zx - jnp.mean(zx, axis=0, keepdims=True)
    yc = zy - jnp.mean(zy, axis=0, keepdims=True)
    var_x = jnp.sum(xc * xc, axis=0, keepdims=True) / (N - 1)
    var_y = jnp.sum(yc * yc, axis=0, keepdims=True) / (N - 1)
    std_loss = (jnp.mean(jnp.maximum(1.0 - jnp.sqrt(var_x + 1e-4), 0.0)) / 2
                + jnp.mean(jnp.maximum(1.0 - jnp.sqrt(var_y + 1e-4), 0.0)) / 2)

    # covariance term: off-diag sum of squares = sum(cov^2) - sum(diag(cov)^2);
    # diag(cov) is exactly the unbiased variance computed above (no iota mask).
    cov_x = jnp.einsum('nd,ne->de', xc, xc,
                       preferred_element_type=jnp.float32) / (N - 1)
    cov_y = jnp.einsum('nd,ne->de', yc, yc,
                       preferred_element_type=jnp.float32) / (N - 1)
    cov_loss = ((jnp.sum(cov_x * cov_x) - jnp.sum(var_x * var_x)) / F_DIM
                + (jnp.sum(cov_y * cov_y) - jnp.sum(var_y * var_y)) / F_DIM)

    loss_ref[0, 0] = (SIM_COEFF * repr_loss
                      + STD_COEFF * std_loss
                      + COV_COEFF * cov_loss)


# ----------------------------- full forward ----------------------------------
def vicreg_forward(x_img, y_img, params):
    n, ch, hh, ww = x_img.shape
    # im2col glue (plain XLA inside jit): both views stacked so the conv weight
    # is loaded once and the kernel sees a single (2N*HW, C*9) operand.
    imgs = jnp.concatenate([x_img, y_img], axis=0)                # (2N, C, H, W)
    xp = jnp.pad(imgs, ((0, 0), (0, 0), (1, 1), (1, 1)))
    slabs = [xp[:, :, dy:dy + hh, dx:dx + ww]
             for dy in range(3) for dx in range(3)]
    patches = jnp.stack(slabs, axis=2)                            # (2N, C, 9, H, W)
    patches = patches.transpose(0, 3, 4, 1, 2).reshape(2 * n * hh * ww, ch * 9)

    cw = params['conv_w'].reshape(E, ch * 9).T                    # (C*9, E)
    cb = params['conv_b'].reshape(1, E)

    loss = pl.pallas_call(
        _vicreg_fused_kernel,
        out_shape=jax.ShapeDtypeStruct((1, 1), jnp.float32),
        in_specs=[pl.BlockSpec(memory_space=pltpu.MemorySpace.VMEM)] * 8,
        out_specs=pl.BlockSpec(memory_space=pltpu.MemorySpace.SMEM),
        compiler_params=pltpu.CompilerParams(vmem_limit_bytes=32 << 20),
    )(patches, cw, cb, params['w1'], params['b1'],
      params['gamma'], params['beta'], params['w2'])
    return loss[0, 0]


def init_params(seed=0):
    keys = jax.random.split(jax.random.PRNGKey(seed), 5)
    fan_conv = C * 9
    bc = 1.0 / math.sqrt(fan_conv)
    b1_ = 1.0 / math.sqrt(E)
    b2_ = 1.0 / math.sqrt(H1)
    return {
        'conv_w': jax.random.uniform(keys[0], (E, C, 3, 3), jnp.float32, -bc, bc),
        'conv_b': jax.random.uniform(keys[1], (E,), jnp.float32, -bc, bc),
        'w1': jax.random.uniform(keys[2], (E, H1), jnp.float32, -b1_, b1_),
        'b1': jax.random.uniform(keys[3], (1, H1), jnp.float32, -b1_, b1_),
        'gamma': jnp.ones((1, H1), jnp.float32),
        'beta': jnp.zeros((1, H1), jnp.float32),
        'w2': jax.random.uniform(keys[4], (H1, F_DIM), jnp.float32, -b2_, b2_),
    }


if __name__ == "__main__":
    params = init_params(0)
    kx, ky = jax.random.split(jax.random.PRNGKey(0), 2)
    x = jax.random.normal(kx, (N, C, H, W), jnp.float32)
    y = jax.random.normal(ky, (N, C, H, W), jnp.float32)

    loss = jax.jit(vicreg_forward)(x, y, params)
    jax.block_until_ready(loss)
    assert jnp.isfinite(loss), "loss is not finite"
    print("KERNEL_OK")
</pallas_src>

<mosaic_0001>
module attributes {stable_mosaic.version = 11 : i64} {
  func.func @_vicreg_fused_kernel(%arg0: memref<4096x36xf32, #tpu.memory_space<vmem>>, %arg1: memref<36x32xf32, #tpu.memory_space<vmem>>, %arg2: memref<1x32xf32, #tpu.memory_space<vmem>>, %arg3: memref<32x32xf32, #tpu.memory_space<vmem>>, %arg4: memref<1x32xf32, #tpu.memory_space<vmem>>, %arg5: memref<1x32xf32, #tpu.memory_space<vmem>>, %arg6: memref<1x32xf32, #tpu.memory_space<vmem>>, %arg7: memref<32x32xf32, #tpu.memory_space<vmem>>, %arg8: memref<1x1xf32, #tpu.memory_space<smem>>) attributes {dimension_semantics = [], scalar_prefetch = 0 : i64, scratch_operands = 0 : i64, tpu.core_type = #tpu.core_type<tc>} {
    %c0 = arith.constant 0 : index
    %c0_0 = arith.constant 0 : index
    %0 = vector.load %arg0[%c0, %c0_0] : memref<4096x36xf32, #tpu.memory_space<vmem>>, vector<4096x36xf32>
    %c0_1 = arith.constant 0 : index
    %c0_2 = arith.constant 0 : index
    %1 = vector.load %arg1[%c0_1, %c0_2] : memref<36x32xf32, #tpu.memory_space<vmem>>, vector<36x32xf32>
    %cst = arith.constant dense<0.000000e+00> : vector<4096x32xf32>
    %2 = tpu.matmul %0, %1, %cst {dimension_numbers = #tpu.dot_dimension_numbers<[1], [0], [0], [1], [0, 0, 1, 1], [], []>} : vector<4096x36xf32>, vector<36x32xf32>, vector<4096x32xf32> -> vector<4096x32xf32>
    %c0_3 = arith.constant 0 : index
    %c0_4 = arith.constant 0 : index
    %3 = vector.load %arg2[%c0_3, %c0_4] : memref<1x32xf32, #tpu.memory_space<vmem>>, vector<1x32xf32>
    %4 = vector.broadcast %3 : vector<1x32xf32> to vector<4096x32xf32>
    %5 = arith.addf %2, %4 : vector<4096x32xf32>
    %cst_5 = arith.constant 0.000000e+00 : f32
    %6 = vector.broadcast %cst_5 : f32 to vector<4096x32xf32>
    %7 = arith.maximumf %5, %6 : vector<4096x32xf32>
    %8 = tpu.iota {dimensions = array<i32: 0>} : vector<16x4096xi32>
    %9 = tpu.iota {dimensions = array<i32: 1>} : vector<16x4096xi32>
    %c256_i32 = arith.constant 256 : i32
    %10 = vector.broadcast %c256_i32 : i32 to vector<16x4096xi32>
    %11 = arith.muli %8, %10 : vector<16x4096xi32>
    %12 = arith.cmpi sge, %9, %11 : vector<16x4096xi32>
    %c1_i32 = arith.constant 1 : i32
    %13 = vector.broadcast %c1_i32 : i32 to vector<16x4096xi32>
    %14 = arith.addi %8, %13 : vector<16x4096xi32>
    %c256_i32_6 = arith.constant 256 : i32
    %15 = vector.broadcast %c256_i32_6 : i32 to vector<16x4096xi32>
    %16 = arith.muli %14, %15 : vector<16x4096xi32>
    %17 = arith.cmpi slt, %9, %16 : vector<16x4096xi32>
    %18 = arith.andi %12, %17 : vector<16x4096xi1>
    %cst_7 = arith.constant 3.906250e-03 : f32
    %cst_8 = arith.constant 0.000000e+00 : f32
    %19 = vector.broadcast %cst_7 : f32 to vector<16x4096xf32>
    %20 = vector.broadcast %cst_8 : f32 to vector<16x4096xf32>
    %21 = arith.select %18, %19, %20 : vector<16x4096xi1>, vector<16x4096xf32>
    %cst_9 = arith.constant dense<0.000000e+00> : vector<16x32xf32>
    %22 = tpu.matmul %21, %7, %cst_9 {dimension_numbers = #tpu.dot_dimension_numbers<[1], [0], [0], [1], [0, 0, 1, 1], [], []>} : vector<16x4096xf32>, vector<4096x32xf32>, vector<16x32xf32> -> vector<16x32xf32>
    %c0_10 = arith.constant 0 : index
    %c0_11 = arith.constant 0 : index
    %23 = vector.load %arg3[%c0_10, %c0_11] : memref<32x32xf32, #tpu.memory_space<vmem>>, vector<32x32xf32>
    %cst_12 = arith.constant dense<0.000000e+00> : vector<16x32xf32>
    %24 = tpu.matmul %22, %23, %cst_12 {dimension_numbers = #tpu.dot_dimension_numbers<[1], [0], [0], [1], [0, 0, 1, 1], [], []>} : vector<16x32xf32>, vector<32x32xf32>, vector<16x32xf32> -> vector<16x32xf32>
    %c0_13 = arith.constant 0 : index
    %c0_14 = arith.constant 0 : index
    %25 = vector.load %arg4[%c0_13, %c0_14] : memref<1x32xf32, #tpu.memory_space<vmem>>, vector<1x32xf32>
    %26 = vector.broadcast %25 : vector<1x32xf32> to vector<16x32xf32>
    %27 = arith.addf %24, %26 : vector<16x32xf32>
    %28 = vector.extract_strided_slice %27 {offsets = [0, 0], sizes = [8, 32], strides = [1, 1]} : vector<16x32xf32> to vector<8x32xf32>
    %29 = vector.extract_strided_slice %27 {offsets = [8, 0], sizes = [8, 32], strides = [1, 1]} : vector<16x32xf32> to vector<8x32xf32>
    %cst_15 = arith.constant dense<0.000000e+00> : vector<32xf32>
    %30 = vector.multi_reduction <add>, %28, %cst_15 [0] : vector<8x32xf32> to vector<32xf32>
    %31 = vector.shape_cast %30 : vector<32xf32> to vector<1x32xf32>
    %cst_16 = arith.constant 8.000000e+00 : f32
    %32 = vector.broadcast %cst_16 : f32 to vector<1x32xf32>
    %33 = arith.divf %31, %32 : vector<1x32xf32>
    %cst_17 = arith.constant dense<0.000000e+00> : vector<32xf32>
    %34 = vector.multi_reduction <add>, %29, %cst_17 [0] : vector<8x32xf32> to vector<32xf32>
    %35 = vector.shape_cast %34 : vector<32xf32> to vector<1x32xf32>
    %cst_18 = arith.constant 8.000000e+00 : f32
    %36 = vector.broadcast %cst_18 : f32 to vector<1x32xf32>
    %37 = arith.divf %35, %36 : vector<1x32xf32>
    %38 = vector.broadcast %33 : vector<1x32xf32> to vector<8x32xf32>
    %39 = arith.subf %28, %38 : vector<8x32xf32>
    %40 = arith.mulf %39, %39 : vector<8x32xf32>
    %cst_19 = arith.constant dense<0.000000e+00> : vector<32xf32>
    %41 = vector.multi_reduction <add>, %40, %cst_19 [0] : vector<8x32xf32> to vector<32xf32>
    %42 = vector.shape_cast %41 : vector<32xf32> to vector<1x32xf32>
    %cst_20 = arith.constant 8.000000e+00 : f32
    %43 = vector.broadcast %cst_20 : f32 to vector<1x32xf32>
    %44 = arith.divf %42, %43 : vector<1x32xf32>
    %45 = vector.broadcast %37 : vector<1x32xf32> to vector<8x32xf32>
    %46 = arith.subf %29, %45 : vector<8x32xf32>
    %47 = arith.mulf %46, %46 : vector<8x32xf32>
    %cst_21 = arith.constant dense<0.000000e+00> : vector<32xf32>
    %48 = vector.multi_reduction <add>, %47, %cst_21 [0] : vector<8x32xf32> to vector<32xf32>
    %49 = vector.shape_cast %48 : vector<32xf32> to vector<1x32xf32>
    %cst_22 = arith.constant 8.000000e+00 : f32
    %50 = vector.broadcast %cst_22 : f32 to vector<1x32xf32>
    %51 = arith.divf %49, %50 : vector<1x32xf32>
    %52 = tpu.iota {dimensions = array<i32: 0>} : vector<16x32xi32>
    %c8_i32 = arith.constant 8 : i32
    %53 = vector.broadcast %c8_i32 : i32 to vector<16x32xi32>
    %54 = arith.cmpi slt, %52, %53 : vector<16x32xi32>
    %55 = vector.shape_cast %33 : vector<1x32xf32> to vector<1x32xf32>
    %56 = vector.broadcast %55 : vector<1x32xf32> to vector<16x32xf32>
    %57 = vector.shape_cast %37 : vector<1x32xf32> to vector<1x32xf32>
    %58 = vector.broadcast %57 : vector<1x32xf32> to vector<16x32xf32>
    %59 = arith.select %54, %56, %58 : vector<16x32xi1>, vector<16x32xf32>
    %60 = vector.shape_cast %44 : vector<1x32xf32> to vector<1x32xf32>
    %61 = vector.broadcast %60 : vector<1x32xf32> to vector<16x32xf32>
    %62 = vector.shape_cast %51 : vector<1x32xf32> to vector<1x32xf32>
    %63 = vector.broadcast %62 : vector<1x32xf32> to vector<16x32xf32>
    %64 = arith.select %54, %61, %63 : vector<16x32xi1>, vector<16x32xf32>
    %65 = arith.subf %27, %59 : vector<16x32xf32>
    %cst_23 = arith.constant 9.99999974E-6 : f32
    %66 = vector.broadcast %cst_23 : f32 to vector<16x32xf32>
    %67 = arith.addf %64, %66 : vector<16x32xf32>
    %68 = math.rsqrt %67 : vector<16x32xf32>
    %69 = arith.mulf %65, %68 : vector<16x32xf32>
    %c0_24 = arith.constant 0 : index
    %c0_25 = arith.constant 0 : index
    %70 = vector.load %arg5[%c0_24, %c0_25] : memref<1x32xf32, #tpu.memory_space<vmem>>, vector<1x32xf32>
    %71 = vector.broadcast %70 : vector<1x32xf32> to vector<16x32xf32>
    %72 = arith.mulf %69, %71 : vector<16x32xf32>
    %c0_26 = arith.constant 0 : index
    %c0_27 = arith.constant 0 : index
    %73 = vector.load %arg6[%c0_26, %c0_27] : memref<1x32xf32, #tpu.memory_space<vmem>>, vector<1x32xf32>
    %74 = vector.broadcast %73 : vector<1x32xf32> to vector<16x32xf32>
    %75 = arith.addf %72, %74 : vector<16x32xf32>
    %cst_28 = arith.constant 0.000000e+00 : f32
    %76 = vector.broadcast %cst_28 : f32 to vector<16x32xf32>
    %77 = arith.maximumf %75, %76 : vector<16x32xf32>
    %c0_29 = arith.constant 0 : index
    %c0_30 = arith.constant 0 : index
    %78 = vector.load %arg7[%c0_29, %c0_30] : memref<32x32xf32, #tpu.memory_space<vmem>>, vector<32x32xf32>
    %cst_31 = arith.constant dense<0.000000e+00> : vector<16x32xf32>
    %79 = tpu.matmul %77, %78, %cst_31 {dimension_numbers = #tpu.dot_dimension_numbers<[1], [0], [0], [1], [0, 0, 1, 1], [], []>} : vector<16x32xf32>, vector<32x32xf32>, vector<16x32xf32> -> vector<16x32xf32>
    %80 = vector.extract_strided_slice %79 {offsets = [0, 0], sizes = [8, 32], strides = [1, 1]} : vector<16x32xf32> to vector<8x32xf32>
    %81 = vector.extract_strided_slice %79 {offsets = [8, 0], sizes = [8, 32], strides = [1, 1]} : vector<16x32xf32> to vector<8x32xf32>
    %82 = arith.subf %80, %81 : vector<8x32xf32>
    %83 = arith.mulf %82, %82 : vector<8x32xf32>
    %84 = vector.shape_cast %83 : vector<8x32xf32> to vector<1x8x32xf32>
    %cst_32 = arith.constant dense<0.000000e+00> : vector<1xf32>
    %85 = vector.multi_reduction <add>, %84, %cst_32 [1, 2] : vector<1x8x32xf32> to vector<1xf32>
    %86 = vector.shape_cast %85 : vector<1xf32> to vector<1x1x1xf32>
    %87 = vector.extract %86[0, 0, 0] : f32 from vector<1x1x1xf32>
    %cst_33 = arith.constant 2.560000e+02 : f32
    %88 = arith.divf %87, %cst_33 : f32
    %cst_34 = arith.constant dense<0.000000e+00> : vector<32xf32>
    %89 = vector.multi_reduction <add>, %80, %cst_34 [0] : vector<8x32xf32> to vector<32xf32>
    %90 = vector.shape_cast %89 : vector<32xf32> to vector<1x32xf32>
    %cst_35 = arith.constant 8.000000e+00 : f32
    %91 = vector.broadcast %cst_35 : f32 to vector<1x32xf32>
    %92 = arith.divf %90, %91 : vector<1x32xf32>
    %93 = vector.broadcast %92 : vector<1x32xf32> to vector<8x32xf32>
    %94 = arith.subf %80, %93 : vector<8x32xf32>
    %cst_36 = arith.constant dense<0.000000e+00> : vector<32xf32>
    %95 = vector.multi_reduction <add>, %81, %cst_36 [0] : vector<8x32xf32> to vector<32xf32>
    %96 = vector.shape_cast %95 : vector<32xf32> to vector<1x32xf32>
    %cst_37 = arith.constant 8.000000e+00 : f32
    %97 = vector.broadcast %cst_37 : f32 to vector<1x32xf32>
    %98 = arith.divf %96, %97 : vector<1x32xf32>
    %99 = vector.broadcast %98 : vector<1x32xf32> to vector<8x32xf32>
    %100 = arith.subf %81, %99 : vector<8x32xf32>
    %101 = arith.mulf %94, %94 : vector<8x32xf32>
    %cst_38 = arith.constant dense<0.000000e+00> : vector<32xf32>
    %102 = vector.multi_reduction <add>, %101, %cst_38 [0] : vector<8x32xf32> to vector<32xf32>
    %103 = vector.shape_cast %102 : vector<32xf32> to vector<1x32xf32>
    %cst_39 = arith.constant 7.000000e+00 : f32
    %104 = vector.broadcast %cst_39 : f32 to vector<1x32xf32>
    %105 = arith.divf %103, %104 : vector<1x32xf32>
    %106 = arith.mulf %100, %100 : vector<8x32xf32>
    %cst_40 = arith.constant dense<0.000000e+00> : vector<32xf32>
    %107 = vector.multi_reduction <add>, %106, %cst_40 [0] : vector<8x32xf32> to vector<32xf32>
    %108 = vector.shape_cast %107 : vector<32xf32> to vector<1x32xf32>
    %cst_41 = arith.constant 7.000000e+00 : f32
    %109 = vector.broadcast %cst_41 : f32 to vector<1x32xf32>
    %110 = arith.divf %108, %109 : vector<1x32xf32>
    %cst_42 = arith.constant 9.99999974E-5 : f32
    %111 = vector.broadcast %cst_42 : f32 to vector<1x32xf32>
    %112 = arith.addf %105, %111 : vector<1x32xf32>
    %113 = math.sqrt %112 : vector<1x32xf32>
    %cst_43 = arith.constant 1.000000e+00 : f32
    %114 = vector.broadcast %cst_43 : f32 to vector<1x32xf32>
    %115 = arith.subf %114, %113 : vector<1x32xf32>
    %cst_44 = arith.constant 0.000000e+00 : f32
    %116 = vector.broadcast %cst_44 : f32 to vector<1x32xf32>
    %117 = arith.maximumf %115, %116 : vector<1x32xf32>
    %118 = vector.shape_cast %117 : vector<1x32xf32> to vector<1x1x32xf32>
    %cst_45 = arith.constant dense<0.000000e+00> : vector<1xf32>
    %119 = vector.multi_reduction <add>, %118, %cst_45 [1, 2] : vector<1x1x32xf32> to vector<1xf32>
    %120 = vector.shape_cast %119 : vector<1xf32> to vector<1x1x1xf32>
    %121 = vector.extract %120[0, 0, 0] : f32 from vector<1x1x1xf32>
    %cst_46 = arith.constant 3.200000e+01 : f32
    %122 = arith.divf %121, %cst_46 : f32
    %cst_47 = arith.constant 2.000000e+00 : f32
    %123 = arith.divf %122, %cst_47 : f32
    %cst_48 = arith.constant 9.99999974E-5 : f32
    %124 = vector.broadcast %cst_48 : f32 to vector<1x32xf32>
    %125 = arith.addf %110, %124 : vector<1x32xf32>
    %126 = math.sqrt %125 : vector<1x32xf32>
    %cst_49 = arith.constant 1.000000e+00 : f32
    %127 = vector.broadcast %cst_49 : f32 to vector<1x32xf32>
    %128 = arith.subf %127, %126 : vector<1x32xf32>
    %cst_50 = arith.constant 0.000000e+00 : f32
    %129 = vector.broadcast %cst_50 : f32 to vector<1x32xf32>
    %130 = arith.maximumf %128, %129 : vector<1x32xf32>
    %131 = vector.shape_cast %130 : vector<1x32xf32> to vector<1x1x32xf32>
    %cst_51 = arith.constant dense<0.000000e+00> : vector<1xf32>
    %132 = vector.multi_reduction <add>, %131, %cst_51 [1, 2] : vector<1x1x32xf32> to vector<1xf32>
    %133 = vector.shape_cast %132 : vector<1xf32> to vector<1x1x1xf32>
    %134 = vector.extract %133[0, 0, 0] : f32 from vector<1x1x1xf32>
    %cst_52 = arith.constant 3.200000e+01 : f32
    %135 = arith.divf %134, %cst_52 : f32
    %cst_53 = arith.constant 2.000000e+00 : f32
    %136 = arith.divf %135, %cst_53 : f32
    %137 = arith.addf %123, %136 : f32
    "tpu.trace_start"() <{level = 10 : i32, message = "nd,ne->de"}> : () -> ()
    %cst_54 = arith.constant dense<0.000000e+00> : vector<32x32xf32>
    %138 = tpu.matmul %94, %94, %cst_54 {dimension_numbers = #tpu.dot_dimension_numbers<[0], [0], [1], [1], [0, 1, 1, 1], [], []>} : vector<8x32xf32>, vector<8x32xf32>, vector<32x32xf32> -> vector<32x32xf32>
    "tpu.trace_stop"() : () -> ()
    %cst_55 = arith.constant 7.000000e+00 : f32
    %139 = vector.broadcast %cst_55 : f32 to vector<32x32xf32>
    %140 = arith.divf %138, %139 : vector<32x32xf32>
    "tpu.trace_start"() <{level = 10 : i32, message = "nd,ne->de"}> : () -> ()
    %cst_56 = arith.constant dense<0.000000e+00> : vector<32x32xf32>
    %141 = tpu.matmul %100, %100, %cst_56 {dimension_numbers = #tpu.dot_dimension_numbers<[0], [0], [1], [1], [0, 1, 1, 1], [], []>} : vector<8x32xf32>, vector<8x32xf32>, vector<32x32xf32> -> vector<32x32xf32>
    "tpu.trace_stop"() : () -> ()
    %cst_57 = arith.constant 7.000000e+00 : f32
    %142 = vector.broadcast %cst_57 : f32 to vector<32x32xf32>
    %143 = arith.divf %141, %142 : vector<32x32xf32>
    %144 = arith.mulf %140, %140 : vector<32x32xf32>
    %145 = vector.shape_cast %144 : vector<32x32xf32> to vector<1x32x32xf32>
    %cst_58 = arith.constant dense<0.000000e+00> : vector<1xf32>
    %146 = vector.multi_reduction <add>, %145, %cst_58 [1, 2] : vector<1x32x32xf32> to vector<1xf32>
    %147 = vector.shape_cast %146 : vector<1xf32> to vector<1x1x1xf32>
    %148 = vector.extract %147[0, 0, 0] : f32 from vector<1x1x1xf32>
    %149 = arith.mulf %105, %105 : vector<1x32xf32>
    %150 = vector.shape_cast %149 : vector<1x32xf32> to vector<1x1x32xf32>
    %cst_59 = arith.constant dense<0.000000e+00> : vector<1xf32>
    %151 = vector.multi_reduction <add>, %150, %cst_59 [1, 2] : vector<1x1x32xf32> to vector<1xf32>
    %152 = vector.shape_cast %151 : vector<1xf32> to vector<1x1x1xf32>
    %153 = vector.extract %152[0, 0, 0] : f32 from vector<1x1x1xf32>
    %154 = arith.subf %148, %153 : f32
    %cst_60 = arith.constant 3.200000e+01 : f32
    %155 = arith.divf %154, %cst_60 : f32
    %156 = arith.mulf %143, %143 : vector<32x32xf32>
    %157 = vector.shape_cast %156 : vector<32x32xf32> to vector<1x32x32xf32>
    %cst_61 = arith.constant dense<0.000000e+00> : vector<1xf32>
    %158 = vector.multi_reduction <add>, %157, %cst_61 [1, 2] : vector<1x32x32xf32> to vector<1xf32>
    %159 = vector.shape_cast %158 : vector<1xf32> to vector<1x1x1xf32>
    %160 = vector.extract %159[0, 0, 0] : f32 from vector<1x1x1xf32>
    %161 = arith.mulf %110, %110 : vector<1x32xf32>
    %162 = vector.shape_cast %161 : vector<1x32xf32> to vector<1x1x32xf32>
    %cst_62 = arith.constant dense<0.000000e+00> : vector<1xf32>
    %163 = vector.multi_reduction <add>, %162, %cst_62 [1, 2] : vector<1x1x32xf32> to vector<1xf32>
    %164 = vector.shape_cast %163 : vector<1xf32> to vector<1x1x1xf32>
    %165 = vector.extract %164[0, 0, 0] : f32 from vector<1x1x1xf32>
    %166 = arith.subf %160, %165 : f32
    %cst_63 = arith.constant 3.200000e+01 : f32
    %167 = arith.divf %166, %cst_63 : f32
    %168 = arith.addf %155, %167 : f32
    %cst_64 = arith.constant 2.500000e+01 : f32
    %169 = arith.mulf %cst_64, %88 : f32
    %cst_65 = arith.constant 2.500000e+01 : f32
    %170 = arith.mulf %cst_65, %137 : f32
    %171 = arith.addf %169, %170 : f32
    %cst_66 = arith.constant 1.000000e+00 : f32
    %172 = arith.mulf %cst_66, %168 : f32
    %173 = arith.addf %171, %172 : f32
    %c0_67 = arith.constant 0 : index
    %c0_68 = arith.constant 0 : index
    %174 = memref.load %arg8[%c0_67, %c0_68] : memref<1x1xf32, #tpu.memory_space<smem>>
    memref.store %173, %arg8[%c0_67, %c0_68] : memref<1x1xf32, #tpu.memory_space<smem>>
    return
  }
}

</mosaic_0001>

<bundles_post_ra>
// kernel: vicreg_forward.1
= control target key start
LH: loop header
LB: loop body
LE: loop exit
PB: predicated region body
PF: predicated region fallthrough
CT: control target
= control target key end

     0   :  { %vm2091_vm0 = vcmask 1043456   ;;  %vm554_vm1 = vcmask 293888   ;;  %s14413_s0 = inlined_call_operand.vmem [shape: f32[4096,36], index: 0, kind: input, shape index: {}]   ;;  %s14414_s1 = inlined_call_operand.vmem [shape: f32[36,32], index: 1, kind: input, shape index: {}]   ;;  %s14415_s2 = inlined_call_operand.vmem [shape: f32[1,32], index: 2, kind: input, shape index: {}]   ;;  %s14416_s3 = inlined_call_operand.vmem [shape: f32[32,32], index: 3, kind: input, shape index: {}]   ;;  %s14417_s4 = inlined_call_operand.vmem [shape: f32[1,32], index: 4, kind: input, shape index: {}]   ;;  %s14418_s5 = inlined_call_operand.vmem [shape: f32[1,32], index: 5, kind: input, shape index: {}]   ;;  %s14419_s6 = inlined_call_operand.vmem [shape: f32[1,32], index: 6, kind: input, shape index: {}]   ;;  %s14420_s7 = inlined_call_operand.vmem [shape: f32[32,32], index: 7, kind: input, shape index: {}]   ;;  %s14421_s8 = inlined_call_operand.hbm [shape: f32[1,1], index: 8, kind: output, shape index: {}]  }
   0x1   :  { %v546_v0 = vld [vmem:[%s14414_s1 + $0x20] sm:$0xf]  ;;  %v545_v1 = vld [vmem:[%s14414_s1 + $0x18] sm:$0xff]  ;;  %v544_v3 = vld [vmem:[%s14414_s1 + $0x10] sm:$0xff] }
   0x2   :  { %9182 = vmatprep.subr.msk.mxu0 %vm2091_vm0, %v546_v0  ;;  %v30_v2 = vld [vmem:[%s14413_s0] sm:$0xff]  ;;  %9998 = vmatprep.subr.msk.mxu1 %vm2091_vm0, %v546_v0  ;;  %v543_v4 = vld [vmem:[%s14414_s1 + $0x8] sm:$0xff]  ;;  %v32_v7 = vld [vmem:[%s14413_s0 + $0x10] sm:$0xff] }
   0x3   :  { %9183 = vmatpush3.msk.msra.mxu0 %vm2091_vm0, %v546_v0  ;;  %9192 = vmatprep.mubr.msk.f32.mxu0 %vm554_vm1, %v30_v2  ;;  %v542_v5 = vld [vmem:[%s14414_s1] sm:$0xff]  ;;  %v31_v6 = vld [vmem:[%s14413_s0 + $0x8] sm:$0xff]  ;;  %v33_v8 = vld [vmem:[%s14413_s0 + $0x18] sm:$0xff] }
   0x4   :  { %9184 = vmatprep.subr.mxu0 %v545_v1  ;;  %10003 = vmatpush3.msk.msra.mxu1 %vm2091_vm0, %v546_v0  ;;  %v34_v9 = vld [vmem:[%s14413_s0 + $0x20] sm:$0xff]  ;;  %v416_v10 = vld [vmem:[%s14413_s0 + $0xc10] sm:$0xff]  ;;  %v417_v11 = vld [vmem:[%s14413_s0 + $0xc18] sm:$0xff] }
   0x5   :  { %9185 = vmatpush3.msra.mxu0 %v545_v1  ;;  %9999 = vmatprep.subr.mxu1 %v545_v1  ;;  %v418_v12 = vld [vmem:[%s14413_s0 + $0xc20] sm:$0xff]  ;;  %v35_v13 = vld [vmem:[%s14413_s0 + $0x28] sm:$0xff]  ;;  %v36_v15 = vld [vmem:[%s14413_s0 + $0x30] sm:$0xff] }
   0x6   :  { %9186 = vmatprep.subr.mxu0 %v544_v3  ;;  %10004 = vmatpush3.msra.mxu1 %v545_v1  ;;  %v419_v14 = vld [vmem:[%s14413_s0 + $0xc28] sm:$0xff]  ;;  %v420_v16 = vld [vmem:[%s14413_s0 + $0xc30] sm:$0xff]  ;;  %v37_v17 = vld [vmem:[%s14413_s0 + $0x38] sm:$0xff] }
   0x7   :  { %9187 = vmatpush3.msra.mxu0 %v544_v3  ;;  %10000 = vmatprep.subr.mxu1 %v544_v3  ;;  %v421_v18 = vld [vmem:[%s14413_s0 + $0xc38] sm:$0xff]  ;;  %v38_v19 = vld [vmem:[%s14413_s0 + $0x40] sm:$0xff]  ;;  %v39_v21 = vld [vmem:[%s14413_s0 + $0x48] sm:$0xff] }
   0x8   :  { %9188 = vmatprep.subr.mxu0 %v543_v4  ;;  %10005 = vmatpush3.msra.mxu1 %v544_v3  ;;  %v422_v20 = vld [vmem:[%s14413_s0 + $0xc40] sm:$0xff]  ;;  %v423_v22 = vld [vmem:[%s14413_s0 + $0xc48] sm:$0xff]  ;;  %v40_v23 = vld [vmem:[%s14413_s0 + $0x50] sm:$0xff] }
   0x9   :  { %9189 = vmatpush3.msra.mxu0 %v543_v4  ;;  %10001 = vmatprep.subr.mxu1 %v543_v4  ;;  %v424_v24 = vld [vmem:[%s14413_s0 + $0xc50] sm:$0xff]  ;;  %v41_v25 = vld [vmem:[%s14413_s0 + $0x58] sm:$0xff]  ;;  %v42_v27 = vld [vmem:[%s14413_s0 + $0x60] sm:$0xff] }
   0xa   :  { %9190 = vmatprep.subr.mxu0 %v542_v5  ;;  %10006 = vmatpush3.msra.mxu1 %v543_v4  ;;  %v425_v26 = vld [vmem:[%s14413_s0 + $0xc58] sm:$0xff]  ;;  %v426_v28 = vld [vmem:[%s14413_s0 + $0xc60] sm:$0xff]  ;;  %v43_v29 = vld [vmem:[%s14413_s0 + $0x68] sm:$0xff] }
   0xb   :  { %9191 = vmatpush3.msra.mxu0 %v542_v5  ;;  %10002 = vmatprep.subr.mxu1 %v542_v5  ;;  %v427_v30 = vld [vmem:[%s14413_s0 + $0xc68] sm:$0xff]  ;;  %v44_v31 = vld [vmem:[%s14413_s0 + $0x70] sm:$0xff]  ;;  %v45_v33 = vld [vmem:[%s14413_s0 + $0x78] sm:$0xff] }
   0xc   :  { %9193 = vmatmul.mubr.msk.f32.vlgmr.msra.gmra.mxu0 %vm554_vm1, %v31_v6  ;;  %10007 = vmatpush3.msra.mxu1 %v542_v5  ;;  %v428_v32 = vld [vmem:[%s14413_s0 + $0xc70] sm:$0xff]  ;;  %v429_v34 = vld [vmem:[%s14413_s0 + $0xc78] sm:$0xff]  ;;  %v46_v35 = vld [vmem:[%s14413_s0 + $0x80] sm:$0xff] }
   0xd   :  { %9195 = vmatprep.mubr.msk.f32.mxu0 %vm554_vm1, %v32_v7  ;;  %9771 = vmatprep.mubr.msk.f32.mxu1 %vm554_vm1, %v416_v10  ;;  %v430_v36 = vld [vmem:[%s14413_s0 + $0xc80] sm:$0xff]  ;;  %v47_v37 = vld [vmem:[%s14413_s0 + $0x88] sm:$0xff]  ;;  %v48_v39 = vld [vmem:[%s14413_s0 + $0x90] sm:$0xff] }
   0xe   :  { %9772 = vmatmul.mubr.msk.f32.vlgmr.msra.gmra.mxu1 %vm554_vm1, %v417_v11  ;;  %v431_v38 = vld [vmem:[%s14413_s0 + $0xc88] sm:$0xff]  ;;  %v432_v40 = vld [vmem:[%s14413_s0 + $0xc90] sm:$0xff]  ;;  %v49_v41 = vld [vmem:[%s14413_s0 + $0x98] sm:$0xff] }
   0xf   :  { %9774 = vmatprep.mubr.msk.f32.mxu1 %vm554_vm1, %v418_v12  ;;  %v433_v42 = vld [vmem:[%s14413_s0 + $0xc98] sm:$0xff]  ;;  %v50_v43 = vld [vmem:[%s14413_s0 + $0xa0] sm:$0xff] }
  0x10   :  { %9196 = vmatmul.mubr.msk.f32.gmra.mxu0 %vm554_vm1, %v33_v8  ;;  %v434_v44 = vld [vmem:[%s14413_s0 + $0xca0] sm:$0xff] }
  0x11   :  { %9198 = vmatprep.mubr.msk.f32.mxu0 %vm554_vm1, %v34_v9 }
  0x12   :  { %9775 = vmatmul.mubr.msk.f32.gmra.mxu1 %vm554_vm1, %v419_v14 }
  0x13   :  { %9777 = vmatprep.mubr.msk.f32.mxu1 %vm554_vm1, %v420_v16 }
  0x14   :  { %9199 = vmatmul.mubr.msk.f32.gmra.mxu0 %vm554_vm1, %v35_v13 }
  0x15   :  { %9201 = vmatprep.mubr.msk.f32.mxu0 %vm554_vm1, %v36_v15 }
  0x16   :  { %9778 = vmatmul.mubr.msk.f32.gmra.mxu1 %vm554_vm1, %v421_v18 }
  0x17   :  { %9780 = vmatprep.mubr.msk.f32.mxu1 %vm554_vm1, %v422_v20 }
  0x18   :  { %9202 = vmatmul.mubr.msk.f32.gmra.mxu0 %vm554_vm1, %v37_v17 }
  0x19   :  { %9204 = vmatprep.mubr.msk.f32.mxu0 %vm554_vm1, %v38_v19 }
  0x1a   :  { %9781 = vmatmul.mubr.msk.f32.gmra.mxu1 %vm554_vm1, %v423_v22 }
  0x1b   :  { %9783 = vmatprep.mubr.msk.f32.mxu1 %vm554_vm1, %v424_v24 }
  0x1c   :  { %9205 = vmatmul.mubr.msk.f32.gmra.mxu0 %vm554_vm1, %v39_v21 }
  0x1d   :  { %9207 = vmatprep.mubr.msk.f32.mxu0 %vm554_vm1, %v40_v23 }
  0x1e   :  { %9784 = vmatmul.mubr.msk.f32.gmra.mxu1 %vm554_vm1, %v425_v26 }
  0x1f   :  { %9786 = vmatprep.mubr.msk.f32.mxu1 %vm554_vm1, %v426_v28 }
  0x20   :  { %9208 = vmatmul.mubr.msk.f32.gmra.mxu0 %vm554_vm1, %v41_v25 }
  0x21   :  { %9210 = vmatprep.mubr.msk.f32.mxu0 %vm554_vm1, %v42_v27 }
  0x22   :  { %9787 = vmatmul.mubr.msk.f32.gmra.mxu1 %vm554_vm1, %v427_v30 }
  0x23   :  { %9789 = vmatprep.mubr.msk.f32.mxu1 %vm554_vm1, %v428_v32 }
  0x24   :  { %9211 = vmatmul.mubr.msk.f32.gmra.mxu0 %vm554_vm1, %v43_v29 }
  0x25   :  { %9213 = vmatprep.mubr.msk.f32.mxu0 %vm554_vm1, %v44_v31 }
  0x26   :  { %9790 = vmatmul.mubr.msk.f32.gmra.mxu1 %vm554_vm1, %v429_v34 }
  0x27   :  { %9792 = vmatprep.mubr.msk.f32.mxu1 %vm554_vm1, %v430_v36 }
  0x28   :  { %9214 = vmatmul.mubr.msk.f32.gmra.mxu0 %vm554_vm1, %v45_v33 }
  0x29   :  { %9216 = vmatprep.mubr.msk.f32.mxu0 %vm554_vm1, %v46_v35 }
  0x2a   :  { %9793 = vmatmul.mubr.msk.f32.gmra.mxu1 %vm554_vm1, %v431_v38 }
  0x2b   :  { %9795 = vmatprep.mubr.msk.f32.mxu1 %vm554_vm1, %v432_v40 }
  0x2c   :  { %9217 = vmatmul.mubr.msk.f32.gmra.mxu0 %vm554_vm1, %v47_v37 }
  0x2d   :  { %9219 = vmatprep.mubr.msk.f32.mxu0 %vm554_vm1, %v48_v39 }
  0x2e   :  { %13 = vsyncpa [#allocation3], 0  ;;  %9796 = vmatmul.mubr.msk.f32.gmra.mxu1 %vm554_vm1, %v433_v42  ;;  %v51_v45 = vld [vmem:[%s14413_s0 + $0xa8] sm:$0xff]  ;;  %v52_v47 = vld [vmem:[%s14413_s0 + $0xb0] sm:$0xff]  ;;  %s10049_s26 = smov [#allocation2]  }
  0x2f   :  { %9798 = vmatprep.mubr.msk.f32.mxu1 %vm554_vm1, %v434_v44  ;;  %v435_v46 = vld [vmem:[%s14413_s0 + $0xca8] sm:$0xff]  ;;  %v436_v48 = vld [vmem:[%s14413_s0 + $0xcb0] sm:$0xff]  ;;  %v53_v49 = vld [vmem:[%s14413_s0 + $0xb8] sm:$0xff] }
  0x30   :  { %9220 = vmatmul.mubr.msk.f32.gmra.mxu0 %vm554_vm1, %v49_v41  ;;  %v437_v50 = vld [vmem:[%s14413_s0 + $0xcb8] sm:$0xff]  ;;  %v54_v51 = vld [vmem:[%s14413_s0 + $0xc0] sm:$0xff]  ;;  %v55_v53 = vld [vmem:[%s14413_s0 + $0xc8] sm:$0xff] }
  0x31   :  { %9222 = vmatprep.mubr.msk.f32.mxu0 %vm554_vm1, %v50_v43  ;;  %v438_v52 = vld [vmem:[%s14413_s0 + $0xcc0] sm:$0xff]  ;;  %v439_v54 = vld [vmem:[%s14413_s0 + $0xcc8] sm:$0xff]  ;;  %v56_v55 = vld [vmem:[%s14413_s0 + $0xd0] sm:$0xff] }
  0x32   :  { %9799 = vmatmul.mubr.msk.f32.gmra.mxu1 %vm554_vm1, %v435_v46  ;;  %v440_v56 = vld [vmem:[%s14413_s0 + $0xcd0] sm:$0xff]  ;;  %v57_v57 = vld [vmem:[%s14413_s0 + $0xd8] sm:$0xff]  ;;  %v58_v59 = vld [vmem:[%s14413_s0 + $0xe0] sm:$0xff] }
  0x33   :  { %9801 = vmatprep.mubr.msk.f32.mxu1 %vm554_vm1, %v436_v48  ;;  %v441_v58 = vld [vmem:[%s14413_s0 + $0xcd8] sm:$0xff]  ;;  %v442_v60 = vld [vmem:[%s14413_s0 + $0xce0] sm:$0xff]  ;;  %v59_v61 = vld [vmem:[%s14413_s0 + $0xe8] sm:$0xff] }
  0x34   :  { %9223 = vmatmul.mubr.msk.f32.gmra.mxu0 %vm554_vm1, %v51_v45  ;;  %v443_v62 = vld [vmem:[%s14413_s0 + $0xce8] sm:$0xff]  ;;  %v60_v63 = vld [vmem:[%s14413_s0 + $0xf0] sm:$0xff]  ;;  %v61_v1 = vld [vmem:[%s14413_s0 + $0xf8] sm:$0xff] }
  0x35   :  { %9225 = vmatprep.mubr.msk.f32.mxu0 %vm554_vm1, %v52_v47  ;;  %v444_v0 = vld [vmem:[%s14413_s0 + $0xcf0] sm:$0xff]  ;;  %v445_v2 = vld [vmem:[%s14413_s0 + $0xcf8] sm:$0xff]  ;;  %v62_v3 = vld [vmem:[%s14413_s0 + $0x100] sm:$0xff] }
  0x36   :  { %9802 = vmatmul.mubr.msk.f32.gmra.mxu1 %vm554_vm1, %v437_v50  ;;  %v446_v4 = vld [vmem:[%s14413_s0 + $0xd00] sm:$0xff]  ;;  %v63_v5 = vld [vmem:[%s14413_s0 + $0x108] sm:$0xff]  ;;  %v64_v7 = vld [vmem:[%s14413_s0 + $0x110] sm:$0xff] }
  0x37   :  { %9804 = vmatprep.mubr.msk.f32.mxu1 %vm554_vm1, %v438_v52  ;;  %v447_v6 = vld [vmem:[%s14413_s0 + $0xd08] sm:$0xff]  ;;  %v448_v8 = vld [vmem:[%s14413_s0 + $0xd10] sm:$0xff]  ;;  %v65_v9 = vld [vmem:[%s14413_s0 + $0x118] sm:$0xff] }
  0x38   :  { %9226 = vmatmul.mubr.msk.f32.gmra.mxu0 %vm554_vm1, %v53_v49  ;;  %v449_v10 = vld [vmem:[%s14413_s0 + $0xd18] sm:$0xff]  ;;  %v66_v11 = vld [vmem:[%s14413_s0 + $0x120] sm:$0xff]  ;;  %v67_v13 = vld [vmem:[%s14413_s0 + $0x128] sm:$0xff] }
  0x39   :  { %9228 = vmatprep.mubr.msk.f32.mxu0 %vm554_vm1, %v54_v51  ;;  %v450_v12 = vld [vmem:[%s14413_s0 + $0xd20] sm:$0xff]  ;;  %v451_v14 = vld [vmem:[%s14413_s0 + $0xd28] sm:$0xff]  ;;  %v68_v15 = vld [vmem:[%s14413_s0 + $0x130] sm:$0xff] }
  0x3a   :  { %9805 = vmatmul.mubr.msk.f32.gmra.mxu1 %vm554_vm1, %v439_v54  ;;  %v452_v16 = vld [vmem:[%s14413_s0 + $0xd30] sm:$0xff]  ;;  %v69_v17 = vld [vmem:[%s14413_s0 + $0x138] sm:$0xff]  ;;  %v70_v19 = vld [vmem:[%s14413_s0 + $0x140] sm:$0xff] }
  0x3b   :  { %9807 = vmatprep.mubr.msk.f32.mxu1 %vm554_vm1, %v440_v56  ;;  %v453_v18 = vld [vmem:[%s14413_s0 + $0xd38] sm:$0xff]  ;;  %v454_v20 = vld [vmem:[%s14413_s0 + $0xd40] sm:$0xff]  ;;  %v71_v21 = vld [vmem:[%s14413_s0 + $0x148] sm:$0xff] }
  0x3c   :  { %9229 = vmatmul.mubr.msk.f32.gmra.mxu0 %vm554_vm1, %v55_v53  ;;  %v455_v22 = vld [vmem:[%s14413_s0 + $0xd48] sm:$0xff]  ;;  %v72_v23 = vld [vmem:[%s14413_s0 + $0x150] sm:$0xff]  ;;  %v73_v25 = vld [vmem:[%s14413_s0 + $0x158] sm:$0xff] }
  0x3d   :  { %9231 = vmatprep.mubr.msk.f32.mxu0 %vm554_vm1, %v56_v55  ;;  %v456_v24 = vld [vmem:[%s14413_s0 + $0xd50] sm:$0xff]  ;;  %v457_v26 = vld [vmem:[%s14413_s0 + $0xd58] sm:$0xff]  ;;  %v74_v27 = vld [vmem:[%s14413_s0 + $0x160] sm:$0xff] }
  0x3e   :  { %9808 = vmatmul.mubr.msk.f32.gmra.mxu1 %vm554_vm1, %v441_v58  ;;  %v458_v28 = vld [vmem:[%s14413_s0 + $0xd60] sm:$0xff]  ;;  %v75_v29 = vld [vmem:[%s14413_s0 + $0x168] sm:$0xff]  ;;  %v76_v31 = vld [vmem:[%s14413_s0 + $0x170] sm:$0xff] }
  0x3f   :  { %9810 = vmatprep.mubr.msk.f32.mxu1 %vm554_vm1, %v442_v60  ;;  %v459_v30 = vld [vmem:[%s14413_s0 + $0xd68] sm:$0xff]  ;;  %v460_v32 = vld [vmem:[%s14413_s0 + $0xd70] sm:$0xff]  ;;  %v77_v33 = vld [vmem:[%s14413_s0 + $0x178] sm:$0xff] }
  0x40   :  { %9232 = vmatmul.mubr.msk.f32.gmra.mxu0 %vm554_vm1, %v57_v57  ;;  %v461_v34 = vld [vmem:[%s14413_s0 + $0xd78] sm:$0xff]  ;;  %v78_v35 = vld [vmem:[%s14413_s0 + $0x180] sm:$0xff]  ;;  %v79_v37 = vld [vmem:[%s14413_s0 + $0x188] sm:$0xff] }
  0x41   :  { %9234 = vmatprep.mubr.msk.f32.mxu0 %vm554_vm1, %v58_v59  ;;  %v462_v36 = vld [vmem:[%s14413_s0 + $0xd80] sm:$0xff]  ;;  %v463_v38 = vld [vmem:[%s14413_s0 + $0xd88] sm:$0xff]  ;;  %v80_v39 = vld [vmem:[%s14413_s0 + $0x190] sm:$0xff] }
  0x42   :  { %9811 = vmatmul.mubr.msk.f32.gmra.mxu1 %vm554_vm1, %v443_v62  ;;  %v464_v40 = vld [vmem:[%s14413_s0 + $0xd90] sm:$0xff]  ;;  %v81_v41 = vld [vmem:[%s14413_s0 + $0x198] sm:$0xff]  ;;  %v82_v43 = vld [vmem:[%s14413_s0 + $0x1a0] sm:$0xff] }
  0x43   :  { %9813 = vmatprep.mubr.msk.f32.mxu1 %vm554_vm1, %v444_v0  ;;  %v465_v42 = vld [vmem:[%s14413_s0 + $0xd98] sm:$0xff]  ;;  %v466_v44 = vld [vmem:[%s14413_s0 + $0xda0] sm:$0xff]  ;;  %v83_v45 = vld [vmem:[%s14413_s0 + $0x1a8] sm:$0xff] }
  0x44   :  { %9235 = vmatmul.mubr.msk.f32.gmra.mxu0 %vm554_vm1, %v59_v61  ;;  %v467_v46 = vld [vmem:[%s14413_s0 + $0xda8] sm:$0xff]  ;;  %v84_v47 = vld [vmem:[%s14413_s0 + $0x1b0] sm:$0xff]  ;;  %v85_v49 = vld [vmem:[%s14413_s0 + $0x1b8] sm:$0xff] }
  0x45   :  { %9237 = vmatprep.mubr.msk.f32.mxu0 %vm554_vm1, %v60_v63  ;;  %v468_v48 = vld [vmem:[%s14413_s0 + $0xdb0] sm:$0xff]  ;;  %v469_v50 = vld [vmem:[%s14413_s0 + $0xdb8] sm:$0xff]  ;;  %v86_v51 = vld [vmem:[%s14413_s0 + $0x1c0] sm:$0xff] }
  0x46   :  { %9814 = vmatmul.mubr.msk.f32.gmra.mxu1 %vm554_vm1, %v445_v2  ;;  %v470_v52 = vld [vmem:[%s14413_s0 + $0xdc0] sm:$0xff]  ;;  %v87_v53 = vld [vmem:[%s14413_s0 + $0x1c8] sm:$0xff]  ;;  %v88_v55 = vld [vmem:[%s14413_s0 + $0x1d0] sm:$0xff] }
  0x47   :  { %9816 = vmatprep.mubr.msk.f32.mxu1 %vm554_vm1, %v446_v4  ;;  %v471_v54 = vld [vmem:[%s14413_s0 + $0xdc8] sm:$0xff]  ;;  %v472_v56 = vld [vmem:[%s14413_s0 + $0xdd0] sm:$0xff]  ;;  %v89_v57 = vld [vmem:[%s14413_s0 + $0x1d8] sm:$0xff] }
  0x48   :  { %9238 = vmatmul.mubr.msk.f32.gmra.mxu0 %vm554_vm1, %v61_v1  ;;  %v473_v58 = vld [vmem:[%s14413_s0 + $0xdd8] sm:$0xff]  ;;  %v90_v59 = vld [vmem:[%s14413_s0 + $0x1e0] sm:$0xff]  ;;  %v91_v61 = vld [vmem:[%s14413_s0 + $0x1e8] sm:$0xff] }
  0x49   :  { %9240 = vmatprep.mubr.msk.f32.mxu0 %vm554_vm1, %v62_v3  ;;  %v474_v60 = vld [vmem:[%s14413_s0 + $0xde0] sm:$0xff]  ;;  %v475_v62 = vld [vmem:[%s14413_s0 + $0xde8] sm:$0xff]  ;;  %v92_v63 = vld [vmem:[%s14413_s0 + $0x1f0] sm:$0xff] }
  0x4a   :  { %9817 = vmatmul.mubr.msk.f32.gmra.mxu1 %vm554_vm1, %v447_v6  ;;  %v476_v0 = vld [vmem:[%s14413_s0 + $0xdf0] sm:$0xff]  ;;  %v93_v1 = vld [vmem:[%s14413_s0 + $0x1f8] sm:$0xff]  ;;  %v94_v3 = vld [vmem:[%s14413_s0 + $0x200] sm:$0xff] }
  0x4b   :  { %9819 = vmatprep.mubr.msk.f32.mxu1 %vm554_vm1, %v448_v8  ;;  %v477_v2 = vld [vmem:[%s14413_s0 + $0xdf8] sm:$0xff]  ;;  %v478_v4 = vld [vmem:[%s14413_s0 + $0xe00] sm:$0xff]  ;;  %v479_v6 = vld [vmem:[%s14413_s0 + $0xe08] sm:$0xff] }
  0x4c   :  { %9241 = vmatmul.mubr.msk.f32.gmra.mxu0 %vm554_vm1, %v63_v5  ;;  %v95_v5 = vld [vmem:[%s14413_s0 + $0x208] sm:$0xff]  ;;  %v480_v8 = vld [vmem:[%s14413_s0 + $0xe10] sm:$0xff] }
  0x4d   :  { %9243 = vmatprep.mubr.msk.f32.mxu0 %vm554_vm1, %v64_v7  ;;  %v96_v7 = vld [vmem:[%s14413_s0 + $0x210] sm:$0xff] }
  0x4e   :  { %9820 = vmatmul.mubr.msk.f32.gmra.mxu1 %vm554_vm1, %v449_v10  ;;  %v481_v10 = vld [vmem:[%s14413_s0 + $0xe18] sm:$0xff] }
  0x4f   :  { %9822 = vmatprep.mubr.msk.f32.mxu1 %vm554_vm1, %v450_v12  ;;  %v482_v12 = vld [vmem:[%s14413_s0 + $0xe20] sm:$0xff] }
  0x50   :  { %9244 = vmatmul.mubr.msk.f32.gmra.mxu0 %vm554_vm1, %v65_v9  ;;  %v97_v9 = vld [vmem:[%s14413_s0 + $0x218] sm:$0xff] }
  0x51   :  { %9246 = vmatprep.mubr.msk.f32.mxu0 %vm554_vm1, %v66_v11  ;;  %v98_v11 = vld [vmem:[%s14413_s0 + $0x220] sm:$0xff] }
  0x52   :  { %9823 = vmatmul.mubr.msk.f32.gmra.mxu1 %vm554_vm1, %v451_v14  ;;  %v483_v14 = vld [vmem:[%s14413_s0 + $0xe28] sm:$0xff] }
  0x53   :  { %9825 = vmatprep.mubr.msk.f32.mxu1 %vm554_vm1, %v452_v16  ;;  %v484_v16 = vld [vmem:[%s14413_s0 + $0xe30] sm:$0xff] }
  0x54   :  { %9247 = vmatmul.mubr.msk.f32.gmra.mxu0 %vm554_vm1, %v67_v13  ;;  %v99_v13 = vld [vmem:[%s14413_s0 + $0x228] sm:$0xff] }
  0x55   :  { %9249 = vmatprep.mubr.msk.f32.mxu0 %vm554_vm1, %v68_v15  ;;  %v100_v15 = vld [vmem:[%s14413_s0 + $0x230] sm:$0xff] }
  0x56   :  { %9826 = vmatmul.mubr.msk.f32.gmra.mxu1 %vm554_vm1, %v453_v18  ;;  %v485_v18 = vld [vmem:[%s14413_s0 + $0xe38] sm:$0xff] }
  0x57   :  { %9828 = vmatprep.mubr.msk.f32.mxu1 %vm554_vm1, %v454_v20  ;;  %v486_v20 = vld [vmem:[%s14413_s0 + $0xe40] sm:$0xff] }
  0x58   :  { %9250 = vmatmul.mubr.msk.f32.gmra.mxu0 %vm554_vm1, %v69_v17  ;;  %v101_v17 = vld [vmem:[%s14413_s0 + $0x238] sm:$0xff] }
  0x59   :  { %9252 = vmatprep.mubr.msk.f32.mxu0 %vm554_vm1, %v70_v19  ;;  %v102_v19 = vld [vmem:[%s14413_s0 + $0x240] sm:$0xff] }
  0x5a   :  { %9829 = vmatmul.mubr.msk.f32.gmra.mxu1 %vm554_vm1, %v455_v22  ;;  %v487_v22 = vld [vmem:[%s14413_s0 + $0xe48] sm:$0xff] }
  0x5b   :  { %9831 = vmatprep.mubr.msk.f32.mxu1 %vm554_vm1, %v456_v24  ;;  %v488_v24 = vld [vmem:[%s14413_s0 + $0xe50] sm:$0xff] }
  0x5c   :  { %9253 = vmatmul.mubr.msk.f32.gmra.mxu0 %vm554_vm1, %v71_v21  ;;  %v103_v21 = vld [vmem:[%s14413_s0 + $0x248] sm:$0xff] }
  0x5d   :  { %9255 = vmatprep.mubr.msk.f32.mxu0 %vm554_vm1, %v72_v23  ;;  %v104_v23 = vld [vmem:[%s14413_s0 + $0x250] sm:$0xff] }
  0x5e   :  { %9832 = vmatmul.mubr.msk.f32.gmra.mxu1 %vm554_vm1, %v457_v26  ;;  %v489_v26 = vld [vmem:[%s14413_s0 + $0xe58] sm:$0xff] }
  0x5f   :  { %9834 = vmatprep.mubr.msk.f32.mxu1 %vm554_vm1, %v458_v28  ;;  %v490_v28 = vld [vmem:[%s14413_s0 + $0xe60] sm:$0xff] }
  0x60   :  { %9256 = vmatmul.mubr.msk.f32.gmra.mxu0 %vm554_vm1, %v73_v25  ;;  %v105_v25 = vld [vmem:[%s14413_s0 + $0x258] sm:$0xff] }
  0x61   :  { %9258 = vmatprep.mubr.msk.f32.mxu0 %vm554_vm1, %v74_v27  ;;  %v106_v27 = vld [vmem:[%s14413_s0 + $0x260] sm:$0xff] }
  0x62   :  { %9835 = vmatmul.mubr.msk.f32.gmra.mxu1 %vm554_vm1, %v459_v30  ;;  %v491_v30 = vld [vmem:[%s14413_s0 + $0xe68] sm:$0xff] }
  0x63   :  { %9837 = vmatprep.mubr.msk.f32.mxu1 %vm554_vm1, %v460_v32  ;;  %v492_v32 = vld [vmem:[%s14413_s0 + $0xe70] sm:$0xff] }
  0x64   :  { %9259 = vmatmul.mubr.msk.f32.gmra.mxu0 %vm554_vm1, %v75_v29  ;;  %v107_v29 = vld [vmem:[%s14413_s0 + $0x268] sm:$0xff] }
  0x65   :  { %9261 = vmatprep.mubr.msk.f32.mxu0 %vm554_vm1, %v76_v31  ;;  %v108_v31 = vld [vmem:[%s14413_s0 + $0x270] sm:$0xff] }
  0x66   :  { %9838 = vmatmul.mubr.msk.f32.gmra.mxu1 %vm554_vm1, %v461_v34  ;;  %v493_v34 = vld [vmem:[%s14413_s0 + $0xe78] sm:$0xff] }
  0x67   :  { %9840 = vmatprep.mubr.msk.f32.mxu1 %vm554_vm1, %v462_v36  ;;  %v494_v36 = vld [vmem:[%s14413_s0 + $0xe80] sm:$0xff] }
  0x68   :  { %9262 = vmatmul.mubr.msk.f32.gmra.mxu0 %vm554_vm1, %v77_v33  ;;  %v109_v33 = vld [vmem:[%s14413_s0 + $0x278] sm:$0xff] }
  0x69   :  { %9264 = vmatprep.mubr.msk.f32.mxu0 %vm554_vm1, %v78_v35  ;;  %v110_v35 = vld [vmem:[%s14413_s0 + $0x280] sm:$0xff] }
  0x6a   :  { %9841 = vmatmul.mubr.msk.f32.gmra.mxu1 %vm554_vm1, %v463_v38  ;;  %v495_v38 = vld [vmem:[%s14413_s0 + $0xe88] sm:$0xff] }
  0x6b   :  { %9843 = vmatprep.mubr.msk.f32.mxu1 %vm554_vm1, %v464_v40  ;;  %v496_v40 = vld [vmem:[%s14413_s0 + $0xe90] sm:$0xff] }
  0x6c   :  { %9265 = vmatmul.mubr.msk.f32.gmra.mxu0 %vm554_vm1, %v79_v37  ;;  %v111_v37 = vld [vmem:[%s14413_s0 + $0x288] sm:$0xff] }
  0x6d   :  { %9267 = vmatprep.mubr.msk.f32.mxu0 %vm554_vm1, %v80_v39  ;;  %v112_v39 = vld [vmem:[%s14413_s0 + $0x290] sm:$0xff] }
  0x6e   :  { %9844 = vmatmul.mubr.msk.f32.gmra.mxu1 %vm554_vm1, %v465_v42  ;;  %v497_v42 = vld [vmem:[%s14413_s0 + $0xe98] sm:$0xff] }
  0x6f   :  { %9846 = vmatprep.mubr.msk.f32.mxu1 %vm554_vm1, %v466_v44  ;;  %v498_v44 = vld [vmem:[%s14413_s0 + $0xea0] sm:$0xff] }
  0x70   :  { %9268 = vmatmul.mubr.msk.f32.gmra.mxu0 %vm554_vm1, %v81_v41  ;;  %v113_v41 = vld [vmem:[%s14413_s0 + $0x298] sm:$0xff] }
  0x71   :  { %9270 = vmatprep.mubr.msk.f32.mxu0 %vm554_vm1, %v82_v43  ;;  %v114_v43 = vld [vmem:[%s14413_s0 + $0x2a0] sm:$0xff] }
  0x72   :  { %9847 = vmatmul.mubr.msk.f32.gmra.mxu1 %vm554_vm1, %v467_v46  ;;  %v499_v46 = vld [vmem:[%s14413_s0 + $0xea8] sm:$0xff] }
  0x73   :  { %9849 = vmatprep.mubr.msk.f32.mxu1 %vm554_vm1, %v468_v48  ;;  %v500_v48 = vld [vmem:[%s14413_s0 + $0xeb0] sm:$0xff] }
  0x74   :  { %9271 = vmatmul.mubr.msk.f32.gmra.mxu0 %vm554_vm1, %v83_v45  ;;  %v115_v45 = vld [vmem:[%s14413_s0 + $0x2a8] sm:$0xff] }
  0x75   :  { %9273 = vmatprep.mubr.msk.f32.mxu0 %vm554_vm1, %v84_v47  ;;  %v116_v47 = vld [vmem:[%s14413_s0 + $0x2b0] sm:$0xff] }
  0x76   :  { %9850 = vmatmul.mubr.msk.f32.gmra.mxu1 %vm554_vm1, %v469_v50  ;;  %v501_v50 = vld [vmem:[%s14413_s0 + $0xeb8] sm:$0xff] }
  0x77   :  { %9852 = vmatprep.mubr.msk.f32.mxu1 %vm554_vm1, %v470_v52  ;;  %v502_v52 = vld [vmem:[%s14413_s0 + $0xec0] sm:$0xff] }
  0x78   :  { %9274 = vmatmul.mubr.msk.f32.gmra.mxu0 %vm554_vm1, %v85_v49  ;;  %v117_v49 = vld [vmem:[%s14413_s0 + $0x2b8] sm:$0xff] }
  0x79   :  { %9276 = vmatprep.mubr.msk.f32.mxu0 %vm554_vm1, %v86_v51  ;;  %v118_v51 = vld [vmem:[%s14413_s0 + $0x2c0] sm:$0xff] }
  0x7a   :  { %9853 = vmatmul.mubr.msk.f32.gmra.mxu1 %vm554_vm1, %v471_v54  ;;  %v503_v54 = vld [vmem:[%s14413_s0 + $0xec8] sm:$0xff] }
  0x7b   :  { %9855 = vmatprep.mubr.msk.f32.mxu1 %vm554_vm1, %v472_v56  ;;  %v504_v56 = vld [vmem:[%s14413_s0 + $0xed0] sm:$0xff] }
  0x7c   :  { %9277 = vmatmul.mubr.msk.f32.gmra.mxu0 %vm554_vm1, %v87_v53  ;;  %v119_v53 = vld [vmem:[%s14413_s0 + $0x2c8] sm:$0xff] }
  0x7d   :  { %9279 = vmatprep.mubr.msk.f32.mxu0 %vm554_vm1, %v88_v55  ;;  %v120_v55 = vld [vmem:[%s14413_s0 + $0x2d0] sm:$0xff] }
  0x7e   :  { %9856 = vmatmul.mubr.msk.f32.gmra.mxu1 %vm554_vm1, %v473_v58  ;;  %v505_v58 = vld [vmem:[%s14413_s0 + $0xed8] sm:$0xff] }
  0x7f   :  { %9858 = vmatprep.mubr.msk.f32.mxu1 %vm554_vm1, %v474_v60  ;;  %v506_v60 = vld [vmem:[%s14413_s0 + $0xee0] sm:$0xff] }
  0x80   :  { %9280 = vmatmul.mubr.msk.f32.gmra.mxu0 %vm554_vm1, %v89_v57  ;;  %v121_v57 = vld [vmem:[%s14413_s0 + $0x2d8] sm:$0xff] }
  0x81   :  { %9282 = vmatprep.mubr.msk.f32.mxu0 %vm554_vm1, %v90_v59  ;;  %v122_v59 = vld [vmem:[%s14413_s0 + $0x2e0] sm:$0xff] }
  0x82   :  { %9859 = vmatmul.mubr.msk.f32.gmra.mxu1 %vm554_vm1, %v475_v62  ;;  %v507_v62 = vld [vmem:[%s14413_s0 + $0xee8] sm:$0xff] }
  0x83   :  { %9861 = vmatprep.mubr.msk.f32.mxu1 %vm554_vm1, %v476_v0  ;;  %v508_v0 = vld [vmem:[%s14413_s0 + $0xef0] sm:$0xff] }
  0x84   :  { %9283 = vmatmul.mubr.msk.f32.gmra.mxu0 %vm554_vm1, %v91_v61  ;;  %v123_v61 = vld [vmem:[%s14413_s0 + $0x2e8] sm:$0xff] }
  0x85   :  { %9285 = vmatprep.mubr.msk.f32.mxu0 %vm554_vm1, %v92_v63  ;;  %v124_v63 = vld [vmem:[%s14413_s0 + $0x2f0] sm:$0xff] }
  0x86   :  { %9862 = vmatmul.mubr.msk.f32.gmra.mxu1 %vm554_vm1, %v477_v2  ;;  %v509_v2 = vld [vmem:[%s14413_s0 + $0xef8] sm:$0xff] }
  0x87   :  { %9864 = vmatprep.mubr.msk.f32.mxu1 %vm554_vm1, %v478_v4  ;;  %v510_v4 = vld [vmem:[%s14413_s0 + $0xf00] sm:$0xff] }
  0x88   :  { %9286 = vmatmul.mubr.msk.f32.gmra.mxu0 %vm554_vm1, %v93_v1  ;;  %v125_v1 = vld [vmem:[%s14413_s0 + $0x2f8] sm:$0xff] }
  0x89   :  { %9288 = vmatprep.mubr.msk.f32.mxu0 %vm554_vm1, %v94_v3  ;;  %v126_v3 = vld [vmem:[%s14413_s0 + $0x300] sm:$0xff] }
  0x8a   :  { %9865 = vmatmul.mubr.msk.f32.gmra.mxu1 %vm554_vm1, %v479_v6  ;;  %v511_v6 = vld [vmem:[%s14413_s0 + $0xf08] sm:$0xff] }
  0x8b   :  { %9867 = vmatprep.mubr.msk.f32.mxu1 %vm554_vm1, %v480_v8  ;;  %v512_v8 = vld [vmem:[%s14413_s0 + $0xf10] sm:$0xff] }
  0x8c   :  { %9289 = vmatmul.mubr.msk.f32.gmra.mxu0 %vm554_vm1, %v95_v5  ;;  %v127_v5 = vld [vmem:[%s14413_s0 + $0x308] sm:$0xff] }
  0x8d   :  { %9291 = vmatprep.mubr.msk.f32.mxu0 %vm554_vm1, %v96_v7  ;;  %v128_v7 = vld [vmem:[%s14413_s0 + $0x310] sm:$0xff] }
  0x8e   :  { %9868 = vmatmul.mubr.msk.f32.gmra.mxu1 %vm554_vm1, %v481_v10  ;;  %v129_v10 = vld [vmem:[%s14413_s0 + $0x318] sm:$0xff] }
  0x8f   :  { %9870 = vmatprep.mubr.msk.f32.mxu1 %vm554_vm1, %v482_v12 }
  0x90   :  { %9292 = vmatmul.mubr.msk.f32.gmra.mxu0 %vm554_vm1, %v97_v9 }
  0x91   :  { %9294 = vmatprep.mubr.msk.f32.mxu0 %vm554_vm1, %v98_v11  ;;  %v513_v11 = vld [vmem:[%s14413_s0 + $0xf18] sm:$0xff] }
  0x92   :  { %9871 = vmatmul.mubr.msk.f32.gmra.mxu1 %vm554_vm1, %v483_v14  ;;  %v514_v14 = vld [vmem:[%s14413_s0 + $0xf20] sm:$0xff] }
  0x93   :  { %9873 = vmatprep.mubr.msk.f32.mxu1 %vm554_vm1, %v484_v16  ;;  %v131_v16 = vld [vmem:[%s14413_s0 + $0x328] sm:$0xff] }
  0x94   :  { %9295 = vmatmul.mubr.msk.f32.gmra.mxu0 %vm554_vm1, %v99_v13  ;;  %v130_v13 = vld [vmem:[%s14413_s0 + $0x320] sm:$0xff] }
  0x95   :  { %9297 = vmatprep.mubr.msk.f32.mxu0 %vm554_vm1, %v100_v15 }
  0x96   :  { %9874 = vmatmul.mubr.msk.f32.gmra.mxu1 %vm554_vm1, %v485_v18 }
  0x97   :  { %9876 = vmatprep.mubr.msk.f32.mxu1 %vm554_vm1, %v486_v20  ;;  %v516_v20 = vld [vmem:[%s14413_s0 + $0xf30] sm:$0xff] }
  0x98   :  { %9298 = vmatmul.mubr.msk.f32.gmra.mxu0 %vm554_vm1, %v101_v17  ;;  %v515_v17 = vld [vmem:[%s14413_s0 + $0xf28] sm:$0xff] }
  0x99   :  { %9300 = vmatprep.mubr.msk.f32.mxu0 %vm554_vm1, %v102_v19  ;;  %v132_v19 = vld [vmem:[%s14413_s0 + $0x330] sm:$0xff] }
  0x9a   :  { %9877 = vmatmul.mubr.msk.f32.gmra.mxu1 %vm554_vm1, %v487_v22 }
  0x9b   :  { %9879 = vmatprep.mubr.msk.f32.mxu1 %vm554_vm1, %v488_v24  ;;  %v517_v24 = vld [vmem:[%s14413_s0 + $0xf38] sm:$0xff] }
  0x9c   :  { %9301 = vmatmul.mubr.msk.f32.gmra.mxu0 %vm554_vm1, %v103_v21 }
  0x9d   :  { %9303 = vmatprep.mubr.msk.f32.mxu0 %vm554_vm1, %v104_v23  ;;  %v133_v23 = vld [vmem:[%s14413_s0 + $0x338] sm:$0xff] }
  0x9e   :  { %9880 = vmatmul.mubr.msk.f32.gmra.mxu1 %vm554_vm1, %v489_v26  ;;  %v134_v26 = vld [vmem:[%s14413_s0 + $0x340] sm:$0xff] }
  0x9f   :  { %9882 = vmatprep.mubr.msk.f32.mxu1 %vm554_vm1, %v490_v28 }
  0xa0   :  { %9304 = vmatmul.mubr.msk.f32.gmra.mxu0 %vm554_vm1, %v105_v25 }
  0xa1   :  { %9306 = vmatprep.mubr.msk.f32.mxu0 %vm554_vm1, %v106_v27  ;;  %v518_v27 = vld [vmem:[%s14413_s0 + $0xf40] sm:$0xff] }
  0xa2   :  { %9883 = vmatmul.mubr.msk.f32.gmra.mxu1 %vm554_vm1, %v491_v30  ;;  %v135_v30 = vld [vmem:[%s14413_s0 + $0x348] sm:$0xff] }
  0xa3   :  { %9885 = vmatprep.mubr.msk.f32.mxu1 %vm554_vm1, %v492_v32 }
  0xa4   :  { %9307 = vmatmul.mubr.msk.f32.gmra.mxu0 %vm554_vm1, %v107_v29 }
  0xa5   :  { %9309 = vmatprep.mubr.msk.f32.mxu0 %vm554_vm1, %v108_v31  ;;  %v519_v31 = vld [vmem:[%s14413_s0 + $0xf48] sm:$0xff] }
  0xa6   :  { %9886 = vmatmul.mubr.msk.f32.gmra.mxu1 %vm554_vm1, %v493_v34  ;;  %v520_v34 = vld [vmem:[%s14413_s0 + $0xf50] sm:$0xff] }
  0xa7   :  { %9888 = vmatprep.mubr.msk.f32.mxu1 %vm554_vm1, %v494_v36 }
  0xa8   :  { %9310 = vmatmul.mubr.msk.f32.gmra.mxu0 %vm554_vm1, %v109_v33  ;;  %v136_v33 = vld [vmem:[%s14413_s0 + $0x350] sm:$0xff] }
  0xa9   :  { %9312 = vmatprep.mubr.msk.f32.mxu0 %vm554_vm1, %v110_v35 }
  0xaa   :  { %9889 = vmatmul.mubr.msk.f32.gmra.mxu1 %vm554_vm1, %v495_v38  ;;  %v521_v38 = vld [vmem:[%s14413_s0 + $0xf58] sm:$0xff] }
  0xab   :  { %9891 = vmatprep.mubr.msk.f32.mxu1 %vm554_vm1, %v496_v40  ;;  %v138_v40 = vld [vmem:[%s14413_s0 + $0x360] sm:$0xff] }
  0xac   :  { %9313 = vmatmul.mubr.msk.f32.gmra.mxu0 %vm554_vm1, %v111_v37  ;;  %v137_v37 = vld [vmem:[%s14413_s0 + $0x358] sm:$0xff] }
  0xad   :  { %9315 = vmatprep.mubr.msk.f32.mxu0 %vm554_vm1, %v112_v39 }
  0xae   :  { %9892 = vmatmul.mubr.msk.f32.gmra.mxu1 %vm554_vm1, %v497_v42 }
  0xaf   :  { %9894 = vmatprep.mubr.msk.f32.mxu1 %vm554_vm1, %v498_v44  ;;  %v139_v44 = vld [vmem:[%s14413_s0 + $0x368] sm:$0xff] }
  0xb0   :  { %9316 = vmatmul.mubr.msk.f32.gmra.mxu0 %vm554_vm1, %v113_v41  ;;  %v522_v41 = vld [vmem:[%s14413_s0 + $0xf60] sm:$0xff] }
  0xb1   :  { %9318 = vmatprep.mubr.msk.f32.mxu0 %vm554_vm1, %v114_v43 }
  0xb2   :  { %9895 = vmatmul.mubr.msk.f32.gmra.mxu1 %vm554_vm1, %v499_v46 }
  0xb3   :  { %9897 = vmatprep.mubr.msk.f32.mxu1 %vm554_vm1, %v500_v48  ;;  %v524_v48 = vld [vmem:[%s14413_s0 + $0xf70] sm:$0xff] }
  0xb4   :  { %9319 = vmatmul.mubr.msk.f32.gmra.mxu0 %vm554_vm1, %v115_v45  ;;  %v523_v45 = vld [vmem:[%s14413_s0 + $0xf68] sm:$0xff] }
  0xb5   :  { %9321 = vmatprep.mubr.msk.f32.mxu0 %vm554_vm1, %v116_v47  ;;  %v140_v47 = vld [vmem:[%s14413_s0 + $0x370] sm:$0xff] }
  0xb6   :  { %9898 = vmatmul.mubr.msk.f32.gmra.mxu1 %vm554_vm1, %v501_v50 }
  0xb7   :  { %9900 = vmatprep.mubr.msk.f32.mxu1 %vm554_vm1, %v502_v52  ;;  %v525_v52 = vld [vmem:[%s14413_s0 + $0xf78] sm:$0xff] }
  0xb8   :  { %9322 = vmatmul.mubr.msk.f32.gmra.mxu0 %vm554_vm1, %v117_v49 }
  0xb9   :  { %9324 = vmatprep.mubr.msk.f32.mxu0 %vm554_vm1, %v118_v51  ;;  %v141_v51 = vld [vmem:[%s14413_s0 + $0x378] sm:$0xff] }
  0xba   :  { %9901 = vmatmul.mubr.msk.f32.gmra.mxu1 %vm554_vm1, %v503_v54  ;;  %v142_v54 = vld [vmem:[%s14413_s0 + $0x380] sm:$0xff] }
  0xbb   :  { %9903 = vmatprep.mubr.msk.f32.mxu1 %vm554_vm1, %v504_v56 }
  0xbc   :  { %9325 = vmatmul.mubr.msk.f32.gmra.mxu0 %vm554_vm1, %v119_v53 }
  0xbd   :  { %9327 = vmatprep.mubr.msk.f32.mxu0 %vm554_vm1, %v120_v55  ;;  %v526_v55 = vld [vmem:[%s14413_s0 + $0xf80] sm:$0xff] }
  0xbe   :  { %9904 = vmatmul.mubr.msk.f32.gmra.mxu1 %vm554_vm1, %v505_v58  ;;  %v143_v58 = vld [vmem:[%s14413_s0 + $0x388] sm:$0xff] }
  0xbf   :  { %9906 = vmatprep.mubr.msk.f32.mxu1 %vm554_vm1, %v506_v60 }
  0xc0   :  { %9328 = vmatmul.mubr.msk.f32.gmra.mxu0 %vm554_vm1, %v121_v57 }
  0xc1   :  { %9330 = vmatprep.mubr.msk.f32.mxu0 %vm554_vm1, %v122_v59  ;;  %v527_v59 = vld [vmem:[%s14413_s0 + $0xf88] sm:$0xff] }
  0xc2   :  { %9907 = vmatmul.mubr.msk.f32.gmra.mxu1 %vm554_vm1, %v507_v62  ;;  %v528_v62 = vld [vmem:[%s14413_s0 + $0xf90] sm:$0xff] }
  0xc3   :  { %9909 = vmatprep.mubr.msk.f32.mxu1 %vm554_vm1, %v508_v0 }
  0xc4   :  { %9331 = vmatmul.mubr.msk.f32.gmra.mxu0 %vm554_vm1, %v123_v61  ;;  %v144_v61 = vld [vmem:[%s14413_s0 + $0x390] sm:$0xff] }
  0xc5   :  { %9333 = vmatprep.mubr.msk.f32.mxu0 %vm554_vm1, %v124_v63 }
  0xc6   :  { %9910 = vmatmul.mubr.msk.f32.gmra.mxu1 %vm554_vm1, %v509_v2  ;;  %v529_v2 = vld [vmem:[%s14413_s0 + $0xf98] sm:$0xff] }
  0xc7   :  { %9912 = vmatprep.mubr.msk.f32.mxu1 %vm554_vm1, %v510_v4  ;;  %v146_v4 = vld [vmem:[%s14413_s0 + $0x3a0] sm:$0xff] }
  0xc8   :  { %9334 = vmatmul.mubr.msk.f32.gmra.mxu0 %vm554_vm1, %v125_v1  ;;  %v145_v1 = vld [vmem:[%s14413_s0 + $0x398] sm:$0xff] }
  0xc9   :  { %9336 = vmatprep.mubr.msk.f32.mxu0 %vm554_vm1, %v126_v3 }
  0xca   :  { %9913 = vmatmul.mubr.msk.f32.gmra.mxu1 %vm554_vm1, %v511_v6 }
  0xcb   :  { %9915 = vmatprep.mubr.msk.f32.mxu1 %vm554_vm1, %v512_v8  ;;  %v147_v8 = vld [vmem:[%s14413_s0 + $0x3a8] sm:$0xff] }
  0xcc   :  { %v10890_v9 = vpop.f32.mrf.mxu0  ;;  %9337 = vmatmul.mubr.msk.f32.gmra.mxu0 %vm554_vm1, %v127_v5  ;;  %v530_v5 = vld [vmem:[%s14413_s0 + $0xfa0] sm:$0xff] }
  0xcd   :  { %9339 = vmatprep.mubr.msk.f32.mxu0 %vm554_vm1, %v128_v7 }
  0xce   :  { %v10902_v12 = vpop.f32.mrf.mxu0  ;;  %9916 = vmatmul.mubr.msk.f32.gmra.mxu1 %vm554_vm1, %v513_v11  ;;  %v10930_v21 = vpop.f32.mrf.mxu1 }
  0xcf   :  { %9918 = vmatprep.mubr.msk.f32.mxu1 %vm554_vm1, %v514_v14  ;;  %14424 = vst [vmem:[#allocation5_spill] sm:$0xff] %v10930_v21  ;;  %v532_v14 = vld [vmem:[%s14413_s0 + $0xfb0] sm:$0xff] }
  0xd0   :  { %v10910_v15 = vpop.f32.mrf.mxu0  ;;  %9340 = vmatmul.mubr.msk.f32.gmra.mxu0 %vm554_vm1, %v129_v10  ;;  %v10952_v28 = vpop.f32.mrf.mxu1  ;;  %v531_v10 = vld [vmem:[%s14413_s0 + $0xfa8] sm:$0xff]  ;;  %v224_v21 = vld [vmem:[%s14413_s0 + $0x610] sm:$0xff] }
  0xd1   :  { %9342 = vmatprep.mubr.msk.f32.mxu0 %vm554_vm1, %v130_v13  ;;  %14425 = vst [vmem:[#allocation6_spill] sm:$0xff] %v10952_v28  ;;  %v148_v13 = vld [vmem:[%s14413_s0 + $0x3b0] sm:$0xff] }
  0xd2   :  { %v10922_v18 = vpop.f32.mrf.mxu0  ;;  %9919 = vmatmul.mubr.msk.f32.gmra.mxu1 %vm554_vm1, %v515_v17  ;;  %v10974_v35 = vpop.f32.mrf.mxu1  ;;  %v5232_v17 = vlaneseq }
  0xd3   :  { %9921 = vmatprep.mubr.msk.f32.mxu1 %vm554_vm1, %v516_v20  ;;  %14426 = vst [vmem:[#allocation7_spill] sm:$0xff] %v10974_v35  ;;  %v149_v20 = vld [vmem:[%s14413_s0 + $0x3b8] sm:$0xff]  ;;  %v256_v35 = vld [vmem:[%s14413_s0 + $0x710] sm:$0xff] }
  0xd4   :  { %v10932_v22 = vpop.f32.mrf.mxu0  ;;  %9343 = vmatmul.mubr.msk.f32.gmra.mxu0 %vm554_vm1, %v131_v16  ;;  %v10996_v42 = vpop.f32.mrf.mxu1 }
  0xd5   :  { %9345 = vmatprep.mubr.msk.f32.mxu0 %vm554_vm1, %v132_v19  ;;  %14427 = vst [vmem:[#allocation8_spill] sm:$0xff] %v10996_v42 }
  0xd6   :  { %v10944_v25 = vpop.f32.mrf.mxu0  ;;  %9922 = vmatmul.mubr.msk.f32.gmra.mxu1 %vm554_vm1, %v517_v24  ;;  %v11018_v49 = vpop.f32.mrf.mxu1 }
  0xd7   :  { %9924 = vmatprep.mubr.msk.f32.mxu1 %vm554_vm1, %v518_v27  ;;  %14428 = vst [vmem:[#allocation9_spill] sm:$0xff] %v11018_v49  ;;  %v534_v27 = vld [vmem:[%s14413_s0 + $0xfc0] sm:$0xff] }
  0xd8   :  { %v10954_v29 = vpop.f32.mrf.mxu0  ;;  %9346 = vmatmul.mubr.msk.f32.gmra.mxu0 %vm554_vm1, %v133_v23  ;;  %v11040_v56 = vpop.f32.mrf.mxu1  ;;  %v533_v23 = vld [vmem:[%s14413_s0 + $0xfb8] sm:$0xff] }
  0xd9   :  { %9348 = vmatprep.mubr.msk.f32.mxu0 %vm554_vm1, %v134_v26  ;;  %14429 = vst [vmem:[#allocation10_spill] sm:$0xff] %v11040_v56  ;;  %v150_v26 = vld [vmem:[%s14413_s0 + $0x3c0] sm:$0xff] }
  0xda   :  { %v10966_v32 = vpop.f32.mrf.mxu0  ;;  %9925 = vmatmul.mubr.msk.f32.gmra.mxu1 %vm554_vm1, %v519_v31  ;;  %v11062_v63 = vpop.f32.mrf.mxu1  ;;  %v11130_v31 = vshrl.u32 %v5232_v17, 7 }
  0xdb   :  { %9927 = vmatprep.mubr.msk.f32.mxu1 %vm554_vm1, %v520_v34  ;;  %14430 = vst [vmem:[#allocation11_spill] sm:$0xff] %v11062_v63  ;;  %v151_v34 = vld [vmem:[%s14413_s0 + $0x3c8] sm:$0xff] }
  0xdc   :  { %v10976_v36 = vpop.f32.mrf.mxu0  ;;  %9349 = vmatmul.mubr.msk.f32.gmra.mxu0 %vm554_vm1, %v135_v30  ;;  %v11084_v6 = vpop.f32.mrf.mxu1 }
  0xdd   :  { %9351 = vmatprep.mubr.msk.f32.mxu0 %vm554_vm1, %v136_v33  ;;  %14431 = vst [vmem:[#allocation12_spill] sm:$0xff] %v11084_v6 }
  0xde   :  { %v10988_v39 = vpop.f32.mrf.mxu0  ;;  %9928 = vmatmul.mubr.msk.f32.gmra.mxu1 %vm554_vm1, %v521_v38  ;;  %v11106_v16 = vpop.f32.mrf.mxu1 }
  0xdf   :  { %9930 = vmatprep.mubr.msk.f32.mxu1 %vm554_vm1, %v522_v41  ;;  %14432 = vst [vmem:[#allocation13_spill] sm:$0xff] %v11106_v16  ;;  %v536_v41 = vld [vmem:[%s14413_s0 + $0xfd0] sm:$0xff] }
  0xe0   :  { %v10998_v43 = vpop.f32.mrf.mxu0  ;;  %9352 = vmatmul.mubr.msk.f32.gmra.mxu0 %vm554_vm1, %v137_v37  ;;  %v11128_v30 = vpop.f32.mrf.mxu1  ;;  %v535_v37 = vld [vmem:[%s14413_s0 + $0xfc8] sm:$0xff] }
  0xe1   :  { %9354 = vmatprep.mubr.msk.f32.mxu0 %vm554_vm1, %v138_v40  ;;  %14433 = vst [vmem:[#allocation14_spill] sm:$0xff] %v11128_v30  ;;  %v152_v40 = vld [vmem:[%s14413_s0 + $0x3d0] sm:$0xff] }
  0xe2   :  { %v11010_v46 = vpop.f32.mrf.mxu0  ;;  %9931 = vmatmul.mubr.msk.f32.gmra.mxu1 %vm554_vm1, %v523_v45  ;;  %v11154_v45 = vand.u32 127, %v5232_v17 }
  0xe3   :  { %9933 = vmatprep.mubr.msk.f32.mxu1 %vm554_vm1, %v524_v48 }
  0xe4   :  { %v11020_v50 = vpop.f32.mrf.mxu0  ;;  %9355 = vmatmul.mubr.msk.f32.gmra.mxu0 %vm554_vm1, %v139_v44  ;;  %v11152_v44 = vpop.f32.mrf.mxu1 }
  0xe5   :  { %9357 = vmatprep.mubr.msk.f32.mxu0 %vm554_vm1, %v140_v47  ;;  %v5334_v47 = vadd.s32 1, %v11130_v31 }
  0xe6   :  { %v11032_v53 = vpop.f32.mrf.mxu0  ;;  %9934 = vmatmul.mubr.msk.f32.gmra.mxu1 %vm554_vm1, %v525_v52  ;;  %v537_v52 = vld [vmem:[%s14413_s0 + $0xfd8] sm:$0xff] }
  0xe7   :  { %9936 = vmatprep.mubr.msk.f32.mxu1 %vm554_vm1, %v526_v55  ;;  %v154_v55 = vld [vmem:[%s14413_s0 + $0x3e0] sm:$0xff] }
  0xe8   :  { %v11042_v57 = vpop.f32.mrf.mxu0  ;;  %9358 = vmatmul.mubr.msk.f32.gmra.mxu0 %vm554_vm1, %v141_v51  ;;  %v153_v51 = vld [vmem:[%s14413_s0 + $0x3d8] sm:$0xff] }
  0xe9   :  { %9360 = vmatprep.mubr.msk.f32.mxu0 %vm554_vm1, %v142_v54 }
  0xea   :  { %v11054_v60 = vpop.f32.mrf.mxu0  ;;  %9937 = vmatmul.mubr.msk.f32.gmra.mxu1 %vm554_vm1, %v527_v59  ;;  %v11177_v59 = vpop.f32.mrf.mxu1 }
  0xeb   :  { %9939 = vmatprep.mubr.msk.f32.mxu1 %vm554_vm1, %v528_v62  ;;  %v11183_v62 = vmul.u32 256, %v11130_v31 }
  0xec   :  { %v11064_v0 = vpop.f32.mrf.mxu0  ;;  %9361 = vmatmul.mubr.msk.f32.gmra.mxu0 %vm554_vm1, %v143_v58  ;;  %v538_v58 = vld [vmem:[%s14413_s0 + $0xfe0] sm:$0xff] }
  0xed   :  { %9363 = vmatprep.mubr.msk.f32.mxu0 %vm554_vm1, %v144_v61  ;;  %v11180_v61 = vadd.s32 128, %v11154_v45  ;;  %vm5270_vm5 = vcmp.ge.s32.totalorder %v11154_v45, %v11183_v62 }
  0xee   :  { %v11076_v3 = vpop.f32.mrf.mxu0  ;;  %9940 = vmatmul.mubr.msk.f32.gmra.mxu1 %vm554_vm1, %v529_v2 }
  0xef   :  { %9942 = vmatprep.mubr.msk.f32.mxu1 %vm554_vm1, %v530_v5  ;;  %v539_v5 = vld [vmem:[%s14413_s0 + $0xfe8] sm:$0xff]  ;;  %vm5271_vm2 = vcmp.ge.s32.totalorder %v11180_v61, %v11183_v62 }
  0xf0   :  { %v11086_v7 = vpop.f32.mrf.mxu0  ;;  %9364 = vmatmul.mubr.msk.f32.gmra.mxu0 %vm554_vm1, %v145_v1  ;;  %v11185_v1 = vmul.u32 256, %v5334_v47 }
  0xf1   :  { %9366 = vmatprep.mubr.msk.f32.mxu0 %vm554_vm1, %v146_v4  ;;  %v155_v4 = vld [vmem:[%s14413_s0 + $0x3e8] sm:$0xff] }
  0xf2   :  { %v11098_v11 = vpop.f32.mrf.mxu0  ;;  %9943 = vmatmul.mubr.msk.f32.gmra.mxu1 %vm554_vm1, %v531_v10  ;;  %v156_v10 = vld [vmem:[%s14413_s0 + $0x3f0] sm:$0xff]  ;;  %vm5339_vm3 = vcmp.lt.s32.totalorder %v11180_v61, %v11185_v1  ;;  %vm5338_vm6 = vcmp.lt.s32.totalorder %v11154_v45, %v11185_v1 }
  0xf3   :  { %9945 = vmatprep.mubr.msk.f32.mxu1 %vm554_vm1, %v532_v14  ;;  %v540_v14 = vld [vmem:[%s14413_s0 + $0xff0] sm:$0xff]  ;;  %vm5403_vm4 = vmand %vm5271_vm2, %vm5339_vm3 }
  0xf4   :  { %v11108_v19 = vpop.f32.mrf.mxu0  ;;  %9367 = vmatmul.mubr.msk.f32.gmra.mxu0 %vm554_vm1, %v147_v8  ;;  %vm5402_vm9 = vmand %vm5270_vm5, %vm5338_vm6 }
  0xf5   :  { %9369 = vmatprep.mubr.msk.f32.mxu0 %vm554_vm1, %v148_v13  ;;  %v11200_v13 = vpop.f32.mrf.mxu1 }
  0xf6   :  { %v11120_v24 = vpop.f32.mrf.mxu0  ;;  %9946 = vmatmul.mubr.msk.f32.gmra.mxu1 %vm554_vm1, %v533_v23  ;;  %v541_v23 = vld [vmem:[%s14413_s0 + $0xff8] sm:$0xff] }
  0xf7   :  { %9948 = vmatprep.mubr.msk.f32.mxu1 %vm554_vm1, %v534_v27  ;;  %v158_v27 = vld [vmem:[%s14413_s0 + $0x400] sm:$0xff] }
  0xf8   :  { %v11132_v33 = vpop.f32.mrf.mxu0  ;;  %9370 = vmatmul.mubr.msk.f32.gmra.mxu0 %vm554_vm1, %v149_v20  ;;  %v157_v20 = vld [vmem:[%s14413_s0 + $0x3f8] sm:$0xff] }
  0xf9   :  { %9372 = vmatprep.mubr.msk.f32.mxu0 %vm554_vm1, %v150_v26 }
  0xfa   :  { %v11144_v38 = vpop.f32.mrf.mxu0  ;;  %9949 = vmatmul.mubr.msk.f32.gmra.mxu1 %vm554_vm1, %v535_v37  ;;  %v11227_v37 = vld [vmem:[%s14415_s2] ss:$0 sm:$0xff] }
  0xfb   :  { %9951 = vmatprep.mubr.msk.f32.mxu1 %vm554_vm1, %v536_v41 }
  0xfc   :  { %v11157_v48 = vpop.f32.mrf.mxu0  ;;  %9373 = vmatmul.mubr.msk.f32.gmra.mxu0 %vm554_vm1, %v151_v34  ;;  %v11222_v34 = vpop.f32.mrf.mxu1 }
  0xfd   :  { %9375 = vmatprep.mubr.msk.f32.mxu0 %vm554_vm1, %v152_v40  ;;  %v2237_v40 = vadd.f32 %v11042_v57, %v11227_v37 }
  0xfe   :  { %v11169_v54 = vpop.f32.mrf.mxu0  ;;  %9952 = vmatmul.mubr.msk.f32.gmra.mxu1 %vm554_vm1, %v537_v52  ;;  %v14422_v52 = vmov 0.00390625  }
  0xff   :  { %9954 = vmatprep.mubr.msk.f32.mxu1 %vm554_vm1, %v538_v58  ;;  %v160_v58 = vld [vmem:[%s14413_s0 + $0x410] sm:$0xff] }
 0x100   :  { %v9233_v2 = vpop.f32.mrf.mxu0  ;;  %9376 = vmatmul.mubr.msk.f32.gmra.mxu0 %vm554_vm1, %v153_v51  ;;  %v159_v51 = vld [vmem:[%s14413_s0 + $0x408] sm:$0xff] }
 0x101   :  { %9378 = vmatprep.mubr.msk.f32.mxu0 %vm554_vm1, %v154_v55  ;;  %v2232_v55 = vadd.f32 %v11227_v37, %v11054_v60 }
 0x102   :  { %v2291_v8 = vpop.f32.mrf.mxu0  ;;  %9955 = vmatmul.mubr.msk.f32.gmra.mxu1 %vm554_vm1, %v539_v5 }
 0x103   :  { %9957 = vmatprep.mubr.msk.f32.mxu1 %vm554_vm1, %v540_v14  ;;  %v2227_v14 = vadd.f32 %v11020_v50, %v11227_v37 }
 0x104   :  { %v9236_v17 = vpop.f32.mrf.mxu0  ;;  %9379 = vmatmul.mubr.msk.f32.gmra.mxu0 %vm554_vm1, %v155_v4 }
 0x105   :  { %9381 = vmatprep.mubr.msk.f32.mxu0 %vm554_vm1, %v156_v10  ;;  %v2307_v4 = vadd.f32 %v9236_v17, %v11227_v37  ;;  %v161_v17 = vld [vmem:[%s14413_s0 + $0x418] sm:$0xff] }
 0x106   :  { %v2301_v26 = vpop.f32.mrf.mxu0  ;;  %9958 = vmatmul.mubr.msk.f32.gmra.mxu1 %vm554_vm1, %v541_v23 }
 0x107   :  { %7956 = vmatprep.mubr.msk.f32.mxu1 %vm5403_vm4, %v14422_v52  ;;  %v2302_v60 = vadd.f32 %v11227_v37, %v2301_v26  ;;  %v2297_v26 = vadd.f32 %v9233_v2, %v11227_v37  ;;  %v163_v2 = vld [vmem:[%s14413_s0 + $0x428] sm:$0xff] }
 0x108   :  { %v9239_v41 = vpop.f32.mrf.mxu0  ;;  %9382 = vmatmul.mubr.msk.f32.gmra.mxu0 %vm554_vm1, %v157_v20  ;;  %v4735_v20 = vmax.f32 %v2237_v40, 0.0  ;;  %v162_v40 = vld [vmem:[%s14413_s0 + $0x420] sm:$0xff] }
 0x109   :  { %v2317_v47 = vadd.f32 %v9239_v41, %v11227_v37  ;;  %9384 = vmatprep.mubr.msk.f32.mxu0 %vm554_vm1, %v158_v27  ;;  %v2222_v41 = vadd.f32 %v11227_v37, %v11032_v53  ;;  %v2292_v53 = vadd.f32 %v11227_v37, %v2291_v8  ;;  %v2287_v8 = vadd.f32 %v11157_v48, %v11227_v37  ;;  %v165_v48 = vld [vmem:[%s14413_s0 + $0x438] sm:$0xff] }
 0x10a   :  { %v2311_v57 = vpop.f32.mrf.mxu0 }
 0x10b   :  { %v4751_v5 = vmax.f32 %v2317_v47, 0.0  ;;  %v2312_v10 = vadd.f32 %v11227_v37, %v2311_v57  ;;  %v4734_v47 = vmax.f32 %v2232_v55, 0.0  ;;  %v2217_v57 = vadd.f32 %v10998_v43, %v11227_v37 }
 0x10c   :  { %v11248_v23 = vpop.f32.mrf.mxu0  ;;  %9385 = vmatmul.mubr.msk.f32.gmra.mxu0 %vm554_vm1, %v159_v51  ;;  %v4749_v51 = vmax.f32 %v2307_v4, 0.0  ;;  %v4748_v55 = vmax.f32 %v2302_v60, 0.0  ;;  %v2212_v4 = vadd.f32 %v11227_v37, %v11010_v46  ;;  %v4732_v43 = vmax.f32 %v2222_v41, 0.0 }
 0x10d   :  { %v4750_v27 = vmax.f32 %v2312_v10, 0.0  ;;  %8552 = vmatprep.subr.mxu1 %v4751_v5  ;;  %9387 = vmatprep.mubr.msk.f32.mxu0 %vm554_vm1, %v160_v58  ;;  %v4733_v58 = vmax.f32 %v2227_v14, 0.0  ;;  %v164_v14 = vld [vmem:[%s14413_s0 + $0x430] sm:$0xff]  ;;  %v2207_v60 = vadd.f32 %v10976_v36, %v11227_v37  ;;  %v2282_v46 = vadd.f32 %v11227_v37, %v11169_v54 }
 0x10e   :  { %v11258_v50 = vpop.f32.mrf.mxu0  ;;  %8553 = vmatpush3.msra.mxu1 %v4735_v20  ;;  %v4747_v20 = vmax.f32 %v2297_v26, 0.0  ;;  %v4746_v41 = vmax.f32 %v2292_v53, 0.0  ;;  %v2202_v36 = vadd.f32 %v11227_v37, %v10988_v39  ;;  %v166_v26 = vld [vmem:[%s14413_s0 + $0x440] sm:$0xff]  ;;  %v2277_v54 = vadd.f32 %v11132_v33, %v11227_v37  ;;  %v167_v33 = vld [vmem:[%s14413_s0 + $0x448] sm:$0xff] }
 0x10f   :  { %8554 = vmatprep.subr.mxu1 %v4750_v27  ;;  %v4731_v27 = vmax.f32 %v2217_v57, 0.0  ;;  %v2197_v57 = vadd.f32 %v10954_v29, %v11227_v37  ;;  %v2272_v39 = vadd.f32 %v11227_v37, %v11144_v38  ;;  %v2192_v29 = vadd.f32 %v11227_v37, %v10966_v32 }
 0x110   :  { %v11266_v5 = vpop.f32.mrf.mxu0  ;;  %9388 = vmatmul.mubr.msk.f32.gmra.mxu0 %vm554_vm1, %v161_v17  ;;  %8555 = vmatpush3.msra.mxu1 %v4734_v47  ;;  %v4730_v47 = vmax.f32 %v2212_v4, 0.0  ;;  %v2267_v38 = vadd.f32 %v11108_v19, %v11227_v37  ;;  %v5234_v32 = vadd.s32 8, %v11130_v31  ;;  %v169_v19 = vld [vmem:[%s14413_s0 + $0x458] sm:$0xff]  ;;  %v170_v31 = vld [vmem:[%s14413_s0 + $0x460] sm:$0xff] }
 0x111   :  { %8556 = vmatprep.subr.mxu1 %v4749_v51  ;;  %9390 = vmatprep.mubr.msk.f32.mxu0 %vm554_vm1, %v162_v40  ;;  %v4745_v51 = vmax.f32 %v2287_v8, 0.0  ;;  %v2187_v8 = vadd.f32 %v10932_v22, %v11227_v37  ;;  %v2182_v22 = vadd.f32 %v11227_v37, %v10944_v25 }
 0x112   :  { %v11276_v10 = vpop.f32.mrf.mxu0  ;;  %8557 = vmatpush3.msra.mxu1 %v4733_v58  ;;  %v4729_v58 = vmax.f32 %v2207_v60, 0.0  ;;  %v5335_v25 = vadd.s32 1, %v5234_v32 }
 0x113   :  { %8558 = vmatprep.subr.mxu1 %v4748_v55  ;;  %v4744_v55 = vmax.f32 %v2282_v46, 0.0  ;;  %v4742_v46 = vmax.f32 %v2272_v39, 0.0 }
 0x114   :  { %v11285_v17 = vpop.f32.mrf.mxu0  ;;  %9391 = vmatmul.mubr.msk.f32.gmra.mxu0 %vm554_vm1, %v163_v2  ;;  %8559 = vmatpush3.msra.mxu1 %v4732_v43  ;;  %v4728_v2 = vmax.f32 %v2202_v36, 0.0  ;;  %v168_v43 = vld [vmem:[%s14413_s0 + $0x450] sm:$0xff]  ;;  %v4741_v36 = vmax.f32 %v2267_v38, 0.0  ;;  %v11371_v38 = vmul.u32 256, %v5335_v25 }
 0x115   :  { %8560 = vmatprep.subr.mxu1 %v4747_v20  ;;  %9393 = vmatprep.mubr.msk.f32.mxu0 %vm554_vm1, %v164_v14  ;;  %v4743_v14 = vmax.f32 %v2277_v54, 0.0  ;;  %v4727_v20 = vmax.f32 %v2197_v57, 0.0 }
 0x116   :  { %v11296_v40 = vpop.f32.mrf.mxu0  ;;  %8561 = vmatpush3.msra.mxu1 %v4731_v27  ;;  %v2262_v27 = vadd.f32 %v11227_v37, %v11120_v24  ;;  %v2257_v24 = vadd.f32 %v11086_v7, %v11227_v37  ;;  %v171_v7 = vld [vmem:[%s14413_s0 + $0x468] sm:$0xff]  ;;  %vm5371_vm8 = vcmp.lt.s32.totalorder %v11180_v61, %v11371_v38  ;;  %vm5370_vm12 = vcmp.lt.s32.totalorder %v11154_v45, %v11371_v38 }
 0x117   :  { %8562 = vmatprep.subr.mxu1 %v4746_v41  ;;  %v4726_v41 = vmax.f32 %v2192_v29, 0.0  ;;  %v2167_v29 = vadd.f32 %v10890_v9, %v11227_v37  ;;  %v173_v9 = vld [vmem:[%s14413_s0 + $0x478] sm:$0xff] }
 0x118   :  { %v11305_v53 = vpop.f32.mrf.mxu0  ;;  %9394 = vmatmul.mubr.msk.f32.gmra.mxu0 %vm554_vm1, %v165_v48  ;;  %8563 = vmatpush3.msra.mxu1 %v4730_v47  ;;  %v2177_v47 = vadd.f32 %v10910_v15, %v11227_v37  ;;  %v4740_v57 = vmax.f32 %v2262_v27, 0.0  ;;  %v2172_v15 = vadd.f32 %v11227_v37, %v10922_v18  ;;  %v11369_v18 = vmul.u32 256, %v5234_v32 }
 0x119   :  { %8564 = vmatprep.subr.mxu1 %v4745_v51  ;;  %9396 = vmatprep.mubr.msk.f32.mxu0 %vm554_vm1, %v166_v26  ;;  %v4725_v26 = vmax.f32 %v2187_v8, 0.0  ;;  %v2252_v51 = vadd.f32 %v11227_v37, %v11098_v11  ;;  %v2247_v11 = vadd.f32 %v11064_v0, %v11227_v37  ;;  %v11379_v0 = vpop.f32.mrf.mxu1 }
 0x11a   :  { %v11316_v4 = vpop.f32.mrf.mxu0  ;;  %8565 = vmatpush3.msra.mxu1 %v4729_v58  ;;  %v4724_v58 = vmax.f32 %v2182_v22, 0.0  ;;  %14434 = vst [vmem:[#allocation15_spill] sm:$0xff] %v11379_v0  ;;  %v4722_v32 = vmax.f32 %v2172_v15, 0.0  ;;  %vm5303_vm7 = vcmp.ge.s32.totalorder %v11180_v61, %v11369_v18  ;;  %vm5302_vm11 = vcmp.ge.s32.totalorder %v11154_v45, %v11369_v18  ;;  %v177_v61 = vld [vmem:[%s14413_s0 + $0x498] sm:$0xff] }
 0x11b   :  { %8566 = vmatprep.subr.mxu1 %v4744_v55  ;;  %v172_v55 = vld [vmem:[%s14413_s0 + $0x470] sm:$0xff]  ;;  %v4738_v8 = vmax.f32 %v2252_v51, 0.0  ;;  %vm5435_vm10 = vmand %vm5303_vm7, %vm5371_vm8 }
 0x11c   :  { %v11325_v60 = vpop.f32.mrf.mxu0  ;;  %9397 = vmatmul.mubr.msk.f32.gmra.mxu0 %vm554_vm1, %v167_v33  ;;  %8567 = vmatpush3.msra.mxu1 %v4728_v2  ;;  %v4739_v33 = vmax.f32 %v2257_v24, 0.0  ;;  %v4723_v2 = vmax.f32 %v2177_v47, 0.0  ;;  %v11406_v24 = vpop.f32.mrf.mxu1  ;;  %vm5434_vm15 = vmand %vm5302_vm11, %vm5370_vm12 }
 0x11d   :  { %8568 = vmatprep.subr.mxu1 %v4743_v14  ;;  %9399 = vmatprep.mubr.msk.f32.mxu0 %vm554_vm1, %v168_v43  ;;  %v2242_v14 = vadd.f32 %v11227_v37, %v11076_v3  ;;  %v174_v3 = vld [vmem:[%s14413_s0 + $0x480] sm:$0xff]  ;;  %14435 = vst [vmem:[#allocation16_spill] sm:$0xff] %v11406_v24 }
 0x11e   :  { %v11337_v48 = vpop.f32.mrf.mxu0  ;;  %8569 = vmatpush3.msra.mxu1 %v4727_v20  ;;  %v2162_v20 = vadd.f32 %v11227_v37, %v10902_v12  ;;  %v11400_v12 = vadd.s32 384, %v11154_v45  ;;  %v11419_v25 = vpop.f32.mrf.mxu1 }
 0x11f   :  { %8570 = vmatprep.subr.mxu1 %v4742_v46  ;;  %v4737_v46 = vmax.f32 %v2247_v11, 0.0  ;;  %14436 = vst [vmem:[#allocation17_spill] sm:$0xff] %v11419_v25 }
 0x120   :  { %v11346_v54 = vpop.f32.mrf.mxu0  ;;  %9400 = vmatmul.mubr.msk.f32.gmra.mxu0 %vm554_vm1, %v169_v19  ;;  %8571 = vmatpush3.msra.mxu1 %v4726_v41  ;;  %v4721_v19 = vmax.f32 %v2167_v29, 0.0  ;;  %v4736_v41 = vmax.f32 %v2242_v14, 0.0  ;;  %vm5273_vm13 = vcmp.ge.s32.totalorder %v11400_v12, %v11183_v62  ;;  %vm5341_vm14 = vcmp.lt.s32.totalorder %v11400_v12, %v11185_v1  ;;  %v11446_v15 = vpop.f32.mrf.mxu1 }
 0x121   :  { %8572 = vmatprep.subr.mxu1 %v4741_v36  ;;  %9402 = vmatprep.mubr.msk.f32.mxu0 %vm554_vm1, %v170_v31  ;;  %v175_v31 = vld [vmem:[%s14413_s0 + $0x488] sm:$0xff]  ;;  %v4720_v36 = vmax.f32 %v2162_v20, 0.0  ;;  %14437 = vst [vmem:[#allocation18_spill] sm:$0xff] %v11446_v15  ;;  %vm5405_vm0 = vmand %vm5273_vm13, %vm5341_vm14  ;;  %vm5305_vm4 = vcmp.ge.s32.totalorder %v11400_v12, %v11369_v18  ;;  %vm5373_vm5 = vcmp.lt.s32.totalorder %v11400_v12, %v11371_v38  ;;  %v209_v12 = vld [vmem:[%s14413_s0 + $0x598] sm:$0xff] }
 0x122   :  { %v11357_v39 = vpop.f32.mrf.mxu0  ;;  %8573 = vmatpush3.msra.mxu1 %v4725_v26  ;;  %v176_v26 = vld [vmem:[%s14413_s0 + $0x490] sm:$0xff]  ;;  %v183_v20 = vld [vmem:[%s14413_s0 + $0x4c8] sm:$0xff]  ;;  %vm5437_vm7 = vmand %vm5305_vm4, %vm5373_vm5 }
 0x123   :  { %8574 = vmatprep.subr.mxu1 %v4740_v57 }
 0x124   :  { %v11366_v43 = vpop.f32.mrf.mxu0  ;;  %9403 = vmatmul.mubr.msk.f32.gmra.mxu0 %vm554_vm1, %v171_v7  ;;  %8575 = vmatpush3.msra.mxu1 %v4724_v58  ;;  %v178_v7 = vld [vmem:[%s14413_s0 + $0x4a0] sm:$0xff] }
 0x125   :  { %8576 = vmatprep.subr.mxu1 %v4739_v33  ;;  %9405 = vmatprep.mubr.msk.f32.mxu0 %vm554_vm1, %v172_v55  ;;  %v179_v55 = vld [vmem:[%s14413_s0 + $0x4a8] sm:$0xff]  ;;  %v180_v33 = vld [vmem:[%s14413_s0 + $0x4b0] sm:$0xff] }
 0x126   :  { %v11383_v27 = vpop.f32.mrf.mxu0  ;;  %8577 = vmatpush3.msra.mxu1 %v4723_v2  ;;  %v181_v2 = vld [vmem:[%s14413_s0 + $0x4b8] sm:$0xff] }
 0x127   :  { %8578 = vmatprep.subr.mxu1 %v4738_v8  ;;  %v182_v8 = vld [vmem:[%s14413_s0 + $0x4c0] sm:$0xff] }
 0x128   :  { %v11392_v22 = vpop.f32.mrf.mxu0  ;;  %9406 = vmatmul.mubr.msk.f32.gmra.mxu0 %vm554_vm1, %v173_v9  ;;  %8579 = vmatpush3.msra.mxu1 %v4722_v32 }
 0x129   :  { %8580 = vmatprep.subr.mxu1 %v4737_v46  ;;  %9408 = vmatprep.mubr.msk.f32.mxu0 %vm554_vm1, %v174_v3  ;;  %v184_v3 = vld [vmem:[%s14413_s0 + $0x4d0] sm:$0xff] }
 0x12a   :  { %v11408_v47 = vpop.f32.mrf.mxu0  ;;  %8581 = vmatpush3.msra.mxu1 %v4721_v19  ;;  %v185_v19 = vld [vmem:[%s14413_s0 + $0x4d8] sm:$0xff] }
 0x12b   :  { %8582 = vmatprep.subr.mxu1 %v4736_v41 }
 0x12c   :  { %v11428_v51 = vpop.f32.mrf.mxu0  ;;  %9409 = vmatmul.mubr.msk.f32.gmra.mxu0 %vm554_vm1, %v175_v31  ;;  %8583 = vmatpush3.msra.mxu1 %v4720_v36  ;;  %v186_v31 = vld [vmem:[%s14413_s0 + $0x4e0] sm:$0xff] }
 0x12d   :  { %9411 = vmatprep.mubr.msk.f32.mxu0 %vm554_vm1, %v176_v26  ;;  %7957 = vmatmul.mubr.msk.f32.vlgmr.msra.gmra.mxu1 %vm5402_vm9, %v14422_v52  ;;  %v187_v26 = vld [vmem:[%s14413_s0 + $0x4e8] sm:$0xff] }
 0x12e   :  { %v11440_v57 = vpop.f32.mrf.mxu0  ;;  %7958 = vmatprep.mubr.msk.f32.mxu1 %vm5435_vm10, %v14422_v52 }
 0x130   :  { %v11448_v58 = vpop.f32.mrf.mxu0  ;;  %9412 = vmatmul.mubr.msk.f32.gmra.mxu0 %vm554_vm1, %v177_v61 }
 0x131   :  { %9414 = vmatprep.mubr.msk.f32.mxu0 %vm554_vm1, %v178_v7  ;;  %7959 = vmatmul.mubr.msk.f32.gmra.mxu1 %vm5434_vm15, %v14422_v52  ;;  %v188_v7 = vld [vmem:[%s14413_s0 + $0x4f0] sm:$0xff] }
 0x132   :  { %v11456_v11 = vpop.f32.mrf.mxu0  ;;  %7960 = vmatprep.mubr.msk.f32.mxu1 %vm5405_vm0, %v14422_v52  ;;  %v192_v52 = vld [vmem:[%s14413_s0 + $0x510] sm:$0xff] }
 0x134   :  { %v11462_v29 = vpop.f32.mrf.mxu0  ;;  %9415 = vmatmul.mubr.msk.f32.gmra.mxu0 %vm554_vm1, %v179_v55 }
 0x135   :  { %9417 = vmatprep.mubr.msk.f32.mxu0 %vm554_vm1, %v180_v33  ;;  %v189_v33 = vld [vmem:[%s14413_s0 + $0x4f8] sm:$0xff] }
 0x136   :  { %v11469_v14 = vpop.f32.mrf.mxu0 }
 0x138   :  { %v11474_v9 = vpop.f32.mrf.mxu0  ;;  %9418 = vmatmul.mubr.msk.f32.gmra.mxu0 %vm554_vm1, %v181_v2 }
 0x139   :  { %9420 = vmatprep.mubr.msk.f32.mxu0 %vm554_vm1, %v182_v8  ;;  %v190_v8 = vld [vmem:[%s14413_s0 + $0x500] sm:$0xff] }
 0x13a   :  { %v11481_v32 = vpop.f32.mrf.mxu0 }
 0x13c   :  { %v9278_v46 = vpop.f32.mrf.mxu0  ;;  %9421 = vmatmul.mubr.msk.f32.gmra.mxu0 %vm554_vm1, %v183_v20  ;;  %v2397_v20 = vadd.f32 %v11392_v22, %v11227_v37 }
 0x13d   :  { %9423 = vmatprep.mubr.msk.f32.mxu0 %vm554_vm1, %v184_v3 }
 0x13e   :  { %v11491_v41 = vpop.f32.mrf.mxu0 }
 0x140   :  { %v9281_v36 = vpop.f32.mrf.mxu0  ;;  %9424 = vmatmul.mubr.msk.f32.gmra.mxu0 %vm554_vm1, %v185_v19 }
 0x141   :  { %9426 = vmatprep.mubr.msk.f32.mxu0 %vm554_vm1, %v186_v31  ;;  %v191_v31 = vld [vmem:[%s14413_s0 + $0x508] sm:$0xff] }
 0x142   :  { %v2451_v61 = vpop.f32.mrf.mxu0 }
 0x144   :  { %v9284_v55 = vpop.f32.mrf.mxu0  ;;  %9427 = vmatmul.mubr.msk.f32.gmra.mxu0 %vm554_vm1, %v187_v26  ;;  %v2392_v26 = vadd.f32 %v11227_v37, %v11408_v47 }
 0x145   :  { %9429 = vmatprep.mubr.msk.f32.mxu0 %vm554_vm1, %v188_v7  ;;  %v2467_v22 = vadd.f32 %v9284_v55, %v11227_v37  ;;  %v193_v55 = vld [vmem:[%s14413_s0 + $0x518] sm:$0xff] }
 0x146   :  { %v2461_v2 = vpop.f32.mrf.mxu0 }
 0x147   :  { %v2462_v47 = vadd.f32 %v11227_v37, %v2461_v2  ;;  %v2457_v2 = vadd.f32 %v9281_v36, %v11227_v37  ;;  %v195_v36 = vld [vmem:[%s14413_s0 + $0x528] sm:$0xff] }
 0x148   :  { %v9287_v3 = vpop.f32.mrf.mxu0  ;;  %9430 = vmatmul.mubr.msk.f32.gmra.mxu0 %vm554_vm1, %v189_v33 }
 0x149   :  { %v2477_v19 = vadd.f32 %v9287_v3, %v11227_v37  ;;  %9432 = vmatprep.mubr.msk.f32.mxu0 %vm554_vm1, %v190_v8  ;;  %v2387_v8 = vadd.f32 %v11366_v43, %v11227_v37  ;;  %v4767_v3 = vmax.f32 %v2397_v20, 0.0  ;;  %v194_v20 = vld [vmem:[%s14413_s0 + $0x520] sm:$0xff] }
 0x14a   :  { %v2471_v7 = vpop.f32.mrf.mxu0 }
 0x14b   :  { %v4783_v24 = vmax.f32 %v2477_v19, 0.0  ;;  %v2472_v33 = vadd.f32 %v11227_v37, %v2471_v7  ;;  %v2382_v19 = vadd.f32 %v11227_v37, %v11383_v27  ;;  %v4766_v7 = vmax.f32 %v2392_v26, 0.0 }
 0x14c   :  { %v11529_v0 = vpop.f32.mrf.mxu0  ;;  %9433 = vmatmul.mubr.msk.f32.gmra.mxu0 %vm554_vm1, %v191_v31  ;;  %v4765_v31 = vmax.f32 %v2387_v8, 0.0  ;;  %v2452_v27 = vadd.f32 %v11227_v37, %v2451_v61  ;;  %v4780_v26 = vmax.f32 %v2462_v47, 0.0  ;;  %v196_v8 = vld [vmem:[%s14413_s0 + $0x530] sm:$0xff]  ;;  %v2447_v61 = vadd.f32 %v9278_v46, %v11227_v37  ;;  %v197_v46 = vld [vmem:[%s14413_s0 + $0x538] sm:$0xff] }
 0x14d   :  { %v4782_v28 = vmax.f32 %v2472_v33, 0.0  ;;  %8590 = vmatprep.subr.mxu1 %v4783_v24  ;;  %9435 = vmatprep.mubr.msk.f32.mxu0 %vm554_vm1, %v192_v52  ;;  %v4781_v24 = vmax.f32 %v2467_v22, 0.0  ;;  %v2377_v52 = vadd.f32 %v11346_v54, %v11227_v37  ;;  %v4764_v54 = vmax.f32 %v2382_v19, 0.0 }
 0x14e   :  { %v11539_v43 = vpop.f32.mrf.mxu0  ;;  %8591 = vmatpush3.msra.mxu1 %v4767_v3  ;;  %v4779_v3 = vmax.f32 %v2457_v2, 0.0  ;;  %v2367_v47 = vadd.f32 %v11325_v60, %v11227_v37  ;;  %v4778_v19 = vmax.f32 %v2452_v27, 0.0  ;;  %v2362_v60 = vadd.f32 %v11227_v37, %v11337_v48 }
 0x14f   :  { %8592 = vmatprep.subr.mxu1 %v4782_v28  ;;  %v2372_v28 = vadd.f32 %v11227_v37, %v11357_v39  ;;  %v2442_v39 = vadd.f32 %v11227_v37, %v11491_v41  ;;  %v2437_v41 = vadd.f32 %v11474_v9, %v11227_v37  ;;  %v2432_v48 = vadd.f32 %v11227_v37, %v11481_v32  ;;  %v199_v9 = vld [vmem:[%s14413_s0 + $0x548] sm:$0xff] }
 0x150   :  { %v11547_v33 = vpop.f32.mrf.mxu0  ;;  %9436 = vmatmul.mubr.msk.f32.gmra.mxu0 %vm554_vm1, %v193_v55  ;;  %8593 = vmatpush3.msra.mxu1 %v4766_v7  ;;  %v4763_v55 = vmax.f32 %v2377_v52, 0.0  ;;  %v4777_v52 = vmax.f32 %v2447_v61, 0.0  ;;  %v4761_v27 = vmax.f32 %v2367_v47, 0.0  ;;  %v2427_v32 = vadd.f32 %v11462_v29, %v11227_v37  ;;  %v201_v29 = vld [vmem:[%s14413_s0 + $0x558] sm:$0xff] }
 0x151   :  { %8594 = vmatprep.subr.mxu1 %v4781_v24  ;;  %9438 = vmatprep.mubr.msk.f32.mxu0 %vm554_vm1, %v194_v20  ;;  %v4762_v20 = vmax.f32 %v2372_v28, 0.0  ;;  %v198_v24 = vld [vmem:[%s14413_s0 + $0x540] sm:$0xff]  ;;  %v4760_v28 = vmax.f32 %v2362_v60, 0.0  ;;  %v4775_v61 = vmax.f32 %v2437_v41, 0.0 }
 0x152   :  { %v11557_v22 = vpop.f32.mrf.mxu0  ;;  %8595 = vmatpush3.msra.mxu1 %v4765_v31  ;;  %v2357_v31 = vadd.f32 %v11305_v53, %v11227_v37  ;;  %v2352_v53 = vadd.f32 %v11227_v37, %v11316_v4  ;;  %v2422_v4 = vadd.f32 %v11227_v37, %v11469_v14  ;;  %v202_v60 = vld [vmem:[%s14413_s0 + $0x560] sm:$0xff]  ;;  %v2417_v14 = vadd.f32 %v11448_v58, %v11227_v37  ;;  %v203_v58 = vld [vmem:[%s14413_s0 + $0x568] sm:$0xff] }
 0x153   :  { %8596 = vmatprep.subr.mxu1 %v4780_v26 }
 0x154   :  { %v11565_v7 = vpop.f32.mrf.mxu0  ;;  %9439 = vmatmul.mubr.msk.f32.gmra.mxu0 %vm554_vm1, %v195_v36  ;;  %8597 = vmatpush3.msra.mxu1 %v4764_v54  ;;  %v4776_v36 = vmax.f32 %v2442_v39, 0.0  ;;  %v4759_v47 = vmax.f32 %v2357_v31, 0.0  ;;  %v4774_v39 = vmax.f32 %v2432_v48, 0.0  ;;  %v4772_v31 = vmax.f32 %v2422_v4, 0.0 }
 0x155   :  { %8598 = vmatprep.subr.mxu1 %v4779_v3  ;;  %9441 = vmatprep.mubr.msk.f32.mxu0 %vm554_vm1, %v196_v8  ;;  %v200_v8 = vld [vmem:[%s14413_s0 + $0x550] sm:$0xff]  ;;  %v2347_v3 = vadd.f32 %v11285_v17, %v11227_v37  ;;  %v2342_v17 = vadd.f32 %v11227_v37, %v11296_v40  ;;  %v2412_v40 = vadd.f32 %v11227_v37, %v11456_v11 }
 0x156   :  { %v11576_v2 = vpop.f32.mrf.mxu0  ;;  %8599 = vmatpush3.msra.mxu1 %v4763_v55  ;;  %v2407_v11 = vadd.f32 %v11428_v51, %v11227_v37  ;;  %v205_v51 = vld [vmem:[%s14413_s0 + $0x578] sm:$0xff] }
 0x157   :  { %8600 = vmatprep.subr.mxu1 %v4778_v19  ;;  %v4758_v19 = vmax.f32 %v2352_v53, 0.0  ;;  %v4757_v41 = vmax.f32 %v2347_v3, 0.0  ;;  %v5238_v53 = vadd.s32 256, %v11154_v45  ;;  %v11655_v3 = vpop.f32.mrf.mxu1 }
 0x158   :  { %v11585_v26 = vpop.f32.mrf.mxu0  ;;  %9442 = vmatmul.mubr.msk.f32.gmra.mxu0 %vm554_vm1, %v197_v46  ;;  %8601 = vmatpush3.msra.mxu1 %v4762_v20  ;;  %v4773_v20 = vmax.f32 %v2427_v32, 0.0  ;;  %v2402_v32 = vadd.f32 %v11227_v37, %v11440_v57  ;;  %14438 = vst [vmem:[#allocation19_spill] sm:$0xff] %v11655_v3  ;;  %v206_v57 = vld [vmem:[%s14413_s0 + $0x580] sm:$0xff] }
 0x159   :  { %8602 = vmatprep.subr.mxu1 %v4777_v52  ;;  %9444 = vmatprep.mubr.msk.f32.mxu0 %vm554_vm1, %v198_v24  ;;  %v2337_v24 = vadd.f32 %v11266_v5, %v11227_v37  ;;  %v2332_v5 = vadd.f32 %v11227_v37, %v11276_v10  ;;  %vm5272_vm2 = vcmp.ge.s32.totalorder %v5238_v53, %v11183_v62 }
 0x15a   :  { %v11596_v54 = vpop.f32.mrf.mxu0  ;;  %8603 = vmatpush3.msra.mxu1 %v4761_v27  ;;  %v4756_v27 = vmax.f32 %v2342_v17, 0.0  ;;  %vm5340_vm3 = vcmp.lt.s32.totalorder %v5238_v53, %v11185_v1  ;;  %vm5304_vm8 = vcmp.ge.s32.totalorder %v5238_v53, %v11369_v18  ;;  %vm5372_vm9 = vcmp.lt.s32.totalorder %v5238_v53, %v11371_v38 }
 0x15b   :  { %8604 = vmatprep.subr.mxu1 %v4776_v36  ;;  %v204_v36 = vld [vmem:[%s14413_s0 + $0x570] sm:$0xff]  ;;  %vm5404_vm6 = vmand %vm5272_vm2, %vm5340_vm3 }
 0x15c   :  { %v11605_v55 = vpop.f32.mrf.mxu0  ;;  %9445 = vmatmul.mubr.msk.f32.gmra.mxu0 %vm554_vm1, %v199_v9  ;;  %8605 = vmatpush3.msra.mxu1 %v4760_v28  ;;  %v4771_v9 = vmax.f32 %v2417_v14, 0.0  ;;  %v2327_v28 = vadd.f32 %v11248_v23, %v11227_v37  ;;  %v2322_v23 = vadd.f32 %v11227_v37, %v11258_v50  ;;  %v11674_v50 = vadd.s32 640, %v11154_v45  ;;  %v11680_v14 = vpop.f32.mrf.mxu1  ;;  %vm5436_vm12 = vmand %vm5304_vm8, %vm5372_vm9 }
 0x15d   :  { %8606 = vmatprep.subr.mxu1 %v4775_v61  ;;  %9447 = vmatprep.mubr.msk.f32.mxu0 %vm554_vm1, %v200_v8  ;;  %v4755_v8 = vmax.f32 %v2337_v24, 0.0  ;;  %v4770_v61 = vmax.f32 %v2412_v40, 0.0  ;;  %14439 = vst [vmem:[#allocation20_spill] sm:$0xff] %v11680_v14 }
 0x15e   :  { %v11616_v46 = vpop.f32.mrf.mxu0  ;;  %8607 = vmatpush3.msra.mxu1 %v4759_v47  ;;  %v4754_v47 = vmax.f32 %v2332_v5, 0.0  ;;  %v11691_v40 = vpop.f32.mrf.mxu1  ;;  %vm5275_vm10 = vcmp.ge.s32.totalorder %v11674_v50, %v11183_v62  ;;  %vm5343_vm11 = vcmp.lt.s32.totalorder %v11674_v50, %v11185_v1  ;;  %vm5307_vm0 = vcmp.ge.s32.totalorder %v11674_v50, %v11369_v18 }
 0x15f   :  { %8608 = vmatprep.subr.mxu1 %v4774_v39  ;;  %v4769_v39 = vmax.f32 %v2407_v11, 0.0  ;;  %14440 = vst [vmem:[#allocation21_spill] sm:$0xff] %v11691_v40  ;;  %vm5407_vm13 = vmand %vm5275_vm10, %vm5343_vm11  ;;  %vm5375_vm2 = vcmp.lt.s32.totalorder %v11674_v50, %v11371_v38  ;;  %v241_v50 = vld [vmem:[%s14413_s0 + $0x698] sm:$0xff] }
 0x160   :  { %v11625_v52 = vpop.f32.mrf.mxu0  ;;  %9448 = vmatmul.mubr.msk.f32.gmra.mxu0 %vm554_vm1, %v201_v29  ;;  %8609 = vmatpush3.msra.mxu1 %v4758_v19  ;;  %v4753_v29 = vmax.f32 %v2327_v28, 0.0  ;;  %v4768_v19 = vmax.f32 %v2402_v32, 0.0  ;;  %v212_v28 = vld [vmem:[%s14413_s0 + $0x5b0] sm:$0xff]  ;;  %v213_v32 = vld [vmem:[%s14413_s0 + $0x5b8] sm:$0xff]  ;;  %vm5439_vm4 = vmand %vm5307_vm0, %vm5375_vm2 }
 0x161   :  { %8610 = vmatprep.subr.mxu1 %v4773_v20  ;;  %9450 = vmatprep.mubr.msk.f32.mxu0 %vm554_vm1, %v202_v60  ;;  %v207_v60 = vld [vmem:[%s14413_s0 + $0x588] sm:$0xff]  ;;  %v4752_v20 = vmax.f32 %v2322_v23, 0.0 }
 0x162   :  { %v11636_v48 = vpop.f32.mrf.mxu0  ;;  %8611 = vmatpush3.msra.mxu1 %v4757_v41  ;;  %v208_v41 = vld [vmem:[%s14413_s0 + $0x590] sm:$0xff] }
 0x163   :  { %8612 = vmatprep.subr.mxu1 %v4772_v31 }
 0x164   :  { %v11646_v10 = vpop.f32.mrf.mxu0  ;;  %9451 = vmatmul.mubr.msk.f32.gmra.mxu0 %vm554_vm1, %v203_v58  ;;  %8613 = vmatpush3.msra.mxu1 %v4756_v27  ;;  %v14441_v58 = vmov 0.00390625   ;;  %v210_v27 = vld [vmem:[%s14413_s0 + $0x5a0] sm:$0xff] }
 0x165   :  { %8614 = vmatprep.subr.mxu1 %v4771_v9  ;;  %9453 = vmatprep.mubr.msk.f32.mxu0 %vm554_vm1, %v204_v36  ;;  %v11716_v36 = vpop.f32.mrf.mxu1  ;;  %v211_v9 = vld [vmem:[%s14413_s0 + $0x5a8] sm:$0xff] }
 0x166   :  { %v11659_v4 = vpop.f32.mrf.mxu0  ;;  %8615 = vmatpush3.msra.mxu1 %v4755_v8  ;;  %14442 = vst [vmem:[#allocation22_spill] sm:$0xff] %v11716_v36 }
 0x167   :  { %8616 = vmatprep.subr.mxu1 %v4770_v61 }
 0x168   :  { %v11666_v17 = vpop.f32.mrf.mxu0  ;;  %9454 = vmatmul.mubr.msk.f32.gmra.mxu0 %vm554_vm1, %v205_v51  ;;  %8617 = vmatpush3.msra.mxu1 %v4754_v47  ;;  %v214_v51 = vld [vmem:[%s14413_s0 + $0x5c0] sm:$0xff]  ;;  %v215_v47 = vld [vmem:[%s14413_s0 + $0x5c8] sm:$0xff] }
 0x169   :  { %8618 = vmatprep.subr.mxu1 %v4769_v39  ;;  %9456 = vmatprep.mubr.msk.f32.mxu0 %vm554_vm1, %v206_v57  ;;  %v216_v39 = vld [vmem:[%s14413_s0 + $0x5d0] sm:$0xff] }
 0x16a   :  { %v11682_v24 = vpop.f32.mrf.mxu0  ;;  %8619 = vmatpush3.msra.mxu1 %v4753_v29 }
 0x16b   :  { %8620 = vmatprep.subr.mxu1 %v4768_v19  ;;  %v217_v19 = vld [vmem:[%s14413_s0 + $0x5d8] sm:$0xff] }
 0x16c   :  { %v11698_v31 = vpop.f32.mrf.mxu0  ;;  %9457 = vmatmul.mubr.msk.f32.gmra.mxu0 %vm554_vm1, %v207_v60  ;;  %8621 = vmatpush3.msra.mxu1 %v4752_v20  ;;  %v218_v20 = vld [vmem:[%s14413_s0 + $0x5e0] sm:$0xff] }
 0x16d   :  { %9459 = vmatprep.mubr.msk.f32.mxu0 %vm554_vm1, %v208_v41  ;;  %7961 = vmatmul.mubr.msk.f32.vlgmr.msra.gmra.mxu1 %vm5404_vm6, %v14441_v58 }
 0x16e   :  { %v11710_v5 = vpop.f32.mrf.mxu0  ;;  %7962 = vmatprep.mubr.msk.f32.mxu1 %vm5437_vm7, %v14441_v58 }
 0x170   :  { %v11718_v11 = vpop.f32.mrf.mxu0  ;;  %9460 = vmatmul.mubr.msk.f32.gmra.mxu0 %vm554_vm1, %v209_v12  ;;  %v219_v12 = vld [vmem:[%s14413_s0 + $0x5e8] sm:$0xff] }
 0x171   :  { %9462 = vmatprep.mubr.msk.f32.mxu0 %vm554_vm1, %v210_v27  ;;  %7963 = vmatmul.mubr.msk.f32.gmra.mxu1 %vm5436_vm12, %v14441_v58 }
 0x172   :  { %v11726_v53 = vpop.f32.mrf.mxu0  ;;  %7964 = vmatprep.mubr.msk.f32.mxu1 %vm5407_vm13, %v14441_v58 }
 0x174   :  { %v11732_v8 = vpop.f32.mrf.mxu0  ;;  %9463 = vmatmul.mubr.msk.f32.gmra.mxu0 %vm554_vm1, %v211_v9  ;;  %v220_v9 = vld [vmem:[%s14413_s0 + $0x5f0] sm:$0xff] }
 0x175   :  { %9465 = vmatprep.mubr.msk.f32.mxu0 %vm554_vm1, %v212_v28 }
 0x176   :  { %v11739_v61 = vpop.f32.mrf.mxu0 }
 0x178   :  { %v11744_v23 = vpop.f32.mrf.mxu0  ;;  %9466 = vmatmul.mubr.msk.f32.gmra.mxu0 %vm554_vm1, %v213_v32  ;;  %v221_v32 = vld [vmem:[%s14413_s0 + $0x5f8] sm:$0xff] }
 0x179   :  { %9468 = vmatprep.mubr.msk.f32.mxu0 %vm554_vm1, %v214_v51 }
 0x17a   :  { %v11751_v57 = vpop.f32.mrf.mxu0 }
 0x17c   :  { %v9326_v29 = vpop.f32.mrf.mxu0  ;;  %9469 = vmatmul.mubr.msk.f32.gmra.mxu0 %vm554_vm1, %v215_v47  ;;  %v222_v47 = vld [vmem:[%s14413_s0 + $0x600] sm:$0xff] }
 0x17d   :  { %9471 = vmatprep.mubr.msk.f32.mxu0 %vm554_vm1, %v216_v39  ;;  %v2557_v39 = vadd.f32 %v11666_v17, %v11227_v37 }
 0x17e   :  { %v11761_v60 = vpop.f32.mrf.mxu0 }
 0x180   :  { %v9329_v41 = vpop.f32.mrf.mxu0  ;;  %9472 = vmatmul.mubr.msk.f32.gmra.mxu0 %vm554_vm1, %v217_v19 }
 0x181   :  { %9474 = vmatprep.mubr.msk.f32.mxu0 %vm554_vm1, %v218_v20 }
 0x182   :  { %v2611_v27 = vpop.f32.mrf.mxu0 }
 0x184   :  { %v9332_v28 = vpop.f32.mrf.mxu0  ;;  %9475 = vmatmul.mubr.msk.f32.gmra.mxu0 %vm554_vm1, %v219_v12  ;;  %v223_v12 = vld [vmem:[%s14413_s0 + $0x608] sm:$0xff] }
 0x185   :  { %9477 = vmatprep.mubr.msk.f32.mxu0 %vm554_vm1, %v220_v9  ;;  %v2552_v9 = vadd.f32 %v11227_v37, %v11682_v24  ;;  %v2627_v17 = vadd.f32 %v9332_v28, %v11227_v37  ;;  %v225_v28 = vld [vmem:[%s14413_s0 + $0x618] sm:$0xff] }
 0x186   :  { %v2621_v51 = vpop.f32.mrf.mxu0 }
 0x187   :  { %v2622_v24 = vadd.f32 %v11227_v37, %v2621_v51  ;;  %v2617_v51 = vadd.f32 %v9329_v41, %v11227_v37  ;;  %v227_v41 = vld [vmem:[%s14413_s0 + $0x628] sm:$0xff] }
 0x188   :  { %v9335_v19 = vpop.f32.mrf.mxu0  ;;  %9478 = vmatmul.mubr.msk.f32.gmra.mxu0 %vm554_vm1, %v221_v32 }
 0x189   :  { %v2637_v20 = vadd.f32 %v9335_v19, %v11227_v37  ;;  %9480 = vmatprep.mubr.msk.f32.mxu0 %vm554_vm1, %v222_v47  ;;  %v2547_v47 = vadd.f32 %v11646_v10, %v11227_v37  ;;  %v4799_v19 = vmax.f32 %v2557_v39, 0.0  ;;  %v226_v39 = vld [vmem:[%s14413_s0 + $0x620] sm:$0xff] }
 0x18a   :  { %v2631_v15 = vpop.f32.mrf.mxu0 }
 0x18b   :  { %v4815_v25 = vmax.f32 %v2637_v20, 0.0  ;;  %v2632_v32 = vadd.f32 %v11227_v37, %v2631_v15  ;;  %v2542_v15 = vadd.f32 %v11227_v37, %v11659_v4  ;;  %v4798_v20 = vmax.f32 %v2552_v9, 0.0 }
 0x18c   :  { %v11799_v42 = vpop.f32.mrf.mxu0  ;;  %9481 = vmatmul.mubr.msk.f32.gmra.mxu0 %vm554_vm1, %v223_v12  ;;  %v4797_v12 = vmax.f32 %v2547_v47, 0.0  ;;  %v2612_v4 = vadd.f32 %v11227_v37, %v2611_v27  ;;  %v4812_v9 = vmax.f32 %v2622_v24, 0.0  ;;  %v228_v47 = vld [vmem:[%s14413_s0 + $0x630] sm:$0xff]  ;;  %v2607_v27 = vadd.f32 %v9326_v29, %v11227_v37  ;;  %v229_v29 = vld [vmem:[%s14413_s0 + $0x638] sm:$0xff] }
 0x18d   :  { %v4814_v14 = vmax.f32 %v2632_v32, 0.0  ;;  %8628 = vmatprep.subr.mxu1 %v4815_v25  ;;  %9483 = vmatprep.mubr.msk.f32.mxu0 %vm554_vm1, %v224_v21  ;;  %v4813_v25 = vmax.f32 %v2627_v17, 0.0  ;;  %v2537_v21 = vadd.f32 %v11625_v52, %v11227_v37  ;;  %v4796_v52 = vmax.f32 %v2542_v15, 0.0 }
 0x18e   :  { %v11809_v10 = vpop.f32.mrf.mxu0  ;;  %8629 = vmatpush3.msra.mxu1 %v4799_v19  ;;  %v4811_v19 = vmax.f32 %v2617_v51, 0.0  ;;  %v2527_v24 = vadd.f32 %v11605_v55, %v11227_v37  ;;  %v4810_v15 = vmax.f32 %v2612_v4, 0.0  ;;  %v2522_v55 = vadd.f32 %v11227_v37, %v11616_v46 }
 0x18f   :  { %8630 = vmatprep.subr.mxu1 %v4814_v14  ;;  %v2532_v14 = vadd.f32 %v11227_v37, %v11636_v48  ;;  %v2602_v48 = vadd.f32 %v11227_v37, %v11761_v60  ;;  %v2597_v60 = vadd.f32 %v11744_v23, %v11227_v37  ;;  %v2592_v46 = vadd.f32 %v11227_v37, %v11751_v57  ;;  %v231_v23 = vld [vmem:[%s14413_s0 + $0x648] sm:$0xff]  ;;  %v11874_v57 = vld [vmem:[%s14415_s2] ss:$0 sm:$0xff] }
 0x190   :  { %v11817_v32 = vpop.f32.mrf.mxu0  ;;  %9484 = vmatmul.mubr.msk.f32.gmra.mxu0 %vm554_vm1, %v225_v28  ;;  %8631 = vmatpush3.msra.mxu1 %v4798_v20  ;;  %v4795_v28 = vmax.f32 %v2537_v21, 0.0  ;;  %v4809_v21 = vmax.f32 %v2607_v27, 0.0  ;;  %v4793_v4 = vmax.f32 %v2527_v24, 0.0  ;;  %v2587_v27 = vadd.f32 %v11874_v57, %v11732_v8  ;;  %v233_v8 = vld [vmem:[%s14413_s0 + $0x658] sm:$0xff] }
 0x191   :  { %8632 = vmatprep.subr.mxu1 %v4813_v25  ;;  %9486 = vmatprep.mubr.msk.f32.mxu0 %vm554_vm1, %v226_v39  ;;  %v4794_v39 = vmax.f32 %v2532_v14, 0.0  ;;  %v230_v25 = vld [vmem:[%s14413_s0 + $0x640] sm:$0xff]  ;;  %v4792_v14 = vmax.f32 %v2522_v55, 0.0 }
 0x192   :  { %v11827_v17 = vpop.f32.mrf.mxu0  ;;  %8633 = vmatpush3.msra.mxu1 %v4797_v12  ;;  %v2517_v12 = vadd.f32 %v11585_v26, %v11227_v37  ;;  %v2512_v26 = vadd.f32 %v11227_v37, %v11596_v54  ;;  %v2507_v37 = vadd.f32 %v11874_v57, %v11565_v7  ;;  %v2502_v7 = vadd.f32 %v11874_v57, %v11576_v2  ;;  %v234_v55 = vld [vmem:[%s14413_s0 + $0x660] sm:$0xff] }
 0x193   :  { %8634 = vmatprep.subr.mxu1 %v4812_v9  ;;  %v2572_v2 = vadd.f32 %v11874_v57, %v11726_v53  ;;  %v2567_v53 = vadd.f32 %v11874_v57, %v11698_v31  ;;  %v237_v31 = vld [vmem:[%s14413_s0 + $0x678] sm:$0xff] }
 0x194   :  { %v11835_v20 = vpop.f32.mrf.mxu0  ;;  %9487 = vmatmul.mubr.msk.f32.gmra.mxu0 %vm554_vm1, %v227_v41  ;;  %8635 = vmatpush3.msra.mxu1 %v4796_v52  ;;  %v4808_v41 = vmax.f32 %v2602_v48, 0.0  ;;  %v4791_v54 = vmax.f32 %v2517_v12, 0.0  ;;  %v4806_v48 = vmax.f32 %v2592_v46, 0.0 }
 0x195   :  { %8636 = vmatprep.subr.mxu1 %v4811_v19  ;;  %9489 = vmatprep.mubr.msk.f32.mxu0 %vm554_vm1, %v228_v47  ;;  %v232_v47 = vld [vmem:[%s14413_s0 + $0x650] sm:$0xff]  ;;  %v4807_v19 = vmax.f32 %v2597_v60, 0.0  ;;  %v4789_v60 = vmax.f32 %v2507_v37, 0.0  ;;  %v11930_v37 = vpop.f32.mrf.mxu1 }
 0x196   :  { %v11846_v51 = vpop.f32.mrf.mxu0  ;;  %8637 = vmatpush3.msra.mxu1 %v4795_v28  ;;  %v2582_v28 = vadd.f32 %v11874_v57, %v11739_v61  ;;  %v2577_v61 = vadd.f32 %v11874_v57, %v11718_v11  ;;  %v235_v11 = vld [vmem:[%s14413_s0 + $0x668] sm:$0xff]  ;;  %14443 = vst [vmem:[#allocation23_spill] sm:$0xff] %v11930_v37 }
 0x197   :  { %8638 = vmatprep.subr.mxu1 %v4810_v15  ;;  %v4790_v15 = vmax.f32 %v2512_v26, 0.0  ;;  %v5240_v26 = vadd.s32 512, %v11154_v45 }
 0x198   :  { %v11855_v9 = vpop.f32.mrf.mxu0  ;;  %9490 = vmatmul.mubr.msk.f32.gmra.mxu0 %vm554_vm1, %v229_v29  ;;  %8639 = vmatpush3.msra.mxu1 %v4794_v39  ;;  %v4805_v39 = vmax.f32 %v2587_v27, 0.0  ;;  %v4804_v12 = vmax.f32 %v2582_v28, 0.0  ;;  %v2562_v27 = vadd.f32 %v11874_v57, %v11710_v5  ;;  %v238_v5 = vld [vmem:[%s14413_s0 + $0x680] sm:$0xff] }
 0x199   :  { %8640 = vmatprep.subr.mxu1 %v4809_v21  ;;  %9492 = vmatprep.mubr.msk.f32.mxu0 %vm554_vm1, %v230_v25  ;;  %v2497_v25 = vadd.f32 %v11874_v57, %v11547_v33  ;;  %v2492_v33 = vadd.f32 %v11874_v57, %v11557_v22  ;;  %vm5274_vm14 = vcmp.ge.s32.totalorder %v5240_v26, %v11183_v62 }
 0x19a   :  { %v11866_v52 = vpop.f32.mrf.mxu0  ;;  %8641 = vmatpush3.msra.mxu1 %v4793_v4  ;;  %v4788_v4 = vmax.f32 %v2502_v7, 0.0  ;;  %vm5342_vm15 = vcmp.lt.s32.totalorder %v5240_v26, %v11185_v1  ;;  %vm5306_vm5 = vcmp.ge.s32.totalorder %v5240_v26, %v11369_v18  ;;  %vm5374_vm6 = vcmp.lt.s32.totalorder %v5240_v26, %v11371_v38  ;;  %v244_v26 = vld [vmem:[%s14413_s0 + $0x6b0] sm:$0xff] }
 0x19b   :  { %8642 = vmatprep.subr.mxu1 %v4808_v41  ;;  %v236_v41 = vld [vmem:[%s14413_s0 + $0x670] sm:$0xff]  ;;  %vm5406_vm3 = vmand %vm5274_vm14, %vm5342_vm15 }
 0x19c   :  { %v11880_v24 = vpop.f32.mrf.mxu0  ;;  %9493 = vmatmul.mubr.msk.f32.gmra.mxu0 %vm554_vm1, %v231_v23  ;;  %8643 = vmatpush3.msra.mxu1 %v4792_v14  ;;  %v4803_v23 = vmax.f32 %v2577_v61, 0.0  ;;  %v2487_v14 = vadd.f32 %v11874_v57, %v11529_v0  ;;  %v2482_v0 = vadd.f32 %v11874_v57, %v11539_v43  ;;  %v11949_v43 = vadd.s32 896, %v11154_v45  ;;  %v11955_v61 = vpop.f32.mrf.mxu1  ;;  %vm5438_vm9 = vmand %vm5306_vm5, %vm5374_vm6 }
 0x19d   :  { %8644 = vmatprep.subr.mxu1 %v4807_v19  ;;  %9495 = vmatprep.mubr.msk.f32.mxu0 %vm554_vm1, %v232_v47  ;;  %v4787_v47 = vmax.f32 %v2497_v25, 0.0  ;;  %v4802_v19 = vmax.f32 %v2572_v2, 0.0  ;;  %14444 = vst [vmem:[#allocation24_spill] sm:$0xff] %v11955_v61 }
 0x19e   :  { %v11891_v29 = vpop.f32.mrf.mxu0  ;;  %8645 = vmatpush3.msra.mxu1 %v4791_v54  ;;  %v4786_v54 = vmax.f32 %v2492_v33, 0.0  ;;  %v11966_v2 = vpop.f32.mrf.mxu1  ;;  %vm5277_vm7 = vcmp.ge.s32.totalorder %v11949_v43, %v11183_v62  ;;  %vm5345_vm8 = vcmp.lt.s32.totalorder %v11949_v43, %v11185_v1  ;;  %v242_v33 = vld [vmem:[%s14413_s0 + $0x6a0] sm:$0xff]  ;;  %vm5309_vm13 = vcmp.ge.s32.totalorder %v11949_v43, %v11369_v18 }
 0x19f   :  { %8646 = vmatprep.subr.mxu1 %v4806_v48  ;;  %v4801_v48 = vmax.f32 %v2567_v53, 0.0  ;;  %vm5409_vm10 = vmand %vm5277_vm7, %vm5345_vm8  ;;  %v243_v53 = vld [vmem:[%s14413_s0 + $0x6a8] sm:$0xff]  ;;  %vm5377_vm14 = vcmp.lt.s32.totalorder %v11949_v43, %v11371_v38 }
 0x1a0   :  { %v11900_v21 = vpop.f32.mrf.mxu0  ;;  %9496 = vmatmul.mubr.msk.f32.gmra.mxu0 %vm554_vm1, %v233_v8  ;;  %8647 = vmatpush3.msra.mxu1 %v4790_v15  ;;  %v4785_v8 = vmax.f32 %v2487_v14, 0.0  ;;  %v4800_v15 = vmax.f32 %v2562_v27, 0.0  ;;  %vm5441_vm0 = vmand %vm5309_vm13, %vm5377_vm14 }
 0x1a1   :  { %8648 = vmatprep.subr.mxu1 %v4805_v39  ;;  %9498 = vmatprep.mubr.msk.f32.mxu0 %vm554_vm1, %v234_v55  ;;  %v239_v55 = vld [vmem:[%s14413_s0 + $0x688] sm:$0xff]  ;;  %v4784_v39 = vmax.f32 %v2482_v0, 0.0 }
 0x1a2   :  { %v11911_v46 = vpop.f32.mrf.mxu0  ;;  %8649 = vmatpush3.msra.mxu1 %v4789_v60  ;;  %v240_v60 = vld [vmem:[%s14413_s0 + $0x690] sm:$0xff]  ;;  %v247_v0 = vld [vmem:[%s14413_s0 + $0x6c8] sm:$0xff] }
 0x1a3   :  { %8650 = vmatprep.subr.mxu1 %v4804_v12 }
 0x1a4   :  { %v11921_v22 = vpop.f32.mrf.mxu0  ;;  %9499 = vmatmul.mubr.msk.f32.gmra.mxu0 %vm554_vm1, %v235_v11  ;;  %8651 = vmatpush3.msra.mxu1 %v4788_v4  ;;  %v11991_v4 = vpop.f32.mrf.mxu1 }
 0x1a5   :  { %8652 = vmatprep.subr.mxu1 %v4803_v23  ;;  %9501 = vmatprep.mubr.msk.f32.mxu0 %vm554_vm1, %v236_v41  ;;  %14445 = vst [vmem:[#allocation25_spill] sm:$0xff] %v11991_v4 }
 0x1a6   :  { %v11934_v28 = vpop.f32.mrf.mxu0  ;;  %8653 = vmatpush3.msra.mxu1 %v4787_v47  ;;  %v245_v47 = vld [vmem:[%s14413_s0 + $0x6b8] sm:$0xff] }
 0x1a7   :  { %8654 = vmatprep.subr.mxu1 %v4802_v19  ;;  %v246_v19 = vld [vmem:[%s14413_s0 + $0x6c0] sm:$0xff] }
 0x1a8   :  { %v11941_v7 = vpop.f32.mrf.mxu0  ;;  %9502 = vmatmul.mubr.msk.f32.gmra.mxu0 %vm554_vm1, %v237_v31  ;;  %8655 = vmatpush3.msra.mxu1 %v4786_v54 }
 0x1a9   :  { %8656 = vmatprep.subr.mxu1 %v4801_v48  ;;  %9504 = vmatprep.mubr.msk.f32.mxu0 %vm554_vm1, %v238_v5  ;;  %v248_v5 = vld [vmem:[%s14413_s0 + $0x6d0] sm:$0xff] }
 0x1aa   :  { %v11957_v25 = vpop.f32.mrf.mxu0  ;;  %8657 = vmatpush3.msra.mxu1 %v4785_v8  ;;  %v249_v8 = vld [vmem:[%s14413_s0 + $0x6d8] sm:$0xff] }
 0x1ab   :  { %8658 = vmatprep.subr.mxu1 %v4800_v15 }
 0x1ac   :  { %v11973_v12 = vpop.f32.mrf.mxu0  ;;  %9505 = vmatmul.mubr.msk.f32.gmra.mxu0 %vm554_vm1, %v239_v55  ;;  %8659 = vmatpush3.msra.mxu1 %v4784_v39  ;;  %v250_v55 = vld [vmem:[%s14413_s0 + $0x6e0] sm:$0xff] }
 0x1ad   :  { %9507 = vmatprep.mubr.msk.f32.mxu0 %vm554_vm1, %v240_v60  ;;  %7965 = vmatmul.mubr.msk.f32.vlgmr.msra.gmra.mxu1 %vm5406_vm3, %v14441_v58  ;;  %v251_v60 = vld [vmem:[%s14413_s0 + $0x6e8] sm:$0xff] }
 0x1ae   :  { %v11985_v11 = vpop.f32.mrf.mxu0  ;;  %7966 = vmatprep.mubr.msk.f32.mxu1 %vm5439_vm4, %v14441_v58 }
 0x1b0   :  { %v11993_v41 = vpop.f32.mrf.mxu0  ;;  %9508 = vmatmul.mubr.msk.f32.gmra.mxu0 %vm554_vm1, %v241_v50 }
 0x1b1   :  { %9510 = vmatprep.mubr.msk.f32.mxu0 %vm554_vm1, %v242_v33  ;;  %7967 = vmatmul.mubr.msk.f32.gmra.mxu1 %vm5438_vm9, %v14441_v58  ;;  %v252_v33 = vld [vmem:[%s14413_s0 + $0x6f0] sm:$0xff] }
 0x1b2   :  { %v12001_v23 = vpop.f32.mrf.mxu0  ;;  %7968 = vmatprep.mubr.msk.f32.mxu1 %vm5409_vm10, %v14441_v58 }
 0x1b4   :  { %v12007_v14 = vpop.f32.mrf.mxu0  ;;  %9511 = vmatmul.mubr.msk.f32.gmra.mxu0 %vm554_vm1, %v243_v53 }
 0x1b5   :  { %9513 = vmatprep.mubr.msk.f32.mxu0 %vm554_vm1, %v244_v26  ;;  %v253_v26 = vld [vmem:[%s14413_s0 + $0x6f8] sm:$0xff] }
 0x1b6   :  { %v12014_v27 = vpop.f32.mrf.mxu0 }
 0x1b8   :  { %v12019_v31 = vpop.f32.mrf.mxu0  ;;  %9514 = vmatmul.mubr.msk.f32.gmra.mxu0 %vm554_vm1, %v245_v47 }
 0x1b9   :  { %9516 = vmatprep.mubr.msk.f32.mxu0 %vm554_vm1, %v246_v19  ;;  %v254_v19 = vld [vmem:[%s14413_s0 + $0x700] sm:$0xff] }
 0x1ba   :  { %v12026_v54 = vpop.f32.mrf.mxu0 }
 0x1bc   :  { %v9374_v48 = vpop.f32.mrf.mxu0  ;;  %9517 = vmatmul.mubr.msk.f32.gmra.mxu0 %vm554_vm1, %v247_v0  ;;  %v2717_v0 = vadd.f32 %v11874_v57, %v11941_v7 }
 0x1bd   :  { %9519 = vmatprep.mubr.msk.f32.mxu0 %vm554_vm1, %v248_v5 }
 0x1be   :  { %v12036_v15 = vpop.f32.mrf.mxu0 }
 0x1c0   :  { %v9377_v39 = vpop.f32.mrf.mxu0  ;;  %9520 = vmatmul.mubr.msk.f32.gmra.mxu0 %vm554_vm1, %v249_v8 }
 0x1c1   :  { %9522 = vmatprep.mubr.msk.f32.mxu0 %vm554_vm1, %v250_v55  ;;  %v255_v55 = vld [vmem:[%s14413_s0 + $0x708] sm:$0xff] }
 0x1c2   :  { %v2771_v50 = vpop.f32.mrf.mxu0 }
 0x1c4   :  { %v9380_v53 = vpop.f32.mrf.mxu0  ;;  %9523 = vmatmul.mubr.msk.f32.gmra.mxu0 %vm554_vm1, %v251_v60  ;;  %v2712_v60 = vadd.f32 %v11874_v57, %v11957_v25 }
 0x1c5   :  { %9525 = vmatprep.mubr.msk.f32.mxu0 %vm554_vm1, %v252_v33  ;;  %v2787_v7 = vadd.f32 %v11874_v57, %v9380_v53  ;;  %v257_v53 = vld [vmem:[%s14413_s0 + $0x718] sm:$0xff] }
 0x1c6   :  { %v2781_v47 = vpop.f32.mrf.mxu0 }
 0x1c7   :  { %v2782_v25 = vadd.f32 %v11874_v57, %v2781_v47  ;;  %v2777_v47 = vadd.f32 %v11874_v57, %v9377_v39  ;;  %v259_v39 = vld [vmem:[%s14413_s0 + $0x728] sm:$0xff] }
 0x1c8   :  { %v9383_v5 = vpop.f32.mrf.mxu0  ;;  %9526 = vmatmul.mubr.msk.f32.gmra.mxu0 %vm554_vm1, %v253_v26 }
 0x1c9   :  { %v2797_v8 = vadd.f32 %v11874_v57, %v9383_v5  ;;  %9528 = vmatprep.mubr.msk.f32.mxu0 %vm554_vm1, %v254_v19  ;;  %v2707_v19 = vadd.f32 %v11874_v57, %v11921_v22  ;;  %v4831_v5 = vmax.f32 %v2717_v0, 0.0  ;;  %v258_v0 = vld [vmem:[%s14413_s0 + $0x720] sm:$0xff] }
 0x1ca   :  { %v2791_v33 = vpop.f32.mrf.mxu0 }
 0x1cb   :  { %v4847_v3 = vmax.f32 %v2797_v8, 0.0  ;;  %v2792_v26 = vadd.f32 %v11874_v57, %v2791_v33  ;;  %v2702_v8 = vadd.f32 %v11874_v57, %v11934_v28  ;;  %v4830_v33 = vmax.f32 %v2712_v60, 0.0 }
 0x1cc   :  { %v12074_v56 = vpop.f32.mrf.mxu0  ;;  %9529 = vmatmul.mubr.msk.f32.gmra.mxu0 %vm554_vm1, %v255_v55  ;;  %v4829_v55 = vmax.f32 %v2707_v19, 0.0  ;;  %v2772_v28 = vadd.f32 %v11874_v57, %v2771_v50  ;;  %v4844_v60 = vmax.f32 %v2782_v25, 0.0  ;;  %v260_v19 = vld [vmem:[%s14413_s0 + $0x730] sm:$0xff]  ;;  %v2767_v50 = vadd.f32 %v11874_v57, %v9374_v48  ;;  %v261_v48 = vld [vmem:[%s14413_s0 + $0x738] sm:$0xff] }
 0x1cd   :  { %v4846_v36 = vmax.f32 %v2792_v26, 0.0  ;;  %8666 = vmatprep.subr.mxu1 %v4847_v3  ;;  %9531 = vmatprep.mubr.msk.f32.mxu0 %vm554_vm1, %v256_v35  ;;  %v4845_v3 = vmax.f32 %v2787_v7, 0.0  ;;  %v2697_v35 = vadd.f32 %v11874_v57, %v11900_v21  ;;  %v4828_v21 = vmax.f32 %v2702_v8, 0.0 }
 0x1ce   :  { %v12084_v22 = vpop.f32.mrf.mxu0  ;;  %8667 = vmatpush3.msra.mxu1 %v4831_v5  ;;  %v4843_v5 = vmax.f32 %v2777_v47, 0.0  ;;  %v2687_v25 = vadd.f32 %v11874_v57, %v11880_v24  ;;  %v4842_v8 = vmax.f32 %v2772_v28, 0.0  ;;  %v2682_v24 = vadd.f32 %v11874_v57, %v11891_v29 }
 0x1cf   :  { %8668 = vmatprep.subr.mxu1 %v4846_v36  ;;  %v2692_v36 = vadd.f32 %v11874_v57, %v11911_v46  ;;  %v2762_v46 = vadd.f32 %v11874_v57, %v12036_v15  ;;  %v2757_v15 = vadd.f32 %v11874_v57, %v12019_v31  ;;  %v2752_v29 = vadd.f32 %v11874_v57, %v12026_v54  ;;  %v263_v31 = vld [vmem:[%s14413_s0 + $0x748] sm:$0xff] }
 0x1d0   :  { %v12092_v26 = vpop.f32.mrf.mxu0  ;;  %9532 = vmatmul.mubr.msk.f32.gmra.mxu0 %vm554_vm1, %v257_v53  ;;  %8669 = vmatpush3.msra.mxu1 %v4830_v33  ;;  %v4827_v53 = vmax.f32 %v2697_v35, 0.0  ;;  %v4841_v35 = vmax.f32 %v2767_v50, 0.0  ;;  %v4825_v28 = vmax.f32 %v2687_v25, 0.0  ;;  %v2747_v54 = vadd.f32 %v11874_v57, %v12007_v14  ;;  %v265_v14 = vld [vmem:[%s14413_s0 + $0x758] sm:$0xff] }
 0x1d1   :  { %8670 = vmatprep.subr.mxu1 %v4845_v3  ;;  %9534 = vmatprep.mubr.msk.f32.mxu0 %vm554_vm1, %v258_v0  ;;  %v4826_v0 = vmax.f32 %v2692_v36, 0.0  ;;  %v262_v3 = vld [vmem:[%s14413_s0 + $0x740] sm:$0xff]  ;;  %v4824_v36 = vmax.f32 %v2682_v24, 0.0  ;;  %v4839_v50 = vmax.f32 %v2757_v15, 0.0  ;;  %v2657_v15 = vadd.f32 %v11874_v57, %v11817_v32 }
 0x1d2   :  { %v12102_v7 = vpop.f32.mrf.mxu0  ;;  %8671 = vmatpush3.msra.mxu1 %v4829_v55  ;;  %v2677_v55 = vadd.f32 %v11874_v57, %v11855_v9  ;;  %v2672_v9 = vadd.f32 %v11874_v57, %v11866_v52  ;;  %v12153_v52 = vpop.f32.mrf.mxu1  ;;  %v2652_v32 = vadd.f32 %v11874_v57, %v11827_v17  ;;  %v2647_v17 = vadd.f32 %v11874_v57, %v11799_v42 }
 0x1d3   :  { %8672 = vmatprep.subr.mxu1 %v4844_v60  ;;  %v2642_v42 = vadd.f32 %v11874_v57, %v11809_v10  ;;  %v12225_v10 = vadd.s32 1152, %v11154_v45 }
 0x1d4   :  { %v12110_v33 = vpop.f32.mrf.mxu0  ;;  %9535 = vmatmul.mubr.msk.f32.gmra.mxu0 %vm554_vm1, %v259_v39  ;;  %8673 = vmatpush3.msra.mxu1 %v4828_v21  ;;  %v4840_v39 = vmax.f32 %v2762_v46, 0.0  ;;  %v4823_v25 = vmax.f32 %v2677_v55, 0.0  ;;  %v2742_v46 = vadd.f32 %v11874_v57, %v12014_v27  ;;  %v2737_v27 = vadd.f32 %v11874_v57, %v11993_v41  ;;  %v267_v41 = vld [vmem:[%s14413_s0 + $0x768] sm:$0xff] }
 0x1d5   :  { %8674 = vmatprep.subr.mxu1 %v4843_v5  ;;  %9537 = vmatprep.mubr.msk.f32.mxu0 %vm554_vm1, %v260_v19  ;;  %v264_v19 = vld [vmem:[%s14413_s0 + $0x750] sm:$0xff]  ;;  %v2667_v5 = vadd.f32 %v11874_v57, %v11835_v20  ;;  %v2662_v20 = vadd.f32 %v11874_v57, %v11846_v51  ;;  %v12175_v51 = vpop.f32.mrf.mxu1  ;;  %vm5279_vm4 = vcmp.ge.s32.totalorder %v12225_v10, %v11183_v62 }
 0x1d6   :  { %v12121_v47 = vpop.f32.mrf.mxu0  ;;  %8675 = vmatpush3.msra.mxu1 %v4827_v53  ;;  %vm5347_vm5 = vcmp.lt.s32.totalorder %v12225_v10, %v11185_v1  ;;  %vm5311_vm10 = vcmp.ge.s32.totalorder %v12225_v10, %v11369_v18 }
 0x1d7   :  { %8676 = vmatprep.subr.mxu1 %v4842_v8  ;;  %v4838_v8 = vmax.f32 %v2752_v29, 0.0  ;;  %v4836_v29 = vmax.f32 %v2742_v46, 0.0  ;;  %vm5411_vm7 = vmand %vm5279_vm4, %vm5347_vm5 }
 0x1d8   :  { %v12130_v60 = vpop.f32.mrf.mxu0  ;;  %9538 = vmatmul.mubr.msk.f32.gmra.mxu0 %vm554_vm1, %v261_v48  ;;  %8677 = vmatpush3.msra.mxu1 %v4826_v0  ;;  %v4822_v48 = vmax.f32 %v2672_v9, 0.0  ;;  %v266_v0 = vld [vmem:[%s14413_s0 + $0x760] sm:$0xff]  ;;  %v268_v9 = vld [vmem:[%s14413_s0 + $0x770] sm:$0xff] }
 0x1d9   :  { %8678 = vmatprep.subr.mxu1 %v4841_v35  ;;  %9540 = vmatprep.mubr.msk.f32.mxu0 %vm554_vm1, %v262_v3  ;;  %v4837_v3 = vmax.f32 %v2747_v54, 0.0  ;;  %v4821_v35 = vmax.f32 %v2667_v5, 0.0  ;;  %v5242_v54 = vadd.s32 768, %v11154_v45 }
 0x1da   :  { %v12141_v21 = vpop.f32.mrf.mxu0  ;;  %8679 = vmatpush3.msra.mxu1 %v4825_v28  ;;  %v2732_v28 = vadd.f32 %v11874_v57, %v12001_v23  ;;  %v12190_v23 = vpop.f32.mrf.mxu1 }
 0x1db   :  { %8680 = vmatprep.subr.mxu1 %v4840_v39  ;;  %v4820_v39 = vmax.f32 %v2662_v20, 0.0  ;;  %v270_v20 = vld [vmem:[%s14413_s0 + $0x780] sm:$0xff]  ;;  %vm5276_vm11 = vcmp.ge.s32.totalorder %v5242_v54, %v11183_v62  ;;  %vm5344_vm12 = vcmp.lt.s32.totalorder %v5242_v54, %v11185_v1  ;;  %vm5308_vm2 = vcmp.ge.s32.totalorder %v5242_v54, %v11369_v18 }
 0x1dc   :  { %v12150_v53 = vpop.f32.mrf.mxu0  ;;  %9541 = vmatmul.mubr.msk.f32.gmra.mxu0 %vm554_vm1, %v263_v31  ;;  %8681 = vmatpush3.msra.mxu1 %v4824_v36  ;;  %v2727_v36 = vadd.f32 %v11874_v57, %v11973_v12  ;;  %v4834_v46 = vmax.f32 %v2732_v28, 0.0  ;;  %v269_v12 = vld [vmem:[%s14413_s0 + $0x778] sm:$0xff]  ;;  %vm5408_vm15 = vmand %vm5276_vm11, %vm5344_vm12  ;;  %vm5376_vm3 = vcmp.lt.s32.totalorder %v5242_v54, %v11371_v38  ;;  %vm5379_vm11 = vcmp.lt.s32.totalorder %v12225_v10, %v11371_v38 }
 0x1dd   :  { %8682 = vmatprep.subr.mxu1 %v4839_v50  ;;  %9543 = vmatprep.mubr.msk.f32.mxu0 %vm554_vm1, %v264_v19  ;;  %v4835_v19 = vmax.f32 %v2737_v27, 0.0  ;;  %v4819_v50 = vmax.f32 %v2657_v15, 0.0  ;;  %v271_v15 = vld [vmem:[%s14413_s0 + $0x788] sm:$0xff]  ;;  %vm5440_vm6 = vmand %vm5308_vm2, %vm5376_vm3  ;;  %v305_v10 = vld [vmem:[%s14413_s0 + $0x898] sm:$0xff] }
 0x1de   :  { %v12163_v24 = vpop.f32.mrf.mxu0  ;;  %8683 = vmatpush3.msra.mxu1 %v4823_v25  ;;  %v2722_v25 = vadd.f32 %v11874_v57, %v11985_v11  ;;  %v12213_v11 = vpop.f32.mrf.mxu1  ;;  %vm5443_vm13 = vmand %vm5311_vm10, %vm5379_vm11 }
 0x1df   :  { %8684 = vmatprep.subr.mxu1 %v4838_v8  ;;  %v4818_v8 = vmax.f32 %v2652_v32, 0.0  ;;  %v273_v32 = vld [vmem:[%s14413_s0 + $0x798] sm:$0xff] }
 0x1e0   :  { %v12172_v55 = vpop.f32.mrf.mxu0  ;;  %9544 = vmatmul.mubr.msk.f32.gmra.mxu0 %vm554_vm1, %v265_v14  ;;  %8685 = vmatpush3.msra.mxu1 %v4822_v48  ;;  %v4833_v48 = vmax.f32 %v2727_v36, 0.0  ;;  %v12240_v43 = vpop.f32.mrf.mxu1 }
 0x1e1   :  { %8686 = vmatprep.subr.mxu1 %v4837_v3  ;;  %9546 = vmatprep.mubr.msk.f32.mxu0 %vm554_vm1, %v266_v0  ;;  %v4817_v0 = vmax.f32 %v2647_v17, 0.0  ;;  %v4832_v3 = vmax.f32 %v2722_v25, 0.0  ;;  %14446 = vst [vmem:[#allocation26_spill] sm:$0xff] %v12240_v43  ;;  %v275_v17 = vld [vmem:[%s14413_s0 + $0x7a8] sm:$0xff]  ;;  %v276_v25 = vld [vmem:[%s14413_s0 + $0x7b0] sm:$0xff] }
 0x1e2   :  { %v12185_v31 = vpop.f32.mrf.mxu0  ;;  %8687 = vmatpush3.msra.mxu1 %v4821_v35  ;;  %v4816_v35 = vmax.f32 %v2642_v42, 0.0  ;;  %v12262_v36 = vpop.f32.mrf.mxu1 }
 0x1e3   :  { %8688 = vmatprep.subr.mxu1 %v4836_v29  ;;  %v272_v29 = vld [vmem:[%s14413_s0 + $0x790] sm:$0xff]  ;;  %14447 = vst [vmem:[#allocation27_spill] sm:$0xff] %v12262_v36  ;;  %v282_v36 = vld [vmem:[%s14413_s0 + $0x7e0] sm:$0xff] }
 0x1e4   :  { %v12197_v5 = vpop.f32.mrf.mxu0  ;;  %9547 = vmatmul.mubr.msk.f32.gmra.mxu0 %vm554_vm1, %v267_v41  ;;  %8689 = vmatpush3.msra.mxu1 %v4820_v39  ;;  %v12267_v54 = vpop.f32.mrf.mxu1 }
 0x1e5   :  { %8690 = vmatprep.subr.mxu1 %v4835_v19  ;;  %9549 = vmatprep.mubr.msk.f32.mxu0 %vm554_vm1, %v268_v9  ;;  %v274_v9 = vld [vmem:[%s14413_s0 + $0x7a0] sm:$0xff]  ;;  %14448 = vst [vmem:[#allocation28_spill] sm:$0xff] %v12267_v54 }
 0x1e6   :  { %v12208_v14 = vpop.f32.mrf.mxu0  ;;  %8691 = vmatpush3.msra.mxu1 %v4819_v50 }
 0x1e7   :  { %8692 = vmatprep.subr.mxu1 %v4834_v46  ;;  %v12280_v46 = vpop.f32.mrf.mxu1 }
 0x1e8   :  { %v12217_v27 = vpop.f32.mrf.mxu0  ;;  %9550 = vmatmul.mubr.msk.f32.gmra.mxu0 %vm554_vm1, %v269_v12  ;;  %8693 = vmatpush3.msra.mxu1 %v4818_v8  ;;  %14449 = vst [vmem:[#allocation29_spill] sm:$0xff] %v12280_v46  ;;  %v277_v8 = vld [vmem:[%s14413_s0 + $0x7b8] sm:$0xff] }
 0x1e9   :  { %8694 = vmatprep.subr.mxu1 %v4833_v48  ;;  %9552 = vmatprep.mubr.msk.f32.mxu0 %vm554_vm1, %v270_v20  ;;  %v12285_v42 = vpop.f32.mrf.mxu1  ;;  %v278_v48 = vld [vmem:[%s14413_s0 + $0x7c0] sm:$0xff] }
 0x1ea   :  { %v12231_v28 = vpop.f32.mrf.mxu0  ;;  %8695 = vmatpush3.msra.mxu1 %v4817_v0  ;;  %14450 = vst [vmem:[#allocation30_spill] sm:$0xff] %v12285_v42 }
 0x1eb   :  { %8696 = vmatprep.subr.mxu1 %v4832_v3  ;;  %v12296_v0 = vpop.f32.mrf.mxu1  ;;  %v2872_v49 = vadd.f32 %v11874_v57, %v12231_v28 }
 0x1ec   :  { %v12244_v41 = vpop.f32.mrf.mxu0  ;;  %9553 = vmatmul.mubr.msk.f32.gmra.mxu0 %vm554_vm1, %v271_v15  ;;  %8697 = vmatpush3.msra.mxu1 %v4816_v35  ;;  %14451 = vst [vmem:[#allocation31_spill] sm:$0xff] %v12296_v0  ;;  %v279_v35 = vld [vmem:[%s14413_s0 + $0x7c8] sm:$0xff]  ;;  %v284_v0 = vld [vmem:[%s14413_s0 + $0x7f0] sm:$0xff] }
 0x1ed   :  { %9555 = vmatprep.mubr.msk.f32.mxu0 %vm554_vm1, %v272_v29  ;;  %7969 = vmatmul.mubr.msk.f32.vlgmr.msra.gmra.mxu1 %vm5408_vm15, %v14441_v58  ;;  %v12301_v15 = vpop.f32.mrf.mxu1 }
 0x1ee   :  { %v12256_v39 = vpop.f32.mrf.mxu0  ;;  %7970 = vmatprep.mubr.msk.f32.mxu1 %vm5441_vm0, %v14441_v58  ;;  %14452 = vst [vmem:[#allocation32_spill] sm:$0xff] %v12301_v15 }
 0x1f0   :  { %v12264_v19 = vpop.f32.mrf.mxu0  ;;  %9556 = vmatmul.mubr.msk.f32.gmra.mxu0 %vm554_vm1, %v273_v32  ;;  %v280_v32 = vld [vmem:[%s14413_s0 + $0x7d0] sm:$0xff] }
 0x1f1   :  { %9558 = vmatprep.mubr.msk.f32.mxu0 %vm554_vm1, %v274_v9  ;;  %7971 = vmatmul.mubr.msk.f32.gmra.mxu1 %vm5440_vm6, %v14441_v58  ;;  %v12312_v9 = vpop.f32.mrf.mxu1 }
 0x1f2   :  { %v12274_v50 = vpop.f32.mrf.mxu0  ;;  %7972 = vmatprep.mubr.msk.f32.mxu1 %vm5411_vm7, %v14441_v58  ;;  %14453 = vst [vmem:[#allocation33_spill] sm:$0xff] %v12312_v9 }
 0x1f4   :  { %v12282_v12 = vpop.f32.mrf.mxu0  ;;  %9559 = vmatmul.mubr.msk.f32.gmra.mxu0 %vm554_vm1, %v275_v17 }
 0x1f5   :  { %9561 = vmatprep.mubr.msk.f32.mxu0 %vm554_vm1, %v276_v25  ;;  %v12317_v25 = vpop.f32.mrf.mxu1 }
 0x1f6   :  { %v12291_v20 = vpop.f32.mrf.mxu0  ;;  %14454 = vst [vmem:[#allocation34_spill] sm:$0xff] %v12317_v25 }
 0x1f7   :  { %v12328_v46 = vpop.f32.mrf.mxu1 }
 0x1f8   :  { %v12298_v3 = vpop.f32.mrf.mxu0  ;;  %9562 = vmatmul.mubr.msk.f32.gmra.mxu0 %vm554_vm1, %v277_v8  ;;  %v281_v8 = vld [vmem:[%s14413_s0 + $0x7d8] sm:$0xff]  ;;  %14455 = vst [vmem:[#allocation35_spill] sm:$0xff] %v12328_v46  ;;  %v286_v46 = vld [vmem:[%s14413_s0 + $0x800] sm:$0xff] }
 0x1f9   :  { %9564 = vmatprep.mubr.msk.f32.mxu0 %vm554_vm1, %v278_v48 }
 0x1fa   :  { %v12307_v29 = vpop.f32.mrf.mxu0 }
 0x1fc   :  { %v12314_v17 = vpop.f32.mrf.mxu0  ;;  %9565 = vmatmul.mubr.msk.f32.gmra.mxu0 %vm554_vm1, %v279_v35  ;;  %v12331_v35 = vpop.f32.mrf.mxu1 }
 0x1fd   :  { %9567 = vmatprep.mubr.msk.f32.mxu0 %vm554_vm1, %v280_v32  ;;  %14456 = vst [vmem:[#allocation36_spill] sm:$0xff] %v12331_v35  ;;  %v283_v32 = vld [vmem:[%s14413_s0 + $0x7e8] sm:$0xff] }
 0x1fe   :  { %v12323_v48 = vpop.f32.mrf.mxu0  ;;  %v12340_v42 = vpop.f32.mrf.mxu1 }
 0x1ff   :  { %14457 = vst [vmem:[#allocation37_spill] sm:$0xff] %v12340_v42  ;;  %v2877_v42 = vadd.f32 %v11874_v57, %v12217_v27  ;;  %v288_v27 = vld [vmem:[%s14413_s0 + $0x810] sm:$0xff] }
 0x200   :  { %v9425_v43 = vpop.f32.mrf.mxu0  ;;  %9568 = vmatmul.mubr.msk.f32.gmra.mxu0 %vm554_vm1, %v281_v8  ;;  %v12343_v15 = vpop.f32.mrf.mxu1 }
 0x201   :  { %9570 = vmatprep.mubr.msk.f32.mxu0 %vm554_vm1, %v282_v36  ;;  %14458 = vst [vmem:[#allocation38_spill] sm:$0xff] %v12343_v15  ;;  %v285_v36 = vld [vmem:[%s14413_s0 + $0x7f8] sm:$0xff]  ;;  %v287_v15 = vld [vmem:[%s14413_s0 + $0x808] sm:$0xff]  ;;  %v4863_v6 = vmax.f32 %v2877_v42, 0.0  ;;  %v4862_v42 = vmax.f32 %v2872_v49, 0.0 }
 0x202   :  { %v2931_v54 = vpop.f32.mrf.mxu0  ;;  %v12352_v25 = vpop.f32.mrf.mxu1 }
 0x203   :  { %14459 = vst [vmem:[#allocation39_spill] sm:$0xff] %v12352_v25 }
 0x204   :  { %v9428_v9 = vpop.f32.mrf.mxu0  ;;  %9571 = vmatmul.mubr.msk.f32.gmra.mxu0 %vm554_vm1, %v283_v32  ;;  %v12357_v32 = vpop.f32.mrf.mxu1 }
 0x205   :  { %9573 = vmatprep.mubr.msk.f32.mxu0 %vm554_vm1, %v284_v0  ;;  %14460 = vst [vmem:[#allocation40_spill] sm:$0xff] %v12357_v32 }
 0x206   :  { %v2941_v8 = vpop.f32.mrf.mxu0  ;;  %v12369_v40 = vpop.f32.mrf.mxu1 }
 0x207   :  { %14461 = vst [vmem:[#allocation41_spill] sm:$0xff] %v12369_v40  ;;  %v2942_v63 = vadd.f32 %v11874_v57, %v2941_v8 }
 0x208   :  { %v9431_v35 = vpop.f32.mrf.mxu0  ;;  %9574 = vmatmul.mubr.msk.f32.gmra.mxu0 %vm554_vm1, %v285_v36  ;;  %v2947_v36 = vadd.f32 %v11874_v57, %v9428_v9  ;;  %v12378_v28 = vpop.f32.mrf.mxu1  ;;  %v289_v9 = vld [vmem:[%s14413_s0 + $0x818] sm:$0xff] }
 0x209   :  { %v2957_v0 = vadd.f32 %v11874_v57, %v9431_v35  ;;  %9576 = vmatprep.mubr.msk.f32.mxu0 %vm554_vm1, %v286_v46  ;;  %v2867_v46 = vadd.f32 %v11874_v57, %v12197_v5  ;;  %14462 = vst [vmem:[#allocation42_spill] sm:$0xff] %v12378_v28  ;;  %v2862_v5 = vadd.f32 %v11874_v57, %v12208_v14  ;;  %v4876_v14 = vmax.f32 %v2942_v63, 0.0 }
 0x20a   :  { %v2951_v25 = vpop.f32.mrf.mxu0  ;;  %v12392_v8 = vpop.f32.mrf.mxu1  ;;  %v2927_v63 = vadd.f32 %v11874_v57, %v12314_v17  ;;  %v293_v17 = vld [vmem:[%s14413_s0 + $0x838] sm:$0xff] }
 0x20b   :  { %v4879_v32 = vmax.f32 %v2957_v0, 0.0  ;;  %v2952_v35 = vadd.f32 %v11874_v57, %v2951_v25  ;;  %14463 = vst [vmem:[#allocation43_spill] sm:$0xff] %v12392_v8  ;;  %v4877_v0 = vmax.f32 %v2947_v36, 0.0 }
 0x20c   :  { %v12375_v61 = vpop.f32.mrf.mxu0  ;;  %9577 = vmatmul.mubr.msk.f32.gmra.mxu0 %vm554_vm1, %v287_v15  ;;  %v290_v15 = vld [vmem:[%s14413_s0 + $0x820] sm:$0xff]  ;;  %v12400_v49 = vpop.f32.mrf.mxu1 }
 0x20d   :  { %v4878_v37 = vmax.f32 %v2952_v35, 0.0  ;;  %8704 = vmatprep.subr.mxu1 %v4879_v32  ;;  %9579 = vmatprep.mubr.msk.f32.mxu0 %vm554_vm1, %v288_v27  ;;  %v2937_v32 = vadd.f32 %v11874_v57, %v9425_v43  ;;  %v2857_v27 = vadd.f32 %v11874_v57, %v12172_v55  ;;  %v4861_v35 = vmax.f32 %v2867_v46, 0.0  ;;  %14464 = vst [vmem:[#allocation44_spill] sm:$0xff] %v12400_v49  ;;  %v292_v46 = vld [vmem:[%s14413_s0 + $0x830] sm:$0xff]  ;;  %v314_v49 = vld [vmem:[%s14413_s0 + $0x8e0] sm:$0xff] }
 0x20e   :  { %v12387_v25 = vpop.f32.mrf.mxu0  ;;  %8705 = vmatpush3.msra.mxu1 %v4863_v6  ;;  %v2932_v6 = vadd.f32 %v11874_v57, %v2931_v54  ;;  %v2852_v55 = vadd.f32 %v11874_v57, %v12185_v31  ;;  %v4860_v43 = vmax.f32 %v2862_v5, 0.0  ;;  %v12414_v54 = vpop.f32.mrf.mxu1 }
 0x20f   :  { %8706 = vmatprep.subr.mxu1 %v4878_v37  ;;  %v291_v37 = vld [vmem:[%s14413_s0 + $0x828] sm:$0xff]  ;;  %14465 = vst [vmem:[#allocation45_spill] sm:$0xff] %v12414_v54 }
 0x210   :  { %v12397_v28 = vpop.f32.mrf.mxu0  ;;  %9580 = vmatmul.mubr.msk.f32.gmra.mxu0 %vm554_vm1, %v289_v9  ;;  %8707 = vmatpush3.msra.mxu1 %v4862_v42  ;;  %v4875_v9 = vmax.f32 %v2937_v32, 0.0  ;;  %v2847_v42 = vadd.f32 %v11874_v57, %v12150_v53  ;;  %v12423_v5 = vpop.f32.mrf.mxu1  ;;  %v2842_v53 = vadd.f32 %v11874_v57, %v12163_v24  ;;  %v4858_v32 = vmax.f32 %v2852_v55, 0.0 }
 0x211   :  { %8708 = vmatprep.subr.mxu1 %v4877_v0  ;;  %9582 = vmatprep.mubr.msk.f32.mxu0 %vm554_vm1, %v290_v15  ;;  %v4859_v15 = vmax.f32 %v2857_v27, 0.0  ;;  %14466 = vst [vmem:[#allocation46_spill] sm:$0xff] %v12423_v5  ;;  %v2922_v0 = vadd.f32 %v11874_v57, %v12323_v48  ;;  %v316_v5 = vld [vmem:[%s14413_s0 + $0x8f0] sm:$0xff] }
 0x212   :  { %v12409_v36 = vpop.f32.mrf.mxu0  ;;  %8709 = vmatpush3.msra.mxu1 %v4861_v35  ;;  %v4874_v35 = vmax.f32 %v2932_v6, 0.0  ;;  %v12438_v48 = vpop.f32.mrf.mxu1  ;;  %v2917_v6 = vadd.f32 %v11874_v57, %v12298_v3  ;;  %v295_v3 = vld [vmem:[%s14413_s0 + $0x848] sm:$0xff] }
 0x213   :  { %8710 = vmatprep.subr.mxu1 %v4876_v14  ;;  %v294_v14 = vld [vmem:[%s14413_s0 + $0x840] sm:$0xff]  ;;  %14467 = vst [vmem:[#allocation47_spill] sm:$0xff] %v12438_v48 }
 0x214   :  { %v12420_v31 = vpop.f32.mrf.mxu0  ;;  %9583 = vmatmul.mubr.msk.f32.gmra.mxu0 %vm554_vm1, %v291_v37  ;;  %8711 = vmatpush3.msra.mxu1 %v4860_v43  ;;  %v4873_v37 = vmax.f32 %v2927_v63, 0.0  ;;  %v2837_v43 = vadd.f32 %v11874_v57, %v12130_v60  ;;  %v12447_v55 = vpop.f32.mrf.mxu1  ;;  %v2832_v60 = vadd.f32 %v11874_v57, %v12141_v21  ;;  %v4856_v63 = vmax.f32 %v2842_v53, 0.0 }
 0x215   :  { %8712 = vmatprep.subr.mxu1 %v4875_v9  ;;  %9585 = vmatprep.mubr.msk.f32.mxu0 %vm554_vm1, %v292_v46  ;;  %v4857_v46 = vmax.f32 %v2847_v42, 0.0  ;;  %14468 = vst [vmem:[#allocation48_spill] sm:$0xff] %v12447_v55  ;;  %v2912_v9 = vadd.f32 %v11874_v57, %v12307_v29 }
 0x216   :  { %v12433_v27 = vpop.f32.mrf.mxu0  ;;  %8713 = vmatpush3.msra.mxu1 %v4859_v15  ;;  %v4872_v15 = vmax.f32 %v2922_v0, 0.0  ;;  %v12462_v29 = vpop.f32.mrf.mxu1  ;;  %v2907_v0 = vadd.f32 %v11874_v57, %v12282_v12  ;;  %v297_v12 = vld [vmem:[%s14413_s0 + $0x858] sm:$0xff] }
 0x217   :  { %8714 = vmatprep.subr.mxu1 %v4874_v35  ;;  %v296_v35 = vld [vmem:[%s14413_s0 + $0x850] sm:$0xff]  ;;  %14469 = vst [vmem:[#allocation49_spill] sm:$0xff] %v12462_v29 }
 0x218   :  { %v12444_v24 = vpop.f32.mrf.mxu0  ;;  %9586 = vmatmul.mubr.msk.f32.gmra.mxu0 %vm554_vm1, %v293_v17  ;;  %8715 = vmatpush3.msra.mxu1 %v4858_v32  ;;  %v4871_v17 = vmax.f32 %v2917_v6, 0.0  ;;  %v2827_v32 = vadd.f32 %v11874_v57, %v12110_v33  ;;  %v12471_v53 = vpop.f32.mrf.mxu1  ;;  %v2822_v33 = vadd.f32 %v11874_v57, %v12121_v47  ;;  %v4854_v6 = vmax.f32 %v2832_v60, 0.0 }
 0x219   :  { %8716 = vmatprep.subr.mxu1 %v4873_v37  ;;  %9588 = vmatprep.mubr.msk.f32.mxu0 %vm554_vm1, %v294_v14  ;;  %v4855_v14 = vmax.f32 %v2837_v43, 0.0  ;;  %14470 = vst [vmem:[#allocation50_spill] sm:$0xff] %v12471_v53  ;;  %v2902_v37 = vadd.f32 %v11874_v57, %v12291_v20 }
 0x21a   :  { %v12457_v42 = vpop.f32.mrf.mxu0  ;;  %8717 = vmatpush3.msra.mxu1 %v4857_v46  ;;  %v4870_v46 = vmax.f32 %v2912_v9, 0.0  ;;  %v12486_v20 = vpop.f32.mrf.mxu1  ;;  %v2897_v9 = vadd.f32 %v11874_v57, %v12264_v19  ;;  %v299_v19 = vld [vmem:[%s14413_s0 + $0x868] sm:$0xff] }
 0x21b   :  { %8718 = vmatprep.subr.mxu1 %v4872_v15  ;;  %v298_v15 = vld [vmem:[%s14413_s0 + $0x860] sm:$0xff]  ;;  %14471 = vst [vmem:[#allocation51_spill] sm:$0xff] %v12486_v20 }
 0x21c   :  { %v12468_v21 = vpop.f32.mrf.mxu0  ;;  %9589 = vmatmul.mubr.msk.f32.gmra.mxu0 %vm554_vm1, %v295_v3  ;;  %8719 = vmatpush3.msra.mxu1 %v4856_v63  ;;  %v4869_v3 = vmax.f32 %v2907_v0, 0.0  ;;  %v2817_v63 = vadd.f32 %v11874_v57, %v12092_v26  ;;  %v12495_v60 = vpop.f32.mrf.mxu1  ;;  %v2812_v26 = vadd.f32 %v11874_v57, %v12102_v7  ;;  %v4852_v0 = vmax.f32 %v2822_v33, 0.0 }
 0x21d   :  { %8720 = vmatprep.subr.mxu1 %v4871_v17  ;;  %9591 = vmatprep.mubr.msk.f32.mxu0 %vm554_vm1, %v296_v35  ;;  %v4853_v35 = vmax.f32 %v2827_v32, 0.0  ;;  %14472 = vst [vmem:[#allocation52_spill] sm:$0xff] %v12495_v60  ;;  %v2892_v17 = vadd.f32 %v11874_v57, %v12274_v50  ;;  %v2807_v7 = vadd.f32 %v11874_v57, %v12074_v56 }
 0x21e   :  { %v12481_v43 = vpop.f32.mrf.mxu0  ;;  %8721 = vmatpush3.msra.mxu1 %v4855_v14  ;;  %v4868_v14 = vmax.f32 %v2902_v37, 0.0  ;;  %v12510_v50 = vpop.f32.mrf.mxu1  ;;  %v2887_v37 = vadd.f32 %v11874_v57, %v12244_v41  ;;  %v4851_v33 = vmax.f32 %v2817_v63, 0.0  ;;  %v301_v41 = vld [vmem:[%s14413_s0 + $0x878] sm:$0xff]  ;;  %v2802_v56 = vadd.f32 %v11874_v57, %v12084_v22 }
 0x21f   :  { %8722 = vmatprep.subr.mxu1 %v4870_v46  ;;  %v300_v46 = vld [vmem:[%s14413_s0 + $0x870] sm:$0xff]  ;;  %14473 = vst [vmem:[#allocation53_spill] sm:$0xff] %v12510_v50  ;;  %v4866_v8 = vmax.f32 %v2892_v17, 0.0 }
 0x220   :  { %v12492_v47 = vpop.f32.mrf.mxu0  ;;  %9592 = vmatmul.mubr.msk.f32.gmra.mxu0 %vm554_vm1, %v297_v12  ;;  %8723 = vmatpush3.msra.mxu1 %v4854_v6  ;;  %v4867_v12 = vmax.f32 %v2897_v9, 0.0  ;;  %v5244_v6 = vadd.s32 1024, %v11154_v45  ;;  %v4850_v9 = vmax.f32 %v2812_v26, 0.0  ;;  %v4865_v17 = vmax.f32 %v2887_v37, 0.0  ;;  %v303_v26 = vld [vmem:[%s14413_s0 + $0x888] sm:$0xff] }
 0x221   :  { %8724 = vmatprep.subr.mxu1 %v4869_v3  ;;  %9594 = vmatprep.mubr.msk.f32.mxu0 %vm554_vm1, %v298_v15  ;;  %v12520_v3 = vpop.f32.mrf.mxu1 }
 0x222   :  { %v12505_v32 = vpop.f32.mrf.mxu0  ;;  %8725 = vmatpush3.msra.mxu1 %v4853_v35  ;;  %14474 = vst [vmem:[#allocation54_spill] sm:$0xff] %v12520_v3  ;;  %v2882_v35 = vadd.f32 %v11874_v57, %v12256_v39  ;;  %vm5278_vm8 = vcmp.ge.s32.totalorder %v5244_v6, %v11183_v62  ;;  %vm5346_vm9 = vcmp.lt.s32.totalorder %v5244_v6, %v11185_v1  ;;  %v12547_v57 = vadd.s32 1408, %v11154_v45 }
 0x223   :  { %8726 = vmatprep.subr.mxu1 %v4868_v14  ;;  %v302_v14 = vld [vmem:[%s14413_s0 + $0x880] sm:$0xff]  ;;  %v12535_v39 = vpop.f32.mrf.mxu1  ;;  %vm5410_vm12 = vmand %vm5278_vm8, %vm5346_vm9  ;;  %vm5310_vm14 = vcmp.ge.s32.totalorder %v5244_v6, %v11369_v18  ;;  %vm5378_vm15 = vcmp.lt.s32.totalorder %v5244_v6, %v11371_v38 }
 0x224   :  { %v12517_v15 = vpop.f32.mrf.mxu0  ;;  %9595 = vmatmul.mubr.msk.f32.gmra.mxu0 %vm554_vm1, %v299_v19  ;;  %8727 = vmatpush3.msra.mxu1 %v4852_v0  ;;  %14475 = vst [vmem:[#allocation55_spill] sm:$0xff] %v12535_v39  ;;  %v4849_v19 = vmax.f32 %v2807_v7, 0.0  ;;  %vm5281_vm0 = vcmp.ge.s32.totalorder %v12547_v57, %v11183_v62  ;;  %vm5349_vm2 = vcmp.lt.s32.totalorder %v12547_v57, %v11185_v1  ;;  %vm5442_vm3 = vmand %vm5310_vm14, %vm5378_vm15 }
 0x225   :  { %8728 = vmatprep.subr.mxu1 %v4867_v12  ;;  %9597 = vmatprep.mubr.msk.f32.mxu0 %vm554_vm1, %v300_v46  ;;  %v12549_v22 = vpop.f32.mrf.mxu1  ;;  %v4848_v46 = vmax.f32 %v2802_v56, 0.0  ;;  %v304_v12 = vld [vmem:[%s14413_s0 + $0x890] sm:$0xff]  ;;  %vm5413_vm4 = vmand %vm5281_vm0, %vm5349_vm2  ;;  %vm5313_vm7 = vcmp.ge.s32.totalorder %v12547_v57, %v11369_v18  ;;  %vm5381_vm8 = vcmp.lt.s32.totalorder %v12547_v57, %v11371_v38  ;;  %v337_v57 = vld [vmem:[%s14413_s0 + $0x998] sm:$0xff] }
 0x226   :  { %v12530_v63 = vpop.f32.mrf.mxu0  ;;  %8729 = vmatpush3.msra.mxu1 %v4851_v33  ;;  %14476 = vst [vmem:[#allocation56_spill] sm:$0xff] %v12549_v22  ;;  %vm5445_vm10 = vmand %vm5313_vm7, %vm5381_vm8 }
 0x227   :  { %8730 = vmatprep.subr.mxu1 %v4866_v8  ;;  %v4864_v8 = vmax.f32 %v2882_v35, 0.0  ;;  %v12564_v7 = vpop.f32.mrf.mxu1 }
 0x228   :  { %v12539_v0 = vpop.f32.mrf.mxu0  ;;  %9598 = vmatmul.mubr.msk.f32.gmra.mxu0 %vm554_vm1, %v301_v41  ;;  %8731 = vmatpush3.msra.mxu1 %v4850_v9  ;;  %14477 = vst [vmem:[#allocation57_spill] sm:$0xff] %v12564_v7  ;;  %v306_v41 = vld [vmem:[%s14413_s0 + $0x8a0] sm:$0xff] }
 0x229   :  { %8732 = vmatprep.subr.mxu1 %v4865_v17  ;;  %9600 = vmatprep.mubr.msk.f32.mxu0 %vm554_vm1, %v302_v14  ;;  %v12578_v35 = vpop.f32.mrf.mxu1  ;;  %v307_v17 = vld [vmem:[%s14413_s0 + $0x8a8] sm:$0xff] }
 0x22a   :  { %v12555_v37 = vpop.f32.mrf.mxu0  ;;  %8733 = vmatpush3.msra.mxu1 %v4849_v19  ;;  %14478 = vst [vmem:[#allocation58_spill] sm:$0xff] %v12578_v35 }
 0x22b   :  { %8734 = vmatprep.subr.mxu1 %v4864_v8  ;;  %v12591_v56 = vpop.f32.mrf.mxu1  ;;  %v308_v8 = vld [vmem:[%s14413_s0 + $0x8b0] sm:$0xff] }
 0x22c   :  { %v12571_v33 = vpop.f32.mrf.mxu0  ;;  %9601 = vmatmul.mubr.msk.f32.gmra.mxu0 %vm554_vm1, %v303_v26  ;;  %8735 = vmatpush3.msra.mxu1 %v4848_v46  ;;  %14479 = vst [vmem:[#allocation59_spill] sm:$0xff] %v12591_v56  ;;  %v310_v56 = vld [vmem:[%s14413_s0 + $0x8c0] sm:$0xff] }
 0x22d   :  { %9603 = vmatprep.mubr.msk.f32.mxu0 %vm554_vm1, %v304_v12  ;;  %7973 = vmatmul.mubr.msk.f32.vlgmr.msra.gmra.mxu1 %vm5410_vm12, %v14441_v58  ;;  %v12596_v14 = vpop.f32.mrf.mxu1 }
 0x22e   :  { %v12585_v6 = vpop.f32.mrf.mxu0  ;;  %7974 = vmatprep.mubr.msk.f32.mxu1 %vm5443_vm13, %v14441_v58  ;;  %14480 = vst [vmem:[#allocation60_spill] sm:$0xff] %v12596_v14 }
 0x22f   :  { %v12609_v26 = vpop.f32.mrf.mxu1 }
 0x230   :  { %v12593_v9 = vpop.f32.mrf.mxu0  ;;  %9604 = vmatmul.mubr.msk.f32.gmra.mxu0 %vm554_vm1, %v305_v10  ;;  %14481 = vst [vmem:[#allocation61_spill] sm:$0xff] %v12609_v26  ;;  %v309_v10 = vld [vmem:[%s14413_s0 + $0x8b8] sm:$0xff] }
 0x231   :  { %9606 = vmatprep.mubr.msk.f32.mxu0 %vm554_vm1, %v306_v41  ;;  %7975 = vmatmul.mubr.msk.f32.gmra.mxu1 %vm5442_vm3, %v14441_v58  ;;  %v12614_v12 = vpop.f32.mrf.mxu1 }
 0x232   :  { %v12603_v19 = vpop.f32.mrf.mxu0  ;;  %7976 = vmatprep.mubr.msk.f32.mxu1 %vm5413_vm4, %v14441_v58  ;;  %14482 = vst [vmem:[#allocation62_spill] sm:$0xff] %v12614_v12  ;;  %v312_v12 = vld [vmem:[%s14413_s0 + $0x8d0] sm:$0xff] }
 0x233   :  { %v12625_v35 = vpop.f32.mrf.mxu1 }
 0x234   :  { %v12611_v46 = vpop.f32.mrf.mxu0  ;;  %9607 = vmatmul.mubr.msk.f32.gmra.mxu0 %vm554_vm1, %v307_v17  ;;  %14483 = vst [vmem:[#allocation63_spill] sm:$0xff] %v12625_v35 }
 0x235   :  { %9609 = vmatprep.mubr.msk.f32.mxu0 %vm554_vm1, %v308_v8  ;;  %v12630_v17 = vpop.f32.mrf.mxu1  ;;  %v311_v8 = vld [vmem:[%s14413_s0 + $0x8c8] sm:$0xff] }
 0x236   :  { %v12620_v41 = vpop.f32.mrf.mxu0  ;;  %14484 = vst [vmem:[#allocation64_spill] sm:$0xff] %v12630_v17 }
 0x237   :  { %v12641_v54 = vpop.f32.mrf.mxu1 }
 0x238   :  { %v12627_v26 = vpop.f32.mrf.mxu0  ;;  %9610 = vmatmul.mubr.msk.f32.gmra.mxu0 %vm554_vm1, %v309_v10  ;;  %14485 = vst [vmem:[#allocation65_spill] sm:$0xff] %v12641_v54 }
 0x239   :  { %9612 = vmatprep.mubr.msk.f32.mxu0 %vm554_vm1, %v310_v56  ;;  %v12646_v10 = vpop.f32.mrf.mxu1  ;;  %v313_v56 = vld [vmem:[%s14413_s0 + $0x8d8] sm:$0xff] }
 0x23a   :  { %v12636_v14 = vpop.f32.mrf.mxu0  ;;  %14486 = vst [vmem:[#allocation66_spill] sm:$0xff] %v12646_v10 }
 0x23b   :  { %v12657_v48 = vpop.f32.mrf.mxu1 }
 0x23c   :  { %v12643_v35 = vpop.f32.mrf.mxu0  ;;  %9613 = vmatmul.mubr.msk.f32.gmra.mxu0 %vm554_vm1, %v311_v8  ;;  %14487 = vst [vmem:[#allocation67_spill] sm:$0xff] %v12657_v48 }
 0x23d   :  { %9615 = vmatprep.mubr.msk.f32.mxu0 %vm554_vm1, %v312_v12  ;;  %v12660_v8 = vpop.f32.mrf.mxu1  ;;  %v315_v12 = vld [vmem:[%s14413_s0 + $0x8e8] sm:$0xff] }
 0x23e   :  { %v12652_v17 = vpop.f32.mrf.mxu0  ;;  %14488 = vst [vmem:[#allocation68_spill] sm:$0xff] %v12660_v8  ;;  %v318_v8 = vld [vmem:[%s14413_s0 + $0x900] sm:$0xff] }
 0x23f   :  { %v12669_v29 = vpop.f32.mrf.mxu1 }
 0x240   :  { %v9473_v54 = vpop.f32.mrf.mxu0  ;;  %9616 = vmatmul.mubr.msk.f32.gmra.mxu0 %vm554_vm1, %v313_v56  ;;  %14489 = vst [vmem:[#allocation69_spill] sm:$0xff] %v12669_v29  ;;  %v12686_v29 = vld [vmem:[%s14415_s2] ss:$0 sm:$0xff] }
 0x241   :  { %9618 = vmatprep.mubr.msk.f32.mxu0 %vm554_vm1, %v314_v49  ;;  %v12672_v48 = vpop.f32.mrf.mxu1  ;;  %v317_v49 = vld [vmem:[%s14413_s0 + $0x8f8] sm:$0xff]  ;;  %v3032_v50 = vadd.f32 %v12686_v29, %v12555_v37 }
 0x242   :  { %v3091_v10 = vpop.f32.mrf.mxu0  ;;  %14490 = vst [vmem:[#allocation70_spill] sm:$0xff] %v12672_v48 }
 0x243   :  { %v12681_v20 = vpop.f32.mrf.mxu1 }
 0x244   :  { %v9476_v55 = vpop.f32.mrf.mxu0  ;;  %9619 = vmatmul.mubr.msk.f32.gmra.mxu0 %vm554_vm1, %v315_v12  ;;  %14491 = vst [vmem:[#allocation71_spill] sm:$0xff] %v12681_v20  ;;  %v3037_v12 = vadd.f32 %v12686_v29, %v12539_v0  ;;  %v319_v20 = vld [vmem:[%s14413_s0 + $0x908] sm:$0xff]  ;;  %v320_v0 = vld [vmem:[%s14413_s0 + $0x910] sm:$0xff] }
 0x245   :  { %9621 = vmatprep.mubr.msk.f32.mxu0 %vm554_vm1, %v316_v5  ;;  %v12691_v48 = vpop.f32.mrf.mxu1 }
 0x246   :  { %v3101_v56 = vpop.f32.mrf.mxu0  ;;  %14492 = vst [vmem:[#allocation72_spill] sm:$0xff] %v12691_v48  ;;  %v4895_v3 = vmax.f32 %v3037_v12, 0.0 }
 0x247   :  { %v12703_v39 = vpop.f32.mrf.mxu1  ;;  %v3102_v7 = vadd.f32 %v12686_v29, %v3101_v56 }
 0x248   :  { %v9479_v5 = vpop.f32.mrf.mxu0  ;;  %9622 = vmatmul.mubr.msk.f32.gmra.mxu0 %vm554_vm1, %v317_v49  ;;  %14493 = vst [vmem:[#allocation73_spill] sm:$0xff] %v12703_v39  ;;  %v3107_v49 = vadd.f32 %v12686_v29, %v9476_v55  ;;  %v321_v55 = vld [vmem:[%s14413_s0 + $0x918] sm:$0xff] }
 0x249   :  { %v3117_v53 = vadd.f32 %v12686_v29, %v9479_v5  ;;  %9624 = vmatprep.mubr.msk.f32.mxu0 %vm554_vm1, %v318_v8  ;;  %v3027_v8 = vadd.f32 %v12686_v29, %v12517_v15  ;;  %v12712_v37 = vpop.f32.mrf.mxu1 }
 0x24a   :  { %v3111_v60 = vpop.f32.mrf.mxu0  ;;  %14494 = vst [vmem:[#allocation74_spill] sm:$0xff] %v12712_v37  ;;  %v4909_v12 = vmax.f32 %v3107_v49, 0.0 }
 0x24b   :  { %v4911_v48 = vmax.f32 %v3117_v53, 0.0  ;;  %v3112_v5 = vadd.f32 %v12686_v29, %v3111_v60  ;;  %v3022_v53 = vadd.f32 %v12686_v29, %v12530_v63  ;;  %v4894_v60 = vmax.f32 %v3032_v50, 0.0  ;;  %v12726_v56 = vpop.f32.mrf.mxu1 }
 0x24c   :  { %v12709_v40 = vpop.f32.mrf.mxu0  ;;  %9625 = vmatmul.mubr.msk.f32.gmra.mxu0 %vm554_vm1, %v319_v20  ;;  %v322_v20 = vld [vmem:[%s14413_s0 + $0x920] sm:$0xff]  ;;  %14495 = vst [vmem:[#allocation75_spill] sm:$0xff] %v12726_v56  ;;  %v4908_v63 = vmax.f32 %v3102_v7, 0.0  ;;  %v3087_v7 = vadd.f32 %v12686_v29, %v12643_v35  ;;  %v325_v35 = vld [vmem:[%s14413_s0 + $0x938] sm:$0xff] }
 0x24d   :  { %v4910_v22 = vmax.f32 %v3112_v5, 0.0  ;;  %8742 = vmatprep.subr.mxu1 %v4911_v48  ;;  %9627 = vmatprep.mubr.msk.f32.mxu0 %vm554_vm1, %v320_v0  ;;  %v3097_v48 = vadd.f32 %v12686_v29, %v9473_v54  ;;  %v3017_v0 = vadd.f32 %v12686_v29, %v12492_v47  ;;  %v4893_v5 = vmax.f32 %v3027_v8, 0.0  ;;  %v12734_v50 = vpop.f32.mrf.mxu1  ;;  %v323_v54 = vld [vmem:[%s14413_s0 + $0x928] sm:$0xff]  ;;  %v324_v8 = vld [vmem:[%s14413_s0 + $0x930] sm:$0xff] }
 0x24e   :  { %v12721_v15 = vpop.f32.mrf.mxu0  ;;  %8743 = vmatpush3.msra.mxu1 %v4895_v3  ;;  %14496 = vst [vmem:[#allocation76_spill] sm:$0xff] %v12734_v50  ;;  %v3092_v3 = vadd.f32 %v12686_v29, %v3091_v10  ;;  %v3012_v47 = vadd.f32 %v12686_v29, %v12505_v32 }
 0x24f   :  { %8744 = vmatprep.subr.mxu1 %v4910_v22  ;;  %v4892_v22 = vmax.f32 %v3022_v53, 0.0  ;;  %v12748_v10 = vpop.f32.mrf.mxu1 }
 0x250   :  { %v12731_v37 = vpop.f32.mrf.mxu0  ;;  %9628 = vmatmul.mubr.msk.f32.gmra.mxu0 %vm554_vm1, %v321_v55  ;;  %8745 = vmatpush3.msra.mxu1 %v4894_v60  ;;  %14497 = vst [vmem:[#allocation77_spill] sm:$0xff] %v12748_v10  ;;  %v4907_v55 = vmax.f32 %v3097_v48, 0.0  ;;  %v3007_v60 = vadd.f32 %v12686_v29, %v12468_v21  ;;  %v3002_v21 = vadd.f32 %v12686_v29, %v12481_v43  ;;  %v4890_v48 = vmax.f32 %v3012_v47, 0.0  ;;  %v344_v10 = vld [vmem:[%s14413_s0 + $0x9d0] sm:$0xff] }
 0x251   :  { %8746 = vmatprep.subr.mxu1 %v4909_v12  ;;  %9630 = vmatprep.mubr.msk.f32.mxu0 %vm554_vm1, %v322_v20  ;;  %v4891_v20 = vmax.f32 %v3017_v0, 0.0  ;;  %v12757_v53 = vpop.f32.mrf.mxu1  ;;  %v3082_v12 = vadd.f32 %v12686_v29, %v12652_v17 }
 0x252   :  { %v12743_v49 = vpop.f32.mrf.mxu0  ;;  %8747 = vmatpush3.msra.mxu1 %v4893_v5  ;;  %14498 = vst [vmem:[#allocation78_spill] sm:$0xff] %v12757_v53  ;;  %v4906_v5 = vmax.f32 %v3092_v3, 0.0  ;;  %v3077_v3 = vadd.f32 %v12686_v29, %v12627_v26  ;;  %v327_v26 = vld [vmem:[%s14413_s0 + $0x948] sm:$0xff] }
 0x253   :  { %8748 = vmatprep.subr.mxu1 %v4908_v63  ;;  %v326_v63 = vld [vmem:[%s14413_s0 + $0x940] sm:$0xff]  ;;  %v12772_v17 = vpop.f32.mrf.mxu1 }
 0x254   :  { %v12754_v32 = vpop.f32.mrf.mxu0  ;;  %9631 = vmatmul.mubr.msk.f32.gmra.mxu0 %vm554_vm1, %v323_v54  ;;  %8749 = vmatpush3.msra.mxu1 %v4892_v22  ;;  %14499 = vst [vmem:[#allocation79_spill] sm:$0xff] %v12772_v17  ;;  %v4905_v54 = vmax.f32 %v3087_v7, 0.0  ;;  %v2997_v22 = vadd.f32 %v12686_v29, %v12444_v24  ;;  %v2992_v24 = vadd.f32 %v12686_v29, %v12457_v42  ;;  %v4888_v7 = vmax.f32 %v3002_v21, 0.0  ;;  %v346_v17 = vld [vmem:[%s14413_s0 + $0x9e0] sm:$0xff] }
 0x255   :  { %8750 = vmatprep.subr.mxu1 %v4907_v55  ;;  %9633 = vmatprep.mubr.msk.f32.mxu0 %vm554_vm1, %v324_v8  ;;  %v4889_v8 = vmax.f32 %v3007_v60, 0.0  ;;  %v12781_v47 = vpop.f32.mrf.mxu1  ;;  %v3072_v55 = vadd.f32 %v12686_v29, %v12636_v14 }
 0x256   :  { %v12767_v0 = vpop.f32.mrf.mxu0  ;;  %8751 = vmatpush3.msra.mxu1 %v4891_v20  ;;  %14500 = vst [vmem:[#allocation80_spill] sm:$0xff] %v12781_v47  ;;  %v4904_v20 = vmax.f32 %v3082_v12, 0.0  ;;  %v3067_v12 = vadd.f32 %v12686_v29, %v12611_v46  ;;  %v329_v46 = vld [vmem:[%s14413_s0 + $0x958] sm:$0xff] }
 0x257   :  { %8752 = vmatprep.subr.mxu1 %v4906_v5  ;;  %v328_v5 = vld [vmem:[%s14413_s0 + $0x950] sm:$0xff]  ;;  %v12796_v14 = vpop.f32.mrf.mxu1 }
 0x258   :  { %v12778_v43 = vpop.f32.mrf.mxu0  ;;  %9634 = vmatmul.mubr.msk.f32.gmra.mxu0 %vm554_vm1, %v325_v35  ;;  %8753 = vmatpush3.msra.mxu1 %v4890_v48  ;;  %14501 = vst [vmem:[#allocation81_spill] sm:$0xff] %v12796_v14  ;;  %v4903_v35 = vmax.f32 %v3077_v3, 0.0  ;;  %v2987_v48 = vadd.f32 %v12686_v29, %v12420_v31  ;;  %v2982_v31 = vadd.f32 %v12686_v29, %v12433_v27  ;;  %v4886_v3 = vmax.f32 %v2992_v24, 0.0  ;;  %v348_v14 = vld [vmem:[%s14413_s0 + $0x9f0] sm:$0xff] }
 0x259   :  { %8754 = vmatprep.subr.mxu1 %v4905_v54  ;;  %9636 = vmatprep.mubr.msk.f32.mxu0 %vm554_vm1, %v326_v63  ;;  %v4887_v63 = vmax.f32 %v2997_v22, 0.0  ;;  %v12805_v21 = vpop.f32.mrf.mxu1  ;;  %v3062_v54 = vadd.f32 %v12686_v29, %v12620_v41 }
 0x25a   :  { %v12791_v60 = vpop.f32.mrf.mxu0  ;;  %8755 = vmatpush3.msra.mxu1 %v4889_v8  ;;  %14502 = vst [vmem:[#allocation82_spill] sm:$0xff] %v12805_v21  ;;  %v4902_v8 = vmax.f32 %v3072_v55, 0.0  ;;  %v3057_v55 = vadd.f32 %v12686_v29, %v12593_v9  ;;  %v331_v9 = vld [vmem:[%s14413_s0 + $0x968] sm:$0xff] }
 0x25b   :  { %8756 = vmatprep.subr.mxu1 %v4904_v20  ;;  %v330_v20 = vld [vmem:[%s14413_s0 + $0x960] sm:$0xff]  ;;  %v12820_v41 = vpop.f32.mrf.mxu1 }
 0x25c   :  { %v12802_v42 = vpop.f32.mrf.mxu0  ;;  %9637 = vmatmul.mubr.msk.f32.gmra.mxu0 %vm554_vm1, %v327_v26  ;;  %8757 = vmatpush3.msra.mxu1 %v4888_v7  ;;  %14503 = vst [vmem:[#allocation83_spill] sm:$0xff] %v12820_v41  ;;  %v4901_v26 = vmax.f32 %v3067_v12, 0.0  ;;  %v2977_v7 = vadd.f32 %v12686_v29, %v12397_v28  ;;  %v2972_v28 = vadd.f32 %v12686_v29, %v12409_v36  ;;  %v4884_v12 = vmax.f32 %v2982_v31, 0.0 }
 0x25d   :  { %8758 = vmatprep.subr.mxu1 %v4903_v35  ;;  %9639 = vmatprep.mubr.msk.f32.mxu0 %vm554_vm1, %v328_v5  ;;  %v4885_v5 = vmax.f32 %v2987_v48, 0.0  ;;  %v12829_v24 = vpop.f32.mrf.mxu1  ;;  %v3052_v35 = vadd.f32 %v12686_v29, %v12603_v19  ;;  %v2967_v36 = vadd.f32 %v12686_v29, %v12375_v61  ;;  %v2962_v61 = vadd.f32 %v12686_v29, %v12387_v25 }
 0x25e   :  { %v12815_v22 = vpop.f32.mrf.mxu0  ;;  %8759 = vmatpush3.msra.mxu1 %v4887_v63  ;;  %14504 = vst [vmem:[#allocation84_spill] sm:$0xff] %v12829_v24  ;;  %v4900_v63 = vmax.f32 %v3062_v54, 0.0  ;;  %v3047_v54 = vadd.f32 %v12686_v29, %v12571_v33  ;;  %v4883_v31 = vmax.f32 %v2977_v7, 0.0  ;;  %v333_v33 = vld [vmem:[%s14413_s0 + $0x978] sm:$0xff]  ;;  %v12881_v25 = vadd.s32 1664, %v11154_v45 }
 0x25f   :  { %8760 = vmatprep.subr.mxu1 %v4902_v8  ;;  %v332_v8 = vld [vmem:[%s14413_s0 + $0x970] sm:$0xff]  ;;  %v12844_v19 = vpop.f32.mrf.mxu1  ;;  %v4898_v56 = vmax.f32 %v3052_v35, 0.0 }
 0x260   :  { %v12826_v27 = vpop.f32.mrf.mxu0  ;;  %9640 = vmatmul.mubr.msk.f32.gmra.mxu0 %vm554_vm1, %v329_v46  ;;  %8761 = vmatpush3.msra.mxu1 %v4886_v3  ;;  %14505 = vst [vmem:[#allocation85_spill] sm:$0xff] %v12844_v19  ;;  %v4899_v46 = vmax.f32 %v3057_v55, 0.0  ;;  %v5246_v3 = vadd.s32 1280, %v11154_v45  ;;  %v4882_v55 = vmax.f32 %v2972_v28, 0.0  ;;  %v4897_v35 = vmax.f32 %v3047_v54, 0.0 }
 0x261   :  { %8762 = vmatprep.subr.mxu1 %v4901_v26  ;;  %9642 = vmatprep.mubr.msk.f32.mxu0 %vm554_vm1, %v330_v20  ;;  %v12854_v26 = vpop.f32.mrf.mxu1  ;;  %v4880_v54 = vmax.f32 %v2962_v61, 0.0  ;;  %vm5283_vm13 = vcmp.ge.s32.totalorder %v12881_v25, %v11183_v62  ;;  %vm5351_vm14 = vcmp.lt.s32.totalorder %v12881_v25, %v11185_v1  ;;  %v338_v61 = vld [vmem:[%s14413_s0 + $0x9a0] sm:$0xff]  ;;  %vm5315_vm4 = vcmp.ge.s32.totalorder %v12881_v25, %v11369_v18 }
 0x262   :  { %v12839_v48 = vpop.f32.mrf.mxu0  ;;  %8763 = vmatpush3.msra.mxu1 %v4885_v5  ;;  %14506 = vst [vmem:[#allocation86_spill] sm:$0xff] %v12854_v26  ;;  %v3042_v5 = vadd.f32 %v12686_v29, %v12585_v6  ;;  %vm5280_vm5 = vcmp.ge.s32.totalorder %v5246_v3, %v11183_v62  ;;  %vm5348_vm6 = vcmp.lt.s32.totalorder %v5246_v3, %v11185_v1  ;;  %vm5415_vm0 = vmand %vm5283_vm13, %vm5351_vm14 }
 0x263   :  { %8764 = vmatprep.subr.mxu1 %v4900_v63  ;;  %v334_v63 = vld [vmem:[%s14413_s0 + $0x980] sm:$0xff]  ;;  %v12869_v6 = vpop.f32.mrf.mxu1  ;;  %vm5412_vm9 = vmand %vm5280_vm5, %vm5348_vm6  ;;  %vm5312_vm11 = vcmp.ge.s32.totalorder %v5246_v3, %v11369_v18  ;;  %vm5380_vm12 = vcmp.lt.s32.totalorder %v5246_v3, %v11371_v38  ;;  %vm5383_vm5 = vcmp.lt.s32.totalorder %v12881_v25, %v11371_v38  ;;  %v369_v25 = vld [vmem:[%s14413_s0 + $0xa98] sm:$0xff] }
 0x264   :  { %v12851_v20 = vpop.f32.mrf.mxu0  ;;  %9643 = vmatmul.mubr.msk.f32.gmra.mxu0 %vm554_vm1, %v331_v9  ;;  %8765 = vmatpush3.msra.mxu1 %v4884_v12  ;;  %14507 = vst [vmem:[#allocation87_spill] sm:$0xff] %v12869_v6  ;;  %v4881_v9 = vmax.f32 %v2967_v36, 0.0  ;;  %v4896_v28 = vmax.f32 %v3042_v5, 0.0  ;;  %v336_v36 = vld [vmem:[%s14413_s0 + $0x990] sm:$0xff]  ;;  %vm5444_vm15 = vmand %vm5312_vm11, %vm5380_vm12 }
 0x265   :  { %8766 = vmatprep.subr.mxu1 %v4899_v46  ;;  %9645 = vmatprep.mubr.msk.f32.mxu0 %vm554_vm1, %v332_v8  ;;  %v335_v8 = vld [vmem:[%s14413_s0 + $0x988] sm:$0xff]  ;;  %vm5447_vm7 = vmand %vm5315_vm4, %vm5383_vm5 }
 0x266   :  { %v12864_v7 = vpop.f32.mrf.mxu0  ;;  %8767 = vmatpush3.msra.mxu1 %v4883_v31 }
 0x267   :  { %8768 = vmatprep.subr.mxu1 %v4898_v56  ;;  %v12883_v56 = vpop.f32.mrf.mxu1 }
 0x268   :  { %v12873_v12 = vpop.f32.mrf.mxu0  ;;  %9646 = vmatmul.mubr.msk.f32.gmra.mxu0 %vm554_vm1, %v333_v33  ;;  %8769 = vmatpush3.msra.mxu1 %v4882_v55  ;;  %14508 = vst [vmem:[#allocation88_spill] sm:$0xff] %v12883_v56 }
 0x269   :  { %8770 = vmatprep.subr.mxu1 %v4897_v35  ;;  %9648 = vmatprep.mubr.msk.f32.mxu0 %vm554_vm1, %v334_v63  ;;  %v12898_v31 = vpop.f32.mrf.mxu1 }
 0x26a   :  { %v12889_v46 = vpop.f32.mrf.mxu0  ;;  %8771 = vmatpush3.msra.mxu1 %v4881_v9  ;;  %14509 = vst [vmem:[#allocation89_spill] sm:$0xff] %v12898_v31  ;;  %v339_v9 = vld [vmem:[%s14413_s0 + $0x9a8] sm:$0xff] }
 0x26b   :  { %8772 = vmatprep.subr.mxu1 %v4896_v28  ;;  %v12912_v33 = vpop.f32.mrf.mxu1  ;;  %v3192_v24 = vadd.f32 %v12686_v29, %v12889_v46 }
 0x26c   :  { %v12905_v5 = vpop.f32.mrf.mxu0  ;;  %9649 = vmatmul.mubr.msk.f32.gmra.mxu0 %vm554_vm1, %v335_v8  ;;  %8773 = vmatpush3.msra.mxu1 %v4880_v54  ;;  %14510 = vst [vmem:[#allocation90_spill] sm:$0xff] %v12912_v33  ;;  %v340_v8 = vld [vmem:[%s14413_s0 + $0x9b0] sm:$0xff]  ;;  %v342_v33 = vld [vmem:[%s14413_s0 + $0x9c0] sm:$0xff] }
 0x26d   :  { %9651 = vmatprep.mubr.msk.f32.mxu0 %vm554_vm1, %v336_v36  ;;  %7977 = vmatmul.mubr.msk.f32.vlgmr.msra.gmra.mxu1 %vm5412_vm9, %v14441_v58  ;;  %v12925_v55 = vpop.f32.mrf.mxu1 }
 0x26e   :  { %v12919_v3 = vpop.f32.mrf.mxu0  ;;  %7978 = vmatprep.mubr.msk.f32.mxu1 %vm5445_vm10, %v14441_v58  ;;  %14511 = vst [vmem:[#allocation91_spill] sm:$0xff] %v12925_v55 }
 0x26f   :  { %v12930_v35 = vpop.f32.mrf.mxu1 }
 0x270   :  { %v12927_v63 = vpop.f32.mrf.mxu0  ;;  %9652 = vmatmul.mubr.msk.f32.gmra.mxu0 %vm554_vm1, %v337_v57  ;;  %14512 = vst [vmem:[#allocation92_spill] sm:$0xff] %v12930_v35 }
 0x271   :  { %9654 = vmatprep.mubr.msk.f32.mxu0 %vm554_vm1, %v338_v61  ;;  %7979 = vmatmul.mubr.msk.f32.gmra.mxu1 %vm5444_vm15, %v14441_v58  ;;  %v12943_v54 = vpop.f32.mrf.mxu1  ;;  %v341_v61 = vld [vmem:[%s14413_s0 + $0x9b8] sm:$0xff] }
 0x272   :  { %v12937_v28 = vpop.f32.mrf.mxu0  ;;  %7980 = vmatprep.mubr.msk.f32.mxu1 %vm5415_vm0, %v14441_v58  ;;  %14513 = vst [vmem:[#allocation93_spill] sm:$0xff] %v12943_v54 }
 0x273   :  { %v12948_v57 = vpop.f32.mrf.mxu1 }
 0x274   :  { %v12945_v36 = vpop.f32.mrf.mxu0  ;;  %9655 = vmatmul.mubr.msk.f32.gmra.mxu0 %vm554_vm1, %v339_v9  ;;  %14514 = vst [vmem:[#allocation94_spill] sm:$0xff] %v12948_v57 }
 0x275   :  { %9657 = vmatprep.mubr.msk.f32.mxu0 %vm554_vm1, %v340_v8  ;;  %v12959_v35 = vpop.f32.mrf.mxu1  ;;  %v343_v8 = vld [vmem:[%s14413_s0 + $0x9c8] sm:$0xff] }
 0x276   :  { %v12954_v55 = vpop.f32.mrf.mxu0  ;;  %14515 = vst [vmem:[#allocation95_spill] sm:$0xff] %v12959_v35 }
 0x277   :  { %v12964_v9 = vpop.f32.mrf.mxu1 }
 0x278   :  { %v12961_v54 = vpop.f32.mrf.mxu0  ;;  %9658 = vmatmul.mubr.msk.f32.gmra.mxu0 %vm554_vm1, %v341_v61  ;;  %14516 = vst [vmem:[#allocation96_spill] sm:$0xff] %v12964_v9 }
 0x279   :  { %9660 = vmatprep.mubr.msk.f32.mxu0 %vm554_vm1, %v342_v33  ;;  %v12975_v50 = vpop.f32.mrf.mxu1  ;;  %v345_v33 = vld [vmem:[%s14413_s0 + $0x9d8] sm:$0xff] }
 0x27a   :  { %v12970_v57 = vpop.f32.mrf.mxu0  ;;  %14517 = vst [vmem:[#allocation97_spill] sm:$0xff] %v12975_v50 }
 0x27b   :  { %v12980_v61 = vpop.f32.mrf.mxu1 }
 0x27c   :  { %v12977_v35 = vpop.f32.mrf.mxu0  ;;  %9661 = vmatmul.mubr.msk.f32.gmra.mxu0 %vm554_vm1, %v343_v8  ;;  %14518 = vst [vmem:[#allocation98_spill] sm:$0xff] %v12980_v61 }
 0x27d   :  { %9663 = vmatprep.mubr.msk.f32.mxu0 %vm554_vm1, %v344_v10  ;;  %v12991_v53 = vpop.f32.mrf.mxu1  ;;  %v347_v10 = vld [vmem:[%s14413_s0 + $0x9e8] sm:$0xff] }
 0x27e   :  { %v12986_v9 = vpop.f32.mrf.mxu0  ;;  %14519 = vst [vmem:[#allocation99_spill] sm:$0xff] %v12991_v53 }
 0x27f   :  { %v12994_v8 = vpop.f32.mrf.mxu1 }
 0x280   :  { %v9521_v50 = vpop.f32.mrf.mxu0  ;;  %9664 = vmatmul.mubr.msk.f32.gmra.mxu0 %vm554_vm1, %v345_v33  ;;  %14520 = vst [vmem:[#allocation100_spill] sm:$0xff] %v12994_v8  ;;  %v350_v8 = vld [vmem:[%s14413_s0 + $0xa00] sm:$0xff] }
 0x281   :  { %9666 = vmatprep.mubr.msk.f32.mxu0 %vm554_vm1, %v346_v17  ;;  %v13003_v47 = vpop.f32.mrf.mxu1  ;;  %v349_v17 = vld [vmem:[%s14413_s0 + $0x9f8] sm:$0xff] }
 0x282   :  { %v3251_v61 = vpop.f32.mrf.mxu0  ;;  %14521 = vst [vmem:[#allocation101_spill] sm:$0xff] %v13003_v47  ;;  %v3197_v47 = vadd.f32 %v12686_v29, %v12873_v12  ;;  %v352_v12 = vld [vmem:[%s14413_s0 + $0xa10] sm:$0xff] }
 0x283   :  { %v13006_v53 = vpop.f32.mrf.mxu1 }
 0x284   :  { %v9524_v41 = vpop.f32.mrf.mxu0  ;;  %9667 = vmatmul.mubr.msk.f32.gmra.mxu0 %vm554_vm1, %v347_v10  ;;  %14522 = vst [vmem:[#allocation102_spill] sm:$0xff] %v13006_v53  ;;  %v351_v53 = vld [vmem:[%s14413_s0 + $0xa08] sm:$0xff]  ;;  %v4927_v26 = vmax.f32 %v3197_v47, 0.0  ;;  %v4926_v47 = vmax.f32 %v3192_v24, 0.0 }
 0x285   :  { %9669 = vmatprep.mubr.msk.f32.mxu0 %vm554_vm1, %v348_v14  ;;  %v13015_v21 = vpop.f32.mrf.mxu1 }
 0x286   :  { %v3261_v33 = vpop.f32.mrf.mxu0  ;;  %14523 = vst [vmem:[#allocation103_spill] sm:$0xff] %v13015_v21 }
 0x287   :  { %v13020_v10 = vpop.f32.mrf.mxu1  ;;  %v3262_v31 = vadd.f32 %v12686_v29, %v3261_v33 }
 0x288   :  { %v9527_v19 = vpop.f32.mrf.mxu0  ;;  %9670 = vmatmul.mubr.msk.f32.gmra.mxu0 %vm554_vm1, %v349_v17  ;;  %14524 = vst [vmem:[#allocation104_spill] sm:$0xff] %v13020_v10  ;;  %v3267_v17 = vadd.f32 %v12686_v29, %v9524_v41  ;;  %v3182_v41 = vadd.f32 %v12686_v29, %v12864_v7 }
 0x289   :  { %v3277_v14 = vadd.f32 %v12686_v29, %v9527_v19  ;;  %9672 = vmatprep.mubr.msk.f32.mxu0 %vm554_vm1, %v350_v8  ;;  %v13032_v6 = vpop.f32.mrf.mxu1  ;;  %v3187_v8 = vadd.f32 %v12686_v29, %v12851_v20  ;;  %v4940_v7 = vmax.f32 %v3262_v31, 0.0  ;;  %v3247_v31 = vadd.f32 %v12686_v29, %v12977_v35  ;;  %v357_v35 = vld [vmem:[%s14413_s0 + $0xa38] sm:$0xff] }
 0x28a   :  { %v3271_v21 = vpop.f32.mrf.mxu0  ;;  %14525 = vst [vmem:[#allocation105_spill] sm:$0xff] %v13032_v6 }
 0x28b   :  { %v4943_v10 = vmax.f32 %v3277_v14, 0.0  ;;  %v3272_v19 = vadd.f32 %v12686_v29, %v3271_v21  ;;  %v13041_v46 = vpop.f32.mrf.mxu1  ;;  %v353_v21 = vld [vmem:[%s14413_s0 + $0xa18] sm:$0xff]  ;;  %v4941_v14 = vmax.f32 %v3267_v17, 0.0 }
 0x28c   :  { %v13038_v39 = vpop.f32.mrf.mxu0  ;;  %9673 = vmatmul.mubr.msk.f32.gmra.mxu0 %vm554_vm1, %v351_v53  ;;  %14526 = vst [vmem:[#allocation106_spill] sm:$0xff] %v13041_v46  ;;  %v354_v53 = vld [vmem:[%s14413_s0 + $0xa20] sm:$0xff] }
 0x28d   :  { %v4942_v56 = vmax.f32 %v3272_v19, 0.0  ;;  %8780 = vmatprep.subr.mxu1 %v4943_v10  ;;  %9675 = vmatprep.mubr.msk.f32.mxu0 %vm554_vm1, %v352_v12  ;;  %v13055_v33 = vpop.f32.mrf.mxu1  ;;  %v3257_v10 = vadd.f32 %v12686_v29, %v9521_v50  ;;  %v3177_v12 = vadd.f32 %v12686_v29, %v12826_v27  ;;  %v4925_v19 = vmax.f32 %v3187_v8, 0.0  ;;  %v355_v50 = vld [vmem:[%s14413_s0 + $0xa28] sm:$0xff]  ;;  %v356_v8 = vld [vmem:[%s14413_s0 + $0xa30] sm:$0xff] }
 0x28e   :  { %v13050_v20 = vpop.f32.mrf.mxu0  ;;  %8781 = vmatpush3.msra.mxu1 %v4927_v26  ;;  %14527 = vst [vmem:[#allocation107_spill] sm:$0xff] %v13055_v33  ;;  %v3252_v26 = vadd.f32 %v12686_v29, %v3251_v61  ;;  %v3172_v27 = vadd.f32 %v12686_v29, %v12839_v48 }
 0x28f   :  { %8782 = vmatprep.subr.mxu1 %v4942_v56  ;;  %v13063_v24 = vpop.f32.mrf.mxu1  ;;  %v4924_v56 = vmax.f32 %v3182_v41, 0.0 }
 0x290   :  { %v13060_v46 = vpop.f32.mrf.mxu0  ;;  %9676 = vmatmul.mubr.msk.f32.gmra.mxu0 %vm554_vm1, %v353_v21  ;;  %8783 = vmatpush3.msra.mxu1 %v4926_v47  ;;  %14528 = vst [vmem:[#allocation108_spill] sm:$0xff] %v13063_v24  ;;  %v4939_v21 = vmax.f32 %v3257_v10, 0.0  ;;  %v3167_v47 = vadd.f32 %v12686_v29, %v12802_v42  ;;  %v3162_v42 = vadd.f32 %v12686_v29, %v12815_v22  ;;  %v4922_v10 = vmax.f32 %v3172_v27, 0.0  ;;  %v374_v24 = vld [vmem:[%s14413_s0 + $0xac0] sm:$0xff] }
 0x291   :  { %8784 = vmatprep.subr.mxu1 %v4941_v14  ;;  %9678 = vmatprep.mubr.msk.f32.mxu0 %vm554_vm1, %v354_v53  ;;  %v13077_v61 = vpop.f32.mrf.mxu1  ;;  %v4923_v53 = vmax.f32 %v3177_v12, 0.0  ;;  %v3242_v14 = vadd.f32 %v12686_v29, %v12986_v9 }
 0x292   :  { %v13072_v17 = vpop.f32.mrf.mxu0  ;;  %8785 = vmatpush3.msra.mxu1 %v4925_v19  ;;  %14529 = vst [vmem:[#allocation109_spill] sm:$0xff] %v13077_v61  ;;  %v4938_v19 = vmax.f32 %v3252_v26, 0.0  ;;  %v3237_v26 = vadd.f32 %v12686_v29, %v12961_v54  ;;  %v359_v54 = vld [vmem:[%s14413_s0 + $0xa48] sm:$0xff] }
 0x293   :  { %8786 = vmatprep.subr.mxu1 %v4940_v7  ;;  %v13086_v41 = vpop.f32.mrf.mxu1  ;;  %v358_v7 = vld [vmem:[%s14413_s0 + $0xa40] sm:$0xff] }
 0x294   :  { %v13083_v48 = vpop.f32.mrf.mxu0  ;;  %9679 = vmatmul.mubr.msk.f32.gmra.mxu0 %vm554_vm1, %v355_v50  ;;  %8787 = vmatpush3.msra.mxu1 %v4924_v56  ;;  %14530 = vst [vmem:[#allocation110_spill] sm:$0xff] %v13086_v41  ;;  %v4937_v50 = vmax.f32 %v3247_v31, 0.0  ;;  %v3157_v56 = vadd.f32 %v12686_v29, %v12778_v43  ;;  %v3152_v43 = vadd.f32 %v12686_v29, %v12791_v60  ;;  %v4920_v31 = vmax.f32 %v3162_v42, 0.0 }
 0x295   :  { %8788 = vmatprep.subr.mxu1 %v4939_v21  ;;  %9681 = vmatprep.mubr.msk.f32.mxu0 %vm554_vm1, %v356_v8  ;;  %v13101_v9 = vpop.f32.mrf.mxu1  ;;  %v4921_v8 = vmax.f32 %v3167_v47, 0.0  ;;  %v3232_v21 = vadd.f32 %v12686_v29, %v12970_v57 }
 0x296   :  { %v13096_v12 = vpop.f32.mrf.mxu0  ;;  %8789 = vmatpush3.msra.mxu1 %v4923_v53  ;;  %14531 = vst [vmem:[#allocation111_spill] sm:$0xff] %v13101_v9  ;;  %v4936_v53 = vmax.f32 %v3242_v14, 0.0  ;;  %v3227_v14 = vadd.f32 %v12686_v29, %v12945_v36  ;;  %v361_v36 = vld [vmem:[%s14413_s0 + $0xa58] sm:$0xff] }
 0x297   :  { %8790 = vmatprep.subr.mxu1 %v4938_v19  ;;  %v13110_v27 = vpop.f32.mrf.mxu1  ;;  %v360_v19 = vld [vmem:[%s14413_s0 + $0xa50] sm:$0xff] }
 0x298   :  { %v13107_v22 = vpop.f32.mrf.mxu0  ;;  %9682 = vmatmul.mubr.msk.f32.gmra.mxu0 %vm554_vm1, %v357_v35  ;;  %8791 = vmatpush3.msra.mxu1 %v4922_v10  ;;  %14532 = vst [vmem:[#allocation112_spill] sm:$0xff] %v13110_v27  ;;  %v4935_v35 = vmax.f32 %v3237_v26, 0.0  ;;  %v3147_v10 = vadd.f32 %v12686_v29, %v12754_v32  ;;  %v3142_v32 = vadd.f32 %v12686_v29, %v12767_v0  ;;  %v4918_v26 = vmax.f32 %v3152_v43, 0.0 }
 0x299   :  { %8792 = vmatprep.subr.mxu1 %v4937_v50  ;;  %9684 = vmatprep.mubr.msk.f32.mxu0 %vm554_vm1, %v358_v7  ;;  %v13125_v57 = vpop.f32.mrf.mxu1  ;;  %v4919_v7 = vmax.f32 %v3157_v56, 0.0  ;;  %v3222_v50 = vadd.f32 %v12686_v29, %v12954_v55 }
 0x29a   :  { %v13120_v47 = vpop.f32.mrf.mxu0  ;;  %8793 = vmatpush3.msra.mxu1 %v4921_v8  ;;  %14533 = vst [vmem:[#allocation113_spill] sm:$0xff] %v13125_v57  ;;  %v4934_v8 = vmax.f32 %v3232_v21, 0.0  ;;  %v3217_v21 = vadd.f32 %v12686_v29, %v12927_v63  ;;  %v363_v63 = vld [vmem:[%s14413_s0 + $0xa68] sm:$0xff] }
 0x29b   :  { %8794 = vmatprep.subr.mxu1 %v4936_v53  ;;  %v13134_v42 = vpop.f32.mrf.mxu1  ;;  %v362_v53 = vld [vmem:[%s14413_s0 + $0xa60] sm:$0xff] }
 0x29c   :  { %v13131_v60 = vpop.f32.mrf.mxu0  ;;  %9685 = vmatmul.mubr.msk.f32.gmra.mxu0 %vm554_vm1, %v359_v54  ;;  %8795 = vmatpush3.msra.mxu1 %v4920_v31  ;;  %14534 = vst [vmem:[#allocation114_spill] sm:$0xff] %v13134_v42  ;;  %v4933_v54 = vmax.f32 %v3227_v14, 0.0  ;;  %v3137_v31 = vadd.f32 %v12686_v29, %v12731_v37  ;;  %v3132_v37 = vadd.f32 %v12686_v29, %v12743_v49  ;;  %v4916_v14 = vmax.f32 %v3142_v32, 0.0 }
 0x29d   :  { %8796 = vmatprep.subr.mxu1 %v4935_v35  ;;  %9687 = vmatprep.mubr.msk.f32.mxu0 %vm554_vm1, %v360_v19  ;;  %v13149_v55 = vpop.f32.mrf.mxu1  ;;  %v4917_v19 = vmax.f32 %v3147_v10, 0.0  ;;  %v3212_v35 = vadd.f32 %v12686_v29, %v12937_v28  ;;  %v3127_v49 = vadd.f32 %v12686_v29, %v12709_v40  ;;  %v3122_v40 = vadd.f32 %v12686_v29, %v12721_v15 }
 0x29e   :  { %v13144_v56 = vpop.f32.mrf.mxu0  ;;  %8797 = vmatpush3.msra.mxu1 %v4919_v7  ;;  %14535 = vst [vmem:[#allocation115_spill] sm:$0xff] %v13149_v55  ;;  %v4932_v7 = vmax.f32 %v3222_v50, 0.0  ;;  %v3207_v50 = vadd.f32 %v12686_v29, %v12905_v5  ;;  %v4915_v32 = vmax.f32 %v3137_v31, 0.0  ;;  %v365_v5 = vld [vmem:[%s14413_s0 + $0xa78] sm:$0xff]  ;;  %v13210_v15 = vadd.s32 1920, %v11154_v45 }
 0x29f   :  { %8798 = vmatprep.subr.mxu1 %v4934_v8  ;;  %v13158_v43 = vpop.f32.mrf.mxu1  ;;  %v364_v8 = vld [vmem:[%s14413_s0 + $0xa70] sm:$0xff]  ;;  %v4930_v33 = vmax.f32 %v3212_v35, 0.0 }
 0x2a0   :  { %v13155_v0 = vpop.f32.mrf.mxu0  ;;  %9688 = vmatmul.mubr.msk.f32.gmra.mxu0 %vm554_vm1, %v361_v36  ;;  %8799 = vmatpush3.msra.mxu1 %v4918_v26  ;;  %14536 = vst [vmem:[#allocation116_spill] sm:$0xff] %v13158_v43  ;;  %v4931_v36 = vmax.f32 %v3217_v21, 0.0  ;;  %v5248_v26 = vadd.s32 1536, %v11154_v45  ;;  %v4914_v21 = vmax.f32 %v3132_v37, 0.0  ;;  %v4929_v35 = vmax.f32 %v3207_v50, 0.0 }
 0x2a1   :  { %8800 = vmatprep.subr.mxu1 %v4933_v54  ;;  %9690 = vmatprep.mubr.msk.f32.mxu0 %vm554_vm1, %v362_v53  ;;  %v13173_v28 = vpop.f32.mrf.mxu1  ;;  %v4912_v50 = vmax.f32 %v3122_v40, 0.0  ;;  %vm5285_vm10 = vcmp.ge.s32.totalorder %v13210_v15, %v11183_v62  ;;  %vm5353_vm11 = vcmp.lt.s32.totalorder %v13210_v15, %v11185_v1  ;;  %v370_v40 = vld [vmem:[%s14413_s0 + $0xaa0] sm:$0xff]  ;;  %vm5317_vm0 = vcmp.ge.s32.totalorder %v13210_v15, %v11369_v18 }
 0x2a2   :  { %v13168_v10 = vpop.f32.mrf.mxu0  ;;  %8801 = vmatpush3.msra.mxu1 %v4917_v19  ;;  %14537 = vst [vmem:[#allocation117_spill] sm:$0xff] %v13173_v28  ;;  %v3202_v19 = vadd.f32 %v12686_v29, %v12919_v3  ;;  %vm5282_vm2 = vcmp.ge.s32.totalorder %v5248_v26, %v11183_v62  ;;  %vm5350_vm3 = vcmp.lt.s32.totalorder %v5248_v26, %v11185_v1  ;;  %vm5417_vm13 = vmand %vm5285_vm10, %vm5353_vm11  ;;  %v378_v28 = vld [vmem:[%s14413_s0 + $0xae0] sm:$0xff] }
 0x2a3   :  { %8802 = vmatprep.subr.mxu1 %v4932_v7  ;;  %v13183_v54 = vpop.f32.mrf.mxu1  ;;  %v366_v7 = vld [vmem:[%s14413_s0 + $0xa80] sm:$0xff]  ;;  %vm5414_vm6 = vmand %vm5282_vm2, %vm5350_vm3  ;;  %vm5314_vm8 = vcmp.ge.s32.totalorder %v5248_v26, %v11369_v18  ;;  %vm5382_vm9 = vcmp.lt.s32.totalorder %v5248_v26, %v11371_v38  ;;  %vm5385_vm2 = vcmp.lt.s32.totalorder %v13210_v15, %v11371_v38  ;;  %v400_v15 = vld [vmem:[%s14413_s0 + $0xb90] sm:$0xff] }
 0x2a4   :  { %v13180_v53 = vpop.f32.mrf.mxu0  ;;  %9691 = vmatmul.mubr.msk.f32.gmra.mxu0 %vm554_vm1, %v363_v63  ;;  %8803 = vmatpush3.msra.mxu1 %v4916_v14  ;;  %14538 = vst [vmem:[#allocation118_spill] sm:$0xff] %v13183_v54  ;;  %v4913_v63 = vmax.f32 %v3127_v49, 0.0  ;;  %v4928_v37 = vmax.f32 %v3202_v19, 0.0  ;;  %v368_v49 = vld [vmem:[%s14413_s0 + $0xa90] sm:$0xff]  ;;  %vm5446_vm12 = vmand %vm5314_vm8, %vm5382_vm9 }
 0x2a5   :  { %8804 = vmatprep.subr.mxu1 %v4931_v36  ;;  %9693 = vmatprep.mubr.msk.f32.mxu0 %vm554_vm1, %v364_v8  ;;  %v13198_v3 = vpop.f32.mrf.mxu1  ;;  %v367_v8 = vld [vmem:[%s14413_s0 + $0xa88] sm:$0xff]  ;;  %vm5449_vm4 = vmand %vm5317_vm0, %vm5385_vm2 }
 0x2a6   :  { %v13193_v31 = vpop.f32.mrf.mxu0  ;;  %8805 = vmatpush3.msra.mxu1 %v4915_v32  ;;  %14539 = vst [vmem:[#allocation119_spill] sm:$0xff] %v13198_v3 }
 0x2a7   :  { %8806 = vmatprep.subr.mxu1 %v4930_v33  ;;  %v13212_v33 = vpop.f32.mrf.mxu1 }
 0x2a8   :  { %v13202_v14 = vpop.f32.mrf.mxu0  ;;  %9694 = vmatmul.mubr.msk.f32.gmra.mxu0 %vm554_vm1, %v365_v5  ;;  %8807 = vmatpush3.msra.mxu1 %v4914_v21  ;;  %14540 = vst [vmem:[#allocation120_spill] sm:$0xff] %v13212_v33 }
 0x2a9   :  { %8808 = vmatprep.subr.mxu1 %v4929_v35  ;;  %9696 = vmatprep.mubr.msk.f32.mxu0 %vm554_vm1, %v366_v7  ;;  %v13227_v32 = vpop.f32.mrf.mxu1 }
 0x2aa   :  { %v13218_v36 = vpop.f32.mrf.mxu0  ;;  %8809 = vmatpush3.msra.mxu1 %v4913_v63  ;;  %14541 = vst [vmem:[#allocation121_spill] sm:$0xff] %v13227_v32  ;;  %v371_v63 = vld [vmem:[%s14413_s0 + $0xaa8] sm:$0xff] }
 0x2ab   :  { %8810 = vmatprep.subr.mxu1 %v4928_v37  ;;  %v8584_v5 = vpop.f32.mrf.mxu1  ;;  %v3352_v30 = vadd.f32 %v12686_v29, %v13218_v36 }
 0x2ac   :  { %v13234_v19 = vpop.f32.mrf.mxu0  ;;  %9697 = vmatmul.mubr.msk.f32.gmra.mxu0 %vm554_vm1, %v367_v8  ;;  %8811 = vmatpush3.msra.mxu1 %v4912_v50  ;;  %v372_v50 = vld [vmem:[%s14413_s0 + $0xab0] sm:$0xff] }
 0x2ad   :  { %7981 = vmatmul.mubr.msk.f32.vlgmr.msra.gmra.mxu1 %vm5414_vm6, %v14441_v58  ;;  %9699 = vmatprep.mubr.msk.f32.mxu0 %vm554_vm1, %v368_v49  ;;  %v8585_v21 = vpop.f32.mrf.mxu1 }
 0x2ae   :  { %v13246_v26 = vpop.f32.mrf.mxu0  ;;  %7982 = vmatprep.mubr.msk.f32.mxu1 %vm5447_vm7, %v14441_v58  ;;  %v8586_v37 = vadd.f32 %v8585_v21, %v8584_v5  ;;  %v373_v5 = vld [vmem:[%s14413_s0 + $0xab8] sm:$0xff] }
 0x2af   :  { %v8587_v35 = vpop.f32.mrf.mxu1 }
 0x2b0   :  { %v13252_v7 = vpop.f32.mrf.mxu0  ;;  %9700 = vmatmul.mubr.msk.f32.gmra.mxu0 %vm554_vm1, %v369_v25 }
 0x2b1   :  { %7983 = vmatmul.mubr.msk.f32.gmra.mxu1 %vm5446_vm12, %v14441_v58  ;;  %9702 = vmatprep.mubr.msk.f32.mxu0 %vm554_vm1, %v370_v40  ;;  %v8588_v49 = vpop.f32.mrf.mxu1 }
 0x2b2   :  { %v13260_v8 = vpop.f32.mrf.mxu0  ;;  %7984 = vmatprep.mubr.msk.f32.mxu1 %vm5417_vm13, %v14441_v58  ;;  %v8589_v40 = vadd.f32 %v8588_v49, %v8587_v35  ;;  %v376_v49 = vld [vmem:[%s14413_s0 + $0xad0] sm:$0xff] }
 0x2b3   :  { %v8622_v61 = vpop.f32.mrf.mxu1 }
 0x2b4   :  { %v13266_v25 = vpop.f32.mrf.mxu0  ;;  %9703 = vmatmul.mubr.msk.f32.gmra.mxu0 %vm554_vm1, %v371_v63 }
 0x2b5   :  { %9705 = vmatprep.mubr.msk.f32.mxu0 %vm554_vm1, %v372_v50  ;;  %v8623_v9 = vpop.f32.mrf.mxu1  ;;  %v375_v50 = vld [vmem:[%s14413_s0 + $0xac8] sm:$0xff] }
 0x2b6   :  { %v13273_v21 = vpop.f32.mrf.mxu0  ;;  %v8624_v57 = vadd.f32 %v8623_v9, %v8622_v61 }
 0x2b7   :  { %v8625_v63 = vpop.f32.mrf.mxu1 }
 0x2b8   :  { %v13278_v41 = vpop.f32.mrf.mxu0  ;;  %9706 = vmatmul.mubr.msk.f32.gmra.mxu0 %vm554_vm1, %v373_v5  ;;  %v5672_v55 = vadd.f32 %v8624_v57, %v8586_v37 }
 0x2b9   :  { %9708 = vmatprep.mubr.msk.f32.mxu0 %vm554_vm1, %v374_v24  ;;  %v8626_v27 = vpop.f32.mrf.mxu1  ;;  %v377_v24 = vld [vmem:[%s14413_s0 + $0xad8] sm:$0xff] }
 0x2ba   :  { %v13285_v35 = vpop.f32.mrf.mxu0  ;;  %v8627_v61 = vadd.f32 %v8626_v27, %v8625_v63  ;;  %v380_v63 = vld [vmem:[%s14413_s0 + $0xaf0] sm:$0xff] }
 0x2bb   :  { %v8660_v5 = vpop.f32.mrf.mxu1 }
 0x2bc   :  { %v13290_v42 = vpop.f32.mrf.mxu0  ;;  %9709 = vmatmul.mubr.msk.f32.gmra.mxu0 %vm554_vm1, %v375_v50  ;;  %v5677_v57 = vadd.f32 %v8627_v61, %v8589_v40 }
 0x2bd   :  { %9711 = vmatprep.mubr.msk.f32.mxu0 %vm554_vm1, %v376_v49  ;;  %v8661_v43 = vpop.f32.mrf.mxu1  ;;  %v379_v49 = vld [vmem:[%s14413_s0 + $0xae8] sm:$0xff] }
 0x2be   :  { %v13297_v9 = vpop.f32.mrf.mxu0  ;;  %v8662_v3 = vadd.f32 %v8661_v43, %v8660_v5  ;;  %v382_v43 = vld [vmem:[%s14413_s0 + $0xb00] sm:$0xff] }
 0x2bf   :  { %v8663_v50 = vpop.f32.mrf.mxu1 }
 0x2c0   :  { %v9569_v37 = vpop.f32.mrf.mxu0  ;;  %9712 = vmatmul.mubr.msk.f32.gmra.mxu0 %vm554_vm1, %v377_v24  ;;  %v5747_v6 = vadd.f32 %v8662_v3, %v5672_v55  ;;  %v3357_v55 = vadd.f32 %v12686_v29, %v13202_v14  ;;  %v384_v14 = vld [vmem:[%s14413_s0 + $0xb10] sm:$0xff] }
 0x2c1   :  { %9714 = vmatprep.mubr.msk.f32.mxu0 %vm554_vm1, %v378_v28  ;;  %v8664_v54 = vpop.f32.mrf.mxu1  ;;  %v381_v28 = vld [vmem:[%s14413_s0 + $0xaf8] sm:$0xff] }
 0x2c2   :  { %v3411_v27 = vpop.f32.mrf.mxu0  ;;  %v8665_v24 = vadd.f32 %v8664_v54, %v8663_v50  ;;  %v383_v54 = vld [vmem:[%s14413_s0 + $0xb08] sm:$0xff]  ;;  %v4959_v16 = vmax.f32 %v3357_v55, 0.0  ;;  %v4958_v55 = vmax.f32 %v3352_v30, 0.0 }
 0x2c3   :  { %v8698_v40 = vpop.f32.mrf.mxu1 }
 0x2c4   :  { %v9572_v32 = vpop.f32.mrf.mxu0  ;;  %9715 = vmatmul.mubr.msk.f32.gmra.mxu0 %vm554_vm1, %v379_v49  ;;  %v5752_v33 = vadd.f32 %v8665_v24, %v5677_v57 }
 0x2c5   :  { %9717 = vmatprep.mubr.msk.f32.mxu0 %vm554_vm1, %v380_v63  ;;  %v8699_v5 = vpop.f32.mrf.mxu1 }
 0x2c6   :  { %v3421_v61 = vpop.f32.mrf.mxu0  ;;  %v8700_v50 = vadd.f32 %v8699_v5, %v8698_v40  ;;  %v13343_v5 = vld [vmem:[%s14415_s2] ss:$0 sm:$0xff] }
 0x2c7   :  { %v8701_v49 = vpop.f32.mrf.mxu1 }
 0x2c8   :  { %v9575_v3 = vpop.f32.mrf.mxu0  ;;  %9718 = vmatmul.mubr.msk.f32.gmra.mxu0 %vm554_vm1, %v381_v28  ;;  %v3427_v28 = vadd.f32 %v12686_v29, %v9572_v32  ;;  %v13333_v4 = vadd.f32 %v8700_v50, %v5747_v6  ;;  %v3422_v32 = vadd.f32 %v13343_v5, %v3421_v61  ;;  %v386_v61 = vld [vmem:[%s14413_s0 + $0xb20] sm:$0xff]  ;;  %v3417_v50 = vadd.f32 %v13343_v5, %v9569_v37 }
 0x2c9   :  { %v3437_v63 = vadd.f32 %v12686_v29, %v9575_v3  ;;  %9720 = vmatprep.mubr.msk.f32.mxu0 %vm554_vm1, %v382_v43  ;;  %v3347_v43 = vadd.f32 %v12686_v29, %v13180_v53  ;;  %v8702_v36 = vpop.f32.mrf.mxu1  ;;  %v3342_v53 = vadd.f32 %v13343_v5, %v13193_v31  ;;  %v387_v31 = vld [vmem:[%s14413_s0 + $0xb28] sm:$0xff] }
 0x2ca   :  { %v3431_v57 = vpop.f32.mrf.mxu0  ;;  %v8703_v6 = vadd.f32 %v8702_v36, %v8701_v49  ;;  %v3337_v49 = vadd.f32 %v13343_v5, %v13155_v0  ;;  %v4972_v30 = vmax.f32 %v3422_v32, 0.0  ;;  %v3327_v36 = vadd.f32 %v13343_v5, %v13131_v60 }
 0x2cb   :  { %v4975_v24 = vmax.f32 %v3437_v63, 0.0  ;;  %v3432_v3 = vadd.f32 %v12686_v29, %v3431_v57  ;;  %v385_v29 = vld [vmem:[%s14413_s0 + $0xb18] sm:$0xff]  ;;  %v4973_v57 = vmax.f32 %v3427_v28, 0.0  ;;  %v4956_v0 = vmax.f32 %v3342_v53, 0.0  ;;  %v388_v28 = vld [vmem:[%s14413_s0 + $0xb30] sm:$0xff] }
 0x2cc   :  { %v13337_v40 = vpop.f32.mrf.mxu0  ;;  %9721 = vmatmul.mubr.msk.f32.gmra.mxu0 %vm554_vm1, %v383_v54  ;;  %v4955_v32 = vmax.f32 %v3337_v49, 0.0  ;;  %v3322_v60 = vadd.f32 %v13343_v5, %v13144_v56  ;;  %v3392_v56 = vadd.f32 %v13343_v5, %v13285_v35  ;;  %v3387_v35 = vadd.f32 %v13343_v5, %v13266_v25  ;;  %v393_v25 = vld [vmem:[%s14413_s0 + $0xb58] sm:$0xff] }
 0x2cd   :  { %v4974_v63 = vmax.f32 %v3432_v3, 0.0  ;;  %8818 = vmatprep.subr.mxu1 %v4975_v24  ;;  %9723 = vmatprep.mubr.msk.f32.mxu0 %vm554_vm1, %v384_v14  ;;  %v13358_v14 = vadd.f32 %v8703_v6, %v5752_v33  ;;  %v4957_v24 = vmax.f32 %v3347_v43, 0.0  ;;  %v3332_v33 = vadd.f32 %v13343_v5, %v13168_v10 }
 0x2ce   :  { %v13352_v54 = vpop.f32.mrf.mxu0  ;;  %8819 = vmatpush3.msra.mxu1 %v4959_v16  ;;  %v3412_v16 = vadd.f32 %v13343_v5, %v3411_v27  ;;  %v3407_v27 = vadd.f32 %v13343_v5, %v13290_v42  ;;  %v4971_v43 = vmax.f32 %v3417_v50, 0.0  ;;  %v3402_v10 = vadd.f32 %v13343_v5, %v13297_v9  ;;  %v389_v42 = vld [vmem:[%s14413_s0 + $0xb38] sm:$0xff] }
 0x2cf   :  { %8820 = vmatprep.subr.mxu1 %v4974_v63  ;;  %v4954_v6 = vmax.f32 %v3332_v33, 0.0  ;;  %v3397_v9 = vadd.f32 %v13343_v5, %v13278_v41  ;;  %v3317_v50 = vadd.f32 %v13343_v5, %v13107_v22  ;;  %v391_v41 = vld [vmem:[%s14413_s0 + $0xb48] sm:$0xff]  ;;  %v3312_v22 = vadd.f32 %v13343_v5, %v13120_v47 }
 0x2d0   :  { %v13362_v3 = vpop.f32.mrf.mxu0  ;;  %9724 = vmatmul.mubr.msk.f32.gmra.mxu0 %vm554_vm1, %v385_v29  ;;  %8821 = vmatpush3.msra.mxu1 %v4958_v55  ;;  %v4970_v29 = vmax.f32 %v3412_v16, 0.0  ;;  %v390_v55 = vld [vmem:[%s14413_s0 + $0xb40] sm:$0xff]  ;;  %v4952_v16 = vmax.f32 %v3322_v60, 0.0  ;;  %v3382_v47 = vadd.f32 %v13343_v5, %v13273_v21  ;;  %v3377_v21 = vadd.f32 %v13343_v5, %v13252_v7  ;;  %v395_v7 = vld [vmem:[%s14413_s0 + $0xb68] sm:$0xff] }
 0x2d1   :  { %8822 = vmatprep.subr.mxu1 %v4973_v57  ;;  %9726 = vmatprep.mubr.msk.f32.mxu0 %vm554_vm1, %v386_v61  ;;  %v4969_v61 = vmax.f32 %v3407_v27, 0.0  ;;  %v4953_v57 = vmax.f32 %v3327_v36, 0.0  ;;  %v4967_v33 = vmax.f32 %v3397_v9, 0.0  ;;  %v4950_v36 = vmax.f32 %v3312_v22, 0.0 }
 0x2d2   :  { %v13372_v37 = vpop.f32.mrf.mxu0  ;;  %8823 = vmatpush3.msra.mxu1 %v4957_v24  ;;  %v4968_v24 = vmax.f32 %v3402_v10, 0.0  ;;  %v394_v10 = vld [vmem:[%s14413_s0 + $0xb60] sm:$0xff]  ;;  %v3362_v22 = vadd.f32 %v13343_v5, %v13246_v26 }
 0x2d3   :  { %8824 = vmatprep.subr.mxu1 %v4972_v30 }
 0x2d4   :  { %v13381_v63 = vpop.f32.mrf.mxu0  ;;  %9727 = vmatmul.mubr.msk.f32.gmra.mxu0 %vm554_vm1, %v387_v31  ;;  %8825 = vmatpush3.msra.mxu1 %v4956_v0  ;;  %v392_v31 = vld [vmem:[%s14413_s0 + $0xb50] sm:$0xff]  ;;  %v3307_v0 = vadd.f32 %v13343_v5, %v13083_v48  ;;  %v3302_v48 = vadd.f32 %v13343_v5, %v13096_v12  ;;  %v3372_v12 = vadd.f32 %v13343_v5, %v13260_v8 }
 0x2d5   :  { %8826 = vmatprep.subr.mxu1 %v4971_v43  ;;  %9729 = vmatprep.mubr.msk.f32.mxu0 %vm554_vm1, %v388_v28  ;;  %v4951_v28 = vmax.f32 %v3317_v50, 0.0  ;;  %v4966_v43 = vmax.f32 %v3392_v56, 0.0  ;;  %v396_v50 = vld [vmem:[%s14413_s0 + $0xb70] sm:$0xff]  ;;  %v3367_v8 = vadd.f32 %v13343_v5, %v13234_v19  ;;  %v5250_v56 = vadd.s32 1792, %v11154_v45  ;;  %v397_v19 = vld [vmem:[%s14413_s0 + $0xb78] sm:$0xff] }
 0x2d6   :  { %v13392_v53 = vpop.f32.mrf.mxu0  ;;  %8827 = vmatpush3.msra.mxu1 %v4955_v32  ;;  %v4949_v60 = vmax.f32 %v3307_v0, 0.0  ;;  %v4948_v9 = vmax.f32 %v3302_v48, 0.0 }
 0x2d7   :  { %8828 = vmatprep.subr.mxu1 %v4970_v29  ;;  %v4965_v29 = vmax.f32 %v3387_v35, 0.0  ;;  %v4961_v26 = vmax.f32 %v3367_v8, 0.0  ;;  %vm5284_vm14 = vcmp.ge.s32.totalorder %v5250_v56, %v11183_v62  ;;  %vm5352_vm15 = vcmp.lt.s32.totalorder %v5250_v56, %v11185_v1 }
 0x2d8   :  { %v13401_v49 = vpop.f32.mrf.mxu0  ;;  %9730 = vmatmul.mubr.msk.f32.gmra.mxu0 %vm554_vm1, %v389_v42  ;;  %8829 = vmatpush3.msra.mxu1 %v4954_v6  ;;  %v3297_v42 = vadd.f32 %v13343_v5, %v13060_v46  ;;  %v3292_v46 = vadd.f32 %v13343_v5, %v13072_v17  ;;  %vm5416_vm3 = vmand %vm5284_vm14, %vm5352_vm15  ;;  %vm5316_vm5 = vcmp.ge.s32.totalorder %v5250_v56, %v11369_v18 }
 0x2d9   :  { %8830 = vmatprep.subr.mxu1 %v4969_v61  ;;  %9732 = vmatprep.mubr.msk.f32.mxu0 %vm554_vm1, %v390_v55  ;;  %v4964_v55 = vmax.f32 %v3382_v47, 0.0  ;;  %v4960_v47 = vmax.f32 %v3362_v22, 0.0  ;;  %vm5384_vm6 = vcmp.lt.s32.totalorder %v5250_v56, %v11371_v38 }
 0x2da   :  { %v13412_v30 = vpop.f32.mrf.mxu0  ;;  %8831 = vmatpush3.msra.mxu1 %v4953_v57  ;;  %v4963_v57 = vmax.f32 %v3377_v21, 0.0  ;;  %vm5448_vm9 = vmand %vm5316_vm5, %vm5384_vm6 }
 0x2db   :  { %8832 = vmatprep.subr.mxu1 %v4968_v24  ;;  %v3287_v24 = vadd.f32 %v13343_v5, %v13038_v39  ;;  %v3282_v39 = vadd.f32 %v13343_v5, %v13050_v20  ;;  %v13488_v20 = vadd.s32 2176, %v11154_v45 }
 0x2dc   :  { %v13421_v27 = vpop.f32.mrf.mxu0  ;;  %9733 = vmatmul.mubr.msk.f32.gmra.mxu0 %vm554_vm1, %v391_v41  ;;  %8833 = vmatpush3.msra.mxu1 %v4952_v16  ;;  %v4947_v41 = vmax.f32 %v3297_v42, 0.0  ;;  %v4962_v16 = vmax.f32 %v3372_v12, 0.0  ;;  %v402_v42 = vld [vmem:[%s14413_s0 + $0xba0] sm:$0xff] }
 0x2dd   :  { %8834 = vmatprep.subr.mxu1 %v4967_v33  ;;  %9735 = vmatprep.mubr.msk.f32.mxu0 %vm554_vm1, %v392_v31  ;;  %v4946_v31 = vmax.f32 %v3292_v46, 0.0  ;;  %v398_v33 = vld [vmem:[%s14413_s0 + $0xb80] sm:$0xff]  ;;  %v4945_v0 = vmax.f32 %v3287_v24, 0.0  ;;  %vm5287_vm7 = vcmp.ge.s32.totalorder %v13488_v20, %v11183_v62  ;;  %vm5355_vm8 = vcmp.lt.s32.totalorder %v13488_v20, %v11185_v1 }
 0x2de   :  { %v13432_v32 = vpop.f32.mrf.mxu0  ;;  %8835 = vmatpush3.msra.mxu1 %v4951_v28  ;;  %vm5419_vm10 = vmand %vm5287_vm7, %vm5355_vm8  ;;  %vm5319_vm12 = vcmp.ge.s32.totalorder %v13488_v20, %v11369_v18  ;;  %vm5387_vm13 = vcmp.lt.s32.totalorder %v13488_v20, %v11371_v38 }
 0x2df   :  { %8836 = vmatprep.subr.mxu1 %v4966_v43  ;;  %v399_v43 = vld [vmem:[%s14413_s0 + $0xb88] sm:$0xff]  ;;  %vm5451_vm15 = vmand %vm5319_vm12, %vm5387_vm13 }
 0x2e0   :  { %v13441_v6 = vpop.f32.mrf.mxu0  ;;  %9736 = vmatmul.mubr.msk.f32.gmra.mxu0 %vm554_vm1, %v393_v25  ;;  %8837 = vmatpush3.msra.mxu1 %v4950_v36  ;;  %v4944_v25 = vmax.f32 %v3282_v39, 0.0  ;;  %v407_v39 = vld [vmem:[%s14413_s0 + $0xbc8] sm:$0xff] }
 0x2e1   :  { %8838 = vmatprep.subr.mxu1 %v4965_v29  ;;  %9738 = vmatprep.mubr.msk.f32.mxu0 %vm554_vm1, %v394_v10  ;;  %v401_v10 = vld [vmem:[%s14413_s0 + $0xb98] sm:$0xff] }
 0x2e2   :  { %v13452_v61 = vpop.f32.mrf.mxu0  ;;  %8839 = vmatpush3.msra.mxu1 %v4949_v60 }
 0x2e3   :  { %8840 = vmatprep.subr.mxu1 %v4964_v55 }
 0x2e4   :  { %v13462_v17 = vpop.f32.mrf.mxu0  ;;  %9739 = vmatmul.mubr.msk.f32.gmra.mxu0 %vm554_vm1, %v395_v7  ;;  %8841 = vmatpush3.msra.mxu1 %v4948_v9  ;;  %v403_v7 = vld [vmem:[%s14413_s0 + $0xba8] sm:$0xff] }
 0x2e5   :  { %8842 = vmatprep.subr.mxu1 %v4963_v57  ;;  %9741 = vmatprep.mubr.msk.f32.mxu0 %vm554_vm1, %v396_v50  ;;  %v404_v50 = vld [vmem:[%s14413_s0 + $0xbb0] sm:$0xff] }
 0x2e6   :  { %v13473_v35 = vpop.f32.mrf.mxu0  ;;  %8843 = vmatpush3.msra.mxu1 %v4947_v41  ;;  %v405_v41 = vld [vmem:[%s14413_s0 + $0xbb8] sm:$0xff] }
 0x2e7   :  { %8844 = vmatprep.subr.mxu1 %v4962_v16  ;;  %v406_v16 = vld [vmem:[%s14413_s0 + $0xbc0] sm:$0xff] }
 0x2e8   :  { %v13480_v28 = vpop.f32.mrf.mxu0  ;;  %9742 = vmatmul.mubr.msk.f32.gmra.mxu0 %vm554_vm1, %v397_v19  ;;  %8845 = vmatpush3.msra.mxu1 %v4946_v31 }
 0x2e9   :  { %8846 = vmatprep.subr.mxu1 %v4961_v26  ;;  %9744 = vmatprep.mubr.msk.f32.mxu0 %vm554_vm1, %v398_v33  ;;  %v408_v33 = vld [vmem:[%s14413_s0 + $0xbd0] sm:$0xff] }
 0x2ea   :  { %v13494_v48 = vpop.f32.mrf.mxu0  ;;  %8847 = vmatpush3.msra.mxu1 %v4945_v0 }
 0x2eb   :  { %8848 = vmatprep.subr.mxu1 %v4960_v47  ;;  %v410_v47 = vld [vmem:[%s14413_s0 + $0xbe0] sm:$0xff] }
 0x2ec   :  { %v13505_v36 = vpop.f32.mrf.mxu0  ;;  %9745 = vmatmul.mubr.msk.f32.gmra.mxu0 %vm554_vm1, %v399_v43  ;;  %8849 = vmatpush3.msra.mxu1 %v4944_v25  ;;  %v411_v25 = vld [vmem:[%s14413_s0 + $0xbe8] sm:$0xff] }
 0x2ed   :  { %7985 = vmatmul.mubr.msk.f32.vlgmr.msra.gmra.mxu1 %vm5416_vm3, %v14441_v58  ;;  %9747 = vmatprep.mubr.msk.f32.mxu0 %vm554_vm1, %v400_v15  ;;  %v8736_v21 = vpop.f32.mrf.mxu1 }
 0x2ee   :  { %v13517_v29 = vpop.f32.mrf.mxu0  ;;  %7986 = vmatprep.mubr.msk.f32.mxu1 %vm5449_vm4, %v14441_v58 }
 0x2ef   :  { %v8737_v60 = vpop.f32.mrf.mxu1 }
 0x2f0   :  { %v13523_v12 = vpop.f32.mrf.mxu0  ;;  %9748 = vmatmul.mubr.msk.f32.gmra.mxu0 %vm554_vm1, %v401_v10  ;;  %v8738_v55 = vadd.f32 %v8737_v60, %v8736_v21  ;;  %v412_v10 = vld [vmem:[%s14413_s0 + $0xbf0] sm:$0xff] }
 0x2f1   :  { %7987 = vmatmul.mubr.msk.f32.gmra.mxu1 %vm5448_vm9, %v14441_v58  ;;  %9750 = vmatprep.mubr.msk.f32.mxu0 %vm554_vm1, %v402_v42  ;;  %v8739_v46 = vpop.f32.mrf.mxu1  ;;  %v413_v42 = vld [vmem:[%s14413_s0 + $0xbf8] sm:$0xff] }
 0x2f2   :  { %v13531_v9 = vpop.f32.mrf.mxu0  ;;  %7988 = vmatprep.mubr.msk.f32.mxu1 %vm5419_vm10, %v14441_v58  ;;  %v13538_v8 = vadd.f32 %v8738_v55, %v13333_v4  ;;  %v414_v55 = vld [vmem:[%s14413_s0 + $0xc00] sm:$0xff] }
 0x2f3   :  { %v8740_v57 = vpop.f32.mrf.mxu1 }
 0x2f4   :  { %v13540_v56 = vpop.f32.mrf.mxu0  ;;  %9751 = vmatmul.mubr.msk.f32.gmra.mxu0 %vm554_vm1, %v403_v7  ;;  %v8741_v24 = vadd.f32 %v8740_v57, %v8739_v46  ;;  %v3517_v7 = vadd.f32 %v13343_v5, %v13480_v28  ;;  %v415_v57 = vld [vmem:[%s14413_s0 + $0xc08] sm:$0xff] }
 0x2f5   :  { %9753 = vmatprep.mubr.msk.f32.mxu0 %vm554_vm1, %v404_v50 }
 0x2f6   :  { %v13547_v22 = vpop.f32.mrf.mxu0  ;;  %v13553_v4 = vadd.f32 %v8741_v24, %v13358_v14  ;;  %v409_v14 = vld [vmem:[%s14413_s0 + $0xbd8] sm:$0xff]  ;;  %v3512_v24 = vadd.f32 %v13343_v5, %v13494_v48  ;;  %v3502_v48 = vadd.f32 %v13343_v5, %v13473_v35  ;;  %v3492_v35 = vadd.f32 %v13343_v5, %v13452_v61 }
 0x2f7   :  { %v3482_v61 = vadd.f32 %v13343_v5, %v13432_v32 }
 0x2f8   :  { %v13555_v19 = vpop.f32.mrf.mxu0  ;;  %9754 = vmatmul.mubr.msk.f32.gmra.mxu0 %vm554_vm1, %v405_v41 }
 0x2f9   :  { %9756 = vmatprep.mubr.msk.f32.mxu0 %vm554_vm1, %v406_v16 }
 0x2fa   :  { %v13562_v31 = vpop.f32.mrf.mxu0 }
 0x2fc   :  { %v9614_v26 = vpop.f32.mrf.mxu0  ;;  %9757 = vmatmul.mubr.msk.f32.gmra.mxu0 %vm554_vm1, %v407_v39 }
 0x2fd   :  { %9759 = vmatprep.mubr.msk.f32.mxu0 %vm554_vm1, %v408_v33  ;;  %v3507_v33 = vadd.f32 %v13343_v5, %v13462_v17  ;;  %v3497_v17 = vadd.f32 %v13343_v5, %v13441_v6  ;;  %v3487_v6 = vadd.f32 %v13343_v5, %v13421_v27  ;;  %v3477_v27 = vadd.f32 %v13343_v5, %v13401_v49 }
 0x2fe   :  { %v3561_v0 = vpop.f32.mrf.mxu0 }
 0x300   :  { %v9617_v43 = vpop.f32.mrf.mxu0  ;;  %9760 = vmatmul.mubr.msk.f32.gmra.mxu0 %vm554_vm1, %v409_v14  ;;  %v4991_v14 = vmax.f32 %v3517_v7, 0.0  ;;  %v4989_v7 = vmax.f32 %v3507_v33, 0.0 }
 0x301   :  { %9762 = vmatprep.mubr.msk.f32.mxu0 %vm554_vm1, %v410_v47 }
 0x302   :  { %v3571_v15 = vpop.f32.mrf.mxu0 }
 0x304   :  { %v9620_v21 = vpop.f32.mrf.mxu0  ;;  %9763 = vmatmul.mubr.msk.f32.gmra.mxu0 %vm554_vm1, %v411_v25 }
 0x305   :  { %9765 = vmatprep.mubr.msk.f32.mxu0 %vm554_vm1, %v412_v10  ;;  %v3587_v16 = vadd.f32 %v13343_v5, %v9620_v21 }
 0x306   :  { %v3581_v60 = vpop.f32.mrf.mxu0 }
 0x307   :  { %v3582_v25 = vadd.f32 %v13343_v5, %v3581_v60  ;;  %v3572_v60 = vadd.f32 %v13343_v5, %v3571_v15  ;;  %v3562_v15 = vadd.f32 %v13343_v5, %v3561_v0  ;;  %v3552_v0 = vadd.f32 %v13343_v5, %v13562_v31 }
 0x308   :  { %v9623_v46 = vpop.f32.mrf.mxu0  ;;  %9766 = vmatmul.mubr.msk.f32.gmra.mxu0 %vm554_vm1, %v413_v42  ;;  %v4990_v42 = vmax.f32 %v3512_v24, 0.0  ;;  %v4988_v24 = vmax.f32 %v3502_v48, 0.0  ;;  %v4985_v48 = vmax.f32 %v3487_v6, 0.0  ;;  %v3542_v31 = vadd.f32 %v13343_v5, %v13547_v22 }
 0x309   :  { %v3597_v50 = vadd.f32 %v13343_v5, %v9623_v46  ;;  %9768 = vmatprep.mubr.msk.f32.mxu0 %vm554_vm1, %v414_v55  ;;  %v3577_v55 = vadd.f32 %v13343_v5, %v9617_v43  ;;  %v5005_v46 = vmax.f32 %v3587_v16, 0.0  ;;  %v3567_v43 = vadd.f32 %v13343_v5, %v9614_v26 }
 0x30a   :  { %v3591_v41 = vpop.f32.mrf.mxu0  ;;  %v5002_v33 = vmax.f32 %v3572_v60, 0.0  ;;  %v3557_v26 = vadd.f32 %v13343_v5, %v13555_v19  ;;  %v5000_v32 = vmax.f32 %v3562_v15, 0.0  ;;  %v3547_v19 = vadd.f32 %v13343_v5, %v13540_v56 }
 0x30b   :  { %v5007_v39 = vmax.f32 %v3597_v50, 0.0  ;;  %v3592_v28 = vadd.f32 %v13343_v5, %v3591_v41  ;;  %v5003_v16 = vmax.f32 %v3577_v55, 0.0  ;;  %v3472_v55 = vadd.f32 %v13343_v5, %v13412_v30 }
 0x30c   :  { %v13605_v47 = vpop.f32.mrf.mxu0  ;;  %9769 = vmatmul.mubr.msk.f32.gmra.mxu0 %vm554_vm1, %v415_v57  ;;  %v5004_v57 = vmax.f32 %v3582_v25, 0.0  ;;  %v4999_v49 = vmax.f32 %v3557_v26, 0.0  ;;  %v4983_v60 = vmax.f32 %v3477_v27, 0.0  ;;  %v4998_v30 = vmax.f32 %v3552_v0, 0.0 }
 0x30d   :  { %v5006_v10 = vmax.f32 %v3592_v28, 0.0  ;;  %8856 = vmatprep.subr.mxu1 %v5007_v39  ;;  %v4987_v39 = vmax.f32 %v3497_v17, 0.0  ;;  %v3537_v56 = vadd.f32 %v13343_v5, %v13523_v12  ;;  %v3532_v22 = vadd.f32 %v13343_v5, %v13531_v9 }
 0x30e   :  { %v13611_v21 = vpop.f32.mrf.mxu0  ;;  %8857 = vmatpush3.msra.mxu1 %v4991_v14  ;;  %v4986_v14 = vmax.f32 %v3492_v35, 0.0  ;;  %v3462_v35 = vadd.f32 %v13343_v5, %v13392_v53  ;;  %v4996_v53 = vmax.f32 %v3542_v31, 0.0  ;;  %v3452_v15 = vadd.f32 %v13343_v5, %v13372_v37 }
 0x30f   :  { %8858 = vmatprep.subr.mxu1 %v5006_v10  ;;  %v5001_v10 = vmax.f32 %v3567_v43, 0.0  ;;  %v3527_v12 = vadd.f32 %v13343_v5, %v13505_v36  ;;  %v3447_v26 = vadd.f32 %v13343_v5, %v13337_v40  ;;  %v3522_v37 = vadd.f32 %v13343_v5, %v13517_v29 }
 0x310   :  { %v13616_v50 = vpop.f32.mrf.mxu0  ;;  %8859 = vmatpush3.msra.mxu1 %v4990_v42  ;;  %v4994_v27 = vmax.f32 %v3532_v22, 0.0  ;;  %v4978_v0 = vmax.f32 %v3452_v15, 0.0 }
 0x311   :  { %8860 = vmatprep.subr.mxu1 %v5005_v46  ;;  %v4984_v46 = vmax.f32 %v3482_v61, 0.0  ;;  %v4977_v40 = vmax.f32 %v3447_v26, 0.0  ;;  %v4992_v29 = vmax.f32 %v3522_v37, 0.0 }
 0x312   :  { %v13621_v41 = vpop.f32.mrf.mxu0  ;;  %8861 = vmatpush3.msra.mxu1 %v4989_v7  ;;  %v3467_v7 = vadd.f32 %v13343_v5, %v13381_v63  ;;  %v4997_v63 = vmax.f32 %v3547_v19, 0.0 }
 0x313   :  { %8862 = vmatprep.subr.mxu1 %v5004_v57 }
 0x314   :  { %v13626_v28 = vpop.f32.mrf.mxu0  ;;  %8863 = vmatpush3.msra.mxu1 %v4988_v24  ;;  %v4982_v24 = vmax.f32 %v3472_v55, 0.0  ;;  %v4981_v6 = vmax.f32 %v3467_v7, 0.0 }
 0x315   :  { %8864 = vmatprep.subr.mxu1 %v5003_v16  ;;  %v3457_v16 = vadd.f32 %v13343_v5, %v13362_v3  ;;  %v4995_v3 = vmax.f32 %v3537_v56, 0.0 }
 0x316   :  { %v13631_v25 = vpop.f32.mrf.mxu0  ;;  %8865 = vmatpush3.msra.mxu1 %v4987_v39 }
 0x317   :  { %8866 = vmatprep.subr.mxu1 %v5002_v33  ;;  %v4980_v33 = vmax.f32 %v3462_v35, 0.0  ;;  %v4979_v9 = vmax.f32 %v3457_v16, 0.0 }
 0x318   :  { %v13637_v42 = vpop.f32.mrf.mxu0  ;;  %8867 = vmatpush3.msra.mxu1 %v4986_v14  ;;  %v5252_v14 = vadd.s32 2048, %v11154_v45 }
 0x319   :  { %8868 = vmatprep.subr.mxu1 %v5001_v10 }
 0x31a   :  { %v13643_v17 = vpop.f32.mrf.mxu0  ;;  %8869 = vmatpush3.msra.mxu1 %v4985_v48  ;;  %v3442_v48 = vadd.f32 %v13343_v5, %v13352_v54  ;;  %vm5286_vm1 = vcmp.ge.s32.totalorder %v5252_v14, %v11183_v62  ;;  %vm5354_vm11 = vcmp.lt.s32.totalorder %v5252_v14, %v11185_v1  ;;  %v13685_v54 = vadd.s32 2432, %v11154_v45 }
 0x31b   :  { %8870 = vmatprep.subr.mxu1 %v5000_v32  ;;  %v4993_v32 = vmax.f32 %v3527_v12, 0.0  ;;  %vm5418_vm14 = vmand %vm5286_vm1, %vm5354_vm11  ;;  %vm5318_vm0 = vcmp.ge.s32.totalorder %v5252_v14, %v11369_v18  ;;  %vm5386_vm2 = vcmp.lt.s32.totalorder %v5252_v14, %v11371_v38 }
 0x31c   :  { %v13649_v57 = vpop.f32.mrf.mxu0  ;;  %8871 = vmatpush3.msra.mxu1 %v4984_v46  ;;  %v4976_v46 = vmax.f32 %v3442_v48, 0.0  ;;  %vm5289_vm3 = vcmp.ge.s32.totalorder %v13685_v54, %v11183_v62  ;;  %vm5357_vm4 = vcmp.lt.s32.totalorder %v13685_v54, %v11185_v1  ;;  %vm5450_vm5 = vmand %vm5318_vm0, %vm5386_vm2  ;;  %vm5321_vm9 = vcmp.ge.s32.totalorder %v13685_v54, %v11369_v18 }
 0x31d   :  { %8872 = vmatprep.subr.mxu1 %v4999_v49  ;;  %vm5421_vm6 = vmand %vm5289_vm3, %vm5357_vm4  ;;  %vm5389_vm10 = vcmp.lt.s32.totalorder %v13685_v54, %v11371_v38 }
 0x31e   :  { %v13655_v43 = vpop.f32.mrf.mxu0  ;;  %8873 = vmatpush3.msra.mxu1 %v4983_v60  ;;  %vm5453_vm11 = vmand %vm5321_vm9, %vm5389_vm10 }
 0x31f   :  { %8874 = vmatprep.subr.mxu1 %v4998_v30 }
 0x320   :  { %v13661_v39 = vpop.f32.mrf.mxu0  ;;  %8875 = vmatpush3.msra.mxu1 %v4982_v24 }
 0x321   :  { %8876 = vmatprep.subr.mxu1 %v4997_v63 }
 0x322   :  { %v13667_v61 = vpop.f32.mrf.mxu0  ;;  %8877 = vmatpush3.msra.mxu1 %v4981_v6 }
 0x323   :  { %8878 = vmatprep.subr.mxu1 %v4996_v53 }
 0x324   :  { %v9644_v10 = vpop.f32.mrf.mxu0  ;;  %8879 = vmatpush3.msra.mxu1 %v4980_v33 }
 0x325   :  { %8880 = vmatprep.subr.mxu1 %v4995_v3 }
 0x326   :  { %v3661_v36 = vpop.f32.mrf.mxu0  ;;  %8881 = vmatpush3.msra.mxu1 %v4979_v9 }
 0x327   :  { %8882 = vmatprep.subr.mxu1 %v4994_v27  ;;  %v3667_v27 = vadd.f32 %v13343_v5, %v9644_v10  ;;  %v3657_v10 = vadd.f32 %v13343_v5, %v13661_v39  ;;  %v3647_v39 = vadd.f32 %v13343_v5, %v13649_v57  ;;  %v3637_v57 = vadd.f32 %v13343_v5, %v13637_v42 }
 0x328   :  { %v9647_v55 = vpop.f32.mrf.mxu0  ;;  %8883 = vmatpush3.msra.mxu1 %v4978_v0  ;;  %v3627_v42 = vadd.f32 %v13343_v5, %v13626_v28 }
 0x329   :  { %8884 = vmatprep.subr.mxu1 %v4993_v32  ;;  %v3677_v15 = vadd.f32 %v13343_v5, %v9647_v55  ;;  %v3662_v55 = vadd.f32 %v13343_v5, %v3661_v36  ;;  %v3652_v36 = vadd.f32 %v13343_v5, %v13667_v61  ;;  %v3642_v61 = vadd.f32 %v13343_v5, %v13655_v43 }
 0x32a   :  { %v3671_v19 = vpop.f32.mrf.mxu0  ;;  %8885 = vmatpush3.msra.mxu1 %v4977_v40  ;;  %v3632_v43 = vadd.f32 %v13343_v5, %v13643_v17 }
 0x32b   :  { %8886 = vmatprep.subr.mxu1 %v4992_v29  ;;  %v3672_v3 = vadd.f32 %v13343_v5, %v3671_v19  ;;  %v5023_v48 = vmax.f32 %v3677_v15, 0.0  ;;  %v5021_v15 = vmax.f32 %v3667_v27, 0.0 }
 0x32c   :  { %v13689_v49 = vpop.f32.mrf.mxu0  ;;  %8887 = vmatpush3.msra.mxu1 %v4976_v46 }
 0x32d   :  { %7989 = vmatmul.mubr.msk.f32.vlgmr.msra.gmra.mxu1 %vm5418_vm14, %v14441_v58  ;;  %v5022_v29 = vmax.f32 %v3672_v3, 0.0  ;;  %v5020_v3 = vmax.f32 %v3662_v55, 0.0  ;;  %v5017_v55 = vmax.f32 %v3647_v39, 0.0  ;;  %v5013_v39 = vmax.f32 %v3627_v42, 0.0 }
 0x32e   :  { %v13696_v20 = vpop.f32.mrf.mxu0  ;;  %7990 = vmatprep.mubr.msk.f32.mxu1 %vm5451_vm15, %v14441_v58 }
 0x330   :  { %v13699_v7 = vpop.f32.mrf.mxu0 }
 0x331   :  { %7991 = vmatmul.mubr.msk.f32.gmra.mxu1 %vm5450_vm5, %v14441_v58 }
 0x332   :  { %v13702_v60 = vpop.f32.mrf.mxu0  ;;  %7992 = vmatprep.mubr.msk.f32.mxu1 %vm5421_vm6, %v14441_v58 }
 0x334   :  { %v13705_v31 = vpop.f32.mrf.mxu0 }
 0x336   :  { %v13707_v30 = vpop.f32.mrf.mxu0 }
 0x338   :  { %v9659_v35 = vpop.f32.mrf.mxu0 }
 0x33a   :  { %v3711_v24 = vpop.f32.mrf.mxu0 }
 0x33c   :  { %v9662_v56 = vpop.f32.mrf.mxu0 }
 0x33e   :  { %v3721_v63 = vpop.f32.mrf.mxu0 }
 0x340   :  { %v9665_v16 = vpop.f32.mrf.mxu0 }
 0x341   :  { %v3737_v19 = vadd.f32 %v13343_v5, %v9665_v16  ;;  %v3727_v16 = vadd.f32 %v13343_v5, %v9662_v56  ;;  %v3717_v56 = vadd.f32 %v13343_v5, %v9659_v35  ;;  %v3707_v35 = vadd.f32 %v13343_v5, %v13705_v31 }
 0x342   :  { %v3731_v6 = vpop.f32.mrf.mxu0  ;;  %v3697_v31 = vadd.f32 %v13343_v5, %v13699_v7  ;;  %v3687_v7 = vadd.f32 %v13343_v5, %v13689_v49 }
 0x343   :  { %v5029_v28 = vmax.f32 %v3707_v35, 0.0 }
 0x344   :  { %v9668_v22 = vpop.f32.mrf.mxu0 }
 0x345   :  { %v3747_v26 = vadd.f32 %v13343_v5, %v9668_v22 }
 0x346   :  { %v3741_v53 = vpop.f32.mrf.mxu0 }
 0x347   :  { %v3742_v32 = vadd.f32 %v13343_v5, %v3741_v53  ;;  %v5037_v22 = vmax.f32 %v3747_v26, 0.0  ;;  %v3732_v53 = vadd.f32 %v13343_v5, %v3731_v6  ;;  %v5035_v26 = vmax.f32 %v3737_v19, 0.0 }
 0x348   :  { %v9671_v33 = vpop.f32.mrf.mxu0  ;;  %v3722_v6 = vadd.f32 %v13343_v5, %v3721_v63  ;;  %v3712_v63 = vadd.f32 %v13343_v5, %v3711_v24  ;;  %v3702_v24 = vadd.f32 %v13343_v5, %v13707_v30  ;;  %v3692_v30 = vadd.f32 %v13343_v5, %v13702_v60 }
 0x349   :  { %v3757_v12 = vadd.f32 %v13343_v5, %v9671_v33  ;;  %v5034_v27 = vmax.f32 %v3732_v53, 0.0  ;;  %v5015_v53 = vmax.f32 %v3637_v57, 0.0 }
 0x34a   :  { %v3751_v14 = vpop.f32.mrf.mxu0  ;;  %v5032_v19 = vmax.f32 %v3722_v6, 0.0  ;;  %v5030_v17 = vmax.f32 %v3712_v63, 0.0  ;;  %v3612_v6 = vadd.f32 %v13343_v5, %v13621_v41  ;;  %v3682_v41 = vadd.f32 %v13343_v5, %v13696_v20 }
 0x34b   :  { %v5039_v9 = vmax.f32 %v3757_v12, 0.0  ;;  %v3752_v37 = vadd.f32 %v13343_v5, %v3751_v14  ;;  %v5036_v12 = vmax.f32 %v3742_v32, 0.0  ;;  %v5026_v57 = vmax.f32 %v3692_v30, 0.0 }
 0x34c   :  { %v13715_v0 = vpop.f32.mrf.mxu0  ;;  %v5010_v63 = vmax.f32 %v3612_v6, 0.0  ;;  %v5024_v20 = vmax.f32 %v3682_v41, 0.0 }
 0x34d   :  { %v5038_v40 = vmax.f32 %v3752_v37, 0.0  ;;  %8894 = vmatprep.subr.mxu1 %v5039_v9  ;;  %v5019_v9 = vmax.f32 %v3657_v10, 0.0 }
 0x34e   :  { %v13719_v46 = vpop.f32.mrf.mxu0  ;;  %8895 = vmatpush3.msra.mxu1 %v5023_v48  ;;  %v5018_v48 = vmax.f32 %v3652_v36, 0.0  ;;  %v3622_v36 = vadd.f32 %v13343_v5, %v13631_v25  ;;  %v5028_v25 = vmax.f32 %v3702_v24, 0.0 }
 0x34f   :  { %8896 = vmatprep.subr.mxu1 %v5038_v40  ;;  %v5033_v40 = vmax.f32 %v3727_v16, 0.0 }
 0x350   :  { %v13724_v33 = vpop.f32.mrf.mxu0  ;;  %8897 = vmatpush3.msra.mxu1 %v5022_v29 }
 0x351   :  { %8898 = vmatprep.subr.mxu1 %v5037_v22  ;;  %v5016_v22 = vmax.f32 %v3642_v61, 0.0 }
 0x352   :  { %v13729_v14 = vpop.f32.mrf.mxu0  ;;  %8899 = vmatpush3.msra.mxu1 %v5021_v15  ;;  %v5031_v15 = vmax.f32 %v3717_v56, 0.0  ;;  %v3607_v56 = vadd.f32 %v13343_v5, %v13605_v47 }
 0x353   :  { %8900 = vmatprep.subr.mxu1 %v5036_v12 }
 0x354   :  { %v13734_v37 = vpop.f32.mrf.mxu0  ;;  %8901 = vmatpush3.msra.mxu1 %v5020_v3  ;;  %v5014_v3 = vmax.f32 %v3632_v43, 0.0  ;;  %v5009_v47 = vmax.f32 %v3607_v56, 0.0 }
 0x355   :  { %8902 = vmatprep.subr.mxu1 %v5035_v26  ;;  %v3617_v26 = vadd.f32 %v13343_v5, %v13616_v50  ;;  %v5027_v50 = vmax.f32 %v3697_v31, 0.0 }
 0x356   :  { %v13739_v32 = vpop.f32.mrf.mxu0  ;;  %8903 = vmatpush3.msra.mxu1 %v5019_v9 }
 0x357   :  { %8904 = vmatprep.subr.mxu1 %v5034_v27  ;;  %v5012_v27 = vmax.f32 %v3622_v36, 0.0  ;;  %v5011_v60 = vmax.f32 %v3617_v26, 0.0 }
 0x358   :  { %v13744_v29 = vpop.f32.mrf.mxu0  ;;  %8905 = vmatpush3.msra.mxu1 %v5018_v48  ;;  %v5254_v48 = vadd.s32 2304, %v11154_v45 }
 0x359   :  { %8906 = vmatprep.subr.mxu1 %v5033_v40 }
 0x35a   :  { %v13749_v10 = vpop.f32.mrf.mxu0  ;;  %8907 = vmatpush3.msra.mxu1 %v5017_v55  ;;  %v3602_v55 = vadd.f32 %v13343_v5, %v13611_v21  ;;  %vm5288_vm7 = vcmp.ge.s32.totalorder %v5254_v48, %v11183_v62  ;;  %vm5356_vm8 = vcmp.lt.s32.totalorder %v5254_v48, %v11185_v1  ;;  %v13791_v21 = vadd.s32 2688, %v11154_v45 }
 0x35b   :  { %8908 = vmatprep.subr.mxu1 %v5032_v19  ;;  %v5025_v19 = vmax.f32 %v3687_v7, 0.0  ;;  %vm5420_vm1 = vmand %vm5288_vm7, %vm5356_vm8  ;;  %vm5320_vm12 = vcmp.ge.s32.totalorder %v5254_v48, %v11369_v18  ;;  %vm5388_vm13 = vcmp.lt.s32.totalorder %v5254_v48, %v11371_v38 }
 0x35c   :  { %v13755_v12 = vpop.f32.mrf.mxu0  ;;  %8909 = vmatpush3.msra.mxu1 %v5016_v22  ;;  %v5008_v22 = vmax.f32 %v3602_v55, 0.0  ;;  %vm5291_vm14 = vcmp.ge.s32.totalorder %v13791_v21, %v11183_v62  ;;  %vm5359_vm15 = vcmp.lt.s32.totalorder %v13791_v21, %v11185_v1  ;;  %vm5452_vm0 = vmand %vm5320_vm12, %vm5388_vm13  ;;  %vm5323_vm5 = vcmp.ge.s32.totalorder %v13791_v21, %v11369_v18 }
 0x35d   :  { %8910 = vmatprep.subr.mxu1 %v5031_v15  ;;  %vm5423_vm2 = vmand %vm5291_vm14, %vm5359_vm15  ;;  %vm5391_vm6 = vcmp.lt.s32.totalorder %v13791_v21, %v11371_v38 }
 0x35e   :  { %v13761_v16 = vpop.f32.mrf.mxu0  ;;  %8911 = vmatpush3.msra.mxu1 %v5015_v53  ;;  %vm5455_vm8 = vmand %vm5323_vm5, %vm5391_vm6 }
 0x35f   :  { %8912 = vmatprep.subr.mxu1 %v5030_v17 }
 0x360   :  { %v13767_v9 = vpop.f32.mrf.mxu0  ;;  %8913 = vmatpush3.msra.mxu1 %v5014_v3 }
 0x361   :  { %8914 = vmatprep.subr.mxu1 %v5029_v28 }
 0x362   :  { %v13773_v61 = vpop.f32.mrf.mxu0  ;;  %8915 = vmatpush3.msra.mxu1 %v5013_v39 }
 0x363   :  { %8916 = vmatprep.subr.mxu1 %v5028_v25 }
 0x364   :  { %v9692_v40 = vpop.f32.mrf.mxu0  ;;  %8917 = vmatpush3.msra.mxu1 %v5012_v27 }
 0x365   :  { %8918 = vmatprep.subr.mxu1 %v5027_v50 }
 0x366   :  { %v3821_v49 = vpop.f32.mrf.mxu0  ;;  %8919 = vmatpush3.msra.mxu1 %v5011_v60 }
 0x367   :  { %8920 = vmatprep.subr.mxu1 %v5026_v57  ;;  %v3827_v57 = vadd.f32 %v13343_v5, %v9692_v40 }
 0x368   :  { %v9695_v43 = vpop.f32.mrf.mxu0  ;;  %8921 = vmatpush3.msra.mxu1 %v5010_v63 }
 0x369   :  { %8922 = vmatprep.subr.mxu1 %v5025_v19  ;;  %v3837_v6 = vadd.f32 %v13343_v5, %v9695_v43  ;;  %v13827_v43 = vld [vmem:[%s14415_s2] ss:$0 sm:$0xff] }
 0x36a   :  { %v3831_v35 = vpop.f32.mrf.mxu0  ;;  %8923 = vmatpush3.msra.mxu1 %v5009_v47 }
 0x36b   :  { %8924 = vmatprep.subr.mxu1 %v5024_v20  ;;  %v3832_v50 = vadd.f32 %v13343_v5, %v3831_v35  ;;  %v5055_v55 = vmax.f32 %v3837_v6, 0.0  ;;  %v3822_v20 = vadd.f32 %v13827_v43, %v3821_v49  ;;  %v3812_v49 = vadd.f32 %v13827_v43, %v13773_v61 }
 0x36c   :  { %v13795_v15 = vpop.f32.mrf.mxu0  ;;  %8925 = vmatpush3.msra.mxu1 %v5008_v22  ;;  %v3802_v61 = vadd.f32 %v13827_v43, %v13761_v16  ;;  %v3792_v16 = vadd.f32 %v13827_v43, %v13749_v10 }
 0x36d   :  { %7993 = vmatmul.mubr.msk.f32.vlgmr.msra.gmra.mxu1 %vm5420_vm1, %v14441_v58  ;;  %v5054_v22 = vmax.f32 %v3832_v50, 0.0  ;;  %v5052_v50 = vmax.f32 %v3822_v20, 0.0 }
 0x36e   :  { %v13802_v54 = vpop.f32.mrf.mxu0  ;;  %7994 = vmatprep.mubr.msk.f32.mxu1 %vm5453_vm11, %v14441_v58 }
 0x370   :  { %v13805_v42 = vpop.f32.mrf.mxu0 }
 0x371   :  { %7995 = vmatmul.mubr.msk.f32.gmra.mxu1 %vm5452_vm0, %v14441_v58 }
 0x372   :  { %v13808_v53 = vpop.f32.mrf.mxu0  ;;  %7996 = vmatprep.mubr.msk.f32.mxu1 %vm5423_vm2, %v14441_v58 }
 0x374   :  { %v13811_v24 = vpop.f32.mrf.mxu0 }
 0x376   :  { %v13813_v17 = vpop.f32.mrf.mxu0 }
 0x378   :  { %v9707_v36 = vpop.f32.mrf.mxu0 }
 0x37a   :  { %v3871_v3 = vpop.f32.mrf.mxu0 }
 0x37c   :  { %v9710_v31 = vpop.f32.mrf.mxu0 }
 0x37e   :  { %v3881_v28 = vpop.f32.mrf.mxu0 }
 0x380   :  { %v9713_v26 = vpop.f32.mrf.mxu0 }
 0x381   :  { %v3897_v40 = vadd.f32 %v13827_v43, %v9713_v26  ;;  %v3887_v26 = vadd.f32 %v13827_v43, %v9710_v31  ;;  %v3877_v31 = vadd.f32 %v13827_v43, %v9707_v36  ;;  %v3867_v36 = vadd.f32 %v13827_v43, %v13811_v24 }
 0x382   :  { %v3891_v39 = vpop.f32.mrf.mxu0  ;;  %v3857_v24 = vadd.f32 %v13827_v43, %v13805_v42  ;;  %v3847_v42 = vadd.f32 %v13827_v43, %v13795_v15 }
 0x384   :  { %v9716_v30 = vpop.f32.mrf.mxu0 }
 0x385   :  { %v3907_v56 = vadd.f32 %v13343_v5, %v9716_v30 }
 0x386   :  { %v3901_v25 = vpop.f32.mrf.mxu0 }
 0x387   :  { %v3902_v19 = vadd.f32 %v13343_v5, %v3901_v25  ;;  %v5069_v30 = vmax.f32 %v3907_v56, 0.0  ;;  %v5053_v25 = vmax.f32 %v3827_v57, 0.0  ;;  %v5067_v56 = vmax.f32 %v3897_v40, 0.0 }
 0x388   :  { %v9719_v27 = vpop.f32.mrf.mxu0 }
 0x389   :  { %v3917_v7 = vadd.f32 %v13343_v5, %v9719_v27  ;;  %v3892_v27 = vadd.f32 %v13827_v43, %v3891_v39  ;;  %v3882_v39 = vadd.f32 %v13827_v43, %v3881_v28  ;;  %v3872_v28 = vadd.f32 %v13827_v43, %v3871_v3 }
 0x38a   :  { %v3911_v48 = vpop.f32.mrf.mxu0  ;;  %v3862_v3 = vadd.f32 %v13827_v43, %v13813_v17  ;;  %v3852_v17 = vadd.f32 %v13827_v43, %v13808_v53 }
 0x38b   :  { %v5071_v60 = vmax.f32 %v3917_v7, 0.0  ;;  %v3912_v41 = vadd.f32 %v13343_v5, %v3911_v48  ;;  %v3817_v5 = vadd.f32 %v13827_v43, %v13767_v9  ;;  %v5068_v7 = vmax.f32 %v3902_v19, 0.0 }
 0x38c   :  { %v13821_v63 = vpop.f32.mrf.mxu0  ;;  %v3807_v9 = vadd.f32 %v13827_v43, %v13755_v12  ;;  %v5066_v57 = vmax.f32 %v3892_v27, 0.0  ;;  %v3797_v12 = vadd.f32 %v13827_v43, %v13744_v29  ;;  %v5064_v40 = vmax.f32 %v3882_v39, 0.0 }
 0x38d   :  { %v5070_v47 = vmax.f32 %v3912_v41, 0.0  ;;  %8932 = vmatprep.subr.mxu1 %v5071_v60  ;;  %v5051_v60 = vmax.f32 %v3817_v5, 0.0  ;;  %v3787_v29 = vadd.f32 %v13827_v43, %v13734_v37  ;;  %v5062_v10 = vmax.f32 %v3872_v28, 0.0 }
 0x38e   :  { %v13830_v35 = vpop.f32.mrf.mxu0  ;;  %8933 = vmatpush3.msra.mxu1 %v5055_v55  ;;  %v5050_v55 = vmax.f32 %v3812_v49, 0.0  ;;  %v5049_v20 = vmax.f32 %v3807_v9, 0.0  ;;  %v5047_v27 = vmax.f32 %v3797_v12, 0.0  ;;  %v3782_v49 = vadd.f32 %v13827_v43, %v13739_v32 }
 0x38f   :  { %8934 = vmatprep.subr.mxu1 %v5070_v47  ;;  %v5065_v47 = vmax.f32 %v3887_v26, 0.0  ;;  %v5061_v37 = vmax.f32 %v3867_v36, 0.0  ;;  %v5045_v9 = vmax.f32 %v3787_v29, 0.0  ;;  %v5060_v32 = vmax.f32 %v3862_v3, 0.0 }
 0x390   :  { %v13835_v6 = vpop.f32.mrf.mxu0  ;;  %8935 = vmatpush3.msra.mxu1 %v5054_v22  ;;  %v3772_v39 = vadd.f32 %v13827_v43, %v13729_v14  ;;  %v3842_v14 = vadd.f32 %v13827_v43, %v13802_v54  ;;  %v5058_v12 = vmax.f32 %v3852_v17, 0.0 }
 0x391   :  { %8936 = vmatprep.subr.mxu1 %v5069_v30  ;;  %v5048_v30 = vmax.f32 %v3802_v61, 0.0 }
 0x392   :  { %v13840_v48 = vpop.f32.mrf.mxu0  ;;  %8937 = vmatpush3.msra.mxu1 %v5053_v25  ;;  %v5063_v25 = vmax.f32 %v3877_v31, 0.0  ;;  %v3767_v31 = vadd.f32 %v13827_v43, %v13715_v0  ;;  %v5042_v28 = vmax.f32 %v3772_v39, 0.0  ;;  %v5056_v54 = vmax.f32 %v3842_v14, 0.0 }
 0x393   :  { %8938 = vmatprep.subr.mxu1 %v5068_v7 }
 0x394   :  { %v13845_v41 = vpop.f32.mrf.mxu0  ;;  %8939 = vmatpush3.msra.mxu1 %v5052_v50  ;;  %v5046_v50 = vmax.f32 %v3792_v16, 0.0  ;;  %v5041_v0 = vmax.f32 %v3767_v31, 0.0 }
 0x395   :  { %8940 = vmatprep.subr.mxu1 %v5067_v56  ;;  %v3777_v56 = vadd.f32 %v13827_v43, %v13724_v33  ;;  %v5059_v33 = vmax.f32 %v3857_v24, 0.0 }
 0x396   :  { %v13850_v19 = vpop.f32.mrf.mxu0  ;;  %8941 = vmatpush3.msra.mxu1 %v5051_v60 }
 0x397   :  { %8942 = vmatprep.subr.mxu1 %v5066_v57  ;;  %v5044_v57 = vmax.f32 %v3782_v49, 0.0  ;;  %v5043_v53 = vmax.f32 %v3777_v56, 0.0 }
 0x398   :  { %v13855_v22 = vpop.f32.mrf.mxu0  ;;  %8943 = vmatpush3.msra.mxu1 %v5050_v55  ;;  %v5256_v55 = vadd.s32 2560, %v11154_v45 }
 0x399   :  { %8944 = vmatprep.subr.mxu1 %v5065_v47 }
 0x39a   :  { %v13860_v5 = vpop.f32.mrf.mxu0  ;;  %8945 = vmatpush3.msra.mxu1 %v5049_v20  ;;  %v3762_v20 = vadd.f32 %v13827_v43, %v13719_v46  ;;  %vm5290_vm3 = vcmp.ge.s32.totalorder %v5256_v55, %v11183_v62  ;;  %vm5358_vm4 = vcmp.lt.s32.totalorder %v5256_v55, %v11185_v1  ;;  %v13902_v46 = vadd.s32 2944, %v11154_v45 }
 0x39b   :  { %8946 = vmatprep.subr.mxu1 %v5064_v40  ;;  %v5057_v40 = vmax.f32 %v3847_v42, 0.0  ;;  %vm5422_vm7 = vmand %vm5290_vm3, %vm5358_vm4  ;;  %vm5322_vm9 = vcmp.ge.s32.totalorder %v5256_v55, %v11369_v18  ;;  %vm5390_vm10 = vcmp.lt.s32.totalorder %v5256_v55, %v11371_v38 }
 0x39c   :  { %v13866_v7 = vpop.f32.mrf.mxu0  ;;  %8947 = vmatpush3.msra.mxu1 %v5048_v30  ;;  %v5040_v30 = vmax.f32 %v3762_v20, 0.0  ;;  %vm5293_vm1 = vcmp.ge.s32.totalorder %v13902_v46, %v11183_v62  ;;  %vm5361_vm11 = vcmp.lt.s32.totalorder %v13902_v46, %v11185_v1  ;;  %vm5454_vm12 = vmand %vm5322_vm9, %vm5390_vm10  ;;  %vm5325_vm0 = vcmp.ge.s32.totalorder %v13902_v46, %v11369_v18 }
 0x39d   :  { %8948 = vmatprep.subr.mxu1 %v5063_v25  ;;  %vm5425_vm13 = vmand %vm5293_vm1, %vm5361_vm11  ;;  %vm5393_vm2 = vcmp.lt.s32.totalorder %v13902_v46, %v11371_v38 }
 0x39e   :  { %v13872_v26 = vpop.f32.mrf.mxu0  ;;  %8949 = vmatpush3.msra.mxu1 %v5047_v27  ;;  %vm5457_vm4 = vmand %vm5325_vm0, %vm5393_vm2 }
 0x39f   :  { %8950 = vmatprep.subr.mxu1 %v5062_v10 }
 0x3a0   :  { %v13878_v60 = vpop.f32.mrf.mxu0  ;;  %8951 = vmatpush3.msra.mxu1 %v5046_v50 }
 0x3a1   :  { %8952 = vmatprep.subr.mxu1 %v5061_v37 }
 0x3a2   :  { %v13884_v61 = vpop.f32.mrf.mxu0  ;;  %8953 = vmatpush3.msra.mxu1 %v5045_v9 }
 0x3a3   :  { %8954 = vmatprep.subr.mxu1 %v5060_v32 }
 0x3a4   :  { %v9740_v47 = vpop.f32.mrf.mxu0  ;;  %8955 = vmatpush3.msra.mxu1 %v5044_v57 }
 0x3a5   :  { %8956 = vmatprep.subr.mxu1 %v5059_v33 }
 0x3a6   :  { %v3981_v15 = vpop.f32.mrf.mxu0  ;;  %8957 = vmatpush3.msra.mxu1 %v5043_v53 }
 0x3a7   :  { %8958 = vmatprep.subr.mxu1 %v5058_v12  ;;  %v3987_v12 = vadd.f32 %v13827_v43, %v9740_v47 }
 0x3a8   :  { %v9743_v16 = vpop.f32.mrf.mxu0  ;;  %8959 = vmatpush3.msra.mxu1 %v5042_v28 }
 0x3a9   :  { %8960 = vmatprep.subr.mxu1 %v5057_v40  ;;  %v3997_v39 = vadd.f32 %v13827_v43, %v9743_v16 }
 0x3aa   :  { %v3991_v36 = vpop.f32.mrf.mxu0  ;;  %8961 = vmatpush3.msra.mxu1 %v5041_v0  ;;  %v3982_v0 = vadd.f32 %v13827_v43, %v3981_v15 }
 0x3ab   :  { %8962 = vmatprep.subr.mxu1 %v5056_v54  ;;  %v3992_v33 = vadd.f32 %v13827_v43, %v3991_v36  ;;  %v5087_v20 = vmax.f32 %v3997_v39, 0.0  ;;  %v3977_v36 = vadd.f32 %v13827_v43, %v13878_v60 }
 0x3ac   :  { %v13906_v25 = vpop.f32.mrf.mxu0  ;;  %8963 = vmatpush3.msra.mxu1 %v5040_v30 }
 0x3ad   :  { %7997 = vmatmul.mubr.msk.f32.vlgmr.msra.gmra.mxu1 %vm5422_vm7, %v14441_v58  ;;  %v5086_v16 = vmax.f32 %v3992_v33, 0.0  ;;  %v5083_v33 = vmax.f32 %v3977_v36, 0.0 }
 0x3ae   :  { %v13913_v21 = vpop.f32.mrf.mxu0  ;;  %7998 = vmatprep.mubr.msk.f32.mxu1 %vm5455_vm8, %v14441_v58 }
 0x3b0   :  { %v13916_v29 = vpop.f32.mrf.mxu0 }
 0x3b1   :  { %7999 = vmatmul.mubr.msk.f32.gmra.mxu1 %vm5454_vm12, %v14441_v58 }
 0x3b2   :  { %v13919_v27 = vpop.f32.mrf.mxu0  ;;  %8000 = vmatprep.mubr.msk.f32.mxu1 %vm5425_vm13, %v14441_v58 }
 0x3b4   :  { %v9752_v3 = vpop.f32.mrf.mxu0 }
 0x3b6   :  { %v13922_v10 = vpop.f32.mrf.mxu0 }
 0x3b8   :  { %v9755_v49 = vpop.f32.mrf.mxu0 }
 0x3ba   :  { %v4031_v50 = vpop.f32.mrf.mxu0 }
 0x3bc   :  { %v9758_v24 = vpop.f32.mrf.mxu0 }
 0x3bd   :  { %v4047_v15 = vadd.f32 %v13827_v43, %v9758_v24  ;;  %v3957_v24 = vadd.f32 %v13827_v43, %v13855_v22  ;;  %v4022_v22 = vadd.f32 %v13827_v43, %v13922_v10  ;;  %v4012_v10 = vadd.f32 %v13827_v43, %v13919_v27 }
 0x3be   :  { %v4041_v37 = vpop.f32.mrf.mxu0  ;;  %v4002_v27 = vadd.f32 %v13827_v43, %v13913_v21  ;;  %v4152_v21 = vadd.f32 %v13827_v43, %v11222_v34  ;;  %v4222_v34 = vadd.f32 %v13827_v43, %v12175_v51  ;;  %v14542_v51 = vld [vmem:[#allocation13_spill] sm:$0xff] }
 0x3bf   :  { %v4042_v60 = vadd.f32 %v13827_v43, %v4041_v37  ;;  %v3952_v37 = vadd.f32 %v13827_v43, %v13860_v5 }
 0x3c0   :  { %v9761_v56 = vpop.f32.mrf.mxu0 }
 0x3c1   :  { %v4057_v54 = vadd.f32 %v13827_v43, %v9761_v56  ;;  %v3967_v56 = vadd.f32 %v13827_v43, %v13866_v7  ;;  %v4032_v7 = vadd.f32 %v13827_v43, %v4031_v50  ;;  %v5078_v5 = vmax.f32 %v3952_v37, 0.0 }
 0x3c2   :  { %v4051_v9 = vpop.f32.mrf.mxu0 }
 0x3c3   :  { %v4052_v47 = vadd.f32 %v13827_v43, %v4051_v9  ;;  %v3962_v9 = vadd.f32 %v13827_v43, %v13872_v26  ;;  %v4027_v26 = vadd.f32 %v13827_v43, %v9752_v3  ;;  %v5094_v50 = vmax.f32 %v4032_v7, 0.0  ;;  %v14544_v7 = vld [vmem:[#allocation14_spill] sm:$0xff] }
 0x3c4   :  { %v9764_v17 = vpop.f32.mrf.mxu0  ;;  %v4017_v3 = vadd.f32 %v13827_v43, %v13916_v29  ;;  %v4007_v29 = vadd.f32 %v13827_v43, %v13906_v25  ;;  %v3922_v25 = vadd.f32 %v13827_v43, %v13830_v35  ;;  %v5088_v35 = vmax.f32 %v4002_v27, 0.0 }
 0x3c5   :  { %v4067_v31 = vadd.f32 %v13827_v43, %v9764_v17  ;;  %v5085_v17 = vmax.f32 %v3987_v12, 0.0  ;;  %v5096_v12 = vmax.f32 %v4042_v60, 0.0 }
 0x3c6   :  { %v4061_v32 = vpop.f32.mrf.mxu0 }
 0x3c7   :  { %v4062_v28 = vadd.f32 %v13827_v43, %v4061_v32  ;;  %v5101_v30 = vmax.f32 %v4067_v31, 0.0  ;;  %v3972_v32 = vadd.f32 %v13827_v43, %v13884_v61  ;;  %v4037_v61 = vadd.f32 %v13827_v43, %v9755_v49 }
 0x3c8   :  { %v9767_v57 = vpop.f32.mrf.mxu0  ;;  %v3947_v49 = vadd.f32 %v13827_v43, %v13845_v41  ;;  %v3937_v41 = vadd.f32 %v13827_v43, %v13835_v6  ;;  %v3927_v6 = vadd.f32 %v13827_v43, %v13821_v63 }
 0x3c9   :  { %v4077_v42 = vadd.f32 %v13827_v43, %v9767_v57  ;;  %v5100_v39 = vmax.f32 %v4062_v28, 0.0  ;;  %v5084_v57 = vmax.f32 %v3982_v0, 0.0  ;;  %v5082_v31 = vmax.f32 %v3972_v32, 0.0 }
 0x3ca   :  { %v4071_v55 = vpop.f32.mrf.mxu0  ;;  %v5095_v28 = vmax.f32 %v4037_v61, 0.0  ;;  %v3942_v0 = vadd.f32 %v13827_v43, %v13850_v19  ;;  %v3932_v19 = vadd.f32 %v13827_v43, %v13840_v48  ;;  %v5090_v32 = vmax.f32 %v4012_v10, 0.0 }
 0x3cb   :  { %v5103_v53 = vmax.f32 %v4077_v42, 0.0  ;;  %v4072_v14 = vadd.f32 %v13827_v43, %v4071_v55  ;;  %v5099_v42 = vmax.f32 %v4057_v54, 0.0  ;;  %v5098_v55 = vmax.f32 %v4052_v47, 0.0 }
 0x3cc   :  { %v5077_v54 = vmax.f32 %v3947_v49, 0.0  ;;  %v5076_v36 = vmax.f32 %v3942_v0, 0.0  ;;  %v5258_v47 = vadd.s32 2816, %v11154_v45  ;;  %v4157_v48 = vadd.f32 %v13827_v43, %v11200_v13 }
 0x3cd   :  { %v5102_v40 = vmax.f32 %v4072_v14, 0.0  ;;  %8970 = vmatprep.subr.mxu1 %v5103_v53  ;;  %v5097_v53 = vmax.f32 %v4047_v15, 0.0  ;;  %v5081_v14 = vmax.f32 %v3967_v56, 0.0  ;;  %v4237_v15 = vadd.f32 %v13827_v43, %v12190_v23 }
 0x3ce   :  { %8971 = vmatpush3.msra.mxu1 %v5087_v20  ;;  %v5080_v20 = vmax.f32 %v3962_v9, 0.0  ;;  %vm5292_vm14 = vcmp.ge.s32.totalorder %v5258_v47, %v11183_v62  ;;  %vm5360_vm15 = vcmp.lt.s32.totalorder %v5258_v47, %v11185_v1  ;;  %v5073_v63 = vmax.f32 %v3927_v6, 0.0  ;;  %v14552_v6 = vld [vmem:[#allocation10_spill] sm:$0xff] }
 0x3cf   :  { %8972 = vmatprep.subr.mxu1 %v5102_v40  ;;  %v5079_v40 = vmax.f32 %v3957_v24, 0.0  ;;  %v13985_v13 = vadd.s32 3200, %v11154_v45  ;;  %v4232_v23 = vadd.f32 %v13827_v43, %v12213_v11  ;;  %v5072_v56 = vmax.f32 %v3922_v25, 0.0  ;;  %vm5424_vm3 = vmand %vm5292_vm14, %vm5360_vm15  ;;  %v14543_v24 = vld [vmem:[#allocation25_spill] sm:$0xff] }
 0x3d0   :  { %8973 = vmatpush3.msra.mxu1 %v5086_v16  ;;  %v5093_v16 = vmax.f32 %v4027_v26, 0.0  ;;  %v5135_v60 = vmax.f32 %v4237_v15, 0.0  ;;  %vm5324_vm5 = vcmp.ge.s32.totalorder %v5258_v47, %v11369_v18  ;;  %vm5392_vm6 = vcmp.lt.s32.totalorder %v5258_v47, %v11371_v38 }
 0x3d1   :  { %8974 = vmatprep.subr.mxu1 %v5101_v30  ;;  %v5092_v30 = vmax.f32 %v4022_v22, 0.0  ;;  %v4147_v11 = vadd.f32 %v13827_v43, %v11152_v44  ;;  %v5119_v46 = vmax.f32 %v4157_v48, 0.0  ;;  %vm5295_vm7 = vcmp.ge.s32.totalorder %v13985_v13, %v11183_v62  ;;  %vm5456_vm9 = vmand %vm5324_vm5, %vm5392_vm6  ;;  %v14547_v22 = vld [vmem:[#allocation24_spill] sm:$0xff] }
 0x3d2   :  { %8975 = vmatpush3.msra.mxu1 %v5085_v17  ;;  %v5091_v17 = vmax.f32 %v4017_v3, 0.0  ;;  %vm5363_vm8 = vcmp.lt.s32.totalorder %v13985_v13, %v11185_v1  ;;  %v5118_v9 = vmax.f32 %v4152_v21, 0.0  ;;  %v4217_v44 = vadd.f32 %v13827_v43, %v11966_v2  ;;  %v14545_v2 = vld [vmem:[#allocation23_spill] sm:$0xff]  ;;  %v14556_v21 = vld [vmem:[#allocation8_spill] sm:$0xff] }
 0x3d3   :  { %8976 = vmatprep.subr.mxu1 %v5100_v39  ;;  %v5075_v39 = vmax.f32 %v3937_v41, 0.0  ;;  %vm5427_vm10 = vmand %vm5295_vm7, %vm5363_vm8  ;;  %v4137_v61 = vadd.f32 %v13827_v43, %v14542_v51  ;;  %v14549_v41 = vld [vmem:[#allocation21_spill] sm:$0xff]  ;;  %vm5327_vm12 = vcmp.ge.s32.totalorder %v13985_v13, %v11369_v18  ;;  %vm5395_vm13 = vcmp.lt.s32.totalorder %v13985_v13, %v11371_v38  ;;  %v14568_v13 = vld [vmem:[#allocation38_spill] sm:$0xff] }
 0x3d4   :  { %8977 = vmatpush3.msra.mxu1 %v5084_v57  ;;  %v5074_v57 = vmax.f32 %v3932_v19, 0.0  ;;  %v5131_v26 = vmax.f32 %v4217_v44, 0.0  ;;  %v14559_v44 = vld [vmem:[#allocation18_spill] sm:$0xff]  ;;  %vm5459_vm15 = vmand %vm5327_vm12, %vm5395_vm13 }
 0x3d5   :  { %8978 = vmatprep.subr.mxu1 %v5099_v42  ;;  %v5089_v42 = vmax.f32 %v4007_v29, 0.0  ;;  %v14551_v29 = vld [vmem:[#allocation22_spill] sm:$0xff] }
 0x3d6   :  { %8979 = vmatpush3.msra.mxu1 %v5083_v33  ;;  %v4227_v33 = vadd.f32 %v13827_v43, %v12153_v52  ;;  %v5134_v52 = vmax.f32 %v4232_v23, 0.0 }
 0x3d7   :  { %8980 = vmatprep.subr.mxu1 %v5098_v55  ;;  %v4142_v55 = vadd.f32 %v13827_v43, %v11177_v59  ;;  %v4212_v59 = vadd.f32 %v13827_v43, %v14543_v24 }
 0x3d8   :  { %8981 = vmatpush3.msra.mxu1 %v5082_v31  ;;  %v5133_v31 = vmax.f32 %v4227_v33, 0.0 }
 0x3d9   :  { %8982 = vmatprep.subr.mxu1 %v5097_v53  ;;  %v5117_v53 = vmax.f32 %v4147_v11, 0.0  ;;  %v5116_v37 = vmax.f32 %v4142_v55, 0.0  ;;  %v5130_v0 = vmax.f32 %v4212_v59, 0.0 }
 0x3da   :  { %8983 = vmatpush3.msra.mxu1 %v5081_v14  ;;  %v5132_v14 = vmax.f32 %v4222_v34, 0.0  ;;  %v9770_v34 = vpop.f32.mrf.mxu0 }
 0x3db   :  { %8984 = vmatprep.subr.mxu1 %v5096_v12  ;;  %v4132_v12 = vadd.f32 %v13827_v43, %v14544_v7  ;;  %v4087_v59 = vadd.f32 %v13827_v43, %v9770_v34 }
 0x3dc   :  { %8985 = vmatpush3.msra.mxu1 %v5080_v20  ;;  %v4207_v20 = vadd.f32 %v13827_v43, %v14545_v2  ;;  %v5260_v2 = vadd.s32 3072, %v11154_v45 }
 0x3dd   :  { %8986 = vmatprep.subr.mxu1 %v5095_v28  ;;  %v14546_v28 = vld [vmem:[#allocation11_spill] sm:$0xff] }
 0x3de   :  { %8987 = vmatpush3.msra.mxu1 %v5079_v40  ;;  %v4127_v49 = vadd.f32 %v13827_v43, %v14546_v28  ;;  %v5115_v40 = vmax.f32 %v4137_v61, 0.0  ;;  %v5129_v10 = vmax.f32 %v4207_v20, 0.0  ;;  %v14560_v61 = vld [vmem:[#allocation6_spill] sm:$0xff]  ;;  %vm5294_vm1 = vcmp.ge.s32.totalorder %v5260_v2, %v11183_v62 }
 0x3df   :  { %8988 = vmatprep.subr.mxu1 %v5094_v50  ;;  %v4202_v50 = vadd.f32 %v13827_v43, %v14547_v22  ;;  %v5105_v22 = vmax.f32 %v4087_v59, 0.0  ;;  %vm5362_vm11 = vcmp.lt.s32.totalorder %v5260_v2, %v11185_v1  ;;  %vm5326_vm0 = vcmp.ge.s32.totalorder %v5260_v2, %v11369_v18  ;;  %v14577_v59 = vld [vmem:[#allocation51_spill] sm:$0xff] }
 0x3e0   :  { %8989 = vmatpush3.msra.mxu1 %v5078_v5  ;;  %v14548_v5 = vld [vmem:[#allocation12_spill] sm:$0xff]  ;;  %vm5426_vm14 = vmand %vm5294_vm1, %vm5362_vm11  ;;  %vm5394_vm2 = vcmp.lt.s32.totalorder %v5260_v2, %v11371_v38 }
 0x3e1   :  { %8990 = vmatprep.subr.mxu1 %v5093_v16  ;;  %v4122_v3 = vadd.f32 %v13827_v43, %v14548_v5  ;;  %v5114_v16 = vmax.f32 %v4132_v12, 0.0  ;;  %v5128_v47 = vmax.f32 %v4202_v50, 0.0  ;;  %v14563_v5 = vld [vmem:[#allocation56_spill] sm:$0xff]  ;;  %vm5458_vm5 = vmand %vm5326_vm0, %vm5394_vm2 }
 0x3e2   :  { %8991 = vmatpush3.msra.mxu1 %v5077_v54  ;;  %v4197_v54 = vadd.f32 %v13827_v43, %v14549_v41 }
 0x3e3   :  { %8992 = vmatprep.subr.mxu1 %v5092_v30  ;;  %v14550_v30 = vld [vmem:[#allocation9_spill] sm:$0xff]  ;;  %v5112_v27 = vmax.f32 %v4122_v3, 0.0  ;;  %v4397_v3 = vadd.f32 %v13827_v43, %v14563_v5 }
 0x3e4   :  { %8993 = vmatpush3.msra.mxu1 %v5076_v36  ;;  %v4117_v19 = vadd.f32 %v13827_v43, %v14550_v30  ;;  %v5113_v36 = vmax.f32 %v4127_v49, 0.0  ;;  %v5127_v25 = vmax.f32 %v4197_v54, 0.0  ;;  %v14069_v54 = vadd.s32 3456, %v11154_v45  ;;  %v14565_v30 = vld [vmem:[#allocation57_spill] sm:$0xff] }
 0x3e5   :  { %8994 = vmatprep.subr.mxu1 %v5091_v17  ;;  %v4192_v17 = vadd.f32 %v13827_v43, %v14551_v29 }
 0x3e6   :  { %8995 = vmatpush3.msra.mxu1 %v5075_v39  ;;  %v4112_v39 = vadd.f32 %v13827_v43, %v14552_v6 }
 0x3e7   :  { %8996 = vmatprep.subr.mxu1 %v5090_v32  ;;  %v14553_v32 = vld [vmem:[#allocation19_spill] sm:$0xff] }
 0x3e8   :  { %8997 = vmatpush3.msra.mxu1 %v5074_v57  ;;  %v4187_v48 = vadd.f32 %v13827_v43, %v14553_v32  ;;  %v14554_v57 = vld [vmem:[#allocation7_spill] sm:$0xff]  ;;  %v5110_v33 = vmax.f32 %v4112_v39, 0.0  ;;  %v5167_v39 = vmax.f32 %v4397_v3, 0.0  ;;  %v14582_v3 = vld [vmem:[#allocation33_spill] sm:$0xff] }
 0x3e9   :  { %8998 = vmatprep.subr.mxu1 %v5089_v42  ;;  %v4107_v15 = vadd.f32 %v13827_v43, %v14554_v57  ;;  %v5111_v42 = vmax.f32 %v4117_v19, 0.0  ;;  %v4392_v19 = vadd.f32 %v13827_v43, %v14565_v30 }
 0x3ea   :  { %8999 = vmatpush3.msra.mxu1 %v5073_v63  ;;  %v14555_v63 = vld [vmem:[#allocation20_spill] sm:$0xff] }
 0x3eb   :  { %9000 = vmatprep.subr.mxu1 %v5088_v35  ;;  %v4182_v23 = vadd.f32 %v13827_v43, %v14555_v63  ;;  %v5126_v35 = vmax.f32 %v4192_v17, 0.0  ;;  %v5166_v57 = vmax.f32 %v4392_v19, 0.0 }
 0x3ec   :  { %9001 = vmatpush3.msra.mxu1 %v5072_v56  ;;  %v4102_v56 = vadd.f32 %v13827_v43, %v14556_v21 }
 0x3ed   :  { %8001 = vmatmul.mubr.msk.f32.vlgmr.msra.gmra.mxu1 %vm5424_vm3, %v14441_v58  ;;  %9008 = vmatprep.subr.mxu1 %v5135_v60  ;;  %v14557_v60 = vld [vmem:[#allocation17_spill] sm:$0xff]  ;;  %v5124_v51 = vmax.f32 %v4182_v23, 0.0  ;;  %vm5297_vm3 = vcmp.ge.s32.totalorder %v14069_v54, %v11183_v62  ;;  %v14571_v23 = vld [vmem:[#allocation52_spill] sm:$0xff] }
 0x3ee   :  { %9009 = vmatpush3.msra.mxu1 %v5119_v46  ;;  %8002 = vmatprep.mubr.msk.f32.mxu1 %vm5457_vm4, %v14441_v58  ;;  %v4177_v11 = vadd.f32 %v13827_v43, %v14557_v60  ;;  %v5125_v46 = vmax.f32 %v4187_v48, 0.0  ;;  %v5108_v24 = vmax.f32 %v4102_v56, 0.0  ;;  %vm5365_vm4 = vcmp.lt.s32.totalorder %v14069_v54, %v11185_v1  ;;  %v14569_v48 = vld [vmem:[#allocation55_spill] sm:$0xff]  ;;  %v14572_v56 = vld [vmem:[#allocation36_spill] sm:$0xff] }
 0x3ef   :  { %9010 = vmatprep.subr.mxu1 %v5134_v52  ;;  %v14558_v52 = vld [vmem:[#allocation5_spill] sm:$0xff]  ;;  %vm5429_vm6 = vmand %vm5297_vm3, %vm5365_vm4 }
 0x3f0   :  { %9011 = vmatpush3.msra.mxu1 %v5118_v9  ;;  %v4097_v55 = vadd.f32 %v13827_v43, %v14558_v52  ;;  %v5109_v9 = vmax.f32 %v4107_v15, 0.0  ;;  %v5123_v12 = vmax.f32 %v4177_v11, 0.0  ;;  %v14570_v15 = vld [vmem:[#allocation39_spill] sm:$0xff]  ;;  %v14573_v11 = vld [vmem:[#allocation53_spill] sm:$0xff] }
 0x3f1   :  { %8003 = vmatmul.mubr.msk.f32.gmra.mxu1 %vm5456_vm9, %v14441_v58  ;;  %9012 = vmatprep.subr.mxu1 %v5133_v31  ;;  %v4172_v31 = vadd.f32 %v13827_v43, %v14559_v44  ;;  %v14574_v52 = vld [vmem:[#allocation37_spill] sm:$0xff]  ;;  %v14575_v44 = vld [vmem:[#allocation50_spill] sm:$0xff]  ;;  %vm5329_vm9 = vcmp.ge.s32.totalorder %v14069_v54, %v11369_v18 }
 0x3f2   :  { %9013 = vmatpush3.msra.mxu1 %v5117_v53  ;;  %8004 = vmatprep.mubr.msk.f32.mxu1 %vm5427_vm10, %v14441_v58  ;;  %v4092_v53 = vadd.f32 %v13827_v43, %v14560_v61  ;;  %v5107_v20 = vmax.f32 %v4097_v55, 0.0  ;;  %v4292_v55 = vadd.f32 %v13827_v43, %v14574_v52  ;;  %v14576_v61 = vld [vmem:[#allocation34_spill] sm:$0xff]  ;;  %vm5397_vm10 = vcmp.lt.s32.totalorder %v14069_v54, %v11371_v38 }
 0x3f3   :  { %9014 = vmatprep.subr.mxu1 %v5132_v14  ;;  %v14561_v14 = vld [vmem:[#allocation15_spill] sm:$0xff]  ;;  %v5122_v49 = vmax.f32 %v4172_v31, 0.0  ;;  %v4367_v31 = vadd.f32 %v13827_v43, %v14575_v44  ;;  %vm5461_vm11 = vmand %vm5329_vm9, %vm5397_vm10  ;;  %v14600_v54 = vld [vmem:[#allocation70_spill] sm:$0xff] }
 0x3f4   :  { %9015 = vmatpush3.msra.mxu1 %v5116_v37  ;;  %v4167_v7 = vadd.f32 %v13827_v43, %v14561_v14  ;;  %v4081_v37 = vpop.f32.mrf.mxu0  ;;  %v4362_v14 = vadd.f32 %v13827_v43, %v14577_v59  ;;  %v5146_v2 = vmax.f32 %v4292_v55, 0.0 }
 0x3f5   :  { %9016 = vmatprep.subr.mxu1 %v5131_v26  ;;  %v14562_v26 = vld [vmem:[#allocation16_spill] sm:$0xff]  ;;  %v4082_v50 = vadd.f32 %v13827_v43, %v4081_v37 }
 0x3f6   :  { %9017 = vmatpush3.msra.mxu1 %v5115_v40  ;;  %v4162_v28 = vadd.f32 %v13827_v43, %v14562_v26  ;;  %v5106_v40 = vmax.f32 %v4092_v53, 0.0  ;;  %v4287_v53 = vadd.f32 %v13827_v43, %v14576_v61  ;;  %v5160_v5 = vmax.f32 %v4362_v14, 0.0 }
 0x3f7   :  { %9018 = vmatprep.subr.mxu1 %v5130_v0  ;;  %v5121_v0 = vmax.f32 %v4167_v7, 0.0  ;;  %v5104_v17 = vmax.f32 %v4082_v50, 0.0  ;;  %v14581_v50 = vld [vmem:[#allocation49_spill] sm:$0xff] }
 0x3f8   :  { %9019 = vmatpush3.msra.mxu1 %v5114_v16  ;;  %v14564_v16 = vld [vmem:[#allocation40_spill] sm:$0xff] }
 0x3f9   :  { %9020 = vmatprep.subr.mxu1 %v5129_v10  ;;  %v4317_v41 = vadd.f32 %v13827_v43, %v14564_v16  ;;  %v5120_v10 = vmax.f32 %v4162_v28, 0.0  ;;  %v5161_v28 = vmax.f32 %v4367_v31, 0.0  ;;  %v4272_v16 = vadd.f32 %v13827_v43, %v14582_v3  ;;  %v14593_v31 = vld [vmem:[#allocation43_spill] sm:$0xff] }
 0x3fa   :  { %9021 = vmatpush3.msra.mxu1 %v5113_v36  ;;  %v14566_v36 = vld [vmem:[#allocation41_spill] sm:$0xff] }
 0x3fb   :  { %9022 = vmatprep.subr.mxu1 %v5128_v47  ;;  %v4312_v29 = vadd.f32 %v13827_v43, %v14566_v36  ;;  %v14567_v47 = vld [vmem:[#allocation54_spill] sm:$0xff]  ;;  %v5151_v32 = vmax.f32 %v4317_v41, 0.0 }
 0x3fc   :  { %9023 = vmatpush3.msra.mxu1 %v5112_v27  ;;  %v4387_v6 = vadd.f32 %v13827_v43, %v14567_v47  ;;  %v4307_v27 = vadd.f32 %v13827_v43, %v14568_v13  ;;  %v14584_v36 = vld [vmem:[#allocation30_spill] sm:$0xff]  ;;  %v14585_v47 = vld [vmem:[#allocation47_spill] sm:$0xff] }
 0x3fd   :  { %9024 = vmatprep.subr.mxu1 %v5127_v25  ;;  %v4382_v25 = vadd.f32 %v13827_v43, %v14569_v48  ;;  %v5150_v63 = vmax.f32 %v4312_v29, 0.0  ;;  %v4267_v29 = vadd.f32 %v13827_v43, %v14584_v36  ;;  %v14586_v13 = vld [vmem:[#allocation31_spill] sm:$0xff]  ;;  %v14587_v48 = vld [vmem:[#allocation44_spill] sm:$0xff] }
 0x3fe   :  { %9025 = vmatpush3.msra.mxu1 %v5111_v42  ;;  %v4302_v42 = vadd.f32 %v13827_v43, %v14570_v15  ;;  %v5165_v21 = vmax.f32 %v4387_v6, 0.0  ;;  %v5149_v60 = vmax.f32 %v4307_v27, 0.0  ;;  %v4342_v6 = vadd.f32 %v13827_v43, %v14585_v47  ;;  %v14588_v15 = vld [vmem:[#allocation28_spill] sm:$0xff] }
 0x3ff   :  { %9026 = vmatprep.subr.mxu1 %v5126_v35  ;;  %v4377_v35 = vadd.f32 %v13827_v43, %v14571_v23  ;;  %v5164_v34 = vmax.f32 %v4382_v25, 0.0  ;;  %v4262_v27 = vadd.f32 %v13827_v43, %v14586_v13  ;;  %v4337_v25 = vadd.f32 %v13827_v43, %v14587_v48  ;;  %v14589_v23 = vld [vmem:[#allocation45_spill] sm:$0xff] }
 0x400   :  { %9027 = vmatpush3.msra.mxu1 %v5110_v33  ;;  %v4297_v33 = vadd.f32 %v13827_v43, %v14572_v56  ;;  %v14590_v56 = vld [vmem:[#allocation26_spill] sm:$0xff] }
 0x401   :  { %9028 = vmatprep.subr.mxu1 %v5125_v46  ;;  %v4372_v46 = vadd.f32 %v13827_v43, %v14573_v11  ;;  %v5155_v55 = vmax.f32 %v4337_v25, 0.0  ;;  %v14605_v25 = vld [vmem:[#allocation85_spill] sm:$0xff] }
 0x402   :  { %9029 = vmatpush3.msra.mxu1 %v5109_v9  ;;  %v5148_v9 = vmax.f32 %v4302_v42, 0.0  ;;  %v4257_v42 = vadd.f32 %v13827_v43, %v14588_v15 }
 0x403   :  { %9030 = vmatprep.subr.mxu1 %v5124_v51  ;;  %v5163_v51 = vmax.f32 %v4377_v35, 0.0  ;;  %v5162_v7 = vmax.f32 %v4372_v46, 0.0  ;;  %v4332_v35 = vadd.f32 %v13827_v43, %v14589_v23  ;;  %v5140_v46 = vmax.f32 %v4262_v27, 0.0  ;;  %v14604_v27 = vld [vmem:[#allocation68_spill] sm:$0xff] }
 0x404   :  { %9031 = vmatpush3.msra.mxu1 %v5108_v24  ;;  %v5147_v24 = vmax.f32 %v4297_v33, 0.0  ;;  %v4247_v33 = vadd.f32 %v13827_v43, %v14590_v56  ;;  %v5139_v44 = vmax.f32 %v4257_v42, 0.0  ;;  %v14606_v42 = vld [vmem:[#allocation69_spill] sm:$0xff] }
 0x405   :  { %9032 = vmatprep.subr.mxu1 %v5123_v12  ;;  %v14578_v12 = vld [vmem:[#allocation35_spill] sm:$0xff]  ;;  %v5154_v61 = vmax.f32 %v4332_v35, 0.0  ;;  %v14607_v35 = vld [vmem:[#allocation82_spill] sm:$0xff] }
 0x406   :  { %9033 = vmatpush3.msra.mxu1 %v5107_v20  ;;  %v4282_v37 = vadd.f32 %v13827_v43, %v14578_v12  ;;  %v14579_v20 = vld [vmem:[#allocation48_spill] sm:$0xff] }
 0x407   :  { %9034 = vmatprep.subr.mxu1 %v5122_v49  ;;  %v4357_v26 = vadd.f32 %v13827_v43, %v14579_v20  ;;  %v14580_v49 = vld [vmem:[#allocation32_spill] sm:$0xff] }
 0x408   :  { %9035 = vmatpush3.msra.mxu1 %v5106_v40  ;;  %v4277_v40 = vadd.f32 %v13827_v43, %v14580_v49  ;;  %v5144_v41 = vmax.f32 %v4282_v37, 0.0  ;;  %v14595_v12 = vld [vmem:[#allocation88_spill] sm:$0xff]  ;;  %v14597_v49 = vld [vmem:[#allocation89_spill] sm:$0xff] }
 0x409   :  { %9036 = vmatprep.subr.mxu1 %v5121_v0  ;;  %v4352_v0 = vadd.f32 %v13827_v43, %v14581_v50  ;;  %v5159_v19 = vmax.f32 %v4357_v26, 0.0  ;;  %v4557_v37 = vadd.f32 %v13827_v43, %v14595_v12  ;;  %v14155_v26 = vadd.s32 3712, %v11154_v45  ;;  %v14598_v50 = vld [vmem:[#allocation73_spill] sm:$0xff] }
 0x40a   :  { %9037 = vmatpush3.msra.mxu1 %v5105_v22  ;;  %v5145_v22 = vmax.f32 %v4287_v53, 0.0  ;;  %v5137_v53 = vmax.f32 %v4247_v33, 0.0  ;;  %v14608_v33 = vld [vmem:[#allocation66_spill] sm:$0xff] }
 0x40b   :  { %9038 = vmatprep.subr.mxu1 %v5120_v10  ;;  %v14583_v10 = vld [vmem:[#allocation46_spill] sm:$0xff] }
 0x40c   :  { %9039 = vmatpush3.msra.mxu1 %v5104_v17  ;;  %v4347_v30 = vadd.f32 %v13827_v43, %v14583_v10  ;;  %v5143_v17 = vmax.f32 %v4277_v40, 0.0  ;;  %v4552_v40 = vadd.f32 %v13827_v43, %v14597_v49 }
 0x40d   :  { %8005 = vmatmul.mubr.msk.f32.vlgmr.msra.gmra.mxu1 %vm5426_vm14, %v14441_v58  ;;  %9046 = vmatprep.subr.mxu1 %v5167_v39  ;;  %v5158_v39 = vmax.f32 %v4352_v0, 0.0  ;;  %v4472_v0 = vadd.f32 %v13827_v43, %v14598_v50  ;;  %vm5299_vm14 = vcmp.ge.s32.totalorder %v14155_v26, %v11183_v62 }
 0x40e   :  { %9047 = vmatpush3.msra.mxu1 %v5151_v32  ;;  %8006 = vmatprep.mubr.msk.f32.mxu1 %vm5459_vm15, %v14441_v58  ;;  %v5142_v32 = vmax.f32 %v4272_v16, 0.0  ;;  %v5199_v16 = vmax.f32 %v4557_v37, 0.0  ;;  %vm5367_vm15 = vcmp.lt.s32.totalorder %v14155_v26, %v11185_v1  ;;  %v5198_v36 = vmax.f32 %v4552_v40, 0.0  ;;  %v14614_v37 = vld [vmem:[#allocation65_spill] sm:$0xff] }
 0x40f   :  { %9048 = vmatprep.subr.mxu1 %v5166_v57  ;;  %v5157_v57 = vmax.f32 %v4347_v30, 0.0  ;;  %v14601_v30 = vld [vmem:[#allocation87_spill] sm:$0xff]  ;;  %v5182_v47 = vmax.f32 %v4472_v0, 0.0  ;;  %vm5431_vm2 = vmand %vm5299_vm14, %vm5367_vm15 }
 0x410   :  { %9049 = vmatpush3.msra.mxu1 %v5150_v63  ;;  %v5141_v63 = vmax.f32 %v4267_v29, 0.0  ;;  %v14602_v29 = vld [vmem:[#allocation71_spill] sm:$0xff] }
 0x411   :  { %8007 = vmatmul.mubr.msk.f32.gmra.mxu1 %vm5458_vm5, %v14441_v58  ;;  %9050 = vmatprep.subr.mxu1 %v5165_v21  ;;  %v5156_v21 = vmax.f32 %v4342_v6, 0.0  ;;  %v14603_v6 = vld [vmem:[#allocation84_spill] sm:$0xff]  ;;  %vm5331_vm5 = vcmp.ge.s32.totalorder %v14155_v26, %v11369_v18 }
 0x412   :  { %9051 = vmatpush3.msra.mxu1 %v5149_v60  ;;  %8008 = vmatprep.mubr.msk.f32.mxu1 %vm5429_vm6, %v14441_v58  ;;  %v14591_v60 = vld [vmem:[#allocation29_spill] sm:$0xff]  ;;  %vm5399_vm6 = vcmp.lt.s32.totalorder %v14155_v26, %v11371_v38  ;;  %v14632_v26 = vld [vmem:[#allocation102_spill] sm:$0xff] }
 0x413   :  { %9052 = vmatprep.subr.mxu1 %v5164_v34  ;;  %v4252_v11 = vadd.f32 %v13827_v43, %v14591_v60  ;;  %v14592_v34 = vld [vmem:[#allocation42_spill] sm:$0xff]  ;;  %v4447_v60 = vadd.f32 %v13827_v43, %v14608_v33 }
 0x414   :  { %9053 = vmatpush3.msra.mxu1 %v5148_v9  ;;  %v4327_v52 = vadd.f32 %v13827_v43, %v14592_v34  ;;  %v5262_v9 = vadd.s32 3328, %v11154_v45 }
 0x415   :  { %9054 = vmatprep.subr.mxu1 %v5163_v51  ;;  %v4322_v51 = vadd.f32 %v13827_v43, %v14593_v31  ;;  %v5138_v14 = vmax.f32 %v4252_v11, 0.0 }
 0x416   :  { %9055 = vmatpush3.msra.mxu1 %v5147_v24  ;;  %v14594_v24 = vld [vmem:[#allocation27_spill] sm:$0xff]  ;;  %vm5296_vm7 = vcmp.ge.s32.totalorder %v5262_v9, %v11183_v62  ;;  %vm5364_vm8 = vcmp.lt.s32.totalorder %v5262_v9, %v11185_v1  ;;  %vm5328_vm12 = vcmp.ge.s32.totalorder %v5262_v9, %v11369_v18  ;;  %vm5396_vm13 = vcmp.lt.s32.totalorder %v5262_v9, %v11371_v38 }
 0x417   :  { %9056 = vmatprep.subr.mxu1 %v5162_v7  ;;  %v4242_v59 = vadd.f32 %v13827_v43, %v14594_v24  ;;  %v5153_v7 = vmax.f32 %v4327_v52, 0.0  ;;  %vm5428_vm1 = vmand %vm5296_vm7, %vm5364_vm8  ;;  %v14610_v9 = vld [vmem:[#allocation67_spill] sm:$0xff]  ;;  %v14612_v24 = vld [vmem:[#allocation64_spill] sm:$0xff] }
 0x418   :  { %9057 = vmatpush3.msra.mxu1 %v5146_v2  ;;  %v14596_v2 = vld [vmem:[#allocation72_spill] sm:$0xff]  ;;  %vm5460_vm0 = vmand %vm5328_vm12, %vm5396_vm13 }
 0x419   :  { %9058 = vmatprep.subr.mxu1 %v5161_v28  ;;  %v4477_v20 = vadd.f32 %v13827_v43, %v14596_v2  ;;  %v5152_v28 = vmax.f32 %v4322_v51, 0.0  ;;  %v14611_v51 = vld [vmem:[#allocation80_spill] sm:$0xff]  ;;  %vm5463_vm8 = vmand %vm5331_vm5, %vm5399_vm6 }
 0x41a   :  { %9059 = vmatpush3.msra.mxu1 %v5145_v22  ;;  %v5136_v22 = vmax.f32 %v4242_v59, 0.0  ;;  %v5177_v59 = vmax.f32 %v4447_v60, 0.0 }
 0x41b   :  { %9060 = vmatprep.subr.mxu1 %v5160_v5  ;;  %v14599_v5 = vld [vmem:[#allocation86_spill] sm:$0xff]  ;;  %v5183_v10 = vmax.f32 %v4477_v20, 0.0 }
 0x41c   :  { %9061 = vmatpush3.msra.mxu1 %v5144_v41  ;;  %v4547_v3 = vadd.f32 %v13827_v43, %v14599_v5  ;;  %v4467_v41 = vadd.f32 %v13827_v43, %v14600_v54  ;;  %v14617_v5 = vld [vmem:[#allocation79_spill] sm:$0xff] }
 0x41d   :  { %9062 = vmatprep.subr.mxu1 %v5159_v19  ;;  %v4542_v19 = vadd.f32 %v13827_v43, %v14601_v30  ;;  %v14618_v54 = vld [vmem:[#allocation63_spill] sm:$0xff]  ;;  %v14619_v30 = vld [vmem:[#allocation76_spill] sm:$0xff] }
 0x41e   :  { %9063 = vmatpush3.msra.mxu1 %v5143_v17  ;;  %v4462_v17 = vadd.f32 %v13827_v43, %v14602_v29  ;;  %v5197_v13 = vmax.f32 %v4547_v3, 0.0  ;;  %v5181_v48 = vmax.f32 %v4467_v41, 0.0  ;;  %v14620_v29 = vld [vmem:[#allocation60_spill] sm:$0xff] }
 0x41f   :  { %9064 = vmatprep.subr.mxu1 %v5158_v39  ;;  %v4537_v39 = vadd.f32 %v13827_v43, %v14603_v6  ;;  %v5196_v15 = vmax.f32 %v4542_v19, 0.0  ;;  %v14621_v6 = vld [vmem:[#allocation77_spill] sm:$0xff] }
 0x420   :  { %9065 = vmatpush3.msra.mxu1 %v5142_v32  ;;  %v4457_v32 = vadd.f32 %v13827_v43, %v14604_v27  ;;  %v5180_v23 = vmax.f32 %v4462_v17, 0.0  ;;  %v14622_v27 = vld [vmem:[#allocation58_spill] sm:$0xff] }
 0x421   :  { %9066 = vmatprep.subr.mxu1 %v5157_v57  ;;  %v4532_v57 = vadd.f32 %v13827_v43, %v14605_v25  ;;  %v5195_v56 = vmax.f32 %v4537_v39, 0.0 }
 0x422   :  { %9067 = vmatpush3.msra.mxu1 %v5141_v63  ;;  %v4452_v63 = vadd.f32 %v13827_v43, %v14606_v42  ;;  %v5179_v11 = vmax.f32 %v4457_v32, 0.0 }
 0x423   :  { %9068 = vmatprep.subr.mxu1 %v5156_v21  ;;  %v4527_v21 = vadd.f32 %v13827_v43, %v14607_v35  ;;  %v5194_v52 = vmax.f32 %v4532_v57, 0.0 }
 0x424   :  { %9069 = vmatpush3.msra.mxu1 %v5140_v46  ;;  %v14609_v46 = vld [vmem:[#allocation83_spill] sm:$0xff]  ;;  %v5178_v31 = vmax.f32 %v4452_v63, 0.0 }
 0x425   :  { %9070 = vmatprep.subr.mxu1 %v5155_v55  ;;  %v4522_v34 = vadd.f32 %v13827_v43, %v14609_v46  ;;  %v14198_v55 = vld [vmem:[%s14415_s2] ss:$0 sm:$0xff] }
 0x426   :  { %9071 = vmatpush3.msra.mxu1 %v5139_v44  ;;  %v4442_v44 = vadd.f32 %v14198_v55, %v14610_v9  ;;  %v4437_v43 = vadd.f32 %v14198_v55, %v14612_v24  ;;  %v4432_v2 = vadd.f32 %v14198_v55, %v14614_v37  ;;  %v4502_v3 = vadd.f32 %v14198_v55, %v14617_v5  ;;  %v14627_v9 = vld [vmem:[#allocation120_spill] sm:$0xff]  ;;  %v14629_v24 = vld [vmem:[#allocation121_spill] sm:$0xff] }
 0x427   :  { %9072 = vmatprep.subr.mxu1 %v5154_v61  ;;  %v4517_v61 = vadd.f32 %v14198_v55, %v14611_v51  ;;  %v5192_v12 = vmax.f32 %v4522_v34, 0.0  ;;  %v4422_v41 = vadd.f32 %v14198_v55, %v14618_v54  ;;  %v4497_v19 = vadd.f32 %v14198_v55, %v14619_v30 }
 0x428   :  { %9073 = vmatpush3.msra.mxu1 %v5138_v14  ;;  %v14613_v14 = vld [vmem:[#allocation81_spill] sm:$0xff]  ;;  %v5176_v20 = vmax.f32 %v4442_v44, 0.0  ;;  %v5175_v0 = vmax.f32 %v4437_v43, 0.0  ;;  %v4417_v17 = vadd.f32 %v14198_v55, %v14620_v29  ;;  %v4492_v39 = vadd.f32 %v14198_v55, %v14621_v6 }
 0x429   :  { %9074 = vmatprep.subr.mxu1 %v5153_v7  ;;  %v4512_v7 = vadd.f32 %v14198_v55, %v14613_v14  ;;  %v5191_v40 = vmax.f32 %v4517_v61, 0.0  ;;  %v4407_v32 = vadd.f32 %v14198_v55, %v14622_v27  ;;  %v5172_v57 = vmax.f32 %v4422_v41, 0.0  ;;  %v14630_v14 = vld [vmem:[#allocation105_spill] sm:$0xff]  ;;  %v14636_v41 = vld [vmem:[#allocation100_spill] sm:$0xff] }
 0x42a   :  { %9075 = vmatpush3.msra.mxu1 %v5137_v53  ;;  %v5193_v53 = vmax.f32 %v4527_v21, 0.0  ;;  %v5187_v63 = vmax.f32 %v4497_v19, 0.0  ;;  %v5171_v35 = vmax.f32 %v4417_v17, 0.0  ;;  %v14625_v21 = vld [vmem:[#allocation75_spill] sm:$0xff]  ;;  %v5186_v33 = vmax.f32 %v4492_v39, 0.0  ;;  %v14637_v19 = vld [vmem:[#allocation117_spill] sm:$0xff] }
 0x42b   :  { %9076 = vmatprep.subr.mxu1 %v5152_v28  ;;  %v14615_v28 = vld [vmem:[#allocation78_spill] sm:$0xff]  ;;  %v5169_v60 = vmax.f32 %v4407_v32, 0.0  ;;  %v4717_v44 = vadd.f32 %v14198_v55, %v14627_v9  ;;  %v14246_v61 = vadd.s32 3968, %v11154_v45  ;;  %v4712_v43 = vadd.f32 %v14198_v55, %v14629_v24  ;;  %v14638_v17 = vld [vmem:[#allocation101_spill] sm:$0xff] }
 0x42c   :  { %9077 = vmatpush3.msra.mxu1 %v5136_v22  ;;  %v4507_v49 = vadd.f32 %v14198_v55, %v14615_v28  ;;  %v14616_v22 = vld [vmem:[#allocation62_spill] sm:$0xff] }
 0x42d   :  { %8009 = vmatmul.mubr.msk.f32.vlgmr.msra.gmra.mxu1 %vm5428_vm1, %v14441_v58  ;;  %9084 = vmatprep.subr.mxu1 %v5199_v16  ;;  %v4427_v50 = vadd.f32 %v14198_v55, %v14616_v22  ;;  %v5190_v16 = vmax.f32 %v4512_v7, 0.0  ;;  %v4632_v7 = vadd.f32 %v14198_v55, %v14630_v14  ;;  %vm5301_vm1 = vcmp.ge.s32.totalorder %v14246_v61, %v11183_v62  ;;  %v14639_v39 = vld [vmem:[#allocation114_spill] sm:$0xff] }
 0x42e   :  { %9085 = vmatpush3.msra.mxu1 %v5183_v10  ;;  %8010 = vmatprep.mubr.msk.f32.mxu1 %vm5461_vm11, %v14441_v58  ;;  %v5174_v10 = vmax.f32 %v4432_v2, 0.0  ;;  %v5231_v2 = vmax.f32 %v4717_v44, 0.0  ;;  %vm5369_vm11 = vcmp.lt.s32.totalorder %v14246_v61, %v11185_v1  ;;  %v5230_v22 = vmax.f32 %v4712_v43, 0.0  ;;  %v14640_v32 = vld [vmem:[#allocation98_spill] sm:$0xff]  ;;  %v14646_v44 = vld [vmem:[#allocation97_spill] sm:$0xff] }
 0x42f   :  { %9086 = vmatprep.subr.mxu1 %v5198_v36  ;;  %v5189_v36 = vmax.f32 %v4507_v49, 0.0  ;;  %v14633_v49 = vld [vmem:[#allocation119_spill] sm:$0xff]  ;;  %v5214_v5 = vmax.f32 %v4632_v7, 0.0  ;;  %vm5433_vm13 = vmand %vm5301_vm1, %vm5369_vm11 }
 0x430   :  { %9087 = vmatpush3.msra.mxu1 %v5182_v47  ;;  %v5173_v47 = vmax.f32 %v4427_v50, 0.0  ;;  %v14634_v50 = vld [vmem:[#allocation103_spill] sm:$0xff] }
 0x431   :  { %8011 = vmatmul.mubr.msk.f32.gmra.mxu1 %vm5460_vm0, %v14441_v58  ;;  %9088 = vmatprep.subr.mxu1 %v5197_v13  ;;  %v5188_v13 = vmax.f32 %v4502_v3, 0.0  ;;  %v14635_v3 = vld [vmem:[#allocation116_spill] sm:$0xff]  ;;  %vm5333_vm0 = vcmp.ge.s32.totalorder %v14246_v61, %v11369_v18 }
 0x432   :  { %9089 = vmatpush3.msra.mxu1 %v5181_v48  ;;  %8012 = vmatprep.mubr.msk.f32.mxu1 %vm5431_vm2, %v14441_v58  ;;  %v14623_v48 = vld [vmem:[#allocation61_spill] sm:$0xff]  ;;  %vm5401_vm2 = vcmp.lt.s32.totalorder %v14246_v61, %v11371_v38 }
 0x433   :  { %9090 = vmatprep.subr.mxu1 %v5196_v15  ;;  %v4412_v25 = vadd.f32 %v14198_v55, %v14623_v48  ;;  %v14624_v15 = vld [vmem:[#allocation74_spill] sm:$0xff]  ;;  %v4607_v48 = vadd.f32 %v14198_v55, %v14640_v32 }
 0x434   :  { %9091 = vmatpush3.msra.mxu1 %v5180_v23  ;;  %v4487_v42 = vadd.f32 %v14198_v55, %v14624_v15  ;;  %v5264_v23 = vadd.s32 3584, %v11154_v45 }
 0x435   :  { %9092 = vmatprep.subr.mxu1 %v5195_v56  ;;  %v4482_v56 = vadd.f32 %v14198_v55, %v14625_v21  ;;  %v5170_v34 = vmax.f32 %v4412_v25, 0.0  ;;  %v14643_v21 = vld [vmem:[#allocation112_spill] sm:$0xff] }
 0x436   :  { %9093 = vmatpush3.msra.mxu1 %v5179_v11  ;;  %v14626_v11 = vld [vmem:[#allocation59_spill] sm:$0xff]  ;;  %vm5298_vm3 = vcmp.ge.s32.totalorder %v5264_v23, %v11183_v62  ;;  %vm5366_vm4 = vcmp.lt.s32.totalorder %v5264_v23, %v11185_v1  ;;  %vm5330_vm9 = vcmp.ge.s32.totalorder %v5264_v23, %v11369_v18  ;;  %vm5398_vm10 = vcmp.lt.s32.totalorder %v5264_v23, %v11371_v38 }
 0x437   :  { %9094 = vmatprep.subr.mxu1 %v5194_v52  ;;  %v4402_v46 = vadd.f32 %v14198_v55, %v14626_v11  ;;  %v5185_v52 = vmax.f32 %v4487_v42, 0.0  ;;  %vm5430_vm7 = vmand %vm5298_vm3, %vm5366_vm4 }
 0x438   :  { %9095 = vmatpush3.msra.mxu1 %v5178_v31  ;;  %v14628_v31 = vld [vmem:[#allocation104_spill] sm:$0xff]  ;;  %vm5462_vm12 = vmand %vm5330_vm9, %vm5398_vm10  ;;  %vm7041_vm9 = vcmask 253952  }
 0x439   :  { %9096 = vmatprep.subr.mxu1 %v5193_v53  ;;  %v4637_v51 = vadd.f32 %v14198_v55, %v14628_v31  ;;  %v5184_v53 = vmax.f32 %v4482_v56, 0.0  ;;  %v4677_v56 = vadd.f32 %v14198_v55, %v14643_v21  ;;  %v4592_v31 = vadd.f32 %v14198_v55, %v14646_v44  ;;  %vm5465_vm4 = vmand %vm5333_vm0, %vm5401_vm2  ;;  %v6730_v21 = vld [vmem:[%s14416_s3] sm:$0xff] }
 0x43a   :  { %9097 = vmatpush3.msra.mxu1 %v5177_v59  ;;  %v5168_v59 = vmax.f32 %v4402_v46, 0.0  ;;  %v5209_v46 = vmax.f32 %v4607_v48, 0.0  ;;  %v14658_v48 = vld [vmem:[#allocation91_spill] sm:$0xff] }
 0x43b   :  { %9098 = vmatprep.subr.mxu1 %v5192_v12  ;;  %v14631_v12 = vld [vmem:[#allocation118_spill] sm:$0xff]  ;;  %v5215_v28 = vmax.f32 %v4637_v51, 0.0  ;;  %v5223_v43 = vmax.f32 %v4677_v56, 0.0 }
 0x43c   :  { %9099 = vmatpush3.msra.mxu1 %v5176_v20  ;;  %v4707_v37 = vadd.f32 %v14198_v55, %v14631_v12  ;;  %v4627_v20 = vadd.f32 %v14198_v55, %v14632_v26  ;;  %v14649_v12 = vld [vmem:[#allocation111_spill] sm:$0xff] }
 0x43d   :  { %9100 = vmatprep.subr.mxu1 %v5191_v40  ;;  %v4702_v40 = vadd.f32 %v14198_v55, %v14633_v49  ;;  %v14650_v26 = vld [vmem:[#allocation95_spill] sm:$0xff]  ;;  %v14651_v49 = vld [vmem:[#allocation108_spill] sm:$0xff] }
 0x43e   :  { %9101 = vmatpush3.msra.mxu1 %v5175_v0  ;;  %v4622_v0 = vadd.f32 %v14198_v55, %v14634_v50  ;;  %v5229_v54 = vmax.f32 %v4707_v37, 0.0  ;;  %v5213_v30 = vmax.f32 %v4627_v20, 0.0  ;;  %v4662_v37 = vadd.f32 %v14198_v55, %v14649_v12  ;;  %v14652_v50 = vld [vmem:[#allocation92_spill] sm:$0xff] }
 0x43f   :  { %9102 = vmatprep.subr.mxu1 %v5190_v16  ;;  %v4697_v16 = vadd.f32 %v14198_v55, %v14635_v3  ;;  %v5228_v29 = vmax.f32 %v4702_v40, 0.0  ;;  %v4582_v20 = vadd.f32 %v14198_v55, %v14650_v26  ;;  %v4657_v40 = vadd.f32 %v14198_v55, %v14651_v49  ;;  %v14653_v3 = vld [vmem:[#allocation109_spill] sm:$0xff] }
 0x440   :  { %9103 = vmatpush3.msra.mxu1 %v5174_v10  ;;  %v4617_v10 = vadd.f32 %v14198_v55, %v14636_v41  ;;  %v5212_v6 = vmax.f32 %v4622_v0, 0.0  ;;  %v4577_v0 = vadd.f32 %v14198_v55, %v14652_v50  ;;  %v14654_v41 = vld [vmem:[#allocation93_spill] sm:$0xff] }
 0x441   :  { %9104 = vmatprep.subr.mxu1 %v5189_v36  ;;  %v4692_v36 = vadd.f32 %v14198_v55, %v14637_v19  ;;  %v5227_v27 = vmax.f32 %v4697_v16, 0.0  ;;  %v4652_v16 = vadd.f32 %v14198_v55, %v14653_v3  ;;  %v14655_v19 = vld [vmem:[#allocation106_spill] sm:$0xff] }
 0x442   :  { %9105 = vmatpush3.msra.mxu1 %v5173_v47  ;;  %v4612_v47 = vadd.f32 %v14198_v55, %v14638_v17  ;;  %v5211_v25 = vmax.f32 %v4617_v10, 0.0  ;;  %v4572_v10 = vadd.f32 %v14198_v55, %v14654_v41  ;;  %v5266_v17 = vadd.s32 3840, %v11154_v45 }
 0x443   :  { %9106 = vmatprep.subr.mxu1 %v5188_v13  ;;  %v4687_v13 = vadd.f32 %v14198_v55, %v14639_v39  ;;  %v5226_v42 = vmax.f32 %v4692_v36, 0.0  ;;  %v4647_v36 = vadd.f32 %v14198_v55, %v14655_v19  ;;  %v5203_v39 = vmax.f32 %v4577_v0, 0.0 }
 0x444   :  { %9107 = vmatpush3.msra.mxu1 %v5172_v57  ;;  %v14641_v57 = vld [vmem:[#allocation115_spill] sm:$0xff]  ;;  %v5218_v32 = vmax.f32 %v4652_v16, 0.0  ;;  %vm5300_vm14 = vcmp.ge.s32.totalorder %v5266_v17, %v11183_v62  ;;  %vm5368_vm15 = vcmp.lt.s32.totalorder %v5266_v17, %v11185_v1  ;;  %vm5332_vm5 = vcmp.ge.s32.totalorder %v5266_v17, %v11369_v18  ;;  %v8774_v62 = vpop.f32.mrf.mxu1 }
 0x445   :  { %9108 = vmatprep.subr.mxu1 %v5187_v63  ;;  %v4682_v15 = vadd.f32 %v14198_v55, %v14641_v57  ;;  %v14642_v63 = vld [vmem:[#allocation99_spill] sm:$0xff]  ;;  %v5202_v57 = vmax.f32 %v4572_v10, 0.0  ;;  %vm5432_vm3 = vmand %vm5300_vm14, %vm5368_vm15  ;;  %vm5400_vm6 = vcmp.lt.s32.totalorder %v5266_v17, %v11371_v38 }
 0x446   :  { %9109 = vmatpush3.msra.mxu1 %v5171_v35  ;;  %v4602_v23 = vadd.f32 %v14198_v55, %v14642_v63  ;;  %v5210_v35 = vmax.f32 %v4612_v47, 0.0  ;;  %v14656_v47 = vld [vmem:[#allocation90_spill] sm:$0xff]  ;;  %v8775_v1 = vpop.f32.mrf.mxu1  ;;  %v6732_v18 = vld [vmem:[%s14416_s3 + $0x10] sm:$0xff] }
 0x447   :  { %9110 = vmatprep.subr.mxu1 %v5186_v33  ;;  %v5225_v33 = vmax.f32 %v4687_v13, 0.0  ;;  %v5224_v9 = vmax.f32 %v4682_v15, 0.0  ;;  %v14657_v13 = vld [vmem:[#allocation107_spill] sm:$0xff]  ;;  %v5217_v15 = vmax.f32 %v4647_v36, 0.0  ;;  %v8776_v3 = vadd.f32 %v8775_v1, %v8774_v62 }
 0x448   :  { %9111 = vmatpush3.msra.mxu1 %v5170_v34  ;;  %v14645_v34 = vld [vmem:[#allocation113_spill] sm:$0xff]  ;;  %v5208_v51 = vmax.f32 %v4602_v23, 0.0 }
 0x449   :  { %9112 = vmatprep.subr.mxu1 %v5185_v52  ;;  %v4672_v52 = vadd.f32 %v14198_v55, %v14645_v34  ;;  %v5972_v10 = vadd.f32 %v8776_v3, %v13538_v8 }
 0x44a   :  { %9113 = vmatpush3.msra.mxu1 %v5169_v60  ;;  %v14644_v60 = vld [vmem:[#allocation96_spill] sm:$0xff] }
 0x44b   :  { %9114 = vmatprep.subr.mxu1 %v5184_v53  ;;  %v4597_v11 = vadd.f32 %v14198_v55, %v14644_v60  ;;  %v14647_v53 = vld [vmem:[#allocation110_spill] sm:$0xff] }
 0x44c   :  { %9115 = vmatpush3.msra.mxu1 %v5168_v59  ;;  %v4667_v24 = vadd.f32 %v14198_v55, %v14647_v53  ;;  %v14648_v59 = vld [vmem:[#allocation94_spill] sm:$0xff] }
 0x44d   :  { %8013 = vmatmul.mubr.msk.f32.vlgmr.msra.gmra.mxu1 %vm5430_vm7, %v14441_v58  ;;  %9122 = vmatprep.subr.mxu1 %v5231_v2  ;;  %v4587_v14 = vadd.f32 %v14198_v55, %v14648_v59  ;;  %v5207_v7 = vmax.f32 %v4597_v11, 0.0  ;;  %v5222_v2 = vmax.f32 %v4672_v52, 0.0  ;;  %vm5464_vm7 = vmand %vm5332_vm5, %vm5400_vm6 }
 0x44e   :  { %9123 = vmatpush3.msra.mxu1 %v5215_v28  ;;  %8014 = vmatprep.mubr.msk.f32.mxu1 %vm5463_vm8, %v14441_v58  ;;  %v5206_v28 = vmax.f32 %v4592_v31, 0.0  ;;  %vm6741_vm8 = vcmask 261120  }
 0x44f   :  { %9124 = vmatprep.subr.mxu1 %v5230_v22  ;;  %v5221_v22 = vmax.f32 %v4667_v24, 0.0 }
 0x450   :  { %9125 = vmatpush3.msra.mxu1 %v5214_v5  ;;  %v5205_v5 = vmax.f32 %v4587_v14, 0.0 }
 0x451   :  { %8015 = vmatmul.mubr.msk.f32.gmra.mxu1 %vm5462_vm12, %v14441_v58  ;;  %9126 = vmatprep.subr.mxu1 %v5229_v54  ;;  %v5220_v54 = vmax.f32 %v4662_v37, 0.0 }
 0x452   :  { %9127 = vmatpush3.msra.mxu1 %v5213_v30  ;;  %8016 = vmatprep.mubr.msk.f32.mxu1 %vm5433_vm13, %v14441_v58  ;;  %v5204_v30 = vmax.f32 %v4582_v20, 0.0  ;;  %vm7117_vm13 = vcmask 64512  }
 0x453   :  { %9128 = vmatprep.subr.mxu1 %v5228_v29  ;;  %v5219_v29 = vmax.f32 %v4657_v40, 0.0 }
 0x454   :  { %9129 = vmatpush3.msra.mxu1 %v5212_v6  ;;  %v4567_v6 = vadd.f32 %v14198_v55, %v14656_v47 }
 0x455   :  { %9130 = vmatprep.subr.mxu1 %v5227_v27  ;;  %v4642_v27 = vadd.f32 %v14198_v55, %v14657_v13 }
 0x456   :  { %9131 = vmatpush3.msra.mxu1 %v5211_v25  ;;  %v4562_v25 = vadd.f32 %v14198_v55, %v14658_v48  ;;  %v5201_v45 = vmax.f32 %v4567_v6, 0.0  ;;  %v8777_v55 = vpop.f32.mrf.mxu1 }
 0x457   :  { %9132 = vmatprep.subr.mxu1 %v5226_v42  ;;  %v5216_v42 = vmax.f32 %v4642_v27, 0.0 }
 0x458   :  { %9133 = vmatpush3.msra.mxu1 %v5210_v35  ;;  %v5200_v63 = vmax.f32 %v4562_v25, 0.0  ;;  %v8778_v61 = vpop.f32.mrf.mxu1  ;;  %v6733_v35 = vld [vmem:[%s14416_s3 + $0x18] sm:$0xff] }
 0x459   :  { %9134 = vmatprep.subr.mxu1 %v5225_v33  ;;  %v8779_v16 = vadd.f32 %v8778_v61, %v8777_v55 }
 0x45a   :  { %9135 = vmatpush3.msra.mxu1 %v5209_v46  ;;  %v8812_v23 = vpop.f32.mrf.mxu1 }
 0x45b   :  { %9136 = vmatprep.subr.mxu1 %v5224_v9  ;;  %v5977_v36 = vadd.f32 %v8779_v16, %v13553_v4 }
 0x45c   :  { %9137 = vmatpush3.msra.mxu1 %v5208_v51  ;;  %v8813_v38 = vpop.f32.mrf.mxu1 }
 0x45d   :  { %9138 = vmatprep.subr.mxu1 %v5223_v43 }
 0x45e   :  { %9139 = vmatpush3.msra.mxu1 %v5207_v7  ;;  %v8815_v56 = vpop.f32.mrf.mxu1 }
 0x45f   :  { %9140 = vmatprep.subr.mxu1 %v5222_v2 }
 0x460   :  { %9141 = vmatpush3.msra.mxu1 %v5206_v28  ;;  %v8816_v33 = vpop.f32.mrf.mxu1 }
 0x461   :  { %9142 = vmatprep.subr.mxu1 %v5221_v22  ;;  %v8817_v17 = vadd.f32 %v8816_v33, %v8815_v56 }
 0x462   :  { %9143 = vmatpush3.msra.mxu1 %v5205_v5  ;;  %v8850_v60 = vpop.f32.mrf.mxu1 }
 0x463   :  { %9144 = vmatprep.subr.mxu1 %v5220_v54  ;;  %v8814_v54 = vadd.f32 %v8813_v38, %v8812_v23 }
 0x464   :  { %9145 = vmatpush3.msra.mxu1 %v5204_v30  ;;  %v8851_v11 = vpop.f32.mrf.mxu1 }
 0x465   :  { %9146 = vmatprep.subr.mxu1 %v5219_v29  ;;  %v8852_v30 = vadd.f32 %v8851_v11, %v8850_v60  ;;  %v6047_v29 = vadd.f32 %v8814_v54, %v5972_v10 }
 0x466   :  { %9147 = vmatpush3.msra.mxu1 %v5203_v39  ;;  %v8853_v46 = vpop.f32.mrf.mxu1 }
 0x467   :  { %9148 = vmatprep.subr.mxu1 %v5218_v32  ;;  %v6122_v6 = vadd.f32 %v8852_v30, %v6047_v29  ;;  %v6052_v32 = vadd.f32 %v8817_v17, %v5977_v36 }
 0x468   :  { %9149 = vmatpush3.msra.mxu1 %v5202_v57  ;;  %v8854_v34 = vpop.f32.mrf.mxu1 }
 0x469   :  { %9150 = vmatprep.subr.mxu1 %v5217_v15  ;;  %v8855_v39 = vadd.f32 %v8854_v34, %v8853_v46 }
 0x46a   :  { %9151 = vmatpush3.msra.mxu1 %v5201_v45  ;;  %v8888_v52 = vpop.f32.mrf.mxu1 }
 0x46b   :  { %9152 = vmatprep.subr.mxu1 %v5216_v42  ;;  %v6127_v15 = vadd.f32 %v8855_v39, %v6052_v32 }
 0x46c   :  { %9153 = vmatpush3.msra.mxu1 %v5200_v63  ;;  %v8889_v9 = vpop.f32.mrf.mxu1 }
 0x46d   :  { %8017 = vmatmul.mubr.msk.f32.vlgmr.msra.gmra.mxu1 %vm5432_vm3, %v14441_v58  ;;  %9960 = vmatprep.subr.mxu1 %v6733_v35  ;;  %v8890_v47 = vadd.f32 %v8889_v9, %v8888_v52 }
 0x46e   :  { %8018 = vmatprep.mubr.msk.f32.mxu1 %vm5465_vm4, %v14441_v58  ;;  %9961 = vmatpush3.msra.mxu1 %v6733_v35  ;;  %v8891_v44 = vpop.f32.mrf.mxu1 }
 0x46f   :  { %9962 = vmatprep.subr.mxu1 %v6732_v18  ;;  %v6197_v48 = vadd.f32 %v8890_v47, %v6122_v6 }
 0x470   :  { %9963 = vmatpush3.msra.mxu1 %v6732_v18  ;;  %v8892_v31 = vpop.f32.mrf.mxu1 }
 0x471   :  { %8019 = vmatmul.mubr.msk.f32.gmra.mxu1 %vm5464_vm7, %v14441_v58  ;;  %v6731_v58 = vld [vmem:[%s14416_s3 + $0x8] sm:$0xff]  ;;  %v8893_v25 = vadd.f32 %v8892_v31, %v8891_v44 }
 0x472   :  { %9964 = vmatprep.subr.mxu1 %v6731_v58  ;;  %v8926_v51 = vpop.f32.mrf.mxu1 }
 0x473   :  { %9965 = vmatpush3.msra.mxu1 %v6731_v58  ;;  %v6202_v62 = vadd.f32 %v8893_v25, %v6127_v15 }
 0x474   :  { %9966 = vmatprep.subr.mxu1 %v6730_v21  ;;  %v8927_v53 = vpop.f32.mrf.mxu1 }
 0x475   :  { %9967 = vmatpush3.msra.mxu1 %v6730_v21  ;;  %v8928_v13 = vadd.f32 %v8927_v53, %v8926_v51 }
 0x476   :  { %v8929_v24 = vpop.f32.mrf.mxu1 }
 0x477   :  { %v6272_v45 = vadd.f32 %v8928_v13, %v6197_v48 }
 0x478   :  { %v8930_v43 = vpop.f32.mrf.mxu1 }
 0x479   :  { %v8931_v42 = vadd.f32 %v8930_v43, %v8929_v24 }
 0x47a   :  { %v8964_v59 = vpop.f32.mrf.mxu1 }
 0x47b   :  { %v6277_v61 = vadd.f32 %v8931_v42, %v6202_v62 }
 0x47c   :  { %v8965_v14 = vpop.f32.mrf.mxu1 }
 0x47d   :  { %v8966_v57 = vadd.f32 %v8965_v14, %v8964_v59 }
 0x47e   :  { %v8967_v7 = vpop.f32.mrf.mxu1 }
 0x47f   :  { %v6347_v1 = vadd.f32 %v8966_v57, %v6272_v45 }
 0x480   :  { %v8968_v12 = vpop.f32.mrf.mxu1 }
 0x481   :  { %v8969_v55 = vadd.f32 %v8968_v12, %v8967_v7 }
 0x483   :  { %v6352_v58 = vadd.f32 %v8969_v55, %v6277_v61 }
 0x4ad   :  { %v9002_v37 = vpop.f32.mrf.mxu1 }
 0x4af   :  { %v9003_v2 = vpop.f32.mrf.mxu1 }
 0x4b0   :  { %v9004_v63 = vadd.f32 %v9003_v2, %v9002_v37  ;;  %v6897_v37 = vld [vmem:[%s14420_s7 + $0x18] sm:$0xff]  ;;  %v6896_v2 = vld [vmem:[%s14420_s7 + $0x10] sm:$0xff] }
 0x4b1   :  { %v9005_v26 = vpop.f32.mrf.mxu1  ;;  %9971 = vmatprep.subr.mxu1 %v6897_v37 }
 0x4b2   :  { %v6422_v23 = vadd.f32 %v9004_v63, %v6347_v1 }
 0x4b3   :  { %v9006_v20 = vpop.f32.mrf.mxu1 }
 0x4b4   :  { %v9007_v35 = vadd.f32 %v9006_v20, %v9005_v26  ;;  %v6895_v26 = vld [vmem:[%s14420_s7 + $0x8] sm:$0xff]  ;;  %v6894_v20 = vld [vmem:[%s14420_s7] sm:$0xff] }
 0x4b6   :  { %v6427_v11 = vadd.f32 %v9007_v35, %v6352_v58 }
 0x4cd   :  { %v9040_v28 = vpop.f32.mrf.mxu1 }
 0x4cf   :  { %v9041_v49 = vpop.f32.mrf.mxu1 }
 0x4d0   :  { %v9042_v4 = vadd.f32 %v9041_v49, %v9040_v28  ;;  %v8020_v28 = vld [vmem:[%s14417_s4] ss:$0 sm:$0xff] }
 0x4d1   :  { %v9043_v40 = vpop.f32.mrf.mxu1 }
 0x4d2   :  { %v6497_v21 = vadd.f32 %v9042_v4, %v6422_v23 }
 0x4d3   :  { %v9044_v22 = vpop.f32.mrf.mxu1 }
 0x4d4   :  { %v9045_v56 = vadd.f32 %v9044_v22, %v9043_v40 }
 0x4d6   :  { %v6502_v9 = vadd.f32 %v9045_v56, %v6427_v11 }
 0x4ed   :  { %v9078_v50 = vpop.f32.mrf.mxu1 }
 0x4ef   :  { %v9079_v0 = vpop.f32.mrf.mxu1 }
 0x4f0   :  { %v9080_v18 = vadd.f32 %v9079_v0, %v9078_v50 }
 0x4f1   :  { %v9081_v5 = vpop.f32.mrf.mxu1 }
 0x4f2   :  { %v6572_v46 = vadd.f32 %v9080_v18, %v6497_v21 }
 0x4f3   :  { %v9082_v41 = vpop.f32.mrf.mxu1 }
 0x4f4   :  { %v9083_v34 = vadd.f32 %v9082_v41, %v9081_v5 }
 0x4f6   :  { %v6577_v24 = vadd.f32 %v9083_v34, %v6502_v9 }
 0x50d   :  { %v9116_v19 = vpop.f32.mrf.mxu1 }
 0x50f   :  { %v9117_v27 = vpop.f32.mrf.mxu1 }
 0x510   :  { %v9118_v33 = vadd.f32 %v9117_v27, %v9116_v19 }
 0x511   :  { %v9119_v8 = vpop.f32.mrf.mxu1 }
 0x512   :  { %v6647_v44 = vadd.f32 %v9118_v33, %v6572_v46 }
 0x513   :  { %v9120_v38 = vpop.f32.mrf.mxu1 }
 0x514   :  { %v9121_v31 = vadd.f32 %v9120_v38, %v9119_v8 }
 0x516   :  { %v6652_v14 = vadd.f32 %v9121_v31, %v6577_v24 }
 0x52d   :  { %v9154_v60 = vpop.f32.mrf.mxu1 }
 0x52f   :  { %v9155_v52 = vpop.f32.mrf.mxu1 }
 0x530   :  { %v9156_v51 = vadd.f32 %v9155_v52, %v9154_v60  ;;  %v8023_v60 = vld [vmem:[%s14418_s5] ss:$0 sm:$0xff] }
 0x531   :  { %v9157_v53 = vpop.f32.mrf.mxu1  ;;  %v8024_v52 = vld [vmem:[%s14419_s6] ss:$0 sm:$0xff] }
 0x532   :  { %v6722_v43 = vadd.f32 %v9156_v51, %v6647_v44 }
 0x533   :  { %v9158_v59 = vpop.f32.mrf.mxu1 }
 0x534   :  { %v9159_v7 = vadd.f32 %v9158_v59, %v9157_v53  ;;  %9968 = vmatprep.mubr.msk.f32.mxu1 %vm6741_vm8, %v6722_v43 }
 0x536   :  { %v6727_v12 = vadd.f32 %v9159_v7, %v6652_v14 }
 0x538   :  { %9969 = vmatmul.mubr.msk.f32.vlgmr.msra.gmra.mxu1 %vm6741_vm8, %v6727_v12 }
 0x539   :  { %9972 = vmatpush3.msra.mxu1 %v6897_v37 }
 0x53a   :  { %9973 = vmatprep.subr.mxu1 %v6896_v2 }
 0x53b   :  { %9974 = vmatpush3.msra.mxu1 %v6896_v2 }
 0x53c   :  { %9975 = vmatprep.subr.mxu1 %v6895_v26 }
 0x53d   :  { %9976 = vmatpush3.msra.mxu1 %v6895_v26 }
 0x53e   :  { %9977 = vmatprep.subr.mxu1 %v6894_v20 }
 0x53f   :  { %9978 = vmatpush3.msra.mxu1 %v6894_v20 }
 0x5f8   :  { %v9970_v49 = vpop.f32.mrf.mxu1 }
 0x5f9   :  { %v6820_v40 = vadd.f32 %v9970_v49, %v8020_v28 }
 0x5fa   :  { %v6814_v22 = vpop.f32.mrf.mxu1 }
 0x5fb   :  { %v6832_v50 = vsel %vm6741_vm8, %v6820_v40, 0.0  ;;  %v6815_v0 = vadd.f32 %v8020_v28, %v6814_v22 }
 0x5fc   :  { %v6833_v5 = vrot.slane %v6832_v50, 4 }
 0x5fd   :  { %v6823_v3 = vsel %vm6741_vm8, %v6815_v0, 0.0 }
 0x5fe   :  { %v6834_v16 = vadd.f32 %v6833_v5, %v6832_v50  ;;  %v6824_v54 = vrot.slane %v6823_v3, 4 }
 0x600   :  { %v6835_v41 = vrot.slane %v6834_v16, 2  ;;  %v6825_v10 = vadd.f32 %v6824_v54, %v6823_v3 }
 0x602   :  { %v6836_v30 = vadd.f32 %v6835_v41, %v6834_v16  ;;  %v6826_v19 = vrot.slane %v6825_v10, 2 }
 0x604   :  { %v6837_v36 = vrot.slane %v6836_v30, 1  ;;  %v6827_v29 = vadd.f32 %v6826_v19, %v6825_v10 }
 0x606   :  { %v6838_v17 = vadd.f32 %v6837_v36, %v6836_v30  ;;  %v6828_v47 = vrot.slane %v6827_v29, 1 }
 0x608   :  { %v6839_v6 = vmul.f32 0.125, %v6838_v17  ;;  %v6829_v39 = vadd.f32 %v6828_v47, %v6827_v29 }
 0x60a   :  { %v6850_v13 = vsub.f32 %v6820_v40, %v6839_v6  ;;  %v6831_v27 = vmul.f32 0.125, %v6829_v39 }
 0x60c   :  { %v6851_v32 = vmul.f32 %v6850_v13, %v6850_v13  ;;  %v6840_v48 = vsub.f32 %v6815_v0, %v6831_v27 }
 0x60e   :  { %v6852_v25 = vsel %vm6741_vm8, %v6851_v32, 0.0  ;;  %v6841_v57 = vmul.f32 %v6840_v48, %v6840_v48 }
 0x60f   :  { %v6853_v15 = vrot.slane %v6852_v25, 4 }
 0x610   :  { %v6842_v45 = vsel %vm6741_vm8, %v6841_v57, 0.0 }
 0x611   :  { %v6854_v42 = vadd.f32 %v6853_v15, %v6852_v25  ;;  %v6843_v63 = vrot.slane %v6842_v45, 4 }
 0x613   :  { %v6855_v8 = vrot.slane %v6854_v42, 2  ;;  %v6844_v62 = vadd.f32 %v6843_v63, %v6842_v45 }
 0x615   :  { %v6856_v1 = vadd.f32 %v6855_v8, %v6854_v42  ;;  %v6845_v55 = vrot.slane %v6844_v62, 2 }
 0x617   :  { %v6857_v4 = vrot.slane %v6856_v1, 1  ;;  %v6846_v61 = vadd.f32 %v6845_v55, %v6844_v62 }
 0x619   :  { %v6858_v23 = vadd.f32 %v6857_v4, %v6856_v1  ;;  %v6847_v35 = vrot.slane %v6846_v61, 1 }
 0x61b   :  { %v6859_v18 = vmul.f32 0.125, %v6858_v23  ;;  %v6848_v38 = vadd.f32 %v6847_v35, %v6846_v61 }
 0x61d   :  { %v6869_v58 = vadd.f32 1e-05, %v6859_v18  ;;  %v6849_v21 = vmul.f32 0.125, %v6848_v38 }
 0x61f   :  { %10025 = vrsqrt.f32 %v6869_v58  ;;  %v6868_v56 = vadd.f32 1e-05, %v6849_v21 }
 0x621   :  { %10027 = vrsqrt.f32 %v6868_v56 }
 0x62c   :  { %v10026_v33 = vpop.eup %10025 }
 0x62d   :  { %v6873_v11 = vmul.f32 %v10026_v33, %v6850_v13 }
 0x62e   :  { %v10028_v46 = vpop.eup %10027 }
 0x62f   :  { %v6882_v34 = vmul.f32 %v8023_v60, %v6873_v11  ;;  %v6872_v9 = vmul.f32 %v10028_v46, %v6840_v48 }
 0x631   :  { %v6881_v44 = vmul.f32 %v8023_v60, %v6872_v9  ;;  %v6891_v31 = vadd.f32 %v8024_v52, %v6882_v34 }
 0x633   :  { %v6890_v51 = vadd.f32 %v8024_v52, %v6881_v44  ;;  %v6893_v24 = vmax.f32 %v6891_v31, 0.0 }
 0x635   :  { %v6892_v53 = vmax.f32 %v6890_v51, 0.0 }
 0x637   :  { %9979 = vmatprep.mubr.msk.f32.mxu1 %vm6741_vm8, %v6892_v53 }
 0x638   :  { %9980 = vmatmul.mubr.msk.f32.vlgmr.msra.gmra.mxu1 %vm6741_vm8, %v6893_v24 }
 0x6f8   :  { %v9981_v43 = vpop.f32.mrf.mxu1 }
 0x6f9   :  { %v7003_v59 = vsel %vm6741_vm8, %v9981_v43, 0.0 }
 0x6fa   :  { %v7004_v14 = vrot.slane %v7003_v59, 4  ;;  %v6970_v7 = vpop.f32.mrf.mxu1 }
 0x6fb   :  { %v6994_v12 = vsel %vm6741_vm8, %v6970_v7, 0.0  ;;  %v6979_v37 = vsub.f32 %v6970_v7, %v9981_v43 }
 0x6fc   :  { %v7005_v2 = vadd.f32 %v7004_v14, %v7003_v59  ;;  %v6995_v26 = vrot.slane %v6994_v12, 4 }
 0x6fd   :  { %v6980_v20 = vmul.f32 %v6979_v37, %v6979_v37 }
 0x6fe   :  { %v7006_v28 = vrot.slane %v7005_v2, 2  ;;  %v6996_v49 = vadd.f32 %v6995_v26, %v6994_v12 }
 0x6ff   :  { %v6981_v40 = vsel %vm6741_vm8, %v6980_v20, 0.0 }
 0x700   :  { %v7007_v22 = vadd.f32 %v7006_v28, %v7005_v2  ;;  %v6997_v50 = vrot.slane %v6996_v49, 2  ;;  %6982 = vadd.xlane.f32.xlu1 %v6981_v40 }
 0x702   :  { %v7008_v0 = vrot.slane %v7007_v22, 1  ;;  %v6998_v5 = vadd.f32 %v6997_v50, %v6996_v49 }
 0x704   :  { %v7009_v3 = vadd.f32 %v7008_v0, %v7007_v22  ;;  %v6999_v16 = vrot.slane %v6998_v5, 1 }
 0x706   :  { %v7010_v54 = vmul.f32 0.125, %v7009_v3  ;;  %v7000_v41 = vadd.f32 %v6999_v16, %v6998_v5 }
 0x708   :  { %v14378_v10 = vsub.f32 %v9981_v43, %v7010_v54  ;;  %v7001_v30 = vmul.f32 0.125, %v7000_v41 }
 0x70a   :  { %v7022_v19 = vmul.f32 %v14378_v10, %v14378_v10  ;;  %v7002_v36 = vsub.f32 %v6970_v7, %v7001_v30 }
 0x70c   :  { %v7023_v29 = vsel %vm6741_vm8, %v7022_v19, 0.0  ;;  %v7012_v17 = vmul.f32 %v7002_v36, %v7002_v36  ;;  %7085 = vxpose.xlu0.b32.start.end [1/1] (short) (narrow) %v7002_v36, 32  ;;  %9982 = vmatprep.subr.mxu1 %v7002_v36 }
 0x70d   :  { %v7024_v47 = vrot.slane %v7023_v29, 4  ;;  %9983 = vmatpush3.msra.mxu1 %v7002_v36 }
 0x70e   :  { %9990 = vmatprep.subr.mxu1 %v14378_v10  ;;  %v7013_v6 = vsel %vm6741_vm8, %v7012_v17, 0.0 }
 0x70f   :  { %v7025_v39 = vadd.f32 %v7024_v47, %v7023_v29  ;;  %v7014_v13 = vrot.slane %v7013_v6, 4 }
 0x711   :  { %v7026_v27 = vrot.slane %v7025_v39, 2  ;;  %v7015_v32 = vadd.f32 %v7014_v13, %v7013_v6 }
 0x713   :  { %v7027_v48 = vadd.f32 %v7026_v27, %v7025_v39  ;;  %v7016_v25 = vrot.slane %v7015_v32, 2 }
 0x715   :  { %v7028_v57 = vrot.slane %v7027_v48, 1  ;;  %v7017_v15 = vadd.f32 %v7016_v25, %v7015_v32 }
 0x717   :  { %v7029_v45 = vadd.f32 %v7028_v57, %v7027_v48  ;;  %v7018_v42 = vrot.slane %v7017_v15, 1 }
 0x719   :  { %v7030_v63 = vmul.f32 0.14285715, %v7029_v45  ;;  %7219 = vxpose.xlu0.b32.start.end [1/1] (short) (narrow) %v14378_v10, 32  ;;  %v7019_v8 = vadd.f32 %v7018_v42, %v7017_v15 }
 0x71b   :  { %v7058_v62 = vadd.f32 0.0001, %v7030_v63  ;;  %v7021_v1 = vmul.f32 0.14285715, %v7019_v8  ;;  %v7407_v55 = vmul.f32 %v7030_v63, %v7030_v63 }
 0x71d   :  { %v7031_v4 = vadd.f32 0.0001, %v7021_v1  ;;  %v7372_v61 = vmul.f32 %v7021_v1, %v7021_v1  ;;  %10029 = vrsqrt.f32 %v7058_v62  ;;  %v14387_v23 = vsel %vm7041_vm9, %v7407_v55, 0.0 }
 0x71e   :  { %vm7061_vm10 = vcmp.eq.f32.partialorder %v7058_v62, inf  ;;  %v7064_v21 = vand.u32 2147483648, %v7058_v62  ;;  %vm7063_vm1 = vcmp.eq.f32.partialorder %v7058_v62, 0.0 }
 0x71f   :  { %v7373_v35 = vsel %vm7041_vm9, %v7372_v61, 0.0  ;;  %10031 = vrsqrt.f32 %v7031_v4  ;;  %vm7034_vm11 = vcmp.eq.f32.partialorder %v7031_v4, inf  ;;  %v7037_v11 = vand.u32 2147483648, %v7031_v4 }
 0x720   :  { %7374 = vadd.xlane.f32.xlu1 %v7373_v35  ;;  %vm7036_vm12 = vcmp.eq.f32.partialorder %v7031_v4, 0.0 }
 0x72a   :  { %v10030_v18 = vpop.eup %10029 }
 0x72b   :  { %v7060_v38 = vmul.f32 %v10030_v18, %v7058_v62 }
 0x72c   :  { %v10032_v58 = vpop.eup %10031 }
 0x72d   :  { %v7062_v56 = vsel %vm7061_vm10, %v7058_v62, %v7060_v38  ;;  %v7033_v33 = vmul.f32 %v10032_v58, %v7031_v4 }
 0x72e   :  { %v7065_v60 = vsel %vm7063_vm1, %v7064_v21, %v7062_v56 }
 0x72f   :  { %v7066_v46 = vsub.f32 1.0, %v7065_v60  ;;  %v7035_v34 = vsel %vm7034_vm11, %v7031_v4, %v7033_v33 }
 0x730   :  { %v7038_v52 = vsel %vm7036_vm12, %v7037_v11, %v7035_v34 }
 0x731   :  { %v7067_v9 = vmax.f32 %v7066_v46, 0.0  ;;  %v7039_v44 = vsub.f32 1.0, %v7038_v52 }
 0x733   :  { %v7068_v31 = vsel %vm7041_vm9, %v7067_v9, 0.0  ;;  %v7040_v51 = vmax.f32 %v7039_v44, 0.0 }
 0x734   :  { %7069 = vadd.xlane.f32.xlu1 %v7068_v31 }
 0x735   :  { %v7042_v53 = vsel %vm7041_vm9, %v7040_v51, 0.0 }
 0x738   :  { %7043 = vadd.xlane.f32.xlu1 %v7042_v53 }
 0x788   :  { %v7101_v24 = vpop.trf.xlu0 }
 0x789   :  { %9984 = vmatprep.mubr.msk.f32.mxu1 %vm7117_vm13, %v7101_v24  ;;  %v6983_v43 = vpop.xlane.xlu1 %6982 }
 0x78a   :  { %v6984_v59 = vrot.slane %v6983_v43, 4 }
 0x78c   :  { %v6985_v14 = vadd.f32 %v6984_v59, %v6983_v43  ;;  %v7102_v7 = vpop.trf.xlu0 }
 0x78d   :  { %9985 = vmatmul.mubr.msk.f32.vlgmr.msra.gmra.mxu1 %vm7117_vm13, %v7102_v7 }
 0x78e   :  { %v6986_v12 = vrot.slane %v6985_v14, 2  ;;  %9991 = vmatpush3.msra.mxu1 %v14378_v10 }
 0x790   :  { %v7103_v37 = vpop.trf.xlu0  ;;  %v6987_v2 = vadd.f32 %v6986_v12, %v6985_v14 }
 0x791   :  { %9987 = vmatprep.mubr.msk.f32.mxu1 %vm7117_vm13, %v7103_v37 }
 0x792   :  { %v6988_v26 = vrot.slane %v6987_v2, 1 }
 0x794   :  { %v7104_v20 = vpop.trf.xlu0  ;;  %v6989_v28 = vadd.f32 %v6988_v26, %v6987_v2 }
 0x795   :  { %9988 = vmatmul.mubr.msk.f32.gmra.mxu1 %vm7117_vm13, %v7104_v20 }
 0x796   :  { %10008 = vpush %v6989_v28 }
 0x798   :  { %v7235_v49 = vpop.trf.xlu0 }
 0x799   :  { %9992 = vmatprep.mubr.msk.f32.mxu1 %vm7117_vm13, %v7235_v49 }
 0x79c   :  { %v7236_v40 = vpop.trf.xlu0 }
 0x79d   :  { %9993 = vmatmul.mubr.msk.f32.vlgmr.msra.gmra.mxu1 %vm7117_vm13, %v7236_v40 }
 0x7a0   :  { %v7237_v22 = vpop.trf.xlu0 }
 0x7a1   :  { %9995 = vmatprep.mubr.msk.f32.mxu1 %vm7117_vm13, %v7237_v22 }
 0x7a4   :  { %v7238_v50 = vpop.trf.xlu0 }
 0x7a5   :  { %9996 = vmatmul.mubr.msk.f32.gmra.mxu1 %vm7117_vm13, %v7238_v50 }
 0x7a9   :  { %v7375_v0 = vpop.xlane.xlu1 %7374 }
 0x7aa   :  { %v7376_v12 = vrot.slane %v7375_v0, 4 }
 0x7bd   :  { %v7070_v5 = vpop.xlane.xlu1 %7069 }
 0x7be   :  { %v7071_v3 = vrot.slane %v7070_v5, 4 }
 0x7c0   :  { %v7072_v16 = vadd.f32 %v7071_v3, %v7070_v5 }
 0x7c1   :  { %v7044_v54 = vpop.xlane.xlu1 %7043 }
 0x7c2   :  { %v7073_v41 = vrot.slane %v7072_v16, 2  ;;  %v7045_v10 = vrot.slane %v7044_v54, 4 }
 0x7c4   :  { %v7046_v30 = vadd.f32 %v7045_v10, %v7044_v54  ;;  %v7074_v19 = vadd.f32 %v7073_v41, %v7072_v16 }
 0x7c6   :  { %v7047_v36 = vrot.slane %v7046_v30, 2  ;;  %v7075_v17 = vrot.slane %v7074_v19, 1 }
 0x7c7   :  { %s10009_s5 = spop %10008 }
 0x7c8   :  { %v7048_v29 = vadd.f32 %v7047_v36, %v7046_v30  ;;  %v7076_v39 = vadd.f32 %v7075_v17, %v7074_v19  ;;  %s6993_s16 = smul.f32 0.00390625, %s10009_s5 }
 0x7ca   :  { %v7049_v47 = vrot.slane %v7048_v29, 1  ;;  %s7423_s1 = smul.f32 25.0, %s6993_s16 }
 0x7cc   :  { %v7050_v6 = vadd.f32 %v7049_v47, %v7048_v29 }
 0x7ce   :  { %10010 = vpush %v7050_v6 }
 0x7cf   :  { %10012 = vpush %v7076_v39 }
 0x7ff   :  { %s10011_s6 = spop %10010 }
 0x800   :  { %s10013_s10 = spop %10012  ;;  %s7054_s11 = smul.f32 0.03125, %s10011_s6 }
 0x801   :  { %s7080_s0 = smul.f32 0.03125, %s10013_s10 }
 0x802   :  { %s7057_s12 = smul.f32 0.5, %s7054_s11 }
 0x803   :  { %s7083_s13 = smul.f32 0.5, %s7080_s0 }
 0x805   :  { %s7084_s15 = sadd.f32 %s7083_s13, %s7057_s12 }
 0x807   :  { %s7424_s19 = smul.f32 25.0, %s7084_s15 }
 0x809   :  { %s7425_s23 = sadd.f32 %s7424_s19, %s7423_s1 }
 0x84d   :  { %v9986_v13 = vpop.f32.mrf.mxu1 }
 0x84e   :  { %v7216_v48 = vmul.f32 0.14285715, %v9986_v13 }
 0x84f   :  { %v7196_v27 = vpop.f32.mrf.mxu1 }
 0x850   :  { %v7215_v32 = vmul.f32 0.14285715, %v7196_v27  ;;  %v7353_v15 = vmul.f32 %v7216_v48, %v7216_v48 }
 0x852   :  { %v7352_v25 = vmul.f32 %v7215_v32, %v7215_v32  ;;  %v7357_v62 = vsel %vm6741_vm8, %v7353_v15, 0.0 }
 0x854   :  { %v7356_v63 = vsel %vm6741_vm8, %v7352_v25, 0.0 }
 0x855   :  { %v9989_v57 = vpop.f32.mrf.mxu1  ;;  %v7358_v4 = vadd.f32 %v7357_v62, %v7356_v63 }
 0x856   :  { %v7218_v45 = vmul.f32 0.14285715, %v9989_v57 }
 0x857   :  { %v7206_v42 = vpop.f32.mrf.mxu1 }
 0x858   :  { %v7217_v8 = vmul.f32 0.14285715, %v7206_v42  ;;  %v7355_v1 = vmul.f32 %v7218_v45, %v7218_v45 }
 0x85a   :  { %v7354_v55 = vmul.f32 %v7217_v8, %v7217_v8  ;;  %v7361_v38 = vsel %vm6741_vm8, %v7355_v1, 0.0 }
 0x85c   :  { %v7359_v61 = vsel %vm6741_vm8, %v7354_v55, 0.0 }
 0x85d   :  { %v9994_v35 = vpop.f32.mrf.mxu1  ;;  %v7360_v18 = vadd.f32 %v7359_v61, %v7358_v4 }
 0x85e   :  { %v7349_v33 = vmul.f32 0.14285715, %v9994_v35 }
 0x85f   :  { %v7329_v58 = vpop.f32.mrf.mxu1  ;;  %v7362_v21 = vadd.f32 %v7361_v38, %v7360_v18 }
 0x860   :  { %v7348_v56 = vmul.f32 0.14285715, %v7329_v58  ;;  %v7388_v46 = vmul.f32 %v7349_v33, %v7349_v33 }
 0x861   :  { %7363 = vadd.xlane.f32.xlu1 %v7362_v21 }
 0x862   :  { %v7387_v60 = vmul.f32 %v7348_v56, %v7348_v56  ;;  %v7392_v31 = vsel %vm6741_vm8, %v7388_v46, 0.0 }
 0x864   :  { %v7391_v9 = vsel %vm6741_vm8, %v7387_v60, 0.0 }
 0x865   :  { %v9997_v11 = vpop.f32.mrf.mxu1  ;;  %7409 = vadd.xlane.f32.xlu1 %v14387_v23  ;;  %v7393_v24 = vadd.f32 %v7392_v31, %v7391_v9  ;;  %v7377_v23 = vadd.f32 %v7376_v12, %v7375_v0 }
 0x866   :  { %v7351_v34 = vmul.f32 0.14285715, %v9997_v11 }
 0x867   :  { %v7339_v52 = vpop.f32.mrf.mxu1  ;;  %v7378_v37 = vrot.slane %v7377_v23, 2 }
 0x868   :  { %v7350_v44 = vmul.f32 0.14285715, %v7339_v52  ;;  %v7390_v51 = vmul.f32 %v7351_v34, %v7351_v34 }
 0x869   :  { %v7379_v28 = vadd.f32 %v7378_v37, %v7377_v23 }
 0x86a   :  { %v7389_v53 = vmul.f32 %v7350_v44, %v7350_v44  ;;  %v7396_v14 = vsel %vm6741_vm8, %v7390_v51, 0.0 }
 0x86b   :  { %v7380_v5 = vrot.slane %v7379_v28, 1 }
 0x86c   :  { %v7394_v43 = vsel %vm6741_vm8, %v7389_v53, 0.0 }
 0x86d   :  { %v7395_v59 = vadd.f32 %v7394_v43, %v7393_v24  ;;  %v7381_v41 = vadd.f32 %v7380_v5, %v7379_v28 }
 0x86f   :  { %v7397_v7 = vadd.f32 %v7396_v14, %v7395_v59 }
 0x871   :  { %7398 = vadd.xlane.f32.xlu0 %v7397_v7 }
 0x8ea   :  { %v7364_v2 = vpop.xlane.xlu1 %7363 }
 0x8eb   :  { %v7365_v26 = vrot.slane %v7364_v2, 4 }
 0x8ed   :  { %v7366_v20 = vadd.f32 %v7365_v26, %v7364_v2 }
 0x8ee   :  { %v7410_v40 = vpop.xlane.xlu1 %7409 }
 0x8ef   :  { %v7367_v49 = vrot.slane %v7366_v20, 2  ;;  %v7411_v50 = vrot.slane %v7410_v40, 4 }
 0x8f1   :  { %v7368_v22 = vadd.f32 %v7367_v49, %v7366_v20  ;;  %v7412_v54 = vadd.f32 %v7411_v50, %v7410_v40 }
 0x8f3   :  { %v7369_v3 = vrot.slane %v7368_v22, 1  ;;  %v7413_v10 = vrot.slane %v7412_v54, 2 }
 0x8f5   :  { %v7370_v16 = vadd.f32 %v7369_v3, %v7368_v22  ;;  %v7414_v36 = vadd.f32 %v7413_v10, %v7412_v54 }
 0x8f7   :  { %10014 = vpush %v7370_v16  ;;  %v7415_v47 = vrot.slane %v7414_v36, 1 }
 0x8f8   :  { %10016 = vpush %v7381_v41 }
 0x8f9   :  { %v7416_v13 = vadd.f32 %v7415_v47, %v7414_v36 }
 0x8fa   :  { %v7399_v30 = vpop.xlane.xlu0 %7398 }
 0x8fb   :  { %v7400_v19 = vrot.slane %v7399_v30, 4 }
 0x8fd   :  { %v7401_v0 = vadd.f32 %v7400_v19, %v7399_v30 }
 0x8ff   :  { %v7402_v29 = vrot.slane %v7401_v0, 2 }
 0x901   :  { %v7403_v17 = vadd.f32 %v7402_v29, %v7401_v0 }
 0x903   :  { %v7404_v6 = vrot.slane %v7403_v17, 1 }
 0x905   :  { %v7405_v39 = vadd.f32 %v7404_v6, %v7403_v17 }
 0x907   :  { %10018 = vpush %v7405_v39 }
 0x908   :  { %10020 = vpush %v7416_v13 }
 0x928   :  { %s10015_s14 = spop %10014 }
 0x929   :  { %s10017_s2 = spop %10016 }
 0x92a   :  { %s7383_s17 = ssub.f32 %s10015_s14, %s10017_s2 }
 0x92c   :  { %s7386_s21 = smul.f32 0.03125, %s7383_s17 }
 0x938   :  { %s10019_s18 = spop %10018 }
 0x939   :  { %s10021_s20 = spop %10020 }
 0x93a   :  { %s7418_s3 = ssub.f32 %s10019_s18, %s10021_s20 }
 0x93c   :  { %s7421_s22 = smul.f32 0.03125, %s7418_s3 }
 0x93e   :  { %s7422_s24 = sadd.f32 %s7421_s22, %s7386_s21 }
 0x940   :  { %s7426_s25 = sadd.f32 %s7425_s23, %s7422_s24 }
 0x942   :  { %7428 = sst [smem:[#allocation2]] %s7426_s25 }
 0x943   :  { %7436 = dma.smem_to_hbm %s10049_s26, 16, %s14421_s8, [#allocation3]  }
 0x944   :  { %10046 = dma.done.wait [#allocation3], 16  }
 0x945   :  { %10047 = vsyncadd [#allocation3], 4294967280 }
 0x946   :  { %7440 = sfence }
 0x947   :  { %7441 = vsyncpa [#allocation3], 1 }

</bundles_post_ra>
